<compile_context>
chip_gen: v5e
topology: v5e:2x2
jax: 0.10.0
libtpu: 0.0.40
codegen_flags: <defaults>
</compile_context>

<pallas_src>
import numpy as np
import jax
import jax.numpy as jnp
from jax.experimental import pallas as pl
from jax.experimental.pallas import tpu as pltpu

H, W = 4, 13                 # Linear(3328) = 64 * 4 * 13  ->  4x13 spatial grid
P = H * W                    # 52 spatial positions
C_IN, C1, C2 = 2, 32, 64
FLAT = C2 * P                # 3328
HID, OUT = 128, 52
B_BLK = 8                    # batch items per grid step -> conv matmul M = 416
M = B_BLK * P                # 416 rows, ordered (position, item-in-block)
_TAPS = tuple((dy, dx) for dy in (-1, 0, 1) for dx in (-1, 0, 1))
HALO = 14 * B_BLK            # max |row shift| = (1*13+1)*B_BLK = 112


def _discardnet_kernel(p1_ref, mask_ref,
                       w1_ref, b1_ref, w2_ref, b2_ref,
                       wf1_ref, bf1_ref, wf2_ref, bf2_ref, wf3_ref, bf3_ref,
                       out_ref,
                       a1pad_ref, cols_ref, flat_ref):
    # ---- Conv1 as a single im2col matmul: (M,18) @ (18,32) ----
    a1 = jnp.dot(p1_ref[...], w1_ref[...], preferred_element_type=jnp.float32)
    a1 = jnp.maximum(a1 + b1_ref[...], 0.0)                      # (M, 32)

    # Stage conv1 activations with a zero halo (only the halo is zeroed; interior
    # is one full-tile store) so every conv2 tap is an aligned static slab read.
    a1pad_ref[0:HALO, :] = jnp.zeros((HALO, C1), jnp.float32)
    a1pad_ref[HALO + M:2 * HALO + M, :] = jnp.zeros((HALO, C1), jnp.float32)
    a1pad_ref[HALO:HALO + M, :] = a1

    # ---- Conv2 im2col: 9 shifted + masked slabs -> (M, 288) bf16 in VMEM ----
    # Row r = pos*B_BLK + b, so the (dy,dx) neighbour of row r is r + (dy*W+dx)*B_BLK.
    for t, (dy, dx) in enumerate(_TAPS):
        shift = (dy * W + dx) * B_BLK                            # multiple of 8
        slab = a1pad_ref[HALO + shift:HALO + shift + M, :]       # (M, 32) f32
        if (dy, dx) != (0, 0):
            slab = slab * mask_ref[:, t:t + 1]                   # zero invalid taps
        cols_ref[:, t * C1:(t + 1) * C1] = slab.astype(jnp.bfloat16)

    # ---- Conv2 as a single matmul: (M,288) @ (288,64) ----
    a2 = jnp.dot(cols_ref[...], w2_ref[...], preferred_element_type=jnp.float32)
    a2 = jnp.maximum(a2 + b2_ref[...], 0.0)                      # (M, 64)

    # ---- Flatten: rows are (pos, item), so position p's (B_BLK,64) slice maps to
    # lanes [p*64, (p+1)*64) of the flattened features (w_fc1 rows pre-permuted). ----
    for p in range(P):
        flat_ref[:, p * C2:(p + 1) * C2] = (
            a2[p * B_BLK:(p + 1) * B_BLK, :].astype(jnp.bfloat16))

    # ---- MLP head ----
    z = jnp.dot(flat_ref[...], wf1_ref[...], preferred_element_type=jnp.float32)
    z = jnp.maximum(z + bf1_ref[...], 0.0)
    z = jnp.dot(z, wf2_ref[...], preferred_element_type=jnp.float32)
    z = jnp.maximum(z + bf2_ref[...], 0.0)
    z = jnp.dot(z, wf3_ref[...], preferred_element_type=jnp.float32) + bf3_ref[...]
    # nn.Softmax() on a 2-D input -> softmax over dim 1.
    z = z - jnp.max(z, axis=-1, keepdims=True)
    e = jnp.exp(z)
    out_ref[...] = (e / jnp.sum(e, axis=-1, keepdims=True)).astype(out_ref.dtype)


def _tap_masks():
    m = np.zeros((P, len(_TAPS)), np.float32)
    for p in range(P):
        h, w = divmod(p, W)
        for t, (dy, dx) in enumerate(_TAPS):
            m[p, t] = 1.0 if (0 <= h + dy < H and 0 <= w + dx < W) else 0.0
    return jnp.asarray(np.repeat(m, B_BLK, axis=0))              # (M, 9)


def discardnet_forward(x_nchw, params):
    n = x_nchw.shape[0]
    nb = pl.cdiv(n, B_BLK)
    n_pad = nb * B_BLK

    # --- one-time XLA-side plumbing: NCHW->NHWC, spatial/batch zero pad,
    #     conv1 im2col patches ordered (block, position, item-in-block) ---
    x = jnp.transpose(x_nchw, (0, 2, 3, 1)).astype(jnp.float32)          # (n,4,13,2)
    x = jnp.pad(x, ((0, n_pad - n), (1, 1), (1, 1), (0, 0)))             # (n_pad,6,15,2)
    patches = jnp.concatenate(
        [x[:, ky:ky + H, kx:kx + W, :] for ky in range(3) for kx in range(3)],
        axis=-1)                                                          # (n_pad,4,13,18)
    patches = patches.reshape(nb, B_BLK, P, 9 * C_IN)
    patches = jnp.transpose(patches, (0, 2, 1, 3)).reshape(nb * M, 9 * C_IN)

    masks = _tap_masks()

    def full(shape):
        return pl.BlockSpec(shape, lambda i, _s=shape: (0,) * len(_s))

    out = pl.pallas_call(
        _discardnet_kernel,
        out_shape=jax.ShapeDtypeStruct((n_pad, OUT), jnp.float32),
        grid=(nb,),
        in_specs=[
            pl.BlockSpec((M, 9 * C_IN), lambda i: (i, 0)),   # conv1 im2col patches
            full((M, len(_TAPS))),                           # conv2 tap validity masks
            full((9 * C_IN, C1)), full((1, C1)),             # conv1 w, b
            full((9 * C1, C2)), full((1, C2)),               # conv2 w, b
            full((FLAT, HID)), full((1, HID)),               # fc1 w (pre-permuted), b
            full((HID, HID)), full((1, HID)),                # fc2 w, b
            full((HID, OUT)), full((1, OUT)),                # fc3 w, b
        ],
        out_specs=pl.BlockSpec((B_BLK, OUT), lambda i: (i, 0)),
        scratch_shapes=[
            pltpu.VMEM((M + 2 * HALO, C1), jnp.float32),     # halo'd conv1 activations
            pltpu.VMEM((M, 9 * C1), jnp.bfloat16),           # conv2 im2col matrix
            pltpu.VMEM((B_BLK, FLAT), jnp.bfloat16),         # flattened features
        ],
        compiler_params=pltpu.CompilerParams(
            dimension_semantics=("parallel",)),
    )(patches, masks,
      params["w_conv1"], params["b_conv1"], params["w_conv2"], params["b_conv2"],
      params["w_fc1"], params["b_fc1"], params["w_fc2"], params["b_fc2"],
      params["w_fc3"], params["b_fc3"])
    return out[:n]


def init_params(key):
    # PyTorch-default-style uniform(-1/sqrt(fan_in), +1/sqrt(fan_in)) init, built in
    # PyTorch layout and permuted ONCE to the fused-kernel layout.
    ks = jax.random.split(key, 10)

    def uniform(k, shape, fan_in):
        bound = 1.0 / np.sqrt(float(fan_in))
        return jax.random.uniform(k, shape, jnp.float32, -bound, bound)

    w_conv1 = uniform(ks[0], (C1, C_IN, 3, 3), C_IN * 9)     # (out, in, kh, kw)
    b_conv1 = uniform(ks[1], (C1,), C_IN * 9)
    w_conv2 = uniform(ks[2], (C2, C1, 3, 3), C1 * 9)
    b_conv2 = uniform(ks[3], (C2,), C1 * 9)
    w_fc1 = uniform(ks[4], (HID, FLAT), FLAT)                # (out, in), in = c*52 + p
    b_fc1 = uniform(ks[5], (HID,), FLAT)
    w_fc2 = uniform(ks[6], (HID, HID), HID)
    b_fc2 = uniform(ks[7], (HID,), HID)
    w_fc3 = uniform(ks[8], (OUT, HID), HID)
    b_fc3 = uniform(ks[9], (OUT,), HID)

    # conv weights -> im2col matmul layout: (kh, kw, c_in, c_out) -> (9*c_in, c_out)
    w1 = jnp.transpose(w_conv1, (2, 3, 1, 0)).reshape(9 * C_IN, C1)
    w2 = jnp.transpose(w_conv2, (2, 3, 1, 0)).reshape(9 * C1, C2)
    # fc1 rows permuted from PyTorch NCHW-flatten order (c*52 + p) to the kernel's
    # (p*64 + c) order -> no runtime transpose between conv and MLP.
    wf1 = jnp.transpose(w_fc1.reshape(HID, C2, P), (2, 1, 0)).reshape(FLAT, HID)

    return {
        "w_conv1": w1, "b_conv1": b_conv1.reshape(1, C1),
        "w_conv2": w2.astype(jnp.bfloat16), "b_conv2": b_conv2.reshape(1, C2),
        "w_fc1": wf1.astype(jnp.bfloat16), "b_fc1": b_fc1.reshape(1, HID),
        "w_fc2": jnp.transpose(w_fc2), "b_fc2": b_fc2.reshape(1, HID),
        "w_fc3": jnp.transpose(w_fc3), "b_fc3": b_fc3.reshape(1, OUT),
    }


if __name__ == "__main__":
    key = jax.random.PRNGKey(0)
    pkey, xkey = jax.random.split(key)
    params = init_params(pkey)
    # PyTorch-style NCHW input: (batch=2, channels=2, H=4, W=13)  (64*4*13 = 3328)
    x = jax.random.normal(xkey, (2, C_IN, H, W), jnp.float32)
    fwd = jax.jit(discardnet_forward)
    out = fwd(x, params)
    jax.block_until_ready(out)
    assert out.shape == (2, OUT) and out.dtype == jnp.float32
    assert bool(jnp.all(jnp.isfinite(out)))
    assert bool(jnp.allclose(jnp.sum(out, axis=-1), 1.0, atol=1e-4))  # softmax rows
    print("KERNEL_OK")
</pallas_src>

<mosaic_0001>
module attributes {stable_mosaic.version = 11 : i64} {
  func.func @_discardnet_kernel(%arg0: i32, %arg1: memref<416x18xf32, #tpu.memory_space<vmem>>, %arg2: memref<416x9xf32, #tpu.memory_space<vmem>>, %arg3: memref<18x32xf32, #tpu.memory_space<vmem>>, %arg4: memref<1x32xf32, #tpu.memory_space<vmem>>, %arg5: memref<288x64xbf16, #tpu.memory_space<vmem>>, %arg6: memref<1x64xf32, #tpu.memory_space<vmem>>, %arg7: memref<3328x128xbf16, #tpu.memory_space<vmem>>, %arg8: memref<1x128xf32, #tpu.memory_space<vmem>>, %arg9: memref<128x128xf32, #tpu.memory_space<vmem>>, %arg10: memref<1x128xf32, #tpu.memory_space<vmem>>, %arg11: memref<128x52xf32, #tpu.memory_space<vmem>>, %arg12: memref<1x52xf32, #tpu.memory_space<vmem>>, %arg13: memref<8x52xf32, #tpu.memory_space<vmem>>, %arg14: memref<640x32xf32, #tpu.memory_space<vmem>>, %arg15: memref<416x288xbf16, #tpu.memory_space<vmem>>, %arg16: memref<8x3328xbf16, #tpu.memory_space<vmem>>) attributes {dimension_semantics = [#tpu.dimension_semantics<parallel>], iteration_bounds = array<i64: 1>, scalar_prefetch = 0 : i64, scratch_operands = 3 : i64, tpu.core_type = #tpu.core_type<tc>, window_params = [{transform_indices = @transform_0, window_bounds = array<i64: 416, 18>}, {pipeline_mode = #tpu.pipeline_mode<synchronous>, transform_indices = @transform_1, window_bounds = array<i64: 416, 9>}, {pipeline_mode = #tpu.pipeline_mode<synchronous>, transform_indices = @transform_2, window_bounds = array<i64: 18, 32>}, {pipeline_mode = #tpu.pipeline_mode<synchronous>, transform_indices = @transform_3, window_bounds = array<i64: 1, 32>}, {pipeline_mode = #tpu.pipeline_mode<synchronous>, transform_indices = @transform_4, window_bounds = array<i64: 288, 64>}, {pipeline_mode = #tpu.pipeline_mode<synchronous>, transform_indices = @transform_5, window_bounds = array<i64: 1, 64>}, {pipeline_mode = #tpu.pipeline_mode<synchronous>, transform_indices = @transform_6, window_bounds = array<i64: 3328, 128>}, {pipeline_mode = #tpu.pipeline_mode<synchronous>, transform_indices = @transform_7, window_bounds = array<i64: 1, 128>}, {pipeline_mode = #tpu.pipeline_mode<synchronous>, transform_indices = @transform_8, window_bounds = array<i64: 128, 128>}, {pipeline_mode = #tpu.pipeline_mode<synchronous>, transform_indices = @transform_9, window_bounds = array<i64: 1, 128>}, {pipeline_mode = #tpu.pipeline_mode<synchronous>, transform_indices = @transform_10, window_bounds = array<i64: 128, 52>}, {pipeline_mode = #tpu.pipeline_mode<synchronous>, transform_indices = @transform_11, window_bounds = array<i64: 1, 52>}, {transform_indices = @transform_12, window_bounds = array<i64: 8, 52>}]} {
    %c0 = arith.constant 0 : index
    %c0_0 = arith.constant 0 : index
    %0 = vector.load %arg1[%c0, %c0_0] : memref<416x18xf32, #tpu.memory_space<vmem>>, vector<416x18xf32>
    %c0_1 = arith.constant 0 : index
    %c0_2 = arith.constant 0 : index
    %1 = vector.load %arg3[%c0_1, %c0_2] : memref<18x32xf32, #tpu.memory_space<vmem>>, vector<18x32xf32>
    %cst = arith.constant dense<0.000000e+00> : vector<416x32xf32>
    %2 = tpu.matmul %0, %1, %cst {dimension_numbers = #tpu.dot_dimension_numbers<[1], [0], [0], [1], [0, 0, 1, 1], [], []>} : vector<416x18xf32>, vector<18x32xf32>, vector<416x32xf32> -> vector<416x32xf32>
    %c0_3 = arith.constant 0 : index
    %c0_4 = arith.constant 0 : index
    %3 = vector.load %arg4[%c0_3, %c0_4] : memref<1x32xf32, #tpu.memory_space<vmem>>, vector<1x32xf32>
    %4 = vector.broadcast %3 : vector<1x32xf32> to vector<416x32xf32>
    %5 = arith.addf %2, %4 : vector<416x32xf32>
    %cst_5 = arith.constant 0.000000e+00 : f32
    %6 = vector.broadcast %cst_5 : f32 to vector<416x32xf32>
    %7 = arith.maximumf %5, %6 : vector<416x32xf32>
    %cst_6 = arith.constant 0.000000e+00 : f32
    %8 = vector.broadcast %cst_6 : f32 to vector<112x32xf32>
    %c0_7 = arith.constant 0 : index
    %c0_8 = arith.constant 0 : index
    %9 = vector.load %arg14[%c0_7, %c0_8] : memref<640x32xf32, #tpu.memory_space<vmem>>, vector<112x32xf32>
    tpu.vector_store %arg14[%c0_7, %c0_8], %8 {strides = array<i32>} : memref<640x32xf32, #tpu.memory_space<vmem>>, vector<112x32xf32>,
    %cst_9 = arith.constant 0.000000e+00 : f32
    %10 = vector.broadcast %cst_9 : f32 to vector<112x32xf32>
    %c528 = arith.constant 528 : index
    %c0_10 = arith.constant 0 : index
    %11 = vector.load %arg14[%c528, %c0_10] : memref<640x32xf32, #tpu.memory_space<vmem>>, vector<112x32xf32>
    tpu.vector_store %arg14[%c528, %c0_10], %10 {strides = array<i32>} : memref<640x32xf32, #tpu.memory_space<vmem>>, vector<112x32xf32>,
    %c112 = arith.constant 112 : index
    %c0_11 = arith.constant 0 : index
    %12 = vector.load %arg14[%c112, %c0_11] : memref<640x32xf32, #tpu.memory_space<vmem>>, vector<416x32xf32>
    tpu.vector_store %arg14[%c112, %c0_11], %7 {strides = array<i32>} : memref<640x32xf32, #tpu.memory_space<vmem>>, vector<416x32xf32>,
    %c0_12 = arith.constant 0 : index
    %c0_13 = arith.constant 0 : index
    %13 = vector.load %arg14[%c0_12, %c0_13] : memref<640x32xf32, #tpu.memory_space<vmem>>, vector<416x32xf32>
    %c0_14 = arith.constant 0 : index
    %c0_15 = arith.constant 0 : index
    %14 = vector.load %arg2[%c0_14, %c0_15] : memref<416x9xf32, #tpu.memory_space<vmem>>, vector<416x1xf32>
    %15 = vector.broadcast %14 : vector<416x1xf32> to vector<416x32xf32>
    %16 = arith.mulf %13, %15 : vector<416x32xf32>
    %17 = arith.truncf %16 : vector<416x32xf32> to vector<416x32xbf16>
    %c0_16 = arith.constant 0 : index
    %c0_17 = arith.constant 0 : index
    %18 = vector.load %arg15[%c0_16, %c0_17] : memref<416x288xbf16, #tpu.memory_space<vmem>>, vector<416x32xbf16>
    tpu.vector_store %arg15[%c0_16, %c0_17], %17 {strides = array<i32>} : memref<416x288xbf16, #tpu.memory_space<vmem>>, vector<416x32xbf16>,
    %c8 = arith.constant 8 : index
    %c0_18 = arith.constant 0 : index
    %19 = vector.load %arg14[%c8, %c0_18] : memref<640x32xf32, #tpu.memory_space<vmem>>, vector<416x32xf32>
    %c0_19 = arith.constant 0 : index
    %c1 = arith.constant 1 : index
    %20 = vector.load %arg2[%c0_19, %c1] : memref<416x9xf32, #tpu.memory_space<vmem>>, vector<416x1xf32>
    %21 = vector.broadcast %20 : vector<416x1xf32> to vector<416x32xf32>
    %22 = arith.mulf %19, %21 : vector<416x32xf32>
    %23 = arith.truncf %22 : vector<416x32xf32> to vector<416x32xbf16>
    %c0_20 = arith.constant 0 : index
    %c32 = arith.constant 32 : index
    %24 = vector.load %arg15[%c0_20, %c32] : memref<416x288xbf16, #tpu.memory_space<vmem>>, vector<416x32xbf16>
    tpu.vector_store %arg15[%c0_20, %c32], %23 {strides = array<i32>} : memref<416x288xbf16, #tpu.memory_space<vmem>>, vector<416x32xbf16>,
    %c16 = arith.constant 16 : index
    %c0_21 = arith.constant 0 : index
    %25 = vector.load %arg14[%c16, %c0_21] : memref<640x32xf32, #tpu.memory_space<vmem>>, vector<416x32xf32>
    %c0_22 = arith.constant 0 : index
    %c2 = arith.constant 2 : index
    %26 = vector.load %arg2[%c0_22, %c2] : memref<416x9xf32, #tpu.memory_space<vmem>>, vector<416x1xf32>
    %27 = vector.broadcast %26 : vector<416x1xf32> to vector<416x32xf32>
    %28 = arith.mulf %25, %27 : vector<416x32xf32>
    %29 = arith.truncf %28 : vector<416x32xf32> to vector<416x32xbf16>
    %c0_23 = arith.constant 0 : index
    %c64 = arith.constant 64 : index
    %30 = vector.load %arg15[%c0_23, %c64] : memref<416x288xbf16, #tpu.memory_space<vmem>>, vector<416x32xbf16>
    tpu.vector_store %arg15[%c0_23, %c64], %29 {strides = array<i32>} : memref<416x288xbf16, #tpu.memory_space<vmem>>, vector<416x32xbf16>,
    %c104 = arith.constant 104 : index
    %c0_24 = arith.constant 0 : index
    %31 = vector.load %arg14[%c104, %c0_24] : memref<640x32xf32, #tpu.memory_space<vmem>>, vector<416x32xf32>
    %c0_25 = arith.constant 0 : index
    %c3 = arith.constant 3 : index
    %32 = vector.load %arg2[%c0_25, %c3] : memref<416x9xf32, #tpu.memory_space<vmem>>, vector<416x1xf32>
    %33 = vector.broadcast %32 : vector<416x1xf32> to vector<416x32xf32>
    %34 = arith.mulf %31, %33 : vector<416x32xf32>
    %35 = arith.truncf %34 : vector<416x32xf32> to vector<416x32xbf16>
    %c0_26 = arith.constant 0 : index
    %c96 = arith.constant 96 : index
    %36 = vector.load %arg15[%c0_26, %c96] : memref<416x288xbf16, #tpu.memory_space<vmem>>, vector<416x32xbf16>
    tpu.vector_store %arg15[%c0_26, %c96], %35 {strides = array<i32>} : memref<416x288xbf16, #tpu.memory_space<vmem>>, vector<416x32xbf16>,
    %c112_27 = arith.constant 112 : index
    %c0_28 = arith.constant 0 : index
    %37 = vector.load %arg14[%c112_27, %c0_28] : memref<640x32xf32, #tpu.memory_space<vmem>>, vector<416x32xf32>
    %38 = arith.truncf %37 : vector<416x32xf32> to vector<416x32xbf16>
    %c0_29 = arith.constant 0 : index
    %c128 = arith.constant 128 : index
    %39 = vector.load %arg15[%c0_29, %c128] : memref<416x288xbf16, #tpu.memory_space<vmem>>, vector<416x32xbf16>
    tpu.vector_store %arg15[%c0_29, %c128], %38 {strides = array<i32>} : memref<416x288xbf16, #tpu.memory_space<vmem>>, vector<416x32xbf16>,
    %c120 = arith.constant 120 : index
    %c0_30 = arith.constant 0 : index
    %40 = vector.load %arg14[%c120, %c0_30] : memref<640x32xf32, #tpu.memory_space<vmem>>, vector<416x32xf32>
    %c0_31 = arith.constant 0 : index
    %c5 = arith.constant 5 : index
    %41 = vector.load %arg2[%c0_31, %c5] : memref<416x9xf32, #tpu.memory_space<vmem>>, vector<416x1xf32>
    %42 = vector.broadcast %41 : vector<416x1xf32> to vector<416x32xf32>
    %43 = arith.mulf %40, %42 : vector<416x32xf32>
    %44 = arith.truncf %43 : vector<416x32xf32> to vector<416x32xbf16>
    %c0_32 = arith.constant 0 : index
    %c160 = arith.constant 160 : index
    %45 = vector.load %arg15[%c0_32, %c160] : memref<416x288xbf16, #tpu.memory_space<vmem>>, vector<416x32xbf16>
    tpu.vector_store %arg15[%c0_32, %c160], %44 {strides = array<i32>} : memref<416x288xbf16, #tpu.memory_space<vmem>>, vector<416x32xbf16>,
    %c208 = arith.constant 208 : index
    %c0_33 = arith.constant 0 : index
    %46 = vector.load %arg14[%c208, %c0_33] : memref<640x32xf32, #tpu.memory_space<vmem>>, vector<416x32xf32>
    %c0_34 = arith.constant 0 : index
    %c6 = arith.constant 6 : index
    %47 = vector.load %arg2[%c0_34, %c6] : memref<416x9xf32, #tpu.memory_space<vmem>>, vector<416x1xf32>
    %48 = vector.broadcast %47 : vector<416x1xf32> to vector<416x32xf32>
    %49 = arith.mulf %46, %48 : vector<416x32xf32>
    %50 = arith.truncf %49 : vector<416x32xf32> to vector<416x32xbf16>
    %c0_35 = arith.constant 0 : index
    %c192 = arith.constant 192 : index
    %51 = vector.load %arg15[%c0_35, %c192] : memref<416x288xbf16, #tpu.memory_space<vmem>>, vector<416x32xbf16>
    tpu.vector_store %arg15[%c0_35, %c192], %50 {strides = array<i32>} : memref<416x288xbf16, #tpu.memory_space<vmem>>, vector<416x32xbf16>,
    %c216 = arith.constant 216 : index
    %c0_36 = arith.constant 0 : index
    %52 = vector.load %arg14[%c216, %c0_36] : memref<640x32xf32, #tpu.memory_space<vmem>>, vector<416x32xf32>
    %c0_37 = arith.constant 0 : index
    %c7 = arith.constant 7 : index
    %53 = vector.load %arg2[%c0_37, %c7] : memref<416x9xf32, #tpu.memory_space<vmem>>, vector<416x1xf32>
    %54 = vector.broadcast %53 : vector<416x1xf32> to vector<416x32xf32>
    %55 = arith.mulf %52, %54 : vector<416x32xf32>
    %56 = arith.truncf %55 : vector<416x32xf32> to vector<416x32xbf16>
    %c0_38 = arith.constant 0 : index
    %c224 = arith.constant 224 : index
    %57 = vector.load %arg15[%c0_38, %c224] : memref<416x288xbf16, #tpu.memory_space<vmem>>, vector<416x32xbf16>
    tpu.vector_store %arg15[%c0_38, %c224], %56 {strides = array<i32>} : memref<416x288xbf16, #tpu.memory_space<vmem>>, vector<416x32xbf16>,
    %c224_39 = arith.constant 224 : index
    %c0_40 = arith.constant 0 : index
    %58 = vector.load %arg14[%c224_39, %c0_40] : memref<640x32xf32, #tpu.memory_space<vmem>>, vector<416x32xf32>
    %c0_41 = arith.constant 0 : index
    %c8_42 = arith.constant 8 : index
    %59 = vector.load %arg2[%c0_41, %c8_42] : memref<416x9xf32, #tpu.memory_space<vmem>>, vector<416x1xf32>
    %60 = vector.broadcast %59 : vector<416x1xf32> to vector<416x32xf32>
    %61 = arith.mulf %58, %60 : vector<416x32xf32>
    %62 = arith.truncf %61 : vector<416x32xf32> to vector<416x32xbf16>
    %c0_43 = arith.constant 0 : index
    %c256 = arith.constant 256 : index
    %63 = vector.load %arg15[%c0_43, %c256] : memref<416x288xbf16, #tpu.memory_space<vmem>>, vector<416x32xbf16>
    tpu.vector_store %arg15[%c0_43, %c256], %62 {strides = array<i32>} : memref<416x288xbf16, #tpu.memory_space<vmem>>, vector<416x32xbf16>,
    %c0_44 = arith.constant 0 : index
    %c0_45 = arith.constant 0 : index
    %64 = vector.load %arg15[%c0_44, %c0_45] : memref<416x288xbf16, #tpu.memory_space<vmem>>, vector<416x288xbf16>
    %c0_46 = arith.constant 0 : index
    %c0_47 = arith.constant 0 : index
    %65 = vector.load %arg5[%c0_46, %c0_47] : memref<288x64xbf16, #tpu.memory_space<vmem>>, vector<288x64xbf16>
    %cst_48 = arith.constant dense<0.000000e+00> : vector<416x64xf32>
    %66 = tpu.matmul %64, %65, %cst_48 {dimension_numbers = #tpu.dot_dimension_numbers<[1], [0], [0], [1], [0, 0, 1, 1], [], []>} : vector<416x288xbf16>, vector<288x64xbf16>, vector<416x64xf32> -> vector<416x64xf32>
    %c0_49 = arith.constant 0 : index
    %c0_50 = arith.constant 0 : index
    %67 = vector.load %arg6[%c0_49, %c0_50] : memref<1x64xf32, #tpu.memory_space<vmem>>, vector<1x64xf32>
    %68 = vector.broadcast %67 : vector<1x64xf32> to vector<416x64xf32>
    %69 = arith.addf %66, %68 : vector<416x64xf32>
    %cst_51 = arith.constant 0.000000e+00 : f32
    %70 = vector.broadcast %cst_51 : f32 to vector<416x64xf32>
    %71 = arith.maximumf %69, %70 : vector<416x64xf32>
    %72 = vector.extract_strided_slice %71 {offsets = [0, 0], sizes = [8, 64], strides = [1, 1]} : vector<416x64xf32> to vector<8x64xf32>
    %73 = arith.truncf %72 : vector<8x64xf32> to vector<8x64xbf16>
    %c0_52 = arith.constant 0 : index
    %c0_53 = arith.constant 0 : index
    %74 = vector.load %arg16[%c0_52, %c0_53] : memref<8x3328xbf16, #tpu.memory_space<vmem>>, vector<8x64xbf16>
    tpu.vector_store %arg16[%c0_52, %c0_53], %73 {strides = array<i32>} : memref<8x3328xbf16, #tpu.memory_space<vmem>>, vector<8x64xbf16>,
    %75 = vector.extract_strided_slice %71 {offsets = [8, 0], sizes = [8, 64], strides = [1, 1]} : vector<416x64xf32> to vector<8x64xf32>
    %76 = arith.truncf %75 : vector<8x64xf32> to vector<8x64xbf16>
    %c0_54 = arith.constant 0 : index
    %c64_55 = arith.constant 64 : index
    %77 = vector.load %arg16[%c0_54, %c64_55] : memref<8x3328xbf16, #tpu.memory_space<vmem>>, vector<8x64xbf16>
    tpu.vector_store %arg16[%c0_54, %c64_55], %76 {strides = array<i32>} : memref<8x3328xbf16, #tpu.memory_space<vmem>>, vector<8x64xbf16>,
    %78 = vector.extract_strided_slice %71 {offsets = [16, 0], sizes = [8, 64], strides = [1, 1]} : vector<416x64xf32> to vector<8x64xf32>
    %79 = arith.truncf %78 : vector<8x64xf32> to vector<8x64xbf16>
    %c0_56 = arith.constant 0 : index
    %c128_57 = arith.constant 128 : index
    %80 = vector.load %arg16[%c0_56, %c128_57] : memref<8x3328xbf16, #tpu.memory_space<vmem>>, vector<8x64xbf16>
    tpu.vector_store %arg16[%c0_56, %c128_57], %79 {strides = array<i32>} : memref<8x3328xbf16, #tpu.memory_space<vmem>>, vector<8x64xbf16>,
    %81 = vector.extract_strided_slice %71 {offsets = [24, 0], sizes = [8, 64], strides = [1, 1]} : vector<416x64xf32> to vector<8x64xf32>
    %82 = arith.truncf %81 : vector<8x64xf32> to vector<8x64xbf16>
    %c0_58 = arith.constant 0 : index
    %c192_59 = arith.constant 192 : index
    %83 = vector.load %arg16[%c0_58, %c192_59] : memref<8x3328xbf16, #tpu.memory_space<vmem>>, vector<8x64xbf16>
    tpu.vector_store %arg16[%c0_58, %c192_59], %82 {strides = array<i32>} : memref<8x3328xbf16, #tpu.memory_space<vmem>>, vector<8x64xbf16>,
    %84 = vector.extract_strided_slice %71 {offsets = [32, 0], sizes = [8, 64], strides = [1, 1]} : vector<416x64xf32> to vector<8x64xf32>
    %85 = arith.truncf %84 : vector<8x64xf32> to vector<8x64xbf16>
    %c0_60 = arith.constant 0 : index
    %c256_61 = arith.constant 256 : index
    %86 = vector.load %arg16[%c0_60, %c256_61] : memref<8x3328xbf16, #tpu.memory_space<vmem>>, vector<8x64xbf16>
    tpu.vector_store %arg16[%c0_60, %c256_61], %85 {strides = array<i32>} : memref<8x3328xbf16, #tpu.memory_space<vmem>>, vector<8x64xbf16>,
    %87 = vector.extract_strided_slice %71 {offsets = [40, 0], sizes = [8, 64], strides = [1, 1]} : vector<416x64xf32> to vector<8x64xf32>
    %88 = arith.truncf %87 : vector<8x64xf32> to vector<8x64xbf16>
    %c0_62 = arith.constant 0 : index
    %c320 = arith.constant 320 : index
    %89 = vector.load %arg16[%c0_62, %c320] : memref<8x3328xbf16, #tpu.memory_space<vmem>>, vector<8x64xbf16>
    tpu.vector_store %arg16[%c0_62, %c320], %88 {strides = array<i32>} : memref<8x3328xbf16, #tpu.memory_space<vmem>>, vector<8x64xbf16>,
    %90 = vector.extract_strided_slice %71 {offsets = [48, 0], sizes = [8, 64], strides = [1, 1]} : vector<416x64xf32> to vector<8x64xf32>
    %91 = arith.truncf %90 : vector<8x64xf32> to vector<8x64xbf16>
    %c0_63 = arith.constant 0 : index
    %c384 = arith.constant 384 : index
    %92 = vector.load %arg16[%c0_63, %c384] : memref<8x3328xbf16, #tpu.memory_space<vmem>>, vector<8x64xbf16>
    tpu.vector_store %arg16[%c0_63, %c384], %91 {strides = array<i32>} : memref<8x3328xbf16, #tpu.memory_space<vmem>>, vector<8x64xbf16>,
    %93 = vector.extract_strided_slice %71 {offsets = [56, 0], sizes = [8, 64], strides = [1, 1]} : vector<416x64xf32> to vector<8x64xf32>
    %94 = arith.truncf %93 : vector<8x64xf32> to vector<8x64xbf16>
    %c0_64 = arith.constant 0 : index
    %c448 = arith.constant 448 : index
    %95 = vector.load %arg16[%c0_64, %c448] : memref<8x3328xbf16, #tpu.memory_space<vmem>>, vector<8x64xbf16>
    tpu.vector_store %arg16[%c0_64, %c448], %94 {strides = array<i32>} : memref<8x3328xbf16, #tpu.memory_space<vmem>>, vector<8x64xbf16>,
    %96 = vector.extract_strided_slice %71 {offsets = [64, 0], sizes = [8, 64], strides = [1, 1]} : vector<416x64xf32> to vector<8x64xf32>
    %97 = arith.truncf %96 : vector<8x64xf32> to vector<8x64xbf16>
    %c0_65 = arith.constant 0 : index
    %c512 = arith.constant 512 : index
    %98 = vector.load %arg16[%c0_65, %c512] : memref<8x3328xbf16, #tpu.memory_space<vmem>>, vector<8x64xbf16>
    tpu.vector_store %arg16[%c0_65, %c512], %97 {strides = array<i32>} : memref<8x3328xbf16, #tpu.memory_space<vmem>>, vector<8x64xbf16>,
    %99 = vector.extract_strided_slice %71 {offsets = [72, 0], sizes = [8, 64], strides = [1, 1]} : vector<416x64xf32> to vector<8x64xf32>
    %100 = arith.truncf %99 : vector<8x64xf32> to vector<8x64xbf16>
    %c0_66 = arith.constant 0 : index
    %c576 = arith.constant 576 : index
    %101 = vector.load %arg16[%c0_66, %c576] : memref<8x3328xbf16, #tpu.memory_space<vmem>>, vector<8x64xbf16>
    tpu.vector_store %arg16[%c0_66, %c576], %100 {strides = array<i32>} : memref<8x3328xbf16, #tpu.memory_space<vmem>>, vector<8x64xbf16>,
    %102 = vector.extract_strided_slice %71 {offsets = [80, 0], sizes = [8, 64], strides = [1, 1]} : vector<416x64xf32> to vector<8x64xf32>
    %103 = arith.truncf %102 : vector<8x64xf32> to vector<8x64xbf16>
    %c0_67 = arith.constant 0 : index
    %c640 = arith.constant 640 : index
    %104 = vector.load %arg16[%c0_67, %c640] : memref<8x3328xbf16, #tpu.memory_space<vmem>>, vector<8x64xbf16>
    tpu.vector_store %arg16[%c0_67, %c640], %103 {strides = array<i32>} : memref<8x3328xbf16, #tpu.memory_space<vmem>>, vector<8x64xbf16>,
    %105 = vector.extract_strided_slice %71 {offsets = [88, 0], sizes = [8, 64], strides = [1, 1]} : vector<416x64xf32> to vector<8x64xf32>
    %106 = arith.truncf %105 : vector<8x64xf32> to vector<8x64xbf16>
    %c0_68 = arith.constant 0 : index
    %c704 = arith.constant 704 : index
    %107 = vector.load %arg16[%c0_68, %c704] : memref<8x3328xbf16, #tpu.memory_space<vmem>>, vector<8x64xbf16>
    tpu.vector_store %arg16[%c0_68, %c704], %106 {strides = array<i32>} : memref<8x3328xbf16, #tpu.memory_space<vmem>>, vector<8x64xbf16>,
    %108 = vector.extract_strided_slice %71 {offsets = [96, 0], sizes = [8, 64], strides = [1, 1]} : vector<416x64xf32> to vector<8x64xf32>
    %109 = arith.truncf %108 : vector<8x64xf32> to vector<8x64xbf16>
    %c0_69 = arith.constant 0 : index
    %c768 = arith.constant 768 : index
    %110 = vector.load %arg16[%c0_69, %c768] : memref<8x3328xbf16, #tpu.memory_space<vmem>>, vector<8x64xbf16>
    tpu.vector_store %arg16[%c0_69, %c768], %109 {strides = array<i32>} : memref<8x3328xbf16, #tpu.memory_space<vmem>>, vector<8x64xbf16>,
    %111 = vector.extract_strided_slice %71 {offsets = [104, 0], sizes = [8, 64], strides = [1, 1]} : vector<416x64xf32> to vector<8x64xf32>
    %112 = arith.truncf %111 : vector<8x64xf32> to vector<8x64xbf16>
    %c0_70 = arith.constant 0 : index
    %c832 = arith.constant 832 : index
    %113 = vector.load %arg16[%c0_70, %c832] : memref<8x3328xbf16, #tpu.memory_space<vmem>>, vector<8x64xbf16>
    tpu.vector_store %arg16[%c0_70, %c832], %112 {strides = array<i32>} : memref<8x3328xbf16, #tpu.memory_space<vmem>>, vector<8x64xbf16>,
    %114 = vector.extract_strided_slice %71 {offsets = [112, 0], sizes = [8, 64], strides = [1, 1]} : vector<416x64xf32> to vector<8x64xf32>
    %115 = arith.truncf %114 : vector<8x64xf32> to vector<8x64xbf16>
    %c0_71 = arith.constant 0 : index
    %c896 = arith.constant 896 : index
    %116 = vector.load %arg16[%c0_71, %c896] : memref<8x3328xbf16, #tpu.memory_space<vmem>>, vector<8x64xbf16>
    tpu.vector_store %arg16[%c0_71, %c896], %115 {strides = array<i32>} : memref<8x3328xbf16, #tpu.memory_space<vmem>>, vector<8x64xbf16>,
    %117 = vector.extract_strided_slice %71 {offsets = [120, 0], sizes = [8, 64], strides = [1, 1]} : vector<416x64xf32> to vector<8x64xf32>
    %118 = arith.truncf %117 : vector<8x64xf32> to vector<8x64xbf16>
    %c0_72 = arith.constant 0 : index
    %c960 = arith.constant 960 : index
    %119 = vector.load %arg16[%c0_72, %c960] : memref<8x3328xbf16, #tpu.memory_space<vmem>>, vector<8x64xbf16>
    tpu.vector_store %arg16[%c0_72, %c960], %118 {strides = array<i32>} : memref<8x3328xbf16, #tpu.memory_space<vmem>>, vector<8x64xbf16>,
    %120 = vector.extract_strided_slice %71 {offsets = [128, 0], sizes = [8, 64], strides = [1, 1]} : vector<416x64xf32> to vector<8x64xf32>
    %121 = arith.truncf %120 : vector<8x64xf32> to vector<8x64xbf16>
    %c0_73 = arith.constant 0 : index
    %c1024 = arith.constant 1024 : index
    %122 = vector.load %arg16[%c0_73, %c1024] : memref<8x3328xbf16, #tpu.memory_space<vmem>>, vector<8x64xbf16>
    tpu.vector_store %arg16[%c0_73, %c1024], %121 {strides = array<i32>} : memref<8x3328xbf16, #tpu.memory_space<vmem>>, vector<8x64xbf16>,
    %123 = vector.extract_strided_slice %71 {offsets = [136, 0], sizes = [8, 64], strides = [1, 1]} : vector<416x64xf32> to vector<8x64xf32>
    %124 = arith.truncf %123 : vector<8x64xf32> to vector<8x64xbf16>
    %c0_74 = arith.constant 0 : index
    %c1088 = arith.constant 1088 : index
    %125 = vector.load %arg16[%c0_74, %c1088] : memref<8x3328xbf16, #tpu.memory_space<vmem>>, vector<8x64xbf16>
    tpu.vector_store %arg16[%c0_74, %c1088], %124 {strides = array<i32>} : memref<8x3328xbf16, #tpu.memory_space<vmem>>, vector<8x64xbf16>,
    %126 = vector.extract_strided_slice %71 {offsets = [144, 0], sizes = [8, 64], strides = [1, 1]} : vector<416x64xf32> to vector<8x64xf32>
    %127 = arith.truncf %126 : vector<8x64xf32> to vector<8x64xbf16>
    %c0_75 = arith.constant 0 : index
    %c1152 = arith.constant 1152 : index
    %128 = vector.load %arg16[%c0_75, %c1152] : memref<8x3328xbf16, #tpu.memory_space<vmem>>, vector<8x64xbf16>
    tpu.vector_store %arg16[%c0_75, %c1152], %127 {strides = array<i32>} : memref<8x3328xbf16, #tpu.memory_space<vmem>>, vector<8x64xbf16>,
    %129 = vector.extract_strided_slice %71 {offsets = [152, 0], sizes = [8, 64], strides = [1, 1]} : vector<416x64xf32> to vector<8x64xf32>
    %130 = arith.truncf %129 : vector<8x64xf32> to vector<8x64xbf16>
    %c0_76 = arith.constant 0 : index
    %c1216 = arith.constant 1216 : index
    %131 = vector.load %arg16[%c0_76, %c1216] : memref<8x3328xbf16, #tpu.memory_space<vmem>>, vector<8x64xbf16>
    tpu.vector_store %arg16[%c0_76, %c1216], %130 {strides = array<i32>} : memref<8x3328xbf16, #tpu.memory_space<vmem>>, vector<8x64xbf16>,
    %132 = vector.extract_strided_slice %71 {offsets = [160, 0], sizes = [8, 64], strides = [1, 1]} : vector<416x64xf32> to vector<8x64xf32>
    %133 = arith.truncf %132 : vector<8x64xf32> to vector<8x64xbf16>
    %c0_77 = arith.constant 0 : index
    %c1280 = arith.constant 1280 : index
    %134 = vector.load %arg16[%c0_77, %c1280] : memref<8x3328xbf16, #tpu.memory_space<vmem>>, vector<8x64xbf16>
    tpu.vector_store %arg16[%c0_77, %c1280], %133 {strides = array<i32>} : memref<8x3328xbf16, #tpu.memory_space<vmem>>, vector<8x64xbf16>,
    %135 = vector.extract_strided_slice %71 {offsets = [168, 0], sizes = [8, 64], strides = [1, 1]} : vector<416x64xf32> to vector<8x64xf32>
    %136 = arith.truncf %135 : vector<8x64xf32> to vector<8x64xbf16>
    %c0_78 = arith.constant 0 : index
    %c1344 = arith.constant 1344 : index
    %137 = vector.load %arg16[%c0_78, %c1344] : memref<8x3328xbf16, #tpu.memory_space<vmem>>, vector<8x64xbf16>
    tpu.vector_store %arg16[%c0_78, %c1344], %136 {strides = array<i32>} : memref<8x3328xbf16, #tpu.memory_space<vmem>>, vector<8x64xbf16>,
    %138 = vector.extract_strided_slice %71 {offsets = [176, 0], sizes = [8, 64], strides = [1, 1]} : vector<416x64xf32> to vector<8x64xf32>
    %139 = arith.truncf %138 : vector<8x64xf32> to vector<8x64xbf16>
    %c0_79 = arith.constant 0 : index
    %c1408 = arith.constant 1408 : index
    %140 = vector.load %arg16[%c0_79, %c1408] : memref<8x3328xbf16, #tpu.memory_space<vmem>>, vector<8x64xbf16>
    tpu.vector_store %arg16[%c0_79, %c1408], %139 {strides = array<i32>} : memref<8x3328xbf16, #tpu.memory_space<vmem>>, vector<8x64xbf16>,
    %141 = vector.extract_strided_slice %71 {offsets = [184, 0], sizes = [8, 64], strides = [1, 1]} : vector<416x64xf32> to vector<8x64xf32>
    %142 = arith.truncf %141 : vector<8x64xf32> to vector<8x64xbf16>
    %c0_80 = arith.constant 0 : index
    %c1472 = arith.constant 1472 : index
    %143 = vector.load %arg16[%c0_80, %c1472] : memref<8x3328xbf16, #tpu.memory_space<vmem>>, vector<8x64xbf16>
    tpu.vector_store %arg16[%c0_80, %c1472], %142 {strides = array<i32>} : memref<8x3328xbf16, #tpu.memory_space<vmem>>, vector<8x64xbf16>,
    %144 = vector.extract_strided_slice %71 {offsets = [192, 0], sizes = [8, 64], strides = [1, 1]} : vector<416x64xf32> to vector<8x64xf32>
    %145 = arith.truncf %144 : vector<8x64xf32> to vector<8x64xbf16>
    %c0_81 = arith.constant 0 : index
    %c1536 = arith.constant 1536 : index
    %146 = vector.load %arg16[%c0_81, %c1536] : memref<8x3328xbf16, #tpu.memory_space<vmem>>, vector<8x64xbf16>
    tpu.vector_store %arg16[%c0_81, %c1536], %145 {strides = array<i32>} : memref<8x3328xbf16, #tpu.memory_space<vmem>>, vector<8x64xbf16>,
    %147 = vector.extract_strided_slice %71 {offsets = [200, 0], sizes = [8, 64], strides = [1, 1]} : vector<416x64xf32> to vector<8x64xf32>
    %148 = arith.truncf %147 : vector<8x64xf32> to vector<8x64xbf16>
    %c0_82 = arith.constant 0 : index
    %c1600 = arith.constant 1600 : index
    %149 = vector.load %arg16[%c0_82, %c1600] : memref<8x3328xbf16, #tpu.memory_space<vmem>>, vector<8x64xbf16>
    tpu.vector_store %arg16[%c0_82, %c1600], %148 {strides = array<i32>} : memref<8x3328xbf16, #tpu.memory_space<vmem>>, vector<8x64xbf16>,
    %150 = vector.extract_strided_slice %71 {offsets = [208, 0], sizes = [8, 64], strides = [1, 1]} : vector<416x64xf32> to vector<8x64xf32>
    %151 = arith.truncf %150 : vector<8x64xf32> to vector<8x64xbf16>
    %c0_83 = arith.constant 0 : index
    %c1664 = arith.constant 1664 : index
    %152 = vector.load %arg16[%c0_83, %c1664] : memref<8x3328xbf16, #tpu.memory_space<vmem>>, vector<8x64xbf16>
    tpu.vector_store %arg16[%c0_83, %c1664], %151 {strides = array<i32>} : memref<8x3328xbf16, #tpu.memory_space<vmem>>, vector<8x64xbf16>,
    %153 = vector.extract_strided_slice %71 {offsets = [216, 0], sizes = [8, 64], strides = [1, 1]} : vector<416x64xf32> to vector<8x64xf32>
    %154 = arith.truncf %153 : vector<8x64xf32> to vector<8x64xbf16>
    %c0_84 = arith.constant 0 : index
    %c1728 = arith.constant 1728 : index
    %155 = vector.load %arg16[%c0_84, %c1728] : memref<8x3328xbf16, #tpu.memory_space<vmem>>, vector<8x64xbf16>
    tpu.vector_store %arg16[%c0_84, %c1728], %154 {strides = array<i32>} : memref<8x3328xbf16, #tpu.memory_space<vmem>>, vector<8x64xbf16>,
    %156 = vector.extract_strided_slice %71 {offsets = [224, 0], sizes = [8, 64], strides = [1, 1]} : vector<416x64xf32> to vector<8x64xf32>
    %157 = arith.truncf %156 : vector<8x64xf32> to vector<8x64xbf16>
    %c0_85 = arith.constant 0 : index
    %c1792 = arith.constant 1792 : index
    %158 = vector.load %arg16[%c0_85, %c1792] : memref<8x3328xbf16, #tpu.memory_space<vmem>>, vector<8x64xbf16>
    tpu.vector_store %arg16[%c0_85, %c1792], %157 {strides = array<i32>} : memref<8x3328xbf16, #tpu.memory_space<vmem>>, vector<8x64xbf16>,
    %159 = vector.extract_strided_slice %71 {offsets = [232, 0], sizes = [8, 64], strides = [1, 1]} : vector<416x64xf32> to vector<8x64xf32>
    %160 = arith.truncf %159 : vector<8x64xf32> to vector<8x64xbf16>
    %c0_86 = arith.constant 0 : index
    %c1856 = arith.constant 1856 : index
    %161 = vector.load %arg16[%c0_86, %c1856] : memref<8x3328xbf16, #tpu.memory_space<vmem>>, vector<8x64xbf16>
    tpu.vector_store %arg16[%c0_86, %c1856], %160 {strides = array<i32>} : memref<8x3328xbf16, #tpu.memory_space<vmem>>, vector<8x64xbf16>,
    %162 = vector.extract_strided_slice %71 {offsets = [240, 0], sizes = [8, 64], strides = [1, 1]} : vector<416x64xf32> to vector<8x64xf32>
    %163 = arith.truncf %162 : vector<8x64xf32> to vector<8x64xbf16>
    %c0_87 = arith.constant 0 : index
    %c1920 = arith.constant 1920 : index
    %164 = vector.load %arg16[%c0_87, %c1920] : memref<8x3328xbf16, #tpu.memory_space<vmem>>, vector<8x64xbf16>
    tpu.vector_store %arg16[%c0_87, %c1920], %163 {strides = array<i32>} : memref<8x3328xbf16, #tpu.memory_space<vmem>>, vector<8x64xbf16>,
    %165 = vector.extract_strided_slice %71 {offsets = [248, 0], sizes = [8, 64], strides = [1, 1]} : vector<416x64xf32> to vector<8x64xf32>
    %166 = arith.truncf %165 : vector<8x64xf32> to vector<8x64xbf16>
    %c0_88 = arith.constant 0 : index
    %c1984 = arith.constant 1984 : index
    %167 = vector.load %arg16[%c0_88, %c1984] : memref<8x3328xbf16, #tpu.memory_space<vmem>>, vector<8x64xbf16>
    tpu.vector_store %arg16[%c0_88, %c1984], %166 {strides = array<i32>} : memref<8x3328xbf16, #tpu.memory_space<vmem>>, vector<8x64xbf16>,
    %168 = vector.extract_strided_slice %71 {offsets = [256, 0], sizes = [8, 64], strides = [1, 1]} : vector<416x64xf32> to vector<8x64xf32>
    %169 = arith.truncf %168 : vector<8x64xf32> to vector<8x64xbf16>
    %c0_89 = arith.constant 0 : index
    %c2048 = arith.constant 2048 : index
    %170 = vector.load %arg16[%c0_89, %c2048] : memref<8x3328xbf16, #tpu.memory_space<vmem>>, vector<8x64xbf16>
    tpu.vector_store %arg16[%c0_89, %c2048], %169 {strides = array<i32>} : memref<8x3328xbf16, #tpu.memory_space<vmem>>, vector<8x64xbf16>,
    %171 = vector.extract_strided_slice %71 {offsets = [264, 0], sizes = [8, 64], strides = [1, 1]} : vector<416x64xf32> to vector<8x64xf32>
    %172 = arith.truncf %171 : vector<8x64xf32> to vector<8x64xbf16>
    %c0_90 = arith.constant 0 : index
    %c2112 = arith.constant 2112 : index
    %173 = vector.load %arg16[%c0_90, %c2112] : memref<8x3328xbf16, #tpu.memory_space<vmem>>, vector<8x64xbf16>
    tpu.vector_store %arg16[%c0_90, %c2112], %172 {strides = array<i32>} : memref<8x3328xbf16, #tpu.memory_space<vmem>>, vector<8x64xbf16>,
    %174 = vector.extract_strided_slice %71 {offsets = [272, 0], sizes = [8, 64], strides = [1, 1]} : vector<416x64xf32> to vector<8x64xf32>
    %175 = arith.truncf %174 : vector<8x64xf32> to vector<8x64xbf16>
    %c0_91 = arith.constant 0 : index
    %c2176 = arith.constant 2176 : index
    %176 = vector.load %arg16[%c0_91, %c2176] : memref<8x3328xbf16, #tpu.memory_space<vmem>>, vector<8x64xbf16>
    tpu.vector_store %arg16[%c0_91, %c2176], %175 {strides = array<i32>} : memref<8x3328xbf16, #tpu.memory_space<vmem>>, vector<8x64xbf16>,
    %177 = vector.extract_strided_slice %71 {offsets = [280, 0], sizes = [8, 64], strides = [1, 1]} : vector<416x64xf32> to vector<8x64xf32>
    %178 = arith.truncf %177 : vector<8x64xf32> to vector<8x64xbf16>
    %c0_92 = arith.constant 0 : index
    %c2240 = arith.constant 2240 : index
    %179 = vector.load %arg16[%c0_92, %c2240] : memref<8x3328xbf16, #tpu.memory_space<vmem>>, vector<8x64xbf16>
    tpu.vector_store %arg16[%c0_92, %c2240], %178 {strides = array<i32>} : memref<8x3328xbf16, #tpu.memory_space<vmem>>, vector<8x64xbf16>,
    %180 = vector.extract_strided_slice %71 {offsets = [288, 0], sizes = [8, 64], strides = [1, 1]} : vector<416x64xf32> to vector<8x64xf32>
    %181 = arith.truncf %180 : vector<8x64xf32> to vector<8x64xbf16>
    %c0_93 = arith.constant 0 : index
    %c2304 = arith.constant 2304 : index
    %182 = vector.load %arg16[%c0_93, %c2304] : memref<8x3328xbf16, #tpu.memory_space<vmem>>, vector<8x64xbf16>
    tpu.vector_store %arg16[%c0_93, %c2304], %181 {strides = array<i32>} : memref<8x3328xbf16, #tpu.memory_space<vmem>>, vector<8x64xbf16>,
    %183 = vector.extract_strided_slice %71 {offsets = [296, 0], sizes = [8, 64], strides = [1, 1]} : vector<416x64xf32> to vector<8x64xf32>
    %184 = arith.truncf %183 : vector<8x64xf32> to vector<8x64xbf16>
    %c0_94 = arith.constant 0 : index
    %c2368 = arith.constant 2368 : index
    %185 = vector.load %arg16[%c0_94, %c2368] : memref<8x3328xbf16, #tpu.memory_space<vmem>>, vector<8x64xbf16>
    tpu.vector_store %arg16[%c0_94, %c2368], %184 {strides = array<i32>} : memref<8x3328xbf16, #tpu.memory_space<vmem>>, vector<8x64xbf16>,
    %186 = vector.extract_strided_slice %71 {offsets = [304, 0], sizes = [8, 64], strides = [1, 1]} : vector<416x64xf32> to vector<8x64xf32>
    %187 = arith.truncf %186 : vector<8x64xf32> to vector<8x64xbf16>
    %c0_95 = arith.constant 0 : index
    %c2432 = arith.constant 2432 : index
    %188 = vector.load %arg16[%c0_95, %c2432] : memref<8x3328xbf16, #tpu.memory_space<vmem>>, vector<8x64xbf16>
    tpu.vector_store %arg16[%c0_95, %c2432], %187 {strides = array<i32>} : memref<8x3328xbf16, #tpu.memory_space<vmem>>, vector<8x64xbf16>,
    %189 = vector.extract_strided_slice %71 {offsets = [312, 0], sizes = [8, 64], strides = [1, 1]} : vector<416x64xf32> to vector<8x64xf32>
    %190 = arith.truncf %189 : vector<8x64xf32> to vector<8x64xbf16>
    %c0_96 = arith.constant 0 : index
    %c2496 = arith.constant 2496 : index
    %191 = vector.load %arg16[%c0_96, %c2496] : memref<8x3328xbf16, #tpu.memory_space<vmem>>, vector<8x64xbf16>
    tpu.vector_store %arg16[%c0_96, %c2496], %190 {strides = array<i32>} : memref<8x3328xbf16, #tpu.memory_space<vmem>>, vector<8x64xbf16>,
    %192 = vector.extract_strided_slice %71 {offsets = [320, 0], sizes = [8, 64], strides = [1, 1]} : vector<416x64xf32> to vector<8x64xf32>
    %193 = arith.truncf %192 : vector<8x64xf32> to vector<8x64xbf16>
    %c0_97 = arith.constant 0 : index
    %c2560 = arith.constant 2560 : index
    %194 = vector.load %arg16[%c0_97, %c2560] : memref<8x3328xbf16, #tpu.memory_space<vmem>>, vector<8x64xbf16>
    tpu.vector_store %arg16[%c0_97, %c2560], %193 {strides = array<i32>} : memref<8x3328xbf16, #tpu.memory_space<vmem>>, vector<8x64xbf16>,
    %195 = vector.extract_strided_slice %71 {offsets = [328, 0], sizes = [8, 64], strides = [1, 1]} : vector<416x64xf32> to vector<8x64xf32>
    %196 = arith.truncf %195 : vector<8x64xf32> to vector<8x64xbf16>
    %c0_98 = arith.constant 0 : index
    %c2624 = arith.constant 2624 : index
    %197 = vector.load %arg16[%c0_98, %c2624] : memref<8x3328xbf16, #tpu.memory_space<vmem>>, vector<8x64xbf16>
    tpu.vector_store %arg16[%c0_98, %c2624], %196 {strides = array<i32>} : memref<8x3328xbf16, #tpu.memory_space<vmem>>, vector<8x64xbf16>,
    %198 = vector.extract_strided_slice %71 {offsets = [336, 0], sizes = [8, 64], strides = [1, 1]} : vector<416x64xf32> to vector<8x64xf32>
    %199 = arith.truncf %198 : vector<8x64xf32> to vector<8x64xbf16>
    %c0_99 = arith.constant 0 : index
    %c2688 = arith.constant 2688 : index
    %200 = vector.load %arg16[%c0_99, %c2688] : memref<8x3328xbf16, #tpu.memory_space<vmem>>, vector<8x64xbf16>
    tpu.vector_store %arg16[%c0_99, %c2688], %199 {strides = array<i32>} : memref<8x3328xbf16, #tpu.memory_space<vmem>>, vector<8x64xbf16>,
    %201 = vector.extract_strided_slice %71 {offsets = [344, 0], sizes = [8, 64], strides = [1, 1]} : vector<416x64xf32> to vector<8x64xf32>
    %202 = arith.truncf %201 : vector<8x64xf32> to vector<8x64xbf16>
    %c0_100 = arith.constant 0 : index
    %c2752 = arith.constant 2752 : index
    %203 = vector.load %arg16[%c0_100, %c2752] : memref<8x3328xbf16, #tpu.memory_space<vmem>>, vector<8x64xbf16>
    tpu.vector_store %arg16[%c0_100, %c2752], %202 {strides = array<i32>} : memref<8x3328xbf16, #tpu.memory_space<vmem>>, vector<8x64xbf16>,
    %204 = vector.extract_strided_slice %71 {offsets = [352, 0], sizes = [8, 64], strides = [1, 1]} : vector<416x64xf32> to vector<8x64xf32>
    %205 = arith.truncf %204 : vector<8x64xf32> to vector<8x64xbf16>
    %c0_101 = arith.constant 0 : index
    %c2816 = arith.constant 2816 : index
    %206 = vector.load %arg16[%c0_101, %c2816] : memref<8x3328xbf16, #tpu.memory_space<vmem>>, vector<8x64xbf16>
    tpu.vector_store %arg16[%c0_101, %c2816], %205 {strides = array<i32>} : memref<8x3328xbf16, #tpu.memory_space<vmem>>, vector<8x64xbf16>,
    %207 = vector.extract_strided_slice %71 {offsets = [360, 0], sizes = [8, 64], strides = [1, 1]} : vector<416x64xf32> to vector<8x64xf32>
    %208 = arith.truncf %207 : vector<8x64xf32> to vector<8x64xbf16>
    %c0_102 = arith.constant 0 : index
    %c2880 = arith.constant 2880 : index
    %209 = vector.load %arg16[%c0_102, %c2880] : memref<8x3328xbf16, #tpu.memory_space<vmem>>, vector<8x64xbf16>
    tpu.vector_store %arg16[%c0_102, %c2880], %208 {strides = array<i32>} : memref<8x3328xbf16, #tpu.memory_space<vmem>>, vector<8x64xbf16>,
    %210 = vector.extract_strided_slice %71 {offsets = [368, 0], sizes = [8, 64], strides = [1, 1]} : vector<416x64xf32> to vector<8x64xf32>
    %211 = arith.truncf %210 : vector<8x64xf32> to vector<8x64xbf16>
    %c0_103 = arith.constant 0 : index
    %c2944 = arith.constant 2944 : index
    %212 = vector.load %arg16[%c0_103, %c2944] : memref<8x3328xbf16, #tpu.memory_space<vmem>>, vector<8x64xbf16>
    tpu.vector_store %arg16[%c0_103, %c2944], %211 {strides = array<i32>} : memref<8x3328xbf16, #tpu.memory_space<vmem>>, vector<8x64xbf16>,
    %213 = vector.extract_strided_slice %71 {offsets = [376, 0], sizes = [8, 64], strides = [1, 1]} : vector<416x64xf32> to vector<8x64xf32>
    %214 = arith.truncf %213 : vector<8x64xf32> to vector<8x64xbf16>
    %c0_104 = arith.constant 0 : index
    %c3008 = arith.constant 3008 : index
    %215 = vector.load %arg16[%c0_104, %c3008] : memref<8x3328xbf16, #tpu.memory_space<vmem>>, vector<8x64xbf16>
    tpu.vector_store %arg16[%c0_104, %c3008], %214 {strides = array<i32>} : memref<8x3328xbf16, #tpu.memory_space<vmem>>, vector<8x64xbf16>,
    %216 = vector.extract_strided_slice %71 {offsets = [384, 0], sizes = [8, 64], strides = [1, 1]} : vector<416x64xf32> to vector<8x64xf32>
    %217 = arith.truncf %216 : vector<8x64xf32> to vector<8x64xbf16>
    %c0_105 = arith.constant 0 : index
    %c3072 = arith.constant 3072 : index
    %218 = vector.load %arg16[%c0_105, %c3072] : memref<8x3328xbf16, #tpu.memory_space<vmem>>, vector<8x64xbf16>
    tpu.vector_store %arg16[%c0_105, %c3072], %217 {strides = array<i32>} : memref<8x3328xbf16, #tpu.memory_space<vmem>>, vector<8x64xbf16>,
    %219 = vector.extract_strided_slice %71 {offsets = [392, 0], sizes = [8, 64], strides = [1, 1]} : vector<416x64xf32> to vector<8x64xf32>
    %220 = arith.truncf %219 : vector<8x64xf32> to vector<8x64xbf16>
    %c0_106 = arith.constant 0 : index
    %c3136 = arith.constant 3136 : index
    %221 = vector.load %arg16[%c0_106, %c3136] : memref<8x3328xbf16, #tpu.memory_space<vmem>>, vector<8x64xbf16>
    tpu.vector_store %arg16[%c0_106, %c3136], %220 {strides = array<i32>} : memref<8x3328xbf16, #tpu.memory_space<vmem>>, vector<8x64xbf16>,
    %222 = vector.extract_strided_slice %71 {offsets = [400, 0], sizes = [8, 64], strides = [1, 1]} : vector<416x64xf32> to vector<8x64xf32>
    %223 = arith.truncf %222 : vector<8x64xf32> to vector<8x64xbf16>
    %c0_107 = arith.constant 0 : index
    %c3200 = arith.constant 3200 : index
    %224 = vector.load %arg16[%c0_107, %c3200] : memref<8x3328xbf16, #tpu.memory_space<vmem>>, vector<8x64xbf16>
    tpu.vector_store %arg16[%c0_107, %c3200], %223 {strides = array<i32>} : memref<8x3328xbf16, #tpu.memory_space<vmem>>, vector<8x64xbf16>,
    %225 = vector.extract_strided_slice %71 {offsets = [408, 0], sizes = [8, 64], strides = [1, 1]} : vector<416x64xf32> to vector<8x64xf32>
    %226 = arith.truncf %225 : vector<8x64xf32> to vector<8x64xbf16>
    %c0_108 = arith.constant 0 : index
    %c3264 = arith.constant 3264 : index
    %227 = vector.load %arg16[%c0_108, %c3264] : memref<8x3328xbf16, #tpu.memory_space<vmem>>, vector<8x64xbf16>
    tpu.vector_store %arg16[%c0_108, %c3264], %226 {strides = array<i32>} : memref<8x3328xbf16, #tpu.memory_space<vmem>>, vector<8x64xbf16>,
    %c0_109 = arith.constant 0 : index
    %c0_110 = arith.constant 0 : index
    %228 = vector.load %arg16[%c0_109, %c0_110] : memref<8x3328xbf16, #tpu.memory_space<vmem>>, vector<8x3328xbf16>
    %c0_111 = arith.constant 0 : index
    %c0_112 = arith.constant 0 : index
    %229 = vector.load %arg7[%c0_111, %c0_112] : memref<3328x128xbf16, #tpu.memory_space<vmem>>, vector<3328x128xbf16>
    %cst_113 = arith.constant dense<0.000000e+00> : vector<8x128xf32>
    %230 = tpu.matmul %228, %229, %cst_113 {dimension_numbers = #tpu.dot_dimension_numbers<[1], [0], [0], [1], [0, 0, 1, 1], [], []>} : vector<8x3328xbf16>, vector<3328x128xbf16>, vector<8x128xf32> -> vector<8x128xf32>
    %c0_114 = arith.constant 0 : index
    %c0_115 = arith.constant 0 : index
    %231 = vector.load %arg8[%c0_114, %c0_115] : memref<1x128xf32, #tpu.memory_space<vmem>>, vector<1x128xf32>
    %232 = vector.broadcast %231 : vector<1x128xf32> to vector<8x128xf32>
    %233 = arith.addf %230, %232 : vector<8x128xf32>
    %cst_116 = arith.constant 0.000000e+00 : f32
    %234 = vector.broadcast %cst_116 : f32 to vector<8x128xf32>
    %235 = arith.maximumf %233, %234 : vector<8x128xf32>
    %c0_117 = arith.constant 0 : index
    %c0_118 = arith.constant 0 : index
    %236 = vector.load %arg9[%c0_117, %c0_118] : memref<128x128xf32, #tpu.memory_space<vmem>>, vector<128x128xf32>
    %cst_119 = arith.constant dense<0.000000e+00> : vector<8x128xf32>
    %237 = tpu.matmul %235, %236, %cst_119 {dimension_numbers = #tpu.dot_dimension_numbers<[1], [0], [0], [1], [0, 0, 1, 1], [], []>} : vector<8x128xf32>, vector<128x128xf32>, vector<8x128xf32> -> vector<8x128xf32>
    %c0_120 = arith.constant 0 : index
    %c0_121 = arith.constant 0 : index
    %238 = vector.load %arg10[%c0_120, %c0_121] : memref<1x128xf32, #tpu.memory_space<vmem>>, vector<1x128xf32>
    %239 = vector.broadcast %238 : vector<1x128xf32> to vector<8x128xf32>
    %240 = arith.addf %237, %239 : vector<8x128xf32>
    %cst_122 = arith.constant 0.000000e+00 : f32
    %241 = vector.broadcast %cst_122 : f32 to vector<8x128xf32>
    %242 = arith.maximumf %240, %241 : vector<8x128xf32>
    %c0_123 = arith.constant 0 : index
    %c0_124 = arith.constant 0 : index
    %243 = vector.load %arg11[%c0_123, %c0_124] : memref<128x52xf32, #tpu.memory_space<vmem>>, vector<128x52xf32>
    %cst_125 = arith.constant dense<0.000000e+00> : vector<8x52xf32>
    %244 = tpu.matmul %242, %243, %cst_125 {dimension_numbers = #tpu.dot_dimension_numbers<[1], [0], [0], [1], [0, 0, 1, 1], [], []>} : vector<8x128xf32>, vector<128x52xf32>, vector<8x52xf32> -> vector<8x52xf32>
    %c0_126 = arith.constant 0 : index
    %c0_127 = arith.constant 0 : index
    %245 = vector.load %arg12[%c0_126, %c0_127] : memref<1x52xf32, #tpu.memory_space<vmem>>, vector<1x52xf32>
    %246 = vector.broadcast %245 : vector<1x52xf32> to vector<8x52xf32>
    %247 = arith.addf %244, %246 : vector<8x52xf32>
    %cst_128 = arith.constant dense<0xFF800000> : vector<8xf32>
    %248 = vector.multi_reduction <maximumf>, %247, %cst_128 [1] : vector<8x52xf32> to vector<8xf32>
    %249 = vector.shape_cast %248 : vector<8xf32> to vector<8x1xf32>
    %250 = vector.broadcast %249 : vector<8x1xf32> to vector<8x52xf32>
    %251 = arith.subf %247, %250 : vector<8x52xf32>
    %252 = math.exp %251 : vector<8x52xf32>
    %cst_129 = arith.constant dense<0.000000e+00> : vector<8xf32>
    %253 = vector.multi_reduction <add>, %252, %cst_129 [1] : vector<8x52xf32> to vector<8xf32>
    %254 = vector.shape_cast %253 : vector<8xf32> to vector<8x1xf32>
    %255 = vector.broadcast %254 : vector<8x1xf32> to vector<8x52xf32>
    %256 = arith.divf %252, %255 : vector<8x52xf32>
    %c0_130 = arith.constant 0 : index
    %c0_131 = arith.constant 0 : index
    %257 = vector.load %arg13[%c0_130, %c0_131] : memref<8x52xf32, #tpu.memory_space<vmem>>, vector<8x52xf32>
    tpu.vector_store %arg13[%c0_130, %c0_131], %256 {strides = array<i32>} : memref<8x52xf32, #tpu.memory_space<vmem>>, vector<8x52xf32>,
    return
  }
  func.func @transform_0(%arg0: i32) -> (i32, i32) {
    %c0_i32 = arith.constant 0 : i32
    %c0_i32_0 = arith.constant 0 : i32
    return %arg0, %c0_i32 : i32, i32
  }
  func.func @transform_1(%arg0: i32) -> (i32, i32) {
    %c0_i32 = arith.constant 0 : i32
    %c0_i32_0 = arith.constant 0 : i32
    %c0_i32_1 = arith.constant 0 : i32
    return %c0_i32, %c0_i32_0 : i32, i32
  }
  func.func @transform_2(%arg0: i32) -> (i32, i32) {
    %c0_i32 = arith.constant 0 : i32
    %c0_i32_0 = arith.constant 0 : i32
    %c0_i32_1 = arith.constant 0 : i32
    return %c0_i32, %c0_i32_0 : i32, i32
  }
  func.func @transform_3(%arg0: i32) -> (i32, i32) {
    %c0_i32 = arith.constant 0 : i32
    %c0_i32_0 = arith.constant 0 : i32
    %c0_i32_1 = arith.constant 0 : i32
    return %c0_i32, %c0_i32_0 : i32, i32
  }
  func.func @transform_4(%arg0: i32) -> (i32, i32) {
    %c0_i32 = arith.constant 0 : i32
    %c0_i32_0 = arith.constant 0 : i32
    %c0_i32_1 = arith.constant 0 : i32
    return %c0_i32, %c0_i32_0 : i32, i32
  }
  func.func @transform_5(%arg0: i32) -> (i32, i32) {
    %c0_i32 = arith.constant 0 : i32
    %c0_i32_0 = arith.constant 0 : i32
    %c0_i32_1 = arith.constant 0 : i32
    return %c0_i32, %c0_i32_0 : i32, i32
  }
  func.func @transform_6(%arg0: i32) -> (i32, i32) {
    %c0_i32 = arith.constant 0 : i32
    %c0_i32_0 = arith.constant 0 : i32
    %c0_i32_1 = arith.constant 0 : i32
    return %c0_i32, %c0_i32_0 : i32, i32
  }
  func.func @transform_7(%arg0: i32) -> (i32, i32) {
    %c0_i32 = arith.constant 0 : i32
    %c0_i32_0 = arith.constant 0 : i32
    %c0_i32_1 = arith.constant 0 : i32
    return %c0_i32, %c0_i32_0 : i32, i32
  }
  func.func @transform_8(%arg0: i32) -> (i32, i32) {
    %c0_i32 = arith.constant 0 : i32
    %c0_i32_0 = arith.constant 0 : i32
    %c0_i32_1 = arith.constant 0 : i32
    return %c0_i32, %c0_i32_0 : i32, i32
  }
  func.func @transform_9(%arg0: i32) -> (i32, i32) {
    %c0_i32 = arith.constant 0 : i32
    %c0_i32_0 = arith.constant 0 : i32
    %c0_i32_1 = arith.constant 0 : i32
    return %c0_i32, %c0_i32_0 : i32, i32
  }
  func.func @transform_10(%arg0: i32) -> (i32, i32) {
    %c0_i32 = arith.constant 0 : i32
    %c0_i32_0 = arith.constant 0 : i32
    %c0_i32_1 = arith.constant 0 : i32
    return %c0_i32, %c0_i32_0 : i32, i32
  }
  func.func @transform_11(%arg0: i32) -> (i32, i32) {
    %c0_i32 = arith.constant 0 : i32
    %c0_i32_0 = arith.constant 0 : i32
    %c0_i32_1 = arith.constant 0 : i32
    return %c0_i32, %c0_i32_0 : i32, i32
  }
  func.func @transform_12(%arg0: i32) -> (i32, i32) {
    %c0_i32 = arith.constant 0 : i32
    %c0_i32_0 = arith.constant 0 : i32
    return %arg0, %c0_i32 : i32, i32
  }
}

</mosaic_0001>

<bundles_post_ra>
// kernel: discardnet_forward.1
= control target key start
LH: loop header
LB: loop body
LE: loop exit
PB: predicated region body
PF: predicated region fallthrough
CT: control target
= control target key end

     0   :  { %vm258_vm0 = vcmask 1041408   ;;  %v11543_v0 = vmov 0   ;;  %vm101_vm1 = vcmask 146432   ;;  %vm487_vm2 = vcmask 261120   ;;  %s11546_s14 = smov 32   ;;  %s11548_s22 = smov 64   ;;  %s16354_s2 = inlined_call_operand.vmem [shape: f32[18,32], index: 2, kind: input, shape index: {}]   ;;  %s16355_s1 = inlined_call_operand.vmem [shape: f32[416,9], index: 1, kind: input, shape index: {}]   ;;  %s16356_s0 = inlined_call_operand.vmem [shape: f32[416,18], index: 0, kind: input, shape index: {}]   ;;  %s16357_s3 = inlined_call_operand.vmem [shape: f32[1,32], index: 3, kind: input, shape index: {}]   ;;  %s16358_s4 = inlined_call_operand.vmem [shape: bf16[288,64], index: 4, kind: input, shape index: {}]   ;;  %s16359_s5 = inlined_call_operand.vmem [shape: f32[1,64], index: 5, kind: input, shape index: {}]   ;;  %s16360_s6 = inlined_call_operand.vmem [shape: bf16[3328,128], index: 6, kind: input, shape index: {}]   ;;  %s16361_s7 = inlined_call_operand.vmem [shape: f32[1,128], index: 7, kind: input, shape index: {}]   ;;  %s16362_s8 = inlined_call_operand.vmem [shape: f32[128,128], index: 8, kind: input, shape index: {}]   ;;  %s16363_s9 = inlined_call_operand.vmem [shape: f32[1,128], index: 9, kind: input, shape index: {}]   ;;  %s16364_s10 = inlined_call_operand.vmem [shape: f32[128,52], index: 10, kind: input, shape index: {}]   ;;  %s16365_s11 = inlined_call_operand.vmem [shape: f32[1,52], index: 11, kind: input, shape index: {}]   ;;  %s16366_s12 = inlined_call_operand.vmem [shape: f32[8,52], index: 12, kind: output, shape index: {}]  }
   0x1   :  { %11370 = vset.pattern.permute.xlu2 %v11543_v0  ;;  %11369 = vset.pattern.permute.xlu1 %v11543_v0  ;;  %v96_v1 = vld [vmem:[%s16354_s2 + $0x10] sm:$0x3]  ;;  %v11626_v2 = vld [vmem:[%s16355_s1 + $0x20] sm:$0xff]  ;;  %v95_v5 = vld [vmem:[%s16354_s2 + $0x8] sm:$0xff]  ;;  %v11544_v35 = vmov 0.0   ;;  %vm1036_vm3 = vcmask 257024  }
   0x2   :  { %v11631_v3 = vld [vmem:[%s16355_s1 + $0x10] sm:$0xff]  ;;  %11368 = vset.pattern.permute.xlu0 %v11543_v0  ;;  %9757 = vmatpush.msk.msra.mxu0 %vm258_vm0, %v96_v1  ;;  %v11636_v4 = vld [vmem:[%s16355_s1] sm:$0xff]  ;;  %v11654_v8 = vld [vmem:[%s16355_s1 + $0x28] sm:$0xff]  ;;  %492 = vst.msk [vmem:[#allocation2 + $0x20] sm:$0xff] %vm487_vm2, %v11544_v35  ;;  %vm1765_vm4 = vcmask 519424   ;;  %vm2494_vm5 = vcmask 781824  }
   0x3   :  { %694 = vperm.xlu2 %11370, %v11626_v2   ;;  %684 = vperm.xlu1 %11369, %v11631_v3   ;;  %v94_v6 = vld [vmem:[%s16354_s2] sm:$0xff]  ;;  %v11659_v9 = vld [vmem:[%s16355_s1 + $0x18] sm:$0xff]  ;;  %v11664_v10 = vld [vmem:[%s16355_s1 + $0x8] sm:$0xff]  ;;  %488 = vst.msk [vmem:[#allocation2] sm:$0xff] %vm487_vm2, %v11544_v35  ;;  %s11550_s18 = smov 96   ;;  %vm3223_vm6 = vcmask 1044224  }
   0x4   :  { %674 = vperm.xlu0 %11368, %v11636_v4   ;;  %276 = vmatpush.msra.mxu0 %v95_v5  ;;  %v42_v7 = vld [vmem:[%s16356_s0] sm:$0xff]  ;;  %v43_v11 = vld [vmem:[%s16356_s0 + $0x8] sm:$0xff]  ;;  %v11681_v13 = vld [vmem:[%s16355_s1 + $0x38] sm:$0xff]  ;;  %489 = vst.msk [vmem:[#allocation2 + $0x8] sm:$0xff] %vm487_vm2, %v11544_v35  ;;  %vm7326_vm7 = vcmask 519168   ;;  %vm7333_vm8 = vcmask 1043968  }
   0x5   :  { %v11676_v12 = vld [vmem:[%s16355_s1 + $0x40] sm:$0xff]  ;;  %v11686_v14 = vld [vmem:[%s16355_s1 + $0x30] sm:$0xff]  ;;  %v11698_v16 = vld [vmem:[%s16355_s1 + $0x58] sm:$0xff]  ;;  %490 = vst.msk [vmem:[#allocation2 + $0x10] sm:$0xff] %vm487_vm2, %v11544_v35  ;;  %vm9727_vm9 = vcmask 424960  }
   0x6   :  { %277 = vmatpush.msra.mxu0 %v94_v6  ;;  %v44_v15 = vld [vmem:[%s16356_s0 + $0x10] sm:$0xff]  ;;  %v11708_v18 = vld [vmem:[%s16355_s1 + $0x48] sm:$0xff]  ;;  %v45_v19 = vld [vmem:[%s16356_s0 + $0x18] sm:$0xff]  ;;  %491 = vst.msk [vmem:[#allocation2 + $0x18] sm:$0xff] %vm487_vm2, %v11544_v35 }
   0x7   :  { %9758 = vmatmul.msk.f32.vlgmr.msra.gmra.mxu0 %vm101_vm1, %v42_v7  ;;  %v11703_v17 = vld [vmem:[%s16355_s1 + $0x50] sm:$0xff]  ;;  %v11725_v21 = vld [vmem:[%s16355_s1 + $0x68] sm:$0xff]  ;;  %v11730_v22 = vld [vmem:[%s16355_s1 + $0x60] sm:$0xff]  ;;  %493 = vst.msk [vmem:[#allocation2 + $0x28] sm:$0xff] %vm487_vm2, %v11544_v35 }
   0x8   :  { %v11720_v20 = vld [vmem:[%s16355_s1 + $0x70] sm:$0xff]  ;;  %v46_v23 = vld [vmem:[%s16356_s0 + $0x20] sm:$0xff]  ;;  %v11742_v24 = vld [vmem:[%s16355_s1 + $0x88] sm:$0xff]  ;;  %494 = vst.msk [vmem:[#allocation2 + $0x30] sm:$0xff] %vm487_vm2, %v11544_v35 }
   0x9   :  { %v11747_v25 = vld [vmem:[%s16355_s1 + $0x80] sm:$0xff]  ;;  %v11752_v26 = vld [vmem:[%s16355_s1 + $0x78] sm:$0xff]  ;;  %v47_v27 = vld [vmem:[%s16356_s0 + $0x28] sm:$0xff]  ;;  %495 = vst.msk [vmem:[#allocation2 + $0x38] sm:$0xff] %vm487_vm2, %v11544_v35 }
   0xa   :  { %v11764_v28 = vld [vmem:[%s16355_s1 + $0xa0] sm:$0xff]  ;;  %v11769_v29 = vld [vmem:[%s16355_s1 + $0x98] sm:$0xff]  ;;  %v11774_v30 = vld [vmem:[%s16355_s1 + $0x90] sm:$0xff]  ;;  %496 = vst.msk [vmem:[#allocation2 + $0x40] sm:$0xff] %vm487_vm2, %v11544_v35 }
   0xb   :  { %699 = vperm.xlu2 %11370, %v11654_v8   ;;  %689 = vperm.xlu1 %11369, %v11659_v9   ;;  %v48_v31 = vld [vmem:[%s16356_s0 + $0x30] sm:$0xff]  ;;  %v11786_v32 = vld [vmem:[%s16355_s1 + $0xb8] sm:$0xff]  ;;  %v11796_v34 = vld [vmem:[%s16355_s1 + $0xa8] sm:$0xff]  ;;  %497 = vst.msk [vmem:[#allocation2 + $0x48] sm:$0xff] %vm487_vm2, %v11544_v35 }
   0xc   :  { %679 = vperm.xlu0 %11368, %v11664_v10   ;;  %v11791_v33 = vld [vmem:[%s16355_s1 + $0xb0] sm:$0xff]  ;;  %v49_v36 = vld [vmem:[%s16356_s0 + $0x38] sm:$0xff]  ;;  %v11820_v38 = vld [vmem:[%s16355_s1 + $0xc8] sm:$0xff]  ;;  %498 = vst.msk [vmem:[#allocation2 + $0x50] sm:$0xff] %vm487_vm2, %v11544_v35 }
   0xd   :  { %v11815_v37 = vld [vmem:[%s16355_s1 + $0xd0] sm:$0xff]  ;;  %v11826_v39 = vld [vmem:[%s16355_s1 + $0xc0] sm:$0xff]  ;;  %499 = vst.msk [vmem:[#allocation2 + $0x58] sm:$0xff] %vm487_vm2, %v11544_v35  ;;  %v11845_v41 = vld [vmem:[%s16355_s1 + $0xe8] sm:$0xff] }
   0xe   :  { %v50_v40 = vld [vmem:[%s16356_s0 + $0x40] sm:$0xff]  ;;  %500 = vst.msk [vmem:[#allocation2 + $0x60] sm:$0xff] %vm487_vm2, %v11544_v35  ;;  %v11856_v43 = vld [vmem:[%s16355_s1 + $0xd8] sm:$0xff]  ;;  %v51_v44 = vld [vmem:[%s16356_s0 + $0x48] sm:$0xff] }
   0xf   :  { %9759 = vmatmul.msk.f32.gmra.mxu0 %vm101_vm1, %v43_v11  ;;  %501 = vst.msk [vmem:[#allocation2 + $0x68] sm:$0xff] %vm487_vm2, %v11544_v35  ;;  %v11850_v42 = vld [vmem:[%s16355_s1 + $0xe0] sm:$0xff]  ;;  %v11880_v46 = vld [vmem:[%s16355_s1 + $0xf8] sm:$0xff]  ;;  %v11886_v47 = vld [vmem:[%s16355_s1 + $0xf0] sm:$0xff] }
  0x10   :  { %502 = vst.msk [vmem:[#allocation2 + $0x210] sm:$0xff] %vm487_vm2, %v11544_v35  ;;  %v11875_v45 = vld [vmem:[%s16355_s1 + $0x100] sm:$0xff]  ;;  %v52_v48 = vld [vmem:[%s16356_s0 + $0x50] sm:$0xff]  ;;  %v11902_v49 = vld [vmem:[%s16355_s1 + $0x118] sm:$0xff] }
  0x11   :  { %503 = vst.msk [vmem:[#allocation2 + $0x218] sm:$0xff] %vm487_vm2, %v11544_v35  ;;  %v11907_v50 = vld [vmem:[%s16355_s1 + $0x110] sm:$0xff]  ;;  %v11912_v51 = vld [vmem:[%s16355_s1 + $0x108] sm:$0xff]  ;;  %v11916_v52 = vld [vmem:[#allocation2 + $0x20] sm:$0xff] }
  0x12   :  { %504 = vst.msk [vmem:[#allocation2 + $0x220] sm:$0xff] %vm487_vm2, %v11544_v35  ;;  %v53_v53 = vld [vmem:[%s16356_s0 + $0x58] sm:$0xff]  ;;  %v11927_v57 = vld [vmem:[%s16355_s1 + $0x130] sm:$0xff]  ;;  %v11932_v58 = vld [vmem:[%s16355_s1 + $0x128] sm:$0xff] }
  0x13   :  { %714 = vperm.xlu2 %11370, %v11676_v12   ;;  %709 = vperm.xlu1 %11369, %v11681_v13   ;;  %505 = vst.msk [vmem:[#allocation2 + $0x228] sm:$0xff] %vm487_vm2, %v11544_v35  ;;  %v11937_v59 = vld [vmem:[%s16355_s1 + $0x120] sm:$0xff]  ;;  %v11942_v60 = vld [vmem:[#allocation2 + $0x28] sm:$0xff]  ;;  %v11963_v6 = vld [vmem:[%s16355_s1 + $0x138] sm:$0xff] }
  0x14   :  { %704 = vperm.xlu0 %11368, %v11686_v14   ;;  %506 = vst.msk [vmem:[#allocation2 + $0x230] sm:$0xff] %vm487_vm2, %v11544_v35  ;;  %v54_v61 = vld [vmem:[%s16356_s0 + $0x60] sm:$0xff]  ;;  %v11953_v1 = vld [vmem:[%s16355_s1 + $0x148] sm:$0xff] }
  0x15   :  { %507 = vst.msk [vmem:[#allocation2 + $0x238] sm:$0xff] %vm487_vm2, %v11544_v35  ;;  %v11958_v5 = vld [vmem:[%s16355_s1 + $0x140] sm:$0xff]  ;;  %v55_v11 = vld [vmem:[%s16356_s0 + $0x68] sm:$0xff] }
  0x16   :  { %508 = vst.msk [vmem:[#allocation2 + $0x240] sm:$0xff] %vm487_vm2, %v11544_v35  ;;  %v11968_v7 = vld [vmem:[#allocation2 + $0x40] sm:$0xff] }
  0x17   :  { %9760 = vmatmul.msk.f32.gmra.mxu0 %vm101_vm1, %v44_v15  ;;  %509 = vst.msk [vmem:[#allocation2 + $0x248] sm:$0xff] %vm487_vm2, %v11544_v35 }
  0x18   :  { %510 = vst.msk [vmem:[#allocation2 + $0x250] sm:$0xff] %vm487_vm2, %v11544_v35 }
  0x19   :  { %511 = vst.msk [vmem:[#allocation2 + $0x258] sm:$0xff] %vm487_vm2, %v11544_v35 }
  0x1a   :  { %512 = vst.msk [vmem:[#allocation2 + $0x260] sm:$0xff] %vm487_vm2, %v11544_v35 }
  0x1b   :  { %729 = vperm.xlu2 %11370, %v11698_v16   ;;  %724 = vperm.xlu1 %11369, %v11703_v17   ;;  %513 = vst.msk [vmem:[#allocation2 + $0x268] sm:$0xff] %vm487_vm2, %v11544_v35 }
  0x1c   :  { %719 = vperm.xlu0 %11368, %v11708_v18   ;;  %514 = vst.msk [vmem:[#allocation2 + $0x270] sm:$0xff] %vm487_vm2, %v11544_v35 }
  0x1d   :  { %515 = vst.msk [vmem:[#allocation2 + $0x278] sm:$0xff] %vm487_vm2, %v11544_v35  ;;  %v11989_v35 = vld [vmem:[%s16355_s1 + $0x150] sm:$0xff] }
  0x1e   :  { %16389 = vst [vmem:[#allocation5_spill] sm:$0xff] %v11916_v52 }
  0x1f   :  { %9761 = vmatmul.msk.f32.gmra.mxu0 %vm101_vm1, %v45_v19  ;;  %16390 = vst [vmem:[#allocation6_spill] sm:$0xff] %v11942_v60 }
  0x20   :  { %16391 = vst [vmem:[#allocation7_spill] sm:$0xff] %v11968_v7 }
  0x23   :  { %744 = vperm.xlu2 %11370, %v11720_v20   ;;  %739 = vperm.xlu1 %11369, %v11725_v21  }
  0x24   :  { %734 = vperm.xlu0 %11368, %v11730_v22  }
  0x27   :  { %9762 = vmatmul.msk.f32.gmra.mxu0 %vm101_vm1, %v46_v23 }
  0x2b   :  { %759 = vperm.xlu2 %11370, %v11742_v24   ;;  %754 = vperm.xlu1 %11369, %v11747_v25  }
  0x2c   :  { %749 = vperm.xlu0 %11368, %v11752_v26  }
  0x2f   :  { %9763 = vmatmul.msk.f32.gmra.mxu0 %vm101_vm1, %v47_v27  ;;  %v11979_v27 = vld [vmem:[%s16355_s1 + $0x160] sm:$0xff] }
  0x30   :  { %16392 = vst [vmem:[#allocation8_spill] sm:$0xff] %v11979_v27 }
  0x33   :  { %774 = vperm.xlu2 %11370, %v11764_v28   ;;  %769 = vperm.xlu1 %11369, %v11769_v29  }
  0x34   :  { %764 = vperm.xlu0 %11368, %v11774_v30  }
  0x37   :  { %9764 = vmatmul.msk.f32.gmra.mxu0 %vm101_vm1, %v48_v31  ;;  %v11984_v31 = vld [vmem:[%s16355_s1 + $0x158] sm:$0xff] }
  0x3b   :  { %789 = vperm.xlu2 %11370, %v11786_v32   ;;  %784 = vperm.xlu1 %11369, %v11791_v33  }
  0x3c   :  { %779 = vperm.xlu0 %11368, %v11796_v34  }
  0x3f   :  { %9765 = vmatmul.msk.f32.gmra.mxu0 %vm101_vm1, %v49_v36  ;;  %v11994_v36 = vld [vmem:[#allocation2 + $0x58] sm:$0xff] }
  0x40   :  { %16393 = vst [vmem:[#allocation9_spill] sm:$0xff] %v11994_v36 }
  0x43   :  { %804 = vperm.xlu2 %11370, %v11815_v37   ;;  %799 = vperm.xlu1 %11369, %v11820_v38  }
  0x44   :  { %794 = vperm.xlu0 %11368, %v11826_v39  }
  0x47   :  { %9766 = vmatmul.msk.f32.gmra.mxu0 %vm101_vm1, %v50_v40  ;;  %v11996_v40 = vld [vmem:[#allocation2 + $0x10] sm:$0xff] }
  0x48   :  { %16394 = vst [vmem:[#allocation10_spill] sm:$0xff] %v11996_v40 }
  0x4b   :  { %819 = vperm.xlu2 %11370, %v11845_v41   ;;  %814 = vperm.xlu1 %11369, %v11850_v42  }
  0x4c   :  { %809 = vperm.xlu0 %11368, %v11856_v43  }
  0x4f   :  { %9767 = vmatmul.msk.f32.gmra.mxu0 %vm101_vm1, %v51_v44  ;;  %v568_v44 = vld [vmem:[#allocation2] sm:$0xff] }
  0x53   :  { %834 = vperm.xlu2 %11370, %v11875_v45   ;;  %829 = vperm.xlu1 %11369, %v11880_v46  }
  0x54   :  { %824 = vperm.xlu0 %11368, %v11886_v47  }
  0x57   :  { %9768 = vmatmul.msk.f32.gmra.mxu0 %vm101_vm1, %v52_v48  ;;  %v56_v48 = vld [vmem:[%s16356_s0 + $0x70] sm:$0xff] }
  0x5b   :  { %849 = vperm.xlu2 %11370, %v11902_v49   ;;  %844 = vperm.xlu1 %11369, %v11907_v50  }
  0x5c   :  { %839 = vperm.xlu0 %11368, %v11912_v51  }
  0x5d   :  { %v695_v54 = vpop.permute.xlu2 %694 }
  0x5e   :  { %v936_v55 = vmul.f32 %v695_v54, %v11916_v52 }
  0x5f   :  { %9769 = vmatmul.msk.f32.gmra.mxu0 %vm101_vm1, %v53_v53 }
  0x60   :  { %v988_v56 = vpack.c.bf16 %v936_v55, %v936_v55 }
  0x62   :  { %1041 = vst.msk [vmem:[#allocation3 + $0x30] sm:$0xf] %vm1036_vm3, %v988_v56 }
  0x63   :  { %864 = vperm.xlu2 %11370, %v11927_v57   ;;  %859 = vperm.xlu1 %11369, %v11932_v58  }
  0x64   :  { %854 = vperm.xlu0 %11368, %v11937_v59  }
  0x65   :  { %v700_v62 = vpop.permute.xlu2 %699 }
  0x66   :  { %v937_v63 = vmul.f32 %v700_v62, %v11942_v60 }
  0x67   :  { %9770 = vmatmul.msk.f32.gmra.mxu0 %vm101_vm1, %v54_v61 }
  0x68   :  { %v989_v0 = vpack.c.bf16 %v937_v63, %v937_v63 }
  0x6a   :  { %1042 = vst.msk [vmem:[#allocation3 + $0x3c] sm:$0xf] %vm1036_vm3, %v989_v0 }
  0x6b   :  { %879 = vperm.xlu2 %11370, %v11953_v1   ;;  %874 = vperm.xlu1 %11369, %v11958_v5  }
  0x6c   :  { %869 = vperm.xlu0 %11368, %v11963_v6  }
  0x6d   :  { %v715_v15 = vpop.permute.xlu2 %714 }
  0x6e   :  { %v940_v19 = vmul.f32 %v715_v15, %v11968_v7  ;;  %v12013_v15 = vld [vmem:[%s16355_s1 + $0x170] sm:$0xff]  ;;  %v58_v7 = vld [vmem:[%s16356_s0 + $0x80] sm:$0xff] }
  0x6f   :  { %9771 = vmatmul.msk.f32.gmra.mxu0 %vm101_vm1, %v55_v11  ;;  %v12008_v11 = vld [vmem:[%s16355_s1 + $0x178] sm:$0xff]  ;;  %16396 = vst [vmem:[#allocation12_spill] sm:$0xff] %v12013_v15 }
  0x70   :  { %v992_v23 = vpack.c.bf16 %v940_v19, %v940_v19  ;;  %16395 = vst [vmem:[#allocation11_spill] sm:$0xff] %v12008_v11 }
  0x72   :  { %1045 = vst.msk [vmem:[#allocation3 + $0x60] sm:$0xf] %vm1036_vm3, %v992_v23  ;;  %v12018_v23 = vld [vmem:[%s16355_s1 + $0x168] sm:$0xff] }
  0x73   :  { %894 = vperm.xlu2 %11370, %v11979_v27   ;;  %889 = vperm.xlu1 %11369, %v11984_v31   ;;  %v12103_v27 = vld [vmem:[#allocation2 + $0x68] sm:$0xff] }
  0x74   :  { %884 = vperm.xlu0 %11368, %v11989_v35  }
  0x75   :  { %v730_v53 = vpop.permute.xlu2 %729  ;;  %v685_v54 = vpop.permute.xlu1 %684 }
  0x76   :  { %v943_v55 = vmul.f32 %v730_v53, %v11994_v36  ;;  %v934_v56 = vmul.f32 %v685_v54, %v11996_v40  ;;  %v675_v61 = vpop.permute.xlu0 %674  ;;  %v57_v53 = vld [vmem:[%s16356_s0 + $0x78] sm:$0xff]  ;;  %v12044_v36 = vld [vmem:[%s16355_s1 + $0x188] sm:$0xff] }
  0x77   :  { %v932_v62 = vmul.f32 %v675_v61, %v568_v44  ;;  %9772 = vmatmul.msk.f32.gmra.mxu0 %vm101_vm1, %v56_v48  ;;  %v12023_v44 = vld [vmem:[#allocation2 + $0x18] sm:$0xff]  ;;  %v12027_v48 = vld [vmem:[#allocation2 + $0x8] sm:$0xff]  ;;  %16400 = vst [vmem:[#allocation16_spill] sm:$0xff] %v12044_v36 }
  0x78   :  { %v995_v63 = vpack.c.bf16 %v943_v55, %v943_v55  ;;  %v986_v0 = vpack.c.bf16 %v934_v56, %v934_v56  ;;  %16397 = vst [vmem:[#allocation13_spill] sm:$0xff] %v12023_v44 }
  0x79   :  { %v984_v19 = vpack.c.bf16 %v932_v62, %v932_v62  ;;  %16398 = vst [vmem:[#allocation14_spill] sm:$0xff] %v12027_v48 }
  0x7a   :  { %1039 = vst.msk [vmem:[#allocation3 + $0x18] sm:$0xf] %vm1036_vm3, %v986_v0 }
  0x7b   :  { %909 = vperm.xlu2 %11370, %v12008_v11   ;;  %904 = vperm.xlu1 %11369, %v12013_v15   ;;  %1037 = vst.msk [vmem:[#allocation3] sm:$0xf] %vm1036_vm3, %v984_v19  ;;  %v12039_v19 = vld [vmem:[%s16355_s1 + $0x190] sm:$0xff]  ;;  %v12078_v11 = vld [vmem:[%s16355_s1 + $0x198] sm:$0xff] }
  0x7c   :  { %899 = vperm.xlu0 %11368, %v12018_v23   ;;  %1048 = vst.msk [vmem:[#allocation3 + $0x84] sm:$0xf] %vm1036_vm3, %v995_v63 }
  0x7d   :  { %v745_v54 = vpop.permute.xlu2 %744  ;;  %v690_v55 = vpop.permute.xlu1 %689  ;;  %16399 = vst [vmem:[#allocation15_spill] sm:$0xff] %v12039_v19 }
  0x7e   :  { %v935_v56 = vmul.f32 %v690_v55, %v12023_v44  ;;  %v680_v61 = vpop.permute.xlu0 %679  ;;  %v12049_v55 = vld [vmem:[%s16355_s1 + $0x180] sm:$0xff]  ;;  %16404 = vst [vmem:[#allocation20_spill] sm:$0xff] %v12078_v11 }
  0x7f   :  { %v933_v62 = vmul.f32 %v680_v61, %v12027_v48  ;;  %9773 = vmatmul.msk.f32.gmra.mxu0 %vm101_vm1, %v57_v53  ;;  %16401 = vst [vmem:[#allocation17_spill] sm:$0xff] %v12049_v55  ;;  %v12054_v53 = vld [vmem:[%s16357_s3] ss:$0 sm:$0xff]  ;;  %v12063_v61 = vld [vmem:[#allocation2 + $0x30] sm:$0xff] }
  0x80   :  { %v987_v0 = vpack.c.bf16 %v935_v56, %v935_v56  ;;  %v12059_v56 = vld [vmem:[#allocation2 + $0x38] sm:$0xff]  ;;  %16403 = vst [vmem:[#allocation19_spill] sm:$0xff] %v12063_v61 }
  0x81   :  { %v985_v63 = vpack.c.bf16 %v933_v62, %v933_v62  ;;  %16402 = vst [vmem:[#allocation18_spill] sm:$0xff] %v12059_v56 }
  0x82   :  { %1040 = vst.msk [vmem:[#allocation3 + $0x24] sm:$0xf] %vm1036_vm3, %v987_v0 }
  0x83   :  { %924 = vperm.xlu2 %11370, %v12039_v19   ;;  %919 = vperm.xlu1 %11369, %v12044_v36   ;;  %1038 = vst.msk [vmem:[#allocation3 + $0xc] sm:$0xf] %vm1036_vm3, %v985_v63 }
  0x84   :  { %914 = vperm.xlu0 %11368, %v12049_v55   ;;  %v279_v62 = vpop.f32.mrf.mxu0 }
  0x85   :  { %v12068_v60 = vpop.permute.xlu2 %759  ;;  %v710_v0 = vpop.permute.xlu1 %709  ;;  %v280_v52 = vadd.f32 %v12054_v53, %v279_v62  ;;  %v11545_v62 = vmov 1  }
  0x86   :  { %v939_v40 = vmul.f32 %v710_v0, %v12059_v56  ;;  %v705_v19 = vpop.permute.xlu0 %704  ;;  %v12081_v0 = vld [vmem:[#allocation2 + $0x50] sm:$0xff] }
  0x87   :  { %v938_v44 = vmul.f32 %v705_v19, %v12063_v61  ;;  %v435_v63 = vmax.f32 %v280_v52, 0.0  ;;  %9774 = vmatmul.msk.f32.gmra.mxu0 %vm101_vm1, %v58_v7  ;;  %v12086_v52 = vld [vmem:[#allocation2 + $0x48] sm:$0xff] }
  0x88   :  { %v991_v48 = vpack.c.bf16 %v939_v40, %v939_v40  ;;  %v59_v40 = vld [vmem:[%s16356_s0 + $0x88] sm:$0xff] }
  0x89   :  { %v990_v36 = vpack.c.bf16 %v938_v44, %v938_v44  ;;  %516 = vst.msk [vmem:[#allocation2 + $0x70] sm:$0xff] %vm487_vm2, %v435_v63 }
  0x8a   :  { %1044 = vst.msk [vmem:[#allocation3 + $0x54] sm:$0xf] %vm1036_vm3, %v991_v48 }
  0x8b   :  { %11372 = vset.pattern.permute.xlu2 %v11545_v62  ;;  %11371 = vset.pattern.permute.xlu1 %v11545_v62  ;;  %1043 = vst.msk [vmem:[#allocation3 + $0x48] sm:$0xf] %vm1036_vm3, %v990_v36 }
  0x8c   :  { %929 = vperm.xlu0 %11368, %v12078_v11   ;;  %1200 = vperm.xlu2 %11372, %v11664_v10   ;;  %v282_v7 = vpop.f32.mrf.mxu0 }
  0x8d   :  { %1195 = vperm.xlu1 %11371, %v11636_v4   ;;  %v12092_v44 = vpop.permute.xlu2 %774  ;;  %v725_v48 = vpop.permute.xlu1 %724  ;;  %v283_v19 = vadd.f32 %v12054_v53, %v282_v7 }
  0x8e   :  { %v942_v36 = vmul.f32 %v725_v48, %v12081_v0  ;;  %v720_v63 = vpop.permute.xlu0 %719 }
  0x8f   :  { %v941_v56 = vmul.f32 %v720_v63, %v12086_v52  ;;  %v436_v10 = vmax.f32 %v283_v19, 0.0  ;;  %9775 = vmatmul.msk.f32.gmra.mxu0 %vm101_vm1, %v59_v40  ;;  %v12107_v40 = vld [vmem:[#allocation2 + $0x60] sm:$0xff] }
  0x90   :  { %v994_v61 = vpack.c.bf16 %v942_v36, %v942_v36  ;;  %v12098_v11 = vld [vmem:[#allocation2 + $0x70] sm:$0xff] }
  0x91   :  { %v993_v55 = vpack.c.bf16 %v941_v56, %v941_v56  ;;  %517 = vst.msk [vmem:[#allocation2 + $0x78] sm:$0xff] %vm487_vm2, %v436_v10  ;;  %v946_v4 = vmul.f32 %v12098_v11, %v745_v54  ;;  %v3276_v15 = vld [vmem:[#allocation2 + $0x70] sm:$0xff] }
  0x92   :  { %1047 = vst.msk [vmem:[#allocation3 + $0x78] sm:$0xf] %vm1036_vm3, %v994_v61  ;;  %v3328_v7 = vpack.c.bf16 %v3276_v15, %v3276_v15  ;;  %v60_v56 = vld [vmem:[%s16356_s0 + $0x90] sm:$0xff] }
  0x93   :  { %1046 = vst.msk [vmem:[#allocation3 + $0x6c] sm:$0xf] %vm1036_vm3, %v993_v55  ;;  %v998_v48 = vpack.c.bf16 %v946_v4, %v946_v4 }
  0x94   :  { %11373 = vset.pattern.permute.xlu0 %v11545_v62  ;;  %1215 = vperm.xlu2 %11372, %v11626_v2   ;;  %v285_v19 = vpop.f32.mrf.mxu0  ;;  %3380 = vst.msk [vmem:[#allocation3 + $0x4] sm:$0xf] %vm1036_vm3, %v3328_v7  ;;  %v61_v7 = vld [vmem:[%s16356_s0 + $0x98] sm:$0xff] }
  0x95   :  { %1210 = vperm.xlu1 %11371, %v11659_v9   ;;  %1205 = vperm.xlu0 %11373, %v11631_v3   ;;  %v12115_v15 = vpop.permute.xlu2 %789  ;;  %v740_v54 = vpop.permute.xlu1 %739  ;;  %v286_v55 = vadd.f32 %v12054_v53, %v285_v19  ;;  %1051 = vst.msk [vmem:[#allocation3 + $0xa8] sm:$0xf] %vm1036_vm3, %v998_v48 }
  0x96   :  { %v945_v2 = vmul.f32 %v740_v54, %v12103_v27  ;;  %v735_v61 = vpop.permute.xlu0 %734 }
  0x97   :  { %v944_v62 = vmul.f32 %v735_v61, %v12107_v40  ;;  %v437_v36 = vmax.f32 %v286_v55, 0.0  ;;  %9776 = vmatmul.msk.f32.gmra.mxu0 %vm101_vm1, %v60_v56 }
  0x98   :  { %v997_v63 = vpack.c.bf16 %v945_v2, %v945_v2  ;;  %v3432_v3 = vld [vmem:[#allocation2 + $0x78] sm:$0xff] }
  0x99   :  { %v996_v10 = vpack.c.bf16 %v944_v62, %v944_v62  ;;  %518 = vst.msk [vmem:[#allocation2 + $0x80] sm:$0xff] %vm487_vm2, %v437_v36  ;;  %v3329_v9 = vpack.c.bf16 %v3432_v3, %v3432_v3  ;;  %v12135_v55 = vld [vmem:[#allocation2 + $0x78] sm:$0xff]  ;;  %v62_v3 = vld [vmem:[%s16356_s0 + $0xa0] sm:$0xff] }
  0x9a   :  { %1050 = vst.msk [vmem:[#allocation3 + $0x9c] sm:$0xf] %vm1036_vm3, %v997_v63 }
  0x9b   :  { %1049 = vst.msk [vmem:[#allocation3 + $0x90] sm:$0xf] %vm1036_vm3, %v996_v10 }
  0x9c   :  { %1225 = vperm.xlu2 %11372, %v11686_v14   ;;  %v288_v4 = vpop.f32.mrf.mxu0  ;;  %3381 = vst.msk [vmem:[#allocation3 + $0x10] sm:$0xf] %vm1036_vm3, %v3329_v9 }
  0x9d   :  { %1220 = vperm.xlu1 %11371, %v11654_v8   ;;  %1230 = vperm.xlu0 %11373, %v11681_v13   ;;  %v12132_v48 = vpop.permute.xlu2 %804  ;;  %v755_v19 = vpop.permute.xlu1 %754  ;;  %v289_v56 = vadd.f32 %v12054_v53, %v288_v4 }
  0x9e   :  { %v750_v54 = vpop.permute.xlu0 %749 }
  0x9f   :  { %v947_v14 = vmul.f32 %v750_v54, %v12135_v55  ;;  %v438_v2 = vmax.f32 %v289_v56, 0.0  ;;  %9777 = vmatmul.msk.f32.gmra.mxu0 %vm101_vm1, %v61_v7 }
  0xa0   :  { %v12139_v61 = vld [vmem:[#allocation2 + $0x80] sm:$0xff] }
  0xa1   :  { %v948_v62 = vmul.f32 %v755_v19, %v12139_v61  ;;  %v999_v8 = vpack.c.bf16 %v947_v14, %v947_v14  ;;  %519 = vst.msk [vmem:[#allocation2 + $0x88] sm:$0xff] %vm487_vm2, %v438_v2  ;;  %v3433_v13 = vld [vmem:[#allocation2 + $0x80] sm:$0xff] }
  0xa2   :  { %v3330_v36 = vpack.c.bf16 %v3433_v13, %v3433_v13 }
  0xa3   :  { %v1000_v63 = vpack.c.bf16 %v948_v62, %v948_v62  ;;  %1052 = vst.msk [vmem:[#allocation3 + $0xb4] sm:$0xf] %vm1036_vm3, %v999_v8  ;;  %v63_v62 = vld [vmem:[%s16356_s0 + $0xa8] sm:$0xff] }
  0xa4   :  { %1240 = vperm.xlu2 %11372, %v11708_v18   ;;  %v291_v10 = vpop.f32.mrf.mxu0  ;;  %3382 = vst.msk [vmem:[#allocation3 + $0x1c] sm:$0xf] %vm1036_vm3, %v3330_v36 }
  0xa5   :  { %1235 = vperm.xlu1 %11371, %v11676_v12   ;;  %1245 = vperm.xlu0 %11373, %v11703_v17   ;;  %v12151_v9 = vpop.permute.xlu2 %819  ;;  %v770_v4 = vpop.permute.xlu1 %769  ;;  %v292_v7 = vadd.f32 %v12054_v53, %v291_v10  ;;  %1053 = vst.msk [vmem:[#allocation3 + $0xc0] sm:$0xf] %vm1036_vm3, %v1000_v63 }
  0xa6   :  { %v765_v19 = vpop.permute.xlu0 %764 }
  0xa7   :  { %v439_v18 = vmax.f32 %v292_v7, 0.0  ;;  %9778 = vmatmul.msk.f32.gmra.mxu0 %vm101_vm1, %v62_v3 }
  0xa8   :  { %v12156_v56 = vld [vmem:[#allocation2 + $0x88] sm:$0xff] }
  0xa9   :  { %520 = vst.msk [vmem:[#allocation2 + $0x90] sm:$0xff] %vm487_vm2, %v439_v18  ;;  %v949_v12 = vmul.f32 %v12156_v56, %v12068_v60  ;;  %v3434_v54 = vld [vmem:[#allocation2 + $0x88] sm:$0xff]  ;;  %v64_v18 = vld [vmem:[%s16356_s0 + $0xb0] sm:$0xff] }
  0xaa   :  { %v3331_v17 = vpack.c.bf16 %v3434_v54, %v3434_v54 }
  0xab   :  { %v1001_v14 = vpack.c.bf16 %v949_v12, %v949_v12 }
  0xac   :  { %1255 = vperm.xlu2 %11372, %v11730_v22   ;;  %v294_v2 = vpop.f32.mrf.mxu0  ;;  %3383 = vst.msk [vmem:[#allocation3 + $0x28] sm:$0xf] %vm1036_vm3, %v3331_v17 }
  0xad   :  { %1250 = vperm.xlu1 %11371, %v11698_v16   ;;  %1260 = vperm.xlu0 %11373, %v11725_v21   ;;  %v12168_v8 = vpop.permute.xlu2 %834  ;;  %v12170_v13 = vpop.permute.xlu1 %784  ;;  %v295_v60 = vadd.f32 %v12054_v53, %v294_v2  ;;  %1054 = vst.msk [vmem:[#allocation3 + $0xcc] sm:$0xf] %vm1036_vm3, %v1001_v14 }
  0xae   :  { %v780_v22 = vpop.permute.xlu0 %779 }
  0xaf   :  { %v440_v36 = vmax.f32 %v295_v60, 0.0  ;;  %9779 = vmatmul.msk.f32.gmra.mxu0 %vm101_vm1, %v63_v62 }
  0xb0   :  { %v12175_v63 = vld [vmem:[#allocation2 + $0x90] sm:$0xff] }
  0xb1   :  { %521 = vst.msk [vmem:[#allocation2 + $0x98] sm:$0xff] %vm487_vm2, %v440_v36  ;;  %v950_v16 = vmul.f32 %v12175_v63, %v765_v19  ;;  %v3435_v10 = vld [vmem:[#allocation2 + $0x90] sm:$0xff]  ;;  %v65_v36 = vld [vmem:[%s16356_s0 + $0xb8] sm:$0xff] }
  0xb2   :  { %v3332_v21 = vpack.c.bf16 %v3435_v10, %v3435_v10 }
  0xb3   :  { %v1002_v3 = vpack.c.bf16 %v950_v16, %v950_v16 }
  0xb4   :  { %1270 = vperm.xlu2 %11372, %v11752_v26   ;;  %v297_v7 = vpop.f32.mrf.mxu0  ;;  %3384 = vst.msk [vmem:[#allocation3 + $0x34] sm:$0xf] %vm1036_vm3, %v3332_v21 }
  0xb5   :  { %1265 = vperm.xlu1 %11371, %v11720_v20   ;;  %1275 = vperm.xlu0 %11373, %v11747_v25   ;;  %v12186_v12 = vpop.permute.xlu2 %849  ;;  %v12188_v54 = vpop.permute.xlu1 %799  ;;  %v298_v19 = vadd.f32 %v12054_v53, %v297_v7  ;;  %1055 = vst.msk [vmem:[#allocation3 + $0xd8] sm:$0xf] %vm1036_vm3, %v1002_v3 }
  0xb6   :  { %v12192_v26 = vpop.permute.xlu0 %794 }
  0xb7   :  { %v441_v17 = vmax.f32 %v298_v19, 0.0  ;;  %9780 = vmatmul.msk.f32.gmra.mxu0 %vm101_vm1, %v64_v18 }
  0xb8   :  { %v12195_v14 = vld [vmem:[#allocation2 + $0x98] sm:$0xff] }
  0xb9   :  { %522 = vst.msk [vmem:[#allocation2 + $0xa0] sm:$0xff] %vm487_vm2, %v441_v17  ;;  %v951_v20 = vmul.f32 %v12195_v14, %v770_v4  ;;  %v3436_v25 = vld [vmem:[#allocation2 + $0x98] sm:$0xff]  ;;  %v66_v17 = vld [vmem:[%s16356_s0 + $0xc0] sm:$0xff] }
  0xba   :  { %v3333_v2 = vpack.c.bf16 %v3436_v25, %v3436_v25 }
  0xbb   :  { %v1003_v62 = vpack.c.bf16 %v951_v20, %v951_v20 }
  0xbc   :  { %1285 = vperm.xlu2 %11372, %v11774_v30   ;;  %v300_v60 = vpop.f32.mrf.mxu0  ;;  %3385 = vst.msk [vmem:[#allocation3 + $0x40] sm:$0xf] %vm1036_vm3, %v3333_v2 }
  0xbd   :  { %1280 = vperm.xlu1 %11371, %v11742_v24   ;;  %1290 = vperm.xlu0 %11373, %v11769_v29   ;;  %v12206_v16 = vpop.permute.xlu2 %864  ;;  %v12208_v10 = vpop.permute.xlu1 %814  ;;  %v301_v4 = vadd.f32 %v12054_v53, %v300_v60  ;;  %1056 = vst.msk [vmem:[#allocation3 + $0xe4] sm:$0xf] %vm1036_vm3, %v1003_v62 }
  0xbe   :  { %v12212_v30 = vpop.permute.xlu0 %809 }
  0xbf   :  { %v442_v21 = vmax.f32 %v301_v4, 0.0  ;;  %9781 = vmatmul.msk.f32.gmra.mxu0 %vm101_vm1, %v65_v36 }
  0xc0   :  { %v12215_v3 = vld [vmem:[#allocation2 + $0xa0] sm:$0xff] }
  0xc1   :  { %523 = vst.msk [vmem:[#allocation2 + $0xa8] sm:$0xff] %vm487_vm2, %v442_v21  ;;  %v952_v24 = vmul.f32 %v12215_v3, %v12092_v44  ;;  %v3437_v29 = vld [vmem:[#allocation2 + $0xa0] sm:$0xff]  ;;  %v67_v21 = vld [vmem:[%s16356_s0 + $0xc8] sm:$0xff] }
  0xc2   :  { %v3334_v7 = vpack.c.bf16 %v3437_v29, %v3437_v29 }
  0xc3   :  { %v1004_v18 = vpack.c.bf16 %v952_v24, %v952_v24 }
  0xc4   :  { %1300 = vperm.xlu2 %11372, %v11796_v34   ;;  %v303_v19 = vpop.f32.mrf.mxu0  ;;  %3386 = vst.msk [vmem:[#allocation3 + $0x4c] sm:$0xf] %vm1036_vm3, %v3334_v7 }
  0xc5   :  { %1295 = vperm.xlu1 %11371, %v11764_v28   ;;  %1305 = vperm.xlu0 %11373, %v11791_v33   ;;  %v12227_v20 = vpop.permute.xlu2 %879  ;;  %v12229_v25 = vpop.permute.xlu1 %829  ;;  %v304_v44 = vadd.f32 %v12054_v53, %v303_v19  ;;  %1057 = vst.msk [vmem:[#allocation3 + $0xf0] sm:$0xf] %vm1036_vm3, %v1004_v18 }
  0xc6   :  { %v12233_v34 = vpop.permute.xlu0 %824 }
  0xc7   :  { %v443_v2 = vmax.f32 %v304_v44, 0.0  ;;  %9782 = vmatmul.msk.f32.gmra.mxu0 %vm101_vm1, %v66_v17 }
  0xc8   :  { %v12236_v62 = vld [vmem:[#allocation2 + $0xa8] sm:$0xff] }
  0xc9   :  { %524 = vst.msk [vmem:[#allocation2 + $0xb0] sm:$0xff] %vm487_vm2, %v443_v2  ;;  %v953_v28 = vmul.f32 %v12236_v62, %v780_v22  ;;  %v3438_v33 = vld [vmem:[#allocation2 + $0xa8] sm:$0xff]  ;;  %v68_v2 = vld [vmem:[%s16356_s0 + $0xd0] sm:$0xff] }
  0xca   :  { %v3335_v60 = vpack.c.bf16 %v3438_v33, %v3438_v33 }
  0xcb   :  { %v1005_v36 = vpack.c.bf16 %v953_v28, %v953_v28 }
  0xcc   :  { %1315 = vperm.xlu2 %11372, %v11826_v39   ;;  %v306_v4 = vpop.f32.mrf.mxu0  ;;  %3387 = vst.msk [vmem:[#allocation3 + $0x58] sm:$0xf] %vm1036_vm3, %v3335_v60 }
  0xcd   :  { %1310 = vperm.xlu1 %11371, %v11786_v32   ;;  %1320 = vperm.xlu0 %11373, %v11820_v38   ;;  %v12247_v24 = vpop.permute.xlu2 %894  ;;  %v12249_v29 = vpop.permute.xlu1 %844  ;;  %v307_v22 = vadd.f32 %v12054_v53, %v306_v4  ;;  %1058 = vst.msk [vmem:[#allocation3 + $0xfc] sm:$0xf] %vm1036_vm3, %v1005_v36 }
  0xce   :  { %v12253_v39 = vpop.permute.xlu0 %839 }
  0xcf   :  { %v444_v7 = vmax.f32 %v307_v22, 0.0  ;;  %9783 = vmatmul.msk.f32.gmra.mxu0 %vm101_vm1, %v67_v21 }
  0xd0   :  { %v12256_v18 = vld [vmem:[#allocation2 + $0xb0] sm:$0xff] }
  0xd1   :  { %525 = vst.msk [vmem:[#allocation2 + $0xb8] sm:$0xff] %vm487_vm2, %v444_v7  ;;  %v954_v32 = vmul.f32 %v12256_v18, %v12170_v13  ;;  %v3439_v38 = vld [vmem:[#allocation2 + $0xb0] sm:$0xff]  ;;  %v69_v7 = vld [vmem:[%s16356_s0 + $0xd8] sm:$0xff] }
  0xd2   :  { %v3336_v19 = vpack.c.bf16 %v3439_v38, %v3439_v38 }
  0xd3   :  { %v1006_v17 = vpack.c.bf16 %v954_v32, %v954_v32 }
  0xd4   :  { %1330 = vperm.xlu2 %11372, %v11856_v43   ;;  %v309_v44 = vpop.f32.mrf.mxu0  ;;  %3388 = vst.msk [vmem:[#allocation3 + $0x64] sm:$0xf] %vm1036_vm3, %v3336_v19 }
  0xd5   :  { %1325 = vperm.xlu1 %11371, %v11815_v37   ;;  %1335 = vperm.xlu0 %11373, %v11850_v42   ;;  %v12268_v28 = vpop.permute.xlu2 %909  ;;  %v12270_v33 = vpop.permute.xlu1 %859  ;;  %v310_v13 = vadd.f32 %v12054_v53, %v309_v44  ;;  %1059 = vst.msk [vmem:[#allocation3 + $0x108] sm:$0xf] %vm1036_vm3, %v1006_v17 }
  0xd6   :  { %16405 = vst [vmem:[#allocation21_spill] sm:$0xff] %v12268_v28  ;;  %v12274_v43 = vpop.permute.xlu0 %854 }
  0xd7   :  { %v445_v60 = vmax.f32 %v310_v13, 0.0  ;;  %9784 = vmatmul.msk.f32.gmra.mxu0 %vm101_vm1, %v68_v2 }
  0xd8   :  { %v12277_v36 = vld [vmem:[#allocation2 + $0xb8] sm:$0xff] }
  0xd9   :  { %526 = vst.msk [vmem:[#allocation2 + $0xc0] sm:$0xff] %vm487_vm2, %v445_v60  ;;  %v955_v37 = vmul.f32 %v12277_v36, %v12115_v15  ;;  %v3440_v42 = vld [vmem:[#allocation2 + $0xb8] sm:$0xff]  ;;  %v70_v60 = vld [vmem:[%s16356_s0 + $0xe0] sm:$0xff] }
  0xda   :  { %v3337_v4 = vpack.c.bf16 %v3440_v42, %v3440_v42 }
  0xdb   :  { %v1007_v21 = vpack.c.bf16 %v955_v37, %v955_v37 }
  0xdc   :  { %1345 = vperm.xlu2 %11372, %v11886_v47   ;;  %v312_v22 = vpop.f32.mrf.mxu0  ;;  %3389 = vst.msk [vmem:[#allocation3 + $0x70] sm:$0xf] %vm1036_vm3, %v3337_v4 }
  0xdd   :  { %1340 = vperm.xlu1 %11371, %v11845_v41   ;;  %1350 = vperm.xlu0 %11373, %v11880_v46   ;;  %v12289_v32 = vpop.permute.xlu2 %924  ;;  %v12291_v38 = vpop.permute.xlu1 %874  ;;  %v313_v15 = vadd.f32 %v12054_v53, %v312_v22  ;;  %1060 = vst.msk [vmem:[#allocation3 + $0x114] sm:$0xf] %vm1036_vm3, %v1007_v21 }
  0xde   :  { %16406 = vst [vmem:[#allocation22_spill] sm:$0xff] %v12289_v32  ;;  %v12295_v47 = vpop.permute.xlu0 %869  ;;  %v16416_v32 = vld [vmem:[#allocation13_spill] sm:$0xff] }
  0xdf   :  { %v446_v19 = vmax.f32 %v313_v15, 0.0  ;;  %9785 = vmatmul.msk.f32.gmra.mxu0 %vm101_vm1, %v69_v7 }
  0xe0   :  { %v12298_v17 = vld [vmem:[#allocation2 + $0xc0] sm:$0xff] }
  0xe1   :  { %527 = vst.msk [vmem:[#allocation2 + $0xc8] sm:$0xff] %vm487_vm2, %v446_v19  ;;  %v956_v41 = vmul.f32 %v12298_v17, %v12192_v26  ;;  %v3441_v46 = vld [vmem:[#allocation2 + $0xc0] sm:$0xff]  ;;  %v71_v19 = vld [vmem:[%s16356_s0 + $0xe8] sm:$0xff] }
  0xe2   :  { %v3338_v44 = vpack.c.bf16 %v3441_v46, %v3441_v46 }
  0xe3   :  { %v1008_v2 = vpack.c.bf16 %v956_v41, %v956_v41 }
  0xe4   :  { %1360 = vperm.xlu2 %11372, %v11912_v51   ;;  %v315_v13 = vpop.f32.mrf.mxu0  ;;  %3390 = vst.msk [vmem:[#allocation3 + $0x7c] sm:$0xf] %vm1036_vm3, %v3338_v44 }
  0xe5   :  { %1355 = vperm.xlu1 %11371, %v11875_v45   ;;  %1365 = vperm.xlu0 %11373, %v11907_v50   ;;  %v12310_v37 = vpop.permute.xlu1 %889  ;;  %v316_v26 = vadd.f32 %v12054_v53, %v315_v13  ;;  %1061 = vst.msk [vmem:[#allocation3 + $0x120] sm:$0xf] %vm1036_vm3, %v1008_v2 }
  0xe6   :  { %v12314_v42 = vpop.permute.xlu0 %884  ;;  %v12316_v51 = vpop.permute.xlu2 %1200 }
  0xe7   :  { %v447_v4 = vmax.f32 %v316_v26, 0.0  ;;  %9786 = vmatmul.msk.f32.gmra.mxu0 %vm101_vm1, %v70_v60 }
  0xe8   :  { %v12319_v21 = vld [vmem:[#allocation2 + $0xc8] sm:$0xff] }
  0xe9   :  { %528 = vst.msk [vmem:[#allocation2 + $0xd0] sm:$0xff] %vm487_vm2, %v447_v4  ;;  %v957_v45 = vmul.f32 %v12319_v21, %v12188_v54  ;;  %v3442_v50 = vld [vmem:[#allocation2 + $0xc8] sm:$0xff]  ;;  %v72_v4 = vld [vmem:[%s16356_s0 + $0xf0] sm:$0xff] }
  0xea   :  { %v3339_v22 = vpack.c.bf16 %v3442_v50, %v3442_v50 }
  0xeb   :  { %v1009_v7 = vpack.c.bf16 %v957_v45, %v957_v45 }
  0xec   :  { %1375 = vperm.xlu2 %11372, %v11937_v59   ;;  %v318_v15 = vpop.f32.mrf.mxu0  ;;  %3391 = vst.msk [vmem:[#allocation3 + $0x88] sm:$0xf] %vm1036_vm3, %v3339_v22 }
  0xed   :  { %1370 = vperm.xlu1 %11371, %v11902_v49   ;;  %1380 = vperm.xlu0 %11373, %v11932_v58   ;;  %v12331_v41 = vpop.permute.xlu1 %904  ;;  %v319_v54 = vadd.f32 %v12054_v53, %v318_v15  ;;  %1062 = vst.msk [vmem:[#allocation3 + $0x12c] sm:$0xf] %vm1036_vm3, %v1009_v7 }
  0xee   :  { %v12335_v46 = vpop.permute.xlu0 %899  ;;  %v12337_v59 = vpop.permute.xlu2 %1215 }
  0xef   :  { %v448_v44 = vmax.f32 %v319_v54, 0.0  ;;  %9787 = vmatmul.msk.f32.gmra.mxu0 %vm101_vm1, %v71_v19 }
  0xf0   :  { %v12340_v2 = vld [vmem:[#allocation2 + $0xd0] sm:$0xff] }
  0xf1   :  { %529 = vst.msk [vmem:[#allocation2 + $0xd8] sm:$0xff] %vm487_vm2, %v448_v44  ;;  %v958_v49 = vmul.f32 %v12340_v2, %v12132_v48  ;;  %v3443_v58 = vld [vmem:[#allocation2 + $0xd0] sm:$0xff]  ;;  %v73_v44 = vld [vmem:[%s16356_s0 + $0xf8] sm:$0xff] }
  0xf2   :  { %v3340_v13 = vpack.c.bf16 %v3443_v58, %v3443_v58 }
  0xf3   :  { %v1010_v60 = vpack.c.bf16 %v958_v49, %v958_v49 }
  0xf4   :  { %1390 = vperm.xlu2 %11372, %v11963_v6   ;;  %v321_v26 = vpop.f32.mrf.mxu0  ;;  %3392 = vst.msk [vmem:[#allocation3 + $0x94] sm:$0xf] %vm1036_vm3, %v3340_v13 }
  0xf5   :  { %1385 = vperm.xlu1 %11371, %v11927_v57   ;;  %1395 = vperm.xlu0 %11373, %v11958_v5   ;;  %v12352_v45 = vpop.permute.xlu1 %919  ;;  %v322_v48 = vadd.f32 %v12054_v53, %v321_v26  ;;  %1063 = vst.msk [vmem:[#allocation3 + $0x138] sm:$0xf] %vm1036_vm3, %v1010_v60 }
  0xf6   :  { %16407 = vst [vmem:[#allocation23_spill] sm:$0xff] %v12352_v45  ;;  %v12356_v50 = vpop.permute.xlu0 %914  ;;  %v12358_v6 = vpop.permute.xlu2 %1225 }
  0xf7   :  { %16408 = vst [vmem:[#allocation24_spill] sm:$0xff] %v12356_v50  ;;  %v449_v22 = vmax.f32 %v322_v48, 0.0  ;;  %9788 = vmatmul.msk.f32.gmra.mxu0 %vm101_vm1, %v72_v4 }
  0xf8   :  { %v12361_v7 = vld [vmem:[#allocation2 + $0xd8] sm:$0xff] }
  0xf9   :  { %530 = vst.msk [vmem:[#allocation2 + $0xe0] sm:$0xff] %vm487_vm2, %v449_v22  ;;  %v959_v57 = vmul.f32 %v12361_v7, %v12212_v30  ;;  %v3444_v5 = vld [vmem:[#allocation2 + $0xd8] sm:$0xff]  ;;  %v74_v22 = vld [vmem:[%s16356_s0 + $0x100] sm:$0xff] }
  0xfa   :  { %v3341_v15 = vpack.c.bf16 %v3444_v5, %v3444_v5  ;;  %v16411_v5 = vld [vmem:[#allocation12_spill] sm:$0xff] }
  0xfb   :  { %v1011_v19 = vpack.c.bf16 %v959_v57, %v959_v57  ;;  %v16410_v57 = vld [vmem:[#allocation8_spill] sm:$0xff] }
  0xfc   :  { %1405 = vperm.xlu2 %11372, %v11989_v35   ;;  %v324_v54 = vpop.f32.mrf.mxu0  ;;  %3393 = vst.msk [vmem:[#allocation3 + $0xa0] sm:$0xf] %vm1036_vm3, %v3341_v15 }
  0xfd   :  { %1400 = vperm.xlu1 %11371, %v11953_v1   ;;  %1410 = vperm.xlu0 %11373, %v11984_v31   ;;  %v325_v49 = vadd.f32 %v12054_v53, %v324_v54  ;;  %1064 = vst.msk [vmem:[#allocation3 + $0x144] sm:$0xf] %vm1036_vm3, %v1011_v19 }
  0xfe   :  { %v12375_v30 = vpop.permute.xlu0 %929  ;;  %v12377_v58 = vpop.permute.xlu2 %1240 }
  0xff   :  { %16409 = vst [vmem:[#allocation25_spill] sm:$0xff] %v12375_v30  ;;  %v450_v35 = vmax.f32 %v325_v49, 0.0  ;;  %v1196_v13 = vpop.permute.xlu1 %1195  ;;  %9789 = vmatmul.msk.f32.gmra.mxu0 %vm101_vm1, %v73_v44 }
 0x100   :  { %v12380_v60 = vld [vmem:[#allocation2 + $0xe0] sm:$0xff] }
 0x101   :  { %531 = vst.msk [vmem:[#allocation2 + $0xe8] sm:$0xff] %vm487_vm2, %v450_v35  ;;  %v960_v1 = vmul.f32 %v12380_v60, %v12208_v10  ;;  %v3445_v31 = vld [vmem:[#allocation2 + $0xe0] sm:$0xff] }
 0x102   :  { %v3342_v26 = vpack.c.bf16 %v3445_v31, %v3445_v31 }
 0x103   :  { %v1012_v4 = vpack.c.bf16 %v960_v1, %v960_v1 }
 0x104   :  { %1420 = vperm.xlu2 %11372, %v12018_v23   ;;  %v327_v48 = vpop.f32.mrf.mxu0  ;;  %3394 = vst.msk [vmem:[#allocation3 + $0xac] sm:$0xf] %vm1036_vm3, %v3342_v26  ;;  %v16412_v26 = vld [vmem:[#allocation17_spill] sm:$0xff] }
 0x105   :  { %1415 = vperm.xlu1 %11371, %v16410_v57   ;;  %1425 = vperm.xlu0 %11373, %v16411_v5   ;;  %v328_v15 = vadd.f32 %v12054_v53, %v327_v48  ;;  %1065 = vst.msk [vmem:[#allocation3 + $0x150] sm:$0xf] %vm1036_vm3, %v1012_v4  ;;  %v75_v48 = vld [vmem:[%s16356_s0 + $0x108] sm:$0xff]  ;;  %v16414_v57 = vld [vmem:[#allocation16_spill] sm:$0xff] }
 0x106   :  { %v12394_v10 = vpop.permute.xlu2 %1255 }
 0x107   :  { %v451_v19 = vmax.f32 %v328_v15, 0.0  ;;  %v1211_v54 = vpop.permute.xlu1 %1210  ;;  %v1206_v23 = vpop.permute.xlu0 %1205  ;;  %9790 = vmatmul.msk.f32.gmra.mxu0 %vm101_vm1, %v74_v22  ;;  %v16413_v22 = vld [vmem:[#allocation11_spill] sm:$0xff]  ;;  %v16415_v15 = vld [vmem:[#allocation14_spill] sm:$0xff] }
 0x108   :  { %v12397_v44 = vld [vmem:[#allocation2 + $0xe8] sm:$0xff]  ;;  %v1455_v45 = vmul.f32 %v1206_v23, %v16416_v32  ;;  %v16419_v32 = vld [vmem:[#allocation10_spill] sm:$0xff] }
 0x109   :  { %532 = vst.msk [vmem:[#allocation2 + $0xf0] sm:$0xff] %vm487_vm2, %v451_v19  ;;  %v961_v49 = vmul.f32 %v12397_v44, %v12151_v9  ;;  %v3446_v35 = vld [vmem:[#allocation2 + $0xe8] sm:$0xff]  ;;  %v1453_v19 = vmul.f32 %v1196_v13, %v16415_v15  ;;  %v16417_v13 = vld [vmem:[#allocation20_spill] sm:$0xff]  ;;  %v1454_v23 = vmul.f32 %v12316_v51, %v16419_v32 }
 0x10a   :  { %v3343_v1 = vpack.c.bf16 %v3446_v35, %v3446_v35  ;;  %v16418_v15 = vld [vmem:[#allocation15_spill] sm:$0xff] }
 0x10b   :  { %v1013_v31 = vpack.c.bf16 %v961_v49, %v961_v49  ;;  %v1506_v28 = vpack.c.bf16 %v1454_v23, %v1454_v23 }
 0x10c   :  { %1435 = vperm.xlu2 %11372, %v16412_v26   ;;  %v330_v4 = vpop.f32.mrf.mxu0  ;;  %3395 = vst.msk [vmem:[#allocation3 + $0xb8] sm:$0xf] %vm1036_vm3, %v3343_v1 }
 0x10d   :  { %1430 = vperm.xlu1 %11371, %v16413_v22   ;;  %1440 = vperm.xlu0 %11373, %v16414_v57   ;;  %v331_v5 = vadd.f32 %v12054_v53, %v330_v4  ;;  %1066 = vst.msk [vmem:[#allocation3 + $0x15c] sm:$0xf] %vm1036_vm3, %v1013_v31  ;;  %v1505_v31 = vpack.c.bf16 %v1453_v19, %v1453_v19 }
 0x10e   :  { %v12411_v9 = vpop.permute.xlu2 %1270 }
 0x10f   :  { %v452_v49 = vmax.f32 %v331_v5, 0.0  ;;  %v1221_v35 = vpop.permute.xlu1 %1220  ;;  %v12414_v26 = vpop.permute.xlu0 %1230  ;;  %9791 = vmatmul.msk.f32.gmra.mxu0 %vm101_vm1, %v75_v48  ;;  %v76_v48 = vld [vmem:[%s16356_s0 + $0x110] sm:$0xff] }
 0x110   :  { %v12417_v30 = vld [vmem:[#allocation2 + $0xf0] sm:$0xff] }
 0x111   :  { %533 = vst.msk [vmem:[#allocation2 + $0xf8] sm:$0xff] %vm487_vm2, %v452_v49  ;;  %v962_v1 = vmul.f32 %v12417_v30, %v12233_v34  ;;  %v3447_v4 = vld [vmem:[#allocation2 + $0xf0] sm:$0xff]  ;;  %v16420_v49 = vld [vmem:[#allocation5_spill] sm:$0xff] }
 0x112   :  { %v3344_v22 = vpack.c.bf16 %v3447_v4, %v3447_v4 }
 0x113   :  { %v1014_v57 = vpack.c.bf16 %v962_v1, %v962_v1  ;;  %v1456_v1 = vmul.f32 %v1211_v54, %v16420_v49  ;;  %v16422_v49 = vld [vmem:[#allocation6_spill] sm:$0xff] }
 0x114   :  { %1450 = vperm.xlu2 %11372, %v16417_v13   ;;  %v333_v5 = vpop.f32.mrf.mxu0  ;;  %3396 = vst.msk [vmem:[#allocation3 + $0xc4] sm:$0xf] %vm1036_vm3, %v3344_v22  ;;  %v1507_v22 = vpack.c.bf16 %v1455_v45, %v1455_v45  ;;  %v16421_v45 = vld [vmem:[#allocation19_spill] sm:$0xff] }
 0x115   :  { %1445 = vperm.xlu1 %11371, %v16418_v15   ;;  %1609 = vrot.lane.b32.xlu0 %v1505_v31, %s11546_s14  ;;  %v334_v34 = vadd.f32 %v12054_v53, %v333_v5  ;;  %1067 = vst.msk [vmem:[#allocation3 + $0x168] sm:$0xf] %vm1036_vm3, %v1014_v57  ;;  %v1508_v51 = vpack.c.bf16 %v1456_v1, %v1456_v1 }
 0x116   :  { %v12432_v19 = vpop.permute.xlu2 %1285  ;;  %v1457_v1 = vmul.f32 %v12337_v59, %v16422_v49 }
 0x117   :  { %v453_v4 = vmax.f32 %v334_v34, 0.0  ;;  %v1236_v13 = vpop.permute.xlu1 %1235  ;;  %v12437_v50 = vpop.permute.xlu0 %1245  ;;  %9792 = vmatmul.msk.f32.gmra.mxu0 %vm101_vm1, %v76_v48  ;;  %v77_v48 = vld [vmem:[%s16356_s0 + $0x118] sm:$0xff]  ;;  %v1458_v34 = vmul.f32 %v1221_v35, %v16421_v45 }
 0x118   :  { %v12440_v15 = vld [vmem:[#allocation2 + $0xf8] sm:$0xff]  ;;  %v1509_v59 = vpack.c.bf16 %v1457_v1, %v1457_v1  ;;  %v1462_v1 = vmul.f32 %v12377_v58, %v12081_v0 }
 0x119   :  { %534 = vst.msk [vmem:[#allocation2 + $0x100] sm:$0xff] %vm487_vm2, %v453_v4  ;;  %v963_v31 = vmul.f32 %v12440_v15, %v12229_v25  ;;  %v3448_v57 = vld [vmem:[#allocation2 + $0xf8] sm:$0xff]  ;;  %v16423_v4 = vld [vmem:[#allocation18_spill] sm:$0xff] }
 0x11a   :  { %v3345_v5 = vpack.c.bf16 %v3448_v57, %v3448_v57  ;;  %v1514_v0 = vpack.c.bf16 %v1462_v1, %v1462_v1 }
 0x11b   :  { %v1015_v32 = vpack.c.bf16 %v963_v31, %v963_v31 }
 0x11c   :  { %1613 = vrot.lane.b32.xlu2 %v1507_v22, %s11546_s14  ;;  %v336_v54 = vpop.f32.mrf.mxu0  ;;  %3397 = vst.msk [vmem:[#allocation3 + $0xd0] sm:$0xf] %vm1036_vm3, %v3345_v5  ;;  %v1459_v22 = vmul.f32 %v12358_v6, %v16423_v4  ;;  %v16424_v4 = vld [vmem:[#allocation7_spill] sm:$0xff] }
 0x11d   :  { %1611 = vrot.lane.b32.xlu1 %v1506_v28, %s11546_s14  ;;  %1615 = vrot.lane.b32.xlu0 %v1508_v51, %s11546_s14  ;;  %v337_v25 = vadd.f32 %v12054_v53, %v336_v54  ;;  %1068 = vst.msk [vmem:[#allocation3 + $0x174] sm:$0xf] %vm1036_vm3, %v1015_v32  ;;  %v1510_v54 = vpack.c.bf16 %v1458_v34, %v1458_v34 }
 0x11e   :  { %v12455_v23 = vpop.permute.xlu2 %1300  ;;  %v1511_v45 = vpack.c.bf16 %v1459_v22, %v1459_v22  ;;  %v1460_v22 = vmul.f32 %v12414_v26, %v16424_v4 }
 0x11f   :  { %v454_v31 = vmax.f32 %v337_v25, 0.0  ;;  %v1251_v57 = vpop.permute.xlu1 %1250  ;;  %v12461_v5 = vpop.permute.xlu0 %1260  ;;  %9793 = vmatmul.msk.f32.gmra.mxu0 %vm101_vm1, %v77_v48  ;;  %v78_v48 = vld [vmem:[%s16356_s0 + $0x120] sm:$0xff]  ;;  %v1461_v25 = vmul.f32 %v1236_v13, %v12086_v52 }
 0x120   :  { %v12464_v28 = vld [vmem:[#allocation2 + $0x100] sm:$0xff]  ;;  %v1512_v58 = vpack.c.bf16 %v1460_v22, %v1460_v22 }
 0x121   :  { %v3449_v51 = vld [vmem:[#allocation2 + $0x100] sm:$0xff]  ;;  %535 = vst.msk [vmem:[#allocation2 + $0x108] sm:$0xff] %vm487_vm2, %v454_v31  ;;  %v964_v35 = vmul.f32 %v12464_v28, %v12168_v8 }
 0x122   :  { %v3346_v32 = vpack.c.bf16 %v3449_v51, %v3449_v51 }
 0x123   :  { %v1016_v49 = vpack.c.bf16 %v964_v35, %v964_v35 }
 0x124   :  { %3398 = vst.msk [vmem:[#allocation3 + $0xdc] sm:$0xf] %vm1036_vm3, %v3346_v32  ;;  %1619 = vrot.lane.b32.xlu2 %v1510_v54, %s11546_s14  ;;  %v339_v6 = vpop.f32.mrf.mxu0 }
 0x125   :  { %1617 = vrot.lane.b32.xlu1 %v1509_v59, %s11546_s14  ;;  %1621 = vrot.lane.b32.xlu0 %v1511_v45, %s11546_s14  ;;  %v340_v8 = vadd.f32 %v12054_v53, %v339_v6  ;;  %1069 = vst.msk [vmem:[#allocation3 + $0x180] sm:$0xf] %vm1036_vm3, %v1016_v49  ;;  %v1513_v59 = vpack.c.bf16 %v1461_v25, %v1461_v25  ;;  %v79_v49 = vld [vmem:[%s16356_s0 + $0x128] sm:$0xff]  ;;  %v16425_v25 = vld [vmem:[#allocation9_spill] sm:$0xff] }
 0x126   :  { %v12479_v34 = vpop.permute.xlu2 %1315  ;;  %v1464_v6 = vmul.f32 %v1251_v57, %v12107_v40  ;;  %v1463_v1 = vmul.f32 %v12437_v50, %v16425_v25 }
 0x127   :  { %v455_v31 = vmax.f32 %v340_v8, 0.0  ;;  %v1266_v51 = vpop.permute.xlu1 %1265  ;;  %v12485_v35 = vpop.permute.xlu0 %1275  ;;  %9794 = vmatmul.msk.f32.gmra.mxu0 %vm101_vm1, %v78_v48  ;;  %v1465_v8 = vmul.f32 %v12394_v10, %v12103_v27 }
 0x128   :  { %v12488_v32 = vld [vmem:[#allocation2 + $0x108] sm:$0xff]  ;;  %v1515_v10 = vpack.c.bf16 %v1463_v1, %v1463_v1 }
 0x129   :  { %v3450_v54 = vld [vmem:[#allocation2 + $0x108] sm:$0xff]  ;;  %536 = vst.msk [vmem:[#allocation2 + $0x110] sm:$0xff] %vm487_vm2, %v455_v31  ;;  %v965_v52 = vmul.f32 %v12488_v32, %v12253_v39  ;;  %v1517_v27 = vpack.c.bf16 %v1465_v8, %v1465_v8 }
 0x12a   :  { %v3347_v13 = vpack.c.bf16 %v3450_v54, %v3450_v54 }
 0x12b   :  { %v1017_v45 = vpack.c.bf16 %v965_v52, %v965_v52 }
 0x12c   :  { %3399 = vst.msk [vmem:[#allocation3 + $0xe8] sm:$0xf] %vm1036_vm3, %v3347_v13  ;;  %1625 = vrot.lane.b32.xlu2 %v1513_v59, %s11546_s14  ;;  %v342_v26 = vpop.f32.mrf.mxu0  ;;  %v1516_v13 = vpack.c.bf16 %v1464_v6, %v1464_v6 }
 0x12d   :  { %1627 = vrot.lane.b32.xlu0 %v1514_v0, %s11546_s14  ;;  %1623 = vrot.lane.b32.xlu1 %v1512_v58, %s11546_s14  ;;  %v343_v39 = vadd.f32 %v12054_v53, %v342_v26  ;;  %1070 = vst.msk [vmem:[#allocation3 + $0x18c] sm:$0xf] %vm1036_vm3, %v1017_v45  ;;  %v80_v0 = vld [vmem:[%s16356_s0 + $0x130] sm:$0xff]  ;;  %v1467_v58 = vmul.f32 %v1266_v51, %v12135_v55 }
 0x12e   :  { %v12503_v48 = vpop.permute.xlu2 %1330  ;;  %v1468_v26 = vmul.f32 %v12411_v9, %v12139_v61 }
 0x12f   :  { %v456_v4 = vmax.f32 %v343_v39, 0.0  ;;  %v1281_v22 = vpop.permute.xlu1 %1280  ;;  %v12509_v31 = vpop.permute.xlu0 %1290  ;;  %9795 = vmatmul.msk.f32.gmra.mxu0 %vm101_vm1, %v79_v49  ;;  %v1466_v49 = vmul.f32 %v12461_v5, %v12098_v11 }
 0x130   :  { %v12512_v54 = vld [vmem:[#allocation2 + $0x110] sm:$0xff]  ;;  %v1520_v61 = vpack.c.bf16 %v1468_v26, %v1468_v26 }
 0x131   :  { %v3451_v52 = vld [vmem:[#allocation2 + $0x110] sm:$0xff]  ;;  %537 = vst.msk [vmem:[#allocation2 + $0x118] sm:$0xff] %vm487_vm2, %v456_v4  ;;  %v966_v40 = vmul.f32 %v12512_v54, %v12249_v29  ;;  %v1519_v4 = vpack.c.bf16 %v1467_v58, %v1467_v58  ;;  %v1518_v9 = vpack.c.bf16 %v1466_v49, %v1466_v49  ;;  %v1474_v49 = vmul.f32 %v12455_v23, %v12256_v18 }
 0x132   :  { %v3348_v57 = vpack.c.bf16 %v3451_v52, %v3451_v52 }
 0x133   :  { %v1018_v59 = vpack.c.bf16 %v966_v40, %v966_v40 }
 0x134   :  { %3400 = vst.msk [vmem:[#allocation3 + $0xf4] sm:$0xf] %vm1036_vm3, %v3348_v57  ;;  %1631 = vrot.lane.b32.xlu2 %v1516_v13, %s11546_s14  ;;  %v345_v50 = vpop.f32.mrf.mxu0  ;;  %v1471_v57 = vmul.f32 %v12432_v19, %v12195_v14  ;;  %v1469_v13 = vmul.f32 %v12485_v35, %v12156_v56  ;;  %v12568_v19 = vld [vmem:[%s16357_s3] ss:$0 sm:$0xff] }
 0x135   :  { %1633 = vrot.lane.b32.xlu0 %v1517_v27, %s11546_s14  ;;  %1629 = vrot.lane.b32.xlu1 %v1515_v10, %s11546_s14  ;;  %v346_v29 = vadd.f32 %v12054_v53, %v345_v50  ;;  %1071 = vst.msk [vmem:[#allocation3 + $0x198] sm:$0xf] %vm1036_vm3, %v1018_v59 }
 0x136   :  { %v12527_v45 = vpop.permute.xlu2 %1345  ;;  %v1521_v58 = vpack.c.bf16 %v1469_v13, %v1469_v13 }
 0x137   :  { %v457_v39 = vmax.f32 %v346_v29, 0.0  ;;  %v1296_v6 = vpop.permute.xlu1 %1295  ;;  %v12533_v8 = vpop.permute.xlu0 %1305  ;;  %9796 = vmatmul.msk.f32.gmra.mxu0 %vm101_vm1, %v80_v0  ;;  %v1523_v29 = vpack.c.bf16 %v1471_v57, %v1471_v57 }
 0x138   :  { %v12536_v25 = vld [vmem:[#allocation2 + $0x118] sm:$0xff]  ;;  %v1473_v35 = vmul.f32 %v1296_v6, %v12236_v62 }
 0x139   :  { %v3452_v1 = vld [vmem:[#allocation2 + $0x118] sm:$0xff]  ;;  %538 = vst.msk [vmem:[#allocation2 + $0x120] sm:$0xff] %vm487_vm2, %v457_v39  ;;  %v967_v55 = vmul.f32 %v12536_v25, %v12186_v12  ;;  %v1470_v12 = vmul.f32 %v1281_v22, %v12175_v63  ;;  %v1472_v39 = vmul.f32 %v12509_v31, %v12215_v3 }
 0x13a   :  { %v3349_v51 = vpack.c.bf16 %v3452_v1, %v3452_v1 }
 0x13b   :  { %v1019_v52 = vpack.c.bf16 %v967_v55, %v967_v55  ;;  %v1522_v22 = vpack.c.bf16 %v1470_v12, %v1470_v12  ;;  %v1475_v12 = vmul.f32 %v12533_v8, %v12277_v36 }
 0x13c   :  { %3401 = vst.msk [vmem:[#allocation3 + $0x100] sm:$0xf] %vm1036_vm3, %v3349_v51  ;;  %1637 = vrot.lane.b32.xlu2 %v1519_v4, %s11546_s14  ;;  %v348_v11 = vpop.f32.mrf.mxu0 }
 0x13d   :  { %1639 = vrot.lane.b32.xlu0 %v1520_v61, %s11546_s14  ;;  %1635 = vrot.lane.b32.xlu1 %v1518_v9, %s11546_s14  ;;  %v349_v5 = vadd.f32 %v12054_v53, %v348_v11  ;;  %1072 = vst.msk [vmem:[#allocation3 + $0x1a4] sm:$0xf] %vm1036_vm3, %v1019_v52  ;;  %v1525_v9 = vpack.c.bf16 %v1473_v35, %v1473_v35 }
 0x13e   :  { %v12548_v40 = vpop.permute.xlu2 %1360  ;;  %v1526_v52 = vpack.c.bf16 %v1474_v49, %v1474_v49  ;;  %v1524_v11 = vpack.c.bf16 %v1472_v39, %v1472_v39 }
 0x13f   :  { %v458_v27 = vmax.f32 %v349_v5, 0.0  ;;  %v1311_v10 = vpop.permute.xlu1 %1310  ;;  %v12554_v59 = vpop.permute.xlu0 %1320  ;;  %v1477_v5 = vmul.f32 %v12479_v34, %v12319_v21 }
 0x140   :  { %v12556_v50 = vld [vmem:[#allocation2 + $0x120] sm:$0xff] }
 0x141   :  { %v3453_v0 = vld [vmem:[#allocation2 + $0x120] sm:$0xff]  ;;  %539 = vst.msk [vmem:[#allocation2 + $0x128] sm:$0xff] %vm487_vm2, %v458_v27  ;;  %v968_v53 = vmul.f32 %v12556_v50, %v12274_v43 }
 0x142   :  { %v3350_v63 = vpack.c.bf16 %v3453_v0, %v3453_v0 }
 0x143   :  { %v1020_v14 = vpack.c.bf16 %v968_v53, %v968_v53 }
 0x144   :  { %3402 = vst.msk [vmem:[#allocation3 + $0x10c] sm:$0xf] %vm1036_vm3, %v3350_v63  ;;  %1643 = vrot.lane.b32.xlu2 %v1522_v22, %s11546_s14  ;;  %v351_v56 = vpop.f32.mrf.mxu0  ;;  %v1529_v22 = vpack.c.bf16 %v1477_v5, %v1477_v5 }
 0x145   :  { %1645 = vrot.lane.b32.xlu0 %v1523_v29, %s11546_s14  ;;  %1641 = vrot.lane.b32.xlu1 %v1521_v58, %s11546_s14  ;;  %v352_v43 = vadd.f32 %v12568_v19, %v351_v56  ;;  %1073 = vst.msk [vmem:[#allocation3 + $0x1b0] sm:$0xf] %vm1036_vm3, %v1020_v14  ;;  %v1527_v29 = vpack.c.bf16 %v1475_v12, %v1475_v12 }
 0x146   :  { %v12573_v26 = vpop.permute.xlu2 %1375  ;;  %v1480_v58 = vmul.f32 %v12503_v48, %v12380_v60  ;;  %v1478_v14 = vmul.f32 %v12554_v59, %v12340_v2 }
 0x147   :  { %v459_v1 = vmax.f32 %v352_v43, 0.0  ;;  %v1326_v55 = vpop.permute.xlu1 %1325  ;;  %v12579_v51 = vpop.permute.xlu0 %1335 }
 0x148   :  { %v12581_v4 = vld [vmem:[#allocation2 + $0x128] sm:$0xff] }
 0x149   :  { %v3454_v61 = vld [vmem:[#allocation2 + $0x128] sm:$0xff]  ;;  %540 = vst.msk [vmem:[#allocation2 + $0x130] sm:$0xff] %vm487_vm2, %v459_v1  ;;  %v969_v62 = vmul.f32 %v12581_v4, %v12270_v33  ;;  %v1476_v33 = vmul.f32 %v1311_v10, %v12298_v17 }
 0x14a   :  { %v3351_v6 = vpack.c.bf16 %v3454_v61, %v3454_v61  ;;  %v1532_v61 = vpack.c.bf16 %v1480_v58, %v1480_v58  ;;  %v1489_v58 = vmul.f32 %v12573_v26, %v12581_v4 }
 0x14b   :  { %v1021_v18 = vpack.c.bf16 %v969_v62, %v969_v62  ;;  %v1528_v63 = vpack.c.bf16 %v1476_v33, %v1476_v33  ;;  %v1530_v62 = vpack.c.bf16 %v1478_v14, %v1478_v14 }
 0x14c   :  { %3403 = vst.msk [vmem:[#allocation3 + $0x118] sm:$0xf] %vm1036_vm3, %v3351_v6  ;;  %1649 = vrot.lane.b32.xlu2 %v1525_v9, %s11546_s14  ;;  %v354_v3 = vpop.f32.mrf.mxu0  ;;  %v1483_v6 = vmul.f32 %v12527_v45, %v12440_v15  ;;  %v1481_v9 = vmul.f32 %v12579_v51, %v12397_v44 }
 0x14d   :  { %1651 = vrot.lane.b32.xlu0 %v1526_v52, %s11546_s14  ;;  %1647 = vrot.lane.b32.xlu1 %v1524_v11, %s11546_s14  ;;  %v355_v23 = vadd.f32 %v12568_v19, %v354_v3  ;;  %1074 = vst.msk [vmem:[#allocation3 + $0x1bc] sm:$0xf] %vm1036_vm3, %v1021_v18 }
 0x14e   :  { %v12593_v31 = vpop.permute.xlu2 %1390  ;;  %v1535_v12 = vpack.c.bf16 %v1483_v6, %v1483_v6 }
 0x14f   :  { %v460_v57 = vmax.f32 %v355_v23, 0.0  ;;  %v1341_v13 = vpop.permute.xlu1 %1340  ;;  %v12599_v27 = vpop.permute.xlu0 %1350 }
 0x150   :  { %v12601_v0 = vld [vmem:[#allocation2 + $0x130] sm:$0xff] }
 0x151   :  { %v3455_v53 = vld [vmem:[#allocation2 + $0x130] sm:$0xff]  ;;  %541 = vst.msk [vmem:[#allocation2 + $0x138] sm:$0xff] %vm487_vm2, %v460_v57  ;;  %v970_v17 = vmul.f32 %v12601_v0, %v12206_v16  ;;  %v1479_v16 = vmul.f32 %v1326_v55, %v12361_v7  ;;  %v1533_v57 = vpack.c.bf16 %v1481_v9, %v1481_v9 }
 0x152   :  { %v3352_v10 = vpack.c.bf16 %v3455_v53, %v3455_v53  ;;  %v1484_v53 = vmul.f32 %v12599_v27, %v12464_v28 }
 0x153   :  { %v1022_v21 = vpack.c.bf16 %v970_v17, %v970_v17  ;;  %v1531_v55 = vpack.c.bf16 %v1479_v16, %v1479_v16 }
 0x154   :  { %3404 = vst.msk [vmem:[#allocation3 + $0x124] sm:$0xf] %vm1036_vm3, %v3352_v10  ;;  %1655 = vrot.lane.b32.xlu2 %v1528_v63, %s11546_s14  ;;  %v357_v36 = vpop.f32.mrf.mxu0  ;;  %v1536_v16 = vpack.c.bf16 %v1484_v53, %v1484_v53 }
 0x155   :  { %1657 = vrot.lane.b32.xlu0 %v1529_v22, %s11546_s14  ;;  %1653 = vrot.lane.b32.xlu1 %v1527_v29, %s11546_s14  ;;  %v358_v34 = vadd.f32 %v12568_v19, %v357_v36  ;;  %1075 = vst.msk [vmem:[#allocation3 + $0x1c8] sm:$0xf] %vm1036_vm3, %v1022_v21 }
 0x156   :  { %v12613_v8 = vpop.permute.xlu2 %1405 }
 0x157   :  { %v461_v56 = vmax.f32 %v358_v34, 0.0  ;;  %v1356_v43 = vpop.permute.xlu1 %1355  ;;  %v12619_v35 = vpop.permute.xlu0 %1365 }
 0x158   :  { %v12621_v49 = vld [vmem:[#allocation2 + $0x138] sm:$0xff]  ;;  %v1487_v14 = vmul.f32 %v12619_v35, %v12536_v25 }
 0x159   :  { %v3456_v39 = vld [vmem:[#allocation2 + $0x138] sm:$0xff]  ;;  %542 = vst.msk [vmem:[#allocation2 + $0x140] sm:$0xff] %vm487_vm2, %v461_v56  ;;  %v971_v7 = vmul.f32 %v12621_v49, %v12295_v47  ;;  %v1482_v47 = vmul.f32 %v1341_v13, %v12417_v30  ;;  %v1486_v13 = vmul.f32 %v12548_v40, %v12512_v54 }
 0x15a   :  { %v3353_v1 = vpack.c.bf16 %v3456_v39, %v3456_v39 }
 0x15b   :  { %v1023_v60 = vpack.c.bf16 %v971_v7, %v971_v7  ;;  %v1534_v5 = vpack.c.bf16 %v1482_v47, %v1482_v47  ;;  %v1538_v34 = vpack.c.bf16 %v1486_v13, %v1486_v13 }
 0x15c   :  { %3405 = vst.msk [vmem:[#allocation3 + $0x130] sm:$0xf] %vm1036_vm3, %v3353_v1  ;;  %1661 = vrot.lane.b32.xlu2 %v1531_v55, %s11546_s14  ;;  %v360_v2 = vpop.f32.mrf.mxu0 }
 0x15d   :  { %1663 = vrot.lane.b32.xlu0 %v1532_v61, %s11546_s14  ;;  %1659 = vrot.lane.b32.xlu1 %v1530_v62, %s11546_s14  ;;  %v361_v48 = vadd.f32 %v12568_v19, %v360_v2  ;;  %1076 = vst.msk [vmem:[#allocation3 + $0x1d4] sm:$0xf] %vm1036_vm3, %v1023_v60  ;;  %v1541_v62 = vpack.c.bf16 %v1489_v58, %v1489_v58  ;;  %v11547_v2 = vmov 2  }
 0x15e   :  { %v12633_v59 = vpop.permute.xlu2 %1420  ;;  %v1539_v60 = vpack.c.bf16 %v1487_v14, %v1487_v14  ;;  %11375 = vset.pattern.permute.xlu2 %v11547_v2  ;;  %11374 = vset.pattern.permute.xlu1 %v11547_v2 }
 0x15f   :  { %v462_v52 = vmax.f32 %v361_v48, 0.0  ;;  %v1371_v11 = vpop.permute.xlu1 %1370  ;;  %v12639_v18 = vpop.permute.xlu0 %1380  ;;  %11376 = vset.pattern.permute.xlu0 %v11547_v2 }
 0x160   :  { %v12641_v3 = vld [vmem:[#allocation2 + $0x140] sm:$0xff]  ;;  %v1490_v48 = vmul.f32 %v12639_v18, %v12601_v0 }
 0x161   :  { %v3457_v23 = vld [vmem:[#allocation2 + $0x140] sm:$0xff]  ;;  %543 = vst.msk [vmem:[#allocation2 + $0x148] sm:$0xff] %vm487_vm2, %v462_v52  ;;  %v972_v30 = vmul.f32 %v12641_v3, %v12291_v38  ;;  %v1485_v38 = vmul.f32 %v1356_v43, %v12488_v32  ;;  %v1492_v52 = vmul.f32 %v12593_v31, %v12641_v3 }
 0x162   :  { %v3354_v33 = vpack.c.bf16 %v3457_v23, %v3457_v23 }
 0x163   :  { %v1024_v15 = vpack.c.bf16 %v972_v30, %v972_v30  ;;  %v1537_v21 = vpack.c.bf16 %v1485_v38, %v1485_v38 }
 0x164   :  { %3406 = vst.msk [vmem:[#allocation3 + $0x13c] sm:$0xf] %vm1036_vm3, %v3354_v33  ;;  %1667 = vrot.lane.b32.xlu2 %v1534_v5, %s11546_s14  ;;  %v363_v44 = vpop.f32.mrf.mxu0  ;;  %v1542_v5 = vpack.c.bf16 %v1490_v48, %v1490_v48 }
 0x165   :  { %1669 = vrot.lane.b32.xlu0 %v1535_v12, %s11546_s14  ;;  %1665 = vrot.lane.b32.xlu1 %v1533_v57, %s11546_s14  ;;  %v364_v45 = vadd.f32 %v12568_v19, %v363_v44  ;;  %1077 = vst.msk [vmem:[#allocation3 + $0x1e0] sm:$0xf] %vm1036_vm3, %v1024_v15  ;;  %v1544_v12 = vpack.c.bf16 %v1492_v52, %v1492_v52 }
 0x166   :  { %v12653_v51 = vpop.permute.xlu2 %1435 }
 0x167   :  { %v463_v17 = vmax.f32 %v364_v45, 0.0  ;;  %v1386_v10 = vpop.permute.xlu1 %1385  ;;  %v12659_v63 = vpop.permute.xlu0 %1395 }
 0x168   :  { %v12661_v22 = vld [vmem:[#allocation2 + $0x148] sm:$0xff]  ;;  %v1491_v4 = vmul.f32 %v1386_v10, %v12621_v49 }
 0x169   :  { %544 = vst.msk [vmem:[#allocation2 + $0x150] sm:$0xff] %vm487_vm2, %v463_v17  ;;  %v973_v29 = vmul.f32 %v12661_v22, %v12227_v20  ;;  %v3458_v32 = vld [vmem:[#allocation2 + $0x148] sm:$0xff]  ;;  %v1488_v20 = vmul.f32 %v1371_v11, %v12556_v50  ;;  %v1493_v57 = vmul.f32 %v12659_v63, %v12661_v22 }
 0x16a   :  { %v3355_v36 = vpack.c.bf16 %v3458_v32, %v3458_v32  ;;  %v1543_v49 = vpack.c.bf16 %v1491_v4, %v1491_v4 }
 0x16b   :  { %v1025_v54 = vpack.c.bf16 %v973_v29, %v973_v29  ;;  %v1540_v50 = vpack.c.bf16 %v1488_v20, %v1488_v20  ;;  %v1545_v32 = vpack.c.bf16 %v1493_v57, %v1493_v57 }
 0x16c   :  { %1673 = vrot.lane.b32.xlu2 %v1537_v21, %s11546_s14  ;;  %v366_v28 = vpop.f32.mrf.mxu0  ;;  %3407 = vst.msk [vmem:[#allocation3 + $0x148] sm:$0xf] %vm1036_vm3, %v3355_v36 }
 0x16d   :  { %1675 = vrot.lane.b32.xlu0 %v1538_v34, %s11546_s14  ;;  %1671 = vrot.lane.b32.xlu1 %v1536_v16, %s11546_s14  ;;  %v367_v40 = vadd.f32 %v12568_v19, %v366_v28  ;;  %1078 = vst.msk [vmem:[#allocation3 + $0x1ec] sm:$0xf] %vm1036_vm3, %v1025_v54 }
 0x16e   :  { %v12673_v27 = vpop.permute.xlu2 %1450 }
 0x16f   :  { %v464_v56 = vmax.f32 %v367_v40, 0.0  ;;  %v1401_v43 = vpop.permute.xlu1 %1400  ;;  %v12679_v39 = vpop.permute.xlu0 %1410 }
 0x170   :  { %v1130_v7 = vld [vmem:[#allocation2 + $0x150] sm:$0xff] }
 0x171   :  { %v3459_v1 = vld [vmem:[#allocation2 + $0x150] sm:$0xff]  ;;  %545 = vst.msk [vmem:[#allocation2 + $0x158] sm:$0xff] %vm487_vm2, %v464_v56  ;;  %v974_v55 = vmul.f32 %v1130_v7, %v12314_v42 }
 0x172   :  { %v3356_v61 = vpack.c.bf16 %v3459_v1, %v3459_v1 }
 0x173   :  { %v1026_v26 = vpack.c.bf16 %v974_v55, %v974_v55 }
 0x174   :  { %3408 = vst.msk [vmem:[#allocation3 + $0x154] sm:$0xf] %vm1036_vm3, %v3356_v61  ;;  %1679 = vrot.lane.b32.xlu2 %v1540_v50, %s11546_s14  ;;  %v369_v25 = vpop.f32.mrf.mxu0 }
 0x175   :  { %1681 = vrot.lane.b32.xlu0 %v1541_v62, %s11546_s14  ;;  %1677 = vrot.lane.b32.xlu1 %v1539_v60, %s11546_s14  ;;  %v370_v42 = vadd.f32 %v12568_v19, %v369_v25  ;;  %1079 = vst.msk [vmem:[#allocation3 + $0x1f8] sm:$0xf] %vm1036_vm3, %v1026_v26  ;;  %v1871_v25 = vld [vmem:[%s16355_s1 + $0x8] sm:$0xff] }
 0x176   :  { %v1614_v35 = vpop.permute.xlu2 %1613 }
 0x177   :  { %v465_v47 = vmax.f32 %v370_v42, 0.0  ;;  %v1416_v6 = vpop.permute.xlu1 %1415  ;;  %1768 = vst.msk [vmem:[#allocation3 + $0x18] sm:$0xf] %vm1765_vm4, %v1614_v35  ;;  %v12693_v9 = vpop.permute.xlu0 %1425  ;;  %v1870_v35 = vld [vmem:[%s16355_s1] sm:$0xff] }
 0x178   :  { %v1131_v11 = vld [vmem:[#allocation2 + $0x158] sm:$0xff] }
 0x179   :  { %546 = vst.msk [vmem:[#allocation2 + $0x160] sm:$0xff] %vm487_vm2, %v465_v47  ;;  %v975_v23 = vmul.f32 %v1131_v11, %v12310_v37  ;;  %v3460_v30 = vld [vmem:[#allocation2 + $0x158] sm:$0xff]  ;;  %v1494_v37 = vmul.f32 %v1401_v43, %v1130_v7  ;;  %v1495_v38 = vmul.f32 %v12613_v8, %v1131_v11 }
 0x17a   :  { %v3357_v33 = vpack.c.bf16 %v3460_v30, %v3460_v30 }
 0x17b   :  { %v1027_v0 = vpack.c.bf16 %v975_v23, %v975_v23  ;;  %v1546_v10 = vpack.c.bf16 %v1494_v37, %v1494_v37  ;;  %v1547_v21 = vpack.c.bf16 %v1495_v38, %v1495_v38 }
 0x17c   :  { %1685 = vrot.lane.b32.xlu2 %v1543_v49, %s11546_s14  ;;  %v372_v18 = vpop.f32.mrf.mxu0  ;;  %3409 = vst.msk [vmem:[#allocation3 + $0x160] sm:$0xf] %vm1036_vm3, %v3357_v33  ;;  %v16426_v49 = vld [vmem:[#allocation21_spill] sm:$0xff] }
 0x17d   :  { %1687 = vrot.lane.b32.xlu0 %v1544_v12, %s11546_s14  ;;  %1683 = vrot.lane.b32.xlu1 %v1542_v5, %s11546_s14  ;;  %v373_v31 = vadd.f32 %v12568_v19, %v372_v18  ;;  %1080 = vst.msk [vmem:[#allocation3 + $0x204] sm:$0xf] %vm1036_vm3, %v1027_v0  ;;  %v1874_v12 = vld [vmem:[%s16355_s1 + $0x20] sm:$0xff]  ;;  %v1872_v0 = vld [vmem:[%s16355_s1 + $0x10] sm:$0xff] }
 0x17e   :  { %v1620_v3 = vpop.permute.xlu2 %1619 }
 0x17f   :  { %v466_v15 = vmax.f32 %v373_v31, 0.0  ;;  %v12707_v44 = vpop.permute.xlu1 %1430  ;;  %1771 = vst.msk [vmem:[#allocation3 + $0x3c] sm:$0xf] %vm1765_vm4, %v1620_v3  ;;  %v12710_v45 = vpop.permute.xlu0 %1440 }
 0x180   :  { %v1132_v13 = vld [vmem:[#allocation2 + $0x160] sm:$0xff] }
 0x181   :  { %547 = vst.msk [vmem:[#allocation2 + $0x168] sm:$0xff] %vm487_vm2, %v466_v15  ;;  %v976_v53 = vmul.f32 %v1132_v13, %v12247_v24  ;;  %v3461_v17 = vld [vmem:[#allocation2 + $0x160] sm:$0xff]  ;;  %v1496_v54 = vmul.f32 %v12679_v39, %v1132_v13 }
 0x182   :  { %v3358_v29 = vpack.c.bf16 %v3461_v17, %v3461_v17 }
 0x183   :  { %v1028_v63 = vpack.c.bf16 %v976_v53, %v976_v53  ;;  %v1548_v56 = vpack.c.bf16 %v1496_v54, %v1496_v54 }
 0x184   :  { %1691 = vrot.lane.b32.xlu2 %v1546_v10, %s11546_s14  ;;  %v375_v22 = vpop.f32.mrf.mxu0  ;;  %3410 = vst.msk [vmem:[#allocation3 + $0x16c] sm:$0xf] %vm1036_vm3, %v3358_v29  ;;  %v16427_v10 = vld [vmem:[#allocation24_spill] sm:$0xff] }
 0x185   :  { %1693 = vrot.lane.b32.xlu0 %v1547_v21, %s11546_s14  ;;  %1689 = vrot.lane.b32.xlu1 %v1545_v32, %s11546_s14  ;;  %v376_v8 = vadd.f32 %v12568_v19, %v375_v22  ;;  %1081 = vst.msk [vmem:[#allocation3 + $0x210] sm:$0xf] %vm1036_vm3, %v1028_v63  ;;  %v1873_v22 = vld [vmem:[%s16355_s1 + $0x18] sm:$0xff] }
 0x186   :  { %v1626_v24 = vpop.permute.xlu2 %1625 }
 0x187   :  { %v467_v36 = vmax.f32 %v376_v8, 0.0  ;;  %v12721_v34 = vpop.permute.xlu1 %1445  ;;  %1774 = vst.msk [vmem:[#allocation3 + $0x60] sm:$0xf] %vm1765_vm4, %v1626_v24  ;;  %v1610_v16 = vpop.permute.xlu0 %1609 }
 0x188   :  { %1766 = vst.msk [vmem:[#allocation3] sm:$0xf] %vm1765_vm4, %v1610_v16  ;;  %v1133_v28 = vld [vmem:[#allocation2 + $0x168] sm:$0xff] }
 0x189   :  { %548 = vst.msk [vmem:[#allocation2 + $0x170] sm:$0xff] %vm487_vm2, %v467_v36  ;;  %v1497_v40 = vmul.f32 %v1416_v6, %v1133_v28  ;;  %v977_v20 = vmul.f32 %v1133_v28, %v12335_v46  ;;  %v3462_v58 = vld [vmem:[#allocation2 + $0x168] sm:$0xff] }
 0x18a   :  { %v3359_v14 = vpack.c.bf16 %v3462_v58, %v3462_v58  ;;  %v16428_v58 = vld [vmem:[#allocation23_spill] sm:$0xff] }
 0x18b   :  { %v1549_v43 = vpack.c.bf16 %v1497_v40, %v1497_v40  ;;  %v1029_v7 = vpack.c.bf16 %v977_v20, %v977_v20 }
 0x18c   :  { %v378_v1 = vpop.f32.mrf.mxu0  ;;  %3411 = vst.msk [vmem:[#allocation3 + $0x178] sm:$0xf] %vm1036_vm3, %v3359_v14 }
 0x18d   :  { %1695 = vrot.lane.b32.xlu1 %v1548_v56, %s11546_s14  ;;  %v379_v39 = vadd.f32 %v12568_v19, %v378_v1  ;;  %1697 = vrot.lane.b32.xlu2 %v1549_v43, %s11546_s14  ;;  %1082 = vst.msk [vmem:[#allocation3 + $0x21c] sm:$0xf] %vm1036_vm3, %v1029_v7  ;;  %v1876_v43 = vld [vmem:[%s16355_s1 + $0x30] sm:$0xff] }
 0x18e   :  { %v1632_v55 = vpop.permute.xlu2 %1631 }
 0x18f   :  { %v468_v61 = vmax.f32 %v379_v39, 0.0  ;;  %v1612_v50 = vpop.permute.xlu1 %1611  ;;  %1777 = vst.msk [vmem:[#allocation3 + $0x84] sm:$0xf] %vm1765_vm4, %v1632_v55  ;;  %v1616_v46 = vpop.permute.xlu0 %1615  ;;  %v1875_v39 = vld [vmem:[%s16355_s1 + $0x28] sm:$0xff] }
 0x190   :  { %1767 = vst.msk [vmem:[#allocation3 + $0xc] sm:$0xf] %vm1765_vm4, %v1612_v50  ;;  %v1134_v62 = vld [vmem:[#allocation2 + $0x170] sm:$0xff] }
 0x191   :  { %549 = vst.msk [vmem:[#allocation2 + $0x178] sm:$0xff] %vm487_vm2, %v468_v61  ;;  %v1498_v60 = vmul.f32 %v12633_v59, %v1134_v62  ;;  %v978_v2 = vmul.f32 %v1134_v62, %v12331_v41  ;;  %v3463_v26 = vld [vmem:[#allocation2 + $0x170] sm:$0xff] }
 0x192   :  { %1769 = vst.msk [vmem:[#allocation3 + $0x24] sm:$0xf] %vm1765_vm4, %v1616_v46  ;;  %v3360_v42 = vpack.c.bf16 %v3463_v26, %v3463_v26 }
 0x193   :  { %v1550_v4 = vpack.c.bf16 %v1498_v60, %v1498_v60  ;;  %v1030_v48 = vpack.c.bf16 %v978_v2, %v978_v2 }
 0x194   :  { %v381_v47 = vpop.f32.mrf.mxu0  ;;  %3412 = vst.msk [vmem:[#allocation3 + $0x184] sm:$0xf] %vm1036_vm3, %v3360_v42 }
 0x195   :  { %v382_v59 = vadd.f32 %v12568_v19, %v381_v47  ;;  %1699 = vrot.lane.b32.xlu0 %v1550_v4, %s11546_s14  ;;  %1929 = vperm.xlu2 %11375, %v1871_v25   ;;  %1083 = vst.msk [vmem:[#allocation3 + $0x228] sm:$0xf] %vm1036_vm3, %v1030_v48  ;;  %v16429_v25 = vld [vmem:[#allocation22_spill] sm:$0xff]  ;;  %v1879_v48 = vld [vmem:[%s16355_s1 + $0x48] sm:$0xff] }
 0x196   :  { %v1638_v41 = vpop.permute.xlu2 %1637  ;;  %1924 = vperm.xlu1 %11374, %v1870_v35   ;;  %v1877_v35 = vld [vmem:[%s16355_s1 + $0x38] sm:$0xff] }
 0x197   :  { %v469_v6 = vmax.f32 %v382_v59, 0.0  ;;  %v1618_v52 = vpop.permute.xlu1 %1617  ;;  %v1622_v11 = vpop.permute.xlu0 %1621  ;;  %1780 = vst.msk [vmem:[#allocation3 + $0xa8] sm:$0xf] %vm1765_vm4, %v1638_v41 }
 0x198   :  { %1770 = vst.msk [vmem:[#allocation3 + $0x30] sm:$0xf] %vm1765_vm4, %v1618_v52  ;;  %v1135_v23 = vld [vmem:[#allocation2 + $0x178] sm:$0xff] }
 0x199   :  { %550 = vst.msk [vmem:[#allocation2 + $0x180] sm:$0xff] %vm487_vm2, %v469_v6  ;;  %v1499_v30 = vmul.f32 %v12693_v9, %v1135_v23  ;;  %v979_v33 = vmul.f32 %v1135_v23, %v16426_v49  ;;  %v3464_v5 = vld [vmem:[#allocation2 + $0x178] sm:$0xff] }
 0x19a   :  { %1772 = vst.msk [vmem:[#allocation3 + $0x48] sm:$0xf] %vm1765_vm4, %v1622_v11  ;;  %v3361_v18 = vpack.c.bf16 %v3464_v5, %v3464_v5 }
 0x19b   :  { %v1551_v31 = vpack.c.bf16 %v1499_v30, %v1499_v30  ;;  %v1031_v37 = vpack.c.bf16 %v979_v33, %v979_v33 }
 0x19c   :  { %v384_v3 = vpop.f32.mrf.mxu0  ;;  %3413 = vst.msk [vmem:[#allocation3 + $0x190] sm:$0xf] %vm1036_vm3, %v3361_v18 }
 0x19d   :  { %v385_v9 = vadd.f32 %v12568_v19, %v384_v3  ;;  %1944 = vperm.xlu2 %11375, %v1874_v12   ;;  %1934 = vperm.xlu0 %11376, %v1872_v0   ;;  %1084 = vst.msk [vmem:[#allocation3 + $0x234] sm:$0xf] %vm1036_vm3, %v1031_v37  ;;  %v1880_v0 = vld [vmem:[%s16355_s1 + $0x50] sm:$0xff]  ;;  %v1878_v37 = vld [vmem:[%s16355_s1 + $0x40] sm:$0xff] }
 0x19e   :  { %v1644_v57 = vpop.permute.xlu2 %1643  ;;  %1701 = vrot.lane.b32.xlu1 %v1551_v31, %s11546_s14 }
 0x19f   :  { %v470_v15 = vmax.f32 %v385_v9, 0.0  ;;  %v1624_v38 = vpop.permute.xlu1 %1623  ;;  %v1628_v13 = vpop.permute.xlu0 %1627  ;;  %1783 = vst.msk [vmem:[#allocation3 + $0xcc] sm:$0xf] %vm1765_vm4, %v1644_v57 }
 0x1a0   :  { %1773 = vst.msk [vmem:[#allocation3 + $0x54] sm:$0xf] %vm1765_vm4, %v1624_v38  ;;  %v1136_v53 = vld [vmem:[#allocation2 + $0x180] sm:$0xff] }
 0x1a1   :  { %551 = vst.msk [vmem:[#allocation2 + $0x188] sm:$0xff] %vm487_vm2, %v470_v15  ;;  %v1500_v17 = vmul.f32 %v12707_v44, %v1136_v53  ;;  %v980_v29 = vmul.f32 %v1136_v53, %v16427_v10  ;;  %v3465_v32 = vld [vmem:[#allocation2 + $0x180] sm:$0xff] }
 0x1a2   :  { %1775 = vst.msk [vmem:[#allocation3 + $0x6c] sm:$0xf] %vm1765_vm4, %v1628_v13  ;;  %v3362_v21 = vpack.c.bf16 %v3465_v32, %v3465_v32  ;;  %v1882_v53 = vld [vmem:[%s16355_s1 + $0x60] sm:$0xff] }
 0x1a3   :  { %v1552_v63 = vpack.c.bf16 %v1500_v17, %v1500_v17  ;;  %v1032_v8 = vpack.c.bf16 %v980_v29, %v980_v29  ;;  %v1881_v29 = vld [vmem:[%s16355_s1 + $0x58] sm:$0xff] }
 0x1a4   :  { %v387_v24 = vpop.f32.mrf.mxu0  ;;  %3414 = vst.msk [vmem:[#allocation3 + $0x19c] sm:$0xf] %vm1036_vm3, %v3362_v21 }
 0x1a5   :  { %v388_v36 = vadd.f32 %v12568_v19, %v387_v24  ;;  %1703 = vrot.lane.b32.xlu2 %v1552_v63, %s11546_s14  ;;  %1085 = vst.msk [vmem:[#allocation3 + $0x240] sm:$0xf] %vm1036_vm3, %v1032_v8  ;;  %v1883_v63 = vld [vmem:[%s16355_s1 + $0x68] sm:$0xff]  ;;  %v1884_v8 = vld [vmem:[%s16355_s1 + $0x70] sm:$0xff] }
 0x1a6   :  { %v1650_v44 = vpop.permute.xlu2 %1649  ;;  %1939 = vperm.xlu1 %11374, %v1873_v22   ;;  %v1885_v22 = vld [vmem:[%s16355_s1 + $0x78] sm:$0xff] }
 0x1a7   :  { %v471_v16 = vmax.f32 %v388_v36, 0.0  ;;  %v1630_v54 = vpop.permute.xlu1 %1629  ;;  %v1634_v28 = vpop.permute.xlu0 %1633  ;;  %1786 = vst.msk [vmem:[#allocation3 + $0xf0] sm:$0xf] %vm1765_vm4, %v1650_v44 }
 0x1a8   :  { %1776 = vst.msk [vmem:[#allocation3 + $0x78] sm:$0xf] %vm1765_vm4, %v1630_v54  ;;  %v1137_v40 = vld [vmem:[#allocation2 + $0x188] sm:$0xff]  ;;  %v1888_v54 = vld [vmem:[%s16355_s1 + $0x90] sm:$0xff] }
 0x1a9   :  { %552 = vst.msk [vmem:[#allocation2 + $0x190] sm:$0xff] %vm487_vm2, %v471_v16  ;;  %v1501_v20 = vmul.f32 %v12653_v51, %v1137_v40  ;;  %v981_v14 = vmul.f32 %v1137_v40, %v16428_v58  ;;  %v3466_v56 = vld [vmem:[#allocation2 + $0x188] sm:$0xff]  ;;  %v1886_v16 = vld [vmem:[%s16355_s1 + $0x80] sm:$0xff] }
 0x1aa   :  { %1778 = vst.msk [vmem:[#allocation3 + $0x90] sm:$0xf] %vm1765_vm4, %v1634_v28  ;;  %v3363_v7 = vpack.c.bf16 %v3466_v56, %v3466_v56  ;;  %v1887_v28 = vld [vmem:[%s16355_s1 + $0x88] sm:$0xff] }
 0x1ab   :  { %v1553_v1 = vpack.c.bf16 %v1501_v20, %v1501_v20  ;;  %v1033_v55 = vpack.c.bf16 %v981_v14, %v981_v14  ;;  %v1889_v14 = vld [vmem:[%s16355_s1 + $0x98] sm:$0xff]  ;;  %v1891_v56 = vld [vmem:[%s16355_s1 + $0xa8] sm:$0xff] }
 0x1ac   :  { %v390_v61 = vpop.f32.mrf.mxu0  ;;  %3415 = vst.msk [vmem:[#allocation3 + $0x1a8] sm:$0xf] %vm1036_vm3, %v3363_v7 }
 0x1ad   :  { %v391_v51 = vadd.f32 %v12568_v19, %v390_v61  ;;  %1705 = vrot.lane.b32.xlu0 %v1553_v1, %s11546_s14  ;;  %1954 = vperm.xlu2 %11375, %v1876_v43   ;;  %1086 = vst.msk [vmem:[#allocation3 + $0x24c] sm:$0xf] %vm1036_vm3, %v1033_v55  ;;  %v1890_v43 = vld [vmem:[%s16355_s1 + $0xa0] sm:$0xff]  ;;  %v81_v55 = vld [vmem:[%s16356_s0 + $0x138] sm:$0xff]  ;;  %v1892_v61 = vld [vmem:[%s16355_s1 + $0xb0] sm:$0xff] }
 0x1ae   :  { %v1656_v50 = vpop.permute.xlu2 %1655  ;;  %1949 = vperm.xlu1 %11374, %v1875_v39   ;;  %9797 = vmatmul.msk.f32.gmra.mxu0 %vm101_vm1, %v81_v55 }
 0x1af   :  { %v472_v46 = vmax.f32 %v391_v51, 0.0  ;;  %v1640_v62 = vpop.permute.xlu0 %1639  ;;  %1789 = vst.msk [vmem:[#allocation3 + $0x114] sm:$0xf] %vm1765_vm4, %v1656_v50  ;;  %v1636_v60 = vpop.permute.xlu1 %1635  ;;  %v1894_v51 = vld [vmem:[%s16355_s1 + $0xc0] sm:$0xff]  ;;  %v1893_v50 = vld [vmem:[%s16355_s1 + $0xb8] sm:$0xff] }
 0x1b0   :  { %1781 = vst.msk [vmem:[#allocation3 + $0xb4] sm:$0xf] %vm1765_vm4, %v1640_v62  ;;  %v12796_v2 = vld [vmem:[#allocation2 + $0x190] sm:$0xff] }
 0x1b1   :  { %553 = vst.msk [vmem:[#allocation2 + $0x198] sm:$0xff] %vm487_vm2, %v472_v46  ;;  %v1502_v26 = vmul.f32 %v12710_v45, %v12796_v2  ;;  %v982_v42 = vmul.f32 %v12796_v2, %v16429_v25  ;;  %v3467_v4 = vld [vmem:[#allocation2 + $0x190] sm:$0xff]  ;;  %v1897_v25 = vld [vmem:[%s16355_s1 + $0xd8] sm:$0xff] }
 0x1b2   :  { %1779 = vst.msk [vmem:[#allocation3 + $0x9c] sm:$0xf] %vm1765_vm4, %v1636_v60  ;;  %v3364_v47 = vpack.c.bf16 %v3467_v4, %v3467_v4 }
 0x1b3   :  { %v1554_v59 = vpack.c.bf16 %v1502_v26, %v1502_v26  ;;  %v1034_v41 = vpack.c.bf16 %v982_v42, %v982_v42  ;;  %v1895_v26 = vld [vmem:[%s16355_s1 + $0xc8] sm:$0xff]  ;;  %v1896_v42 = vld [vmem:[%s16355_s1 + $0xd0] sm:$0xff] }
 0x1b4   :  { %v393_v6 = vpop.f32.mrf.mxu0  ;;  %3416 = vst.msk [vmem:[#allocation3 + $0x1b4] sm:$0xf] %vm1036_vm3, %v3364_v47  ;;  %v1898_v47 = vld [vmem:[%s16355_s1 + $0xe0] sm:$0xff] }
 0x1b5   :  { %v394_v45 = vadd.f32 %v12568_v19, %v393_v6  ;;  %1959 = vperm.xlu0 %11376, %v1877_v35   ;;  %1969 = vperm.xlu2 %11375, %v1879_v48   ;;  %1087 = vst.msk [vmem:[#allocation3 + $0x258] sm:$0xf] %vm1036_vm3, %v1034_v41  ;;  %v16430_v19 = vld [vmem:[#allocation25_spill] sm:$0xff]  ;;  %v1899_v41 = vld [vmem:[%s16355_s1 + $0xe8] sm:$0xff] }
 0x1b6   :  { %v1662_v52 = vpop.permute.xlu2 %1661  ;;  %1707 = vrot.lane.b32.xlu1 %v1554_v59, %s11546_s14  ;;  %v1900_v59 = vld [vmem:[%s16355_s1 + $0xf0] sm:$0xff] }
 0x1b7   :  { %v473_v11 = vmax.f32 %v394_v45, 0.0  ;;  %v1646_v23 = vpop.permute.xlu0 %1645  ;;  %1792 = vst.msk [vmem:[#allocation3 + $0x138] sm:$0xf] %vm1765_vm4, %v1662_v52  ;;  %v1642_v30 = vpop.permute.xlu1 %1641 }
 0x1b8   :  { %1784 = vst.msk [vmem:[#allocation3 + $0xd8] sm:$0xf] %vm1765_vm4, %v1646_v23  ;;  %v1139_v49 = vld [vmem:[#allocation2 + $0x198] sm:$0xff]  ;;  %v1903_v23 = vld [vmem:[%s16355_s1 + $0x108] sm:$0xff] }
 0x1b9   :  { %554 = vst.msk [vmem:[#allocation2 + $0x1a0] sm:$0xff] %vm487_vm2, %v473_v11  ;;  %v1503_v33 = vmul.f32 %v12721_v34, %v1139_v49  ;;  %v983_v5 = vmul.f32 %v1139_v49, %v16430_v19  ;;  %v3468_v12 = vld [vmem:[#allocation2 + $0x198] sm:$0xff]  ;;  %v12939_v19 = vld [vmem:[%s16355_s1 + $0x110] sm:$0xff] }
 0x1ba   :  { %1782 = vst.msk [vmem:[#allocation3 + $0xc0] sm:$0xf] %vm1765_vm4, %v1642_v30  ;;  %v3365_v18 = vpack.c.bf16 %v3468_v12, %v3468_v12  ;;  %v1901_v11 = vld [vmem:[%s16355_s1 + $0xf8] sm:$0xff]  ;;  %v1902_v30 = vld [vmem:[%s16355_s1 + $0x100] sm:$0xff] }
 0x1bb   :  { %v1555_v31 = vpack.c.bf16 %v1503_v33, %v1503_v33  ;;  %v1035_v3 = vpack.c.bf16 %v983_v5, %v983_v5  ;;  %v1906_v5 = vld [vmem:[%s16355_s1 + $0x120] sm:$0xff]  ;;  %v1905_v12 = vld [vmem:[%s16355_s1 + $0x118] sm:$0xff] }
 0x1bc   :  { %3417 = vst.msk [vmem:[#allocation3 + $0x1c0] sm:$0xf] %vm1036_vm3, %v3365_v18 }
 0x1bd   :  { %1974 = vperm.xlu0 %11376, %v1880_v0   ;;  %1709 = vrot.lane.b32.xlu2 %v1555_v31, %s11546_s14  ;;  %1088 = vst.msk [vmem:[#allocation3 + $0x264] sm:$0xf] %vm1036_vm3, %v1035_v3  ;;  %v1909_v3 = vld [vmem:[%s16355_s1 + $0x138] sm:$0xff] }
 0x1be   :  { %v1668_v34 = vpop.permute.xlu2 %1667  ;;  %1964 = vperm.xlu1 %11374, %v1878_v37   ;;  %v12954_v37 = vld [vmem:[%s16355_s1 + $0x128] sm:$0xff] }
 0x1bf   :  { %v1652_v9 = vpop.permute.xlu0 %1651  ;;  %1795 = vst.msk [vmem:[#allocation3 + $0x15c] sm:$0xf] %vm1765_vm4, %v1668_v34  ;;  %v1648_v57 = vpop.permute.xlu1 %1647  ;;  %v1908_v34 = vld [vmem:[%s16355_s1 + $0x130] sm:$0xff] }
 0x1c0   :  { %1787 = vst.msk [vmem:[#allocation3 + $0xfc] sm:$0xf] %vm1765_vm4, %v1652_v9  ;;  %v12831_v15 = vld [vmem:[#allocation2 + $0x1a0] sm:$0xff] }
 0x1c1   :  { %1785 = vst.msk [vmem:[#allocation3 + $0xe4] sm:$0xf] %vm1765_vm4, %v1648_v57  ;;  %v1504_v38 = vmul.f32 %v12673_v27, %v12831_v15  ;;  %v3469_v13 = vld [vmem:[#allocation2 + $0x1a0] sm:$0xff] }
 0x1c2   :  { %v3366_v17 = vpack.c.bf16 %v3469_v13, %v3469_v13  ;;  %v1912_v13 = vld [vmem:[%s16355_s1 + $0x150] sm:$0xff] }
 0x1c3   :  { %v1556_v10 = vpack.c.bf16 %v1504_v38, %v1504_v38  ;;  %v12969_v38 = vld [vmem:[%s16355_s1 + $0x140] sm:$0xff] }
 0x1c4   :  { %3418 = vst.msk [vmem:[#allocation3 + $0x1cc] sm:$0xf] %vm1036_vm3, %v3366_v17 }
 0x1c5   :  { %1711 = vrot.lane.b32.xlu0 %v1556_v10, %s11546_s14  ;;  %1984 = vperm.xlu2 %11375, %v1882_v53   ;;  %v1911_v53 = vld [vmem:[%s16355_s1 + $0x148] sm:$0xff] }
 0x1c6   :  { %v1674_v32 = vpop.permute.xlu2 %1673  ;;  %1979 = vperm.xlu1 %11374, %v1881_v29  }
 0x1c7   :  { %v1658_v21 = vpop.permute.xlu0 %1657  ;;  %1798 = vst.msk [vmem:[#allocation3 + $0x180] sm:$0xf] %vm1765_vm4, %v1674_v32  ;;  %v1654_v27 = vpop.permute.xlu1 %1653  ;;  %v12982_v32 = vld [vmem:[%s16355_s1 + $0x158] sm:$0xff] }
 0x1c8   :  { %1790 = vst.msk [vmem:[#allocation3 + $0x120] sm:$0xf] %vm1765_vm4, %v1658_v21  ;;  %v1915_v21 = vld [vmem:[%s16355_s1 + $0x168] sm:$0xff] }
 0x1c9   :  { %1788 = vst.msk [vmem:[#allocation3 + $0x108] sm:$0xf] %vm1765_vm4, %v1654_v27  ;;  %v1914_v27 = vld [vmem:[%s16355_s1 + $0x160] sm:$0xff] }
 0x1cd   :  { %1989 = vperm.xlu0 %11376, %v1883_v63   ;;  %1999 = vperm.xlu2 %11375, %v1885_v22  }
 0x1ce   :  { %v1680_v24 = vpop.permute.xlu2 %1679  ;;  %1994 = vperm.xlu1 %11374, %v1884_v8  }
 0x1cf   :  { %v1664_v36 = vpop.permute.xlu0 %1663  ;;  %1801 = vst.msk [vmem:[#allocation3 + $0x1a4] sm:$0xf] %vm1765_vm4, %v1680_v24  ;;  %v1660_v44 = vpop.permute.xlu1 %1659  ;;  %v12997_v24 = vld [vmem:[%s16355_s1 + $0x170] sm:$0xff] }
 0x1d0   :  { %1793 = vst.msk [vmem:[#allocation3 + $0x144] sm:$0xf] %vm1765_vm4, %v1664_v36  ;;  %v1918_v36 = vld [vmem:[%s16355_s1 + $0x180] sm:$0xff] }
 0x1d1   :  { %1791 = vst.msk [vmem:[#allocation3 + $0x12c] sm:$0xf] %vm1765_vm4, %v1660_v44  ;;  %v1917_v44 = vld [vmem:[%s16355_s1 + $0x178] sm:$0xff] }
 0x1d5   :  { %2004 = vperm.xlu0 %11376, %v1886_v16   ;;  %2014 = vperm.xlu2 %11375, %v1888_v54  }
 0x1d6   :  { %v1686_v40 = vpop.permute.xlu2 %1685  ;;  %2009 = vperm.xlu1 %11374, %v1887_v28  }
 0x1d7   :  { %v1670_v20 = vpop.permute.xlu0 %1669  ;;  %1804 = vst.msk [vmem:[#allocation3 + $0x1c8] sm:$0xf] %vm1765_vm4, %v1686_v40  ;;  %v1666_v58 = vpop.permute.xlu1 %1665  ;;  %v13012_v40 = vld [vmem:[%s16355_s1 + $0x188] sm:$0xff] }
 0x1d8   :  { %1796 = vst.msk [vmem:[#allocation3 + $0x168] sm:$0xf] %vm1765_vm4, %v1670_v20  ;;  %v1921_v20 = vld [vmem:[%s16355_s1 + $0x198] sm:$0xff] }
 0x1d9   :  { %1794 = vst.msk [vmem:[#allocation3 + $0x150] sm:$0xf] %vm1765_vm4, %v1666_v58  ;;  %v1920_v58 = vld [vmem:[%s16355_s1 + $0x190] sm:$0xff] }
 0x1dd   :  { %2019 = vperm.xlu0 %11376, %v1889_v14   ;;  %2029 = vperm.xlu2 %11375, %v1891_v56   ;;  %v1818_v14 = vld [vmem:[#allocation2 + $0x10] sm:$0xff]  ;;  %v1820_v56 = vld [vmem:[#allocation2 + $0x20] sm:$0xff] }
 0x1de   :  { %v1692_v7 = vpop.permute.xlu2 %1691  ;;  %2024 = vperm.xlu1 %11374, %v1890_v43   ;;  %v1819_v43 = vld [vmem:[#allocation2 + $0x18] sm:$0xff] }
 0x1df   :  { %v1676_v1 = vpop.permute.xlu0 %1675  ;;  %1807 = vst.msk [vmem:[#allocation3 + $0x1ec] sm:$0xf] %vm1765_vm4, %v1692_v7  ;;  %v1672_v39 = vpop.permute.xlu1 %1671 }
 0x1e0   :  { %1799 = vst.msk [vmem:[#allocation3 + $0x18c] sm:$0xf] %vm1765_vm4, %v1676_v1 }
 0x1e1   :  { %1797 = vst.msk [vmem:[#allocation3 + $0x174] sm:$0xf] %vm1765_vm4, %v1672_v39 }
 0x1e5   :  { %2034 = vperm.xlu0 %11376, %v1892_v61   ;;  %2044 = vperm.xlu2 %11375, %v1894_v51  }
 0x1e6   :  { %2039 = vperm.xlu1 %11374, %v1893_v50  }
 0x1e7   :  { %v1682_v46 = vpop.permute.xlu0 %1681  ;;  %v1678_v62 = vpop.permute.xlu1 %1677 }
 0x1e8   :  { %1802 = vst.msk [vmem:[#allocation3 + $0x1b0] sm:$0xf] %vm1765_vm4, %v1682_v46  ;;  %v1698_v60 = vpop.permute.xlu2 %1697 }
 0x1e9   :  { %1800 = vst.msk [vmem:[#allocation3 + $0x198] sm:$0xf] %vm1765_vm4, %v1678_v62 }
 0x1ea   :  { %1810 = vst.msk [vmem:[#allocation3 + $0x210] sm:$0xf] %vm1765_vm4, %v1698_v60  ;;  %v1821_v60 = vld [vmem:[#allocation2 + $0x28] sm:$0xff] }
 0x1ed   :  { %2049 = vperm.xlu0 %11376, %v1895_v26   ;;  %2059 = vperm.xlu2 %11375, %v1897_v25   ;;  %v1823_v26 = vld [vmem:[#allocation2 + $0x38] sm:$0xff]  ;;  %v1822_v25 = vld [vmem:[#allocation2 + $0x30] sm:$0xff] }
 0x1ee   :  { %2054 = vperm.xlu1 %11374, %v1896_v42  }
 0x1ef   :  { %v1688_v4 = vpop.permute.xlu0 %1687  ;;  %v1684_v35 = vpop.permute.xlu1 %1683 }
 0x1f0   :  { %1805 = vst.msk [vmem:[#allocation3 + $0x1d4] sm:$0xf] %vm1765_vm4, %v1688_v4  ;;  %v12909_v48 = vpop.permute.xlu2 %1929 }
 0x1f1   :  { %1803 = vst.msk [vmem:[#allocation3 + $0x1bc] sm:$0xf] %vm1765_vm4, %v1684_v35  ;;  %v2183_v55 = vmul.f32 %v12909_v48, %v1819_v43 }
 0x1f3   :  { %v2235_v62 = vpack.c.bf16 %v2183_v55, %v2183_v55  ;;  %v13063_v55 = vld [vmem:[#allocation2 + $0x88] sm:$0xff] }
 0x1f5   :  { %2064 = vperm.xlu0 %11376, %v1898_v47   ;;  %2074 = vperm.xlu2 %11375, %v1900_v59  }
 0x1f6   :  { %2069 = vperm.xlu1 %11374, %v1899_v41  }
 0x1f7   :  { %v1694_v6 = vpop.permute.xlu0 %1693  ;;  %v1690_v45 = vpop.permute.xlu1 %1689 }
 0x1f8   :  { %1808 = vst.msk [vmem:[#allocation3 + $0x1f8] sm:$0xf] %vm1765_vm4, %v1694_v6  ;;  %v12922_v52 = vpop.permute.xlu2 %1944 }
 0x1f9   :  { %1806 = vst.msk [vmem:[#allocation3 + $0x1e0] sm:$0xf] %vm1765_vm4, %v1690_v45  ;;  %v2186_v48 = vmul.f32 %v12922_v52, %v1822_v25 }
 0x1fb   :  { %v2238_v45 = vpack.c.bf16 %v2186_v48, %v2186_v48  ;;  %v13078_v48 = vld [vmem:[#allocation2 + $0xa0] sm:$0xff] }
 0x1fd   :  { %2079 = vperm.xlu0 %11376, %v1901_v11   ;;  %2089 = vperm.xlu2 %11375, %v1903_v23   ;;  %v1824_v11 = vld [vmem:[#allocation2 + $0x40] sm:$0xff]  ;;  %v1826_v23 = vld [vmem:[#allocation2 + $0x50] sm:$0xff] }
 0x1fe   :  { %2084 = vperm.xlu1 %11374, %v1902_v30   ;;  %v1825_v30 = vld [vmem:[#allocation2 + $0x48] sm:$0xff] }
 0x1ff   :  { %v1696_v49 = vpop.permute.xlu1 %1695 }
 0x200   :  { %1809 = vst.msk [vmem:[#allocation3 + $0x204] sm:$0xf] %vm1765_vm4, %v1696_v49  ;;  %v1704_v33 = vpop.permute.xlu2 %1703 }
 0x201   :  { %1813 = vst.msk [vmem:[#allocation3 + $0x234] sm:$0xf] %vm1765_vm4, %v1704_v33 }
 0x205   :  { %2094 = vperm.xlu0 %11376, %v12939_v19   ;;  %2104 = vperm.xlu2 %11375, %v1906_v5  }
 0x206   :  { %2099 = vperm.xlu1 %11374, %v1905_v12  }
 0x207   :  { %v1700_v0 = vpop.permute.xlu0 %1699 }
 0x208   :  { %1811 = vst.msk [vmem:[#allocation3 + $0x21c] sm:$0xf] %vm1765_vm4, %v1700_v0  ;;  %v12949_v18 = vpop.permute.xlu2 %1954  ;;  %v1925_v31 = vpop.permute.xlu1 %1924 }
 0x209   :  { %v2182_v7 = vmul.f32 %v1925_v31, %v1818_v14  ;;  %v2188_v49 = vmul.f32 %v12949_v18, %v1824_v11 }
 0x20b   :  { %v2234_v50 = vpack.c.bf16 %v2182_v7, %v2182_v7  ;;  %v2240_v31 = vpack.c.bf16 %v2188_v49, %v2188_v49 }
 0x20d   :  { %2109 = vperm.xlu0 %11376, %v12954_v37   ;;  %2119 = vperm.xlu2 %11375, %v1909_v3  }
 0x20e   :  { %2114 = vperm.xlu1 %11374, %v1908_v34   ;;  %v1827_v34 = vld [vmem:[#allocation2 + $0x58] sm:$0xff] }
 0x20f   :  { %v1935_v17 = vpop.permute.xlu0 %1934 }
 0x210   :  { %v12963_v9 = vpop.permute.xlu2 %1969  ;;  %v1702_v57 = vpop.permute.xlu1 %1701  ;;  %v2184_v1 = vmul.f32 %v1935_v17, %v1820_v56 }
 0x211   :  { %1812 = vst.msk [vmem:[#allocation3 + $0x228] sm:$0xf] %vm1765_vm4, %v1702_v57  ;;  %v2191_v18 = vmul.f32 %v12963_v9, %v1827_v34  ;;  %v13102_v34 = vld [vmem:[#allocation2 + $0xc8] sm:$0xff] }
 0x212   :  { %v2236_v46 = vpack.c.bf16 %v2184_v1, %v2184_v1 }
 0x215   :  { %2124 = vperm.xlu0 %11376, %v12969_v38   ;;  %2134 = vperm.xlu2 %11375, %v1912_v13   ;;  %v13037_v13 = vld [vmem:[#allocation2 + $0x68] sm:$0xff] }
 0x216   :  { %2129 = vperm.xlu1 %11374, %v1911_v53   ;;  %v1828_v53 = vld [vmem:[#allocation2 + $0x60] sm:$0xff] }
 0x218   :  { %v1710_v10 = vpop.permute.xlu2 %1709  ;;  %v1940_v29 = vpop.permute.xlu1 %1939 }
 0x219   :  { %1816 = vst.msk [vmem:[#allocation3 + $0x258] sm:$0xf] %vm1765_vm4, %v1710_v10  ;;  %v2185_v42 = vmul.f32 %v1940_v29, %v1821_v60 }
 0x21b   :  { %v2237_v41 = vpack.c.bf16 %v2185_v42, %v2185_v42 }
 0x21d   :  { %2139 = vperm.xlu0 %11376, %v12982_v32   ;;  %2149 = vperm.xlu2 %11375, %v1915_v21  }
 0x21e   :  { %2144 = vperm.xlu1 %11374, %v1914_v27  }
 0x21f   :  { %v1706_v63 = vpop.permute.xlu0 %1705 }
 0x220   :  { %1814 = vst.msk [vmem:[#allocation3 + $0x240] sm:$0xf] %vm1765_vm4, %v1706_v63  ;;  %v12992_v22 = vpop.permute.xlu2 %1984  ;;  %v1950_v8 = vpop.permute.xlu1 %1949  ;;  %v2243_v63 = vpack.c.bf16 %v2191_v18, %v2191_v18 }
 0x221   :  { %v2187_v4 = vmul.f32 %v1950_v8, %v1823_v26 }
 0x223   :  { %v2239_v6 = vpack.c.bf16 %v2187_v4, %v2187_v4 }
 0x225   :  { %2154 = vperm.xlu0 %11376, %v12997_v24   ;;  %2164 = vperm.xlu2 %11375, %v1918_v36  }
 0x226   :  { %2159 = vperm.xlu1 %11374, %v1917_v44   ;;  %v13048_v44 = vld [vmem:[#allocation2 + $0x70] sm:$0xff] }
 0x227   :  { %v1960_v16 = vpop.permute.xlu0 %1959  ;;  %v2194_v9 = vmul.f32 %v12992_v22, %v13048_v44  ;;  %v13065_v22 = vld [vmem:[#allocation2 + $0x98] sm:$0xff] }
 0x228   :  { %v13006_v54 = vpop.permute.xlu2 %1999  ;;  %v1708_v28 = vpop.permute.xlu1 %1707  ;;  %v2189_v5 = vmul.f32 %v1960_v16, %v1825_v30  ;;  %v13050_v16 = vld [vmem:[#allocation2 + $0x80] sm:$0xff] }
 0x229   :  { %1815 = vst.msk [vmem:[#allocation3 + $0x24c] sm:$0xf] %vm1765_vm4, %v1708_v28  ;;  %v13055_v28 = vld [vmem:[#allocation2 + $0x78] sm:$0xff]  ;;  %v2246_v7 = vpack.c.bf16 %v2194_v9, %v2194_v9  ;;  %v13115_v9 = vld [vmem:[#allocation2 + $0xd0] sm:$0xff] }
 0x22a   :  { %v2241_v57 = vpack.c.bf16 %v2189_v5, %v2189_v5 }
 0x22d   :  { %2169 = vperm.xlu0 %11376, %v13012_v40   ;;  %2179 = vperm.xlu2 %11375, %v1921_v20  }
 0x22e   :  { %2174 = vperm.xlu1 %11374, %v1920_v58  }
 0x22f   :  { %v1975_v39 = vpop.permute.xlu0 %1974 }
 0x230   :  { %v13022_v61 = vpop.permute.xlu2 %2014  ;;  %v1965_v51 = vpop.permute.xlu1 %1964  ;;  %v2192_v29 = vmul.f32 %v1975_v39, %v1828_v53  ;;  %v13107_v53 = vld [vmem:[#allocation2 + $0xc0] sm:$0xff] }
 0x231   :  { %v2190_v52 = vmul.f32 %v1965_v51, %v1826_v23  ;;  %v2197_v51 = vmul.f32 %v13006_v54, %v13063_v55  ;;  %v13080_v54 = vld [vmem:[#allocation2 + $0xb0] sm:$0xff]  ;;  %v13091_v23 = vld [vmem:[%s16357_s3] ss:$0 sm:$0xff] }
 0x232   :  { %v2244_v36 = vpack.c.bf16 %v2192_v29, %v2192_v29 }
 0x233   :  { %v2242_v3 = vpack.c.bf16 %v2190_v52, %v2190_v52  ;;  %v2249_v42 = vpack.c.bf16 %v2197_v51, %v2197_v51 }
 0x235   :  { %2342 = vrot.lane.b32.xlu2 %v2236_v46, %s11548_s22  ;;  %2338 = vrot.lane.b32.xlu0 %v2234_v50, %s11548_s22  ;;  %v13070_v50 = vld [vmem:[#allocation2 + $0x90] sm:$0xff] }
 0x236   :  { %2340 = vrot.lane.b32.xlu1 %v2235_v62, %s11548_s22 }
 0x237   :  { %v1712_v35 = vpop.permute.xlu0 %1711 }
 0x238   :  { %1817 = vst.msk [vmem:[#allocation3 + $0x264] sm:$0xf] %vm1765_vm4, %v1712_v35  ;;  %v13029_v47 = vpop.permute.xlu2 %2029  ;;  %v1980_v59 = vpop.permute.xlu1 %1979 }
 0x239   :  { %v2193_v17 = vmul.f32 %v1980_v59, %v13037_v13  ;;  %v396_v59 = vpop.f32.mrf.mxu0 }
 0x23a   :  { %v397_v30 = vadd.f32 %v13091_v23, %v396_v59 }
 0x23b   :  { %v2245_v8 = vpack.c.bf16 %v2193_v17, %v2193_v17 }
 0x23c   :  { %v474_v5 = vmax.f32 %v397_v30, 0.0 }
 0x23d   :  { %2344 = vrot.lane.b32.xlu0 %v2237_v41, %s11548_s22  ;;  %2348 = vrot.lane.b32.xlu2 %v2239_v6, %s11548_s22  ;;  %v2200_v41 = vmul.f32 %v13022_v61, %v13078_v48  ;;  %v13085_v6 = vld [vmem:[#allocation2 + $0xa8] sm:$0xff] }
 0x23e   :  { %2346 = vrot.lane.b32.xlu1 %v2238_v45, %s11548_s22  ;;  %555 = vst.msk [vmem:[#allocation2 + $0x1a8] sm:$0xff] %vm487_vm2, %v474_v5 }
 0x23f   :  { %v1990_v33 = vpop.permute.xlu0 %1989 }
 0x240   :  { %v13035_v12 = vpop.permute.xlu2 %2044  ;;  %v1995_v0 = vpop.permute.xlu1 %1994  ;;  %v2195_v14 = vmul.f32 %v1990_v33, %v13055_v28 }
 0x241   :  { %v2196_v20 = vmul.f32 %v1995_v0, %v13050_v16  ;;  %v2252_v0 = vpack.c.bf16 %v2200_v41, %v2200_v41 }
 0x242   :  { %v2247_v39 = vpack.c.bf16 %v2195_v14, %v2195_v14 }
 0x243   :  { %v2248_v1 = vpack.c.bf16 %v2196_v20, %v2196_v20  ;;  %v2206_v20 = vmul.f32 %v13035_v12, %v13115_v9  ;;  %v13132_v12 = vld [vmem:[#allocation2 + $0xf8] sm:$0xff] }
 0x245   :  { %2350 = vrot.lane.b32.xlu0 %v2240_v31, %s11548_s22  ;;  %2354 = vrot.lane.b32.xlu2 %v2242_v3, %s11548_s22  ;;  %v13100_v3 = vld [vmem:[#allocation2 + $0xb8] sm:$0xff]  ;;  %v2258_v51 = vpack.c.bf16 %v2206_v20, %v2206_v20  ;;  %v13167_v20 = vld [vmem:[#allocation2 + $0x120] sm:$0xff] }
 0x246   :  { %2352 = vrot.lane.b32.xlu1 %v2241_v57, %s11548_s22  ;;  %v2203_v57 = vmul.f32 %v13029_v47, %v13100_v3  ;;  %v13117_v47 = vld [vmem:[#allocation2 + $0xe0] sm:$0xff] }
 0x247   :  { %v2005_v10 = vpop.permute.xlu0 %2004 }
 0x248   :  { %v13044_v21 = vpop.permute.xlu2 %2059  ;;  %v2010_v27 = vpop.permute.xlu1 %2009  ;;  %v2198_v60 = vmul.f32 %v2005_v10, %v13070_v50 }
 0x249   :  { %v2199_v46 = vmul.f32 %v2010_v27, %v13065_v22 }
 0x24a   :  { %v2250_v35 = vpack.c.bf16 %v2198_v60, %v2198_v60  ;;  %v13130_v60 = vld [vmem:[#allocation2 + $0xe8] sm:$0xff] }
 0x24b   :  { %v2251_v4 = vpack.c.bf16 %v2199_v46, %v2199_v46 }
 0x24d   :  { %2356 = vrot.lane.b32.xlu0 %v2243_v63, %s11548_s22  ;;  %2360 = vrot.lane.b32.xlu2 %v2245_v8, %s11548_s22  ;;  %v2255_v63 = vpack.c.bf16 %v2203_v57, %v2203_v57 }
 0x24e   :  { %2358 = vrot.lane.b32.xlu1 %v2244_v36, %s11548_s22 }
 0x24f   :  { %v2020_v58 = vpop.permute.xlu0 %2019 }
 0x250   :  { %v13059_v56 = vpop.permute.xlu2 %2074  ;;  %v2025_v43 = vpop.permute.xlu1 %2024  ;;  %v2201_v49 = vmul.f32 %v2020_v58, %v13085_v6  ;;  %v13122_v58 = vld [vmem:[#allocation2 + $0xd8] sm:$0xff] }
 0x251   :  { %v2202_v45 = vmul.f32 %v2025_v43, %v13080_v54 }
 0x252   :  { %v2253_v31 = vpack.c.bf16 %v2201_v49, %v2201_v49 }
 0x253   :  { %v2254_v61 = vpack.c.bf16 %v2202_v45, %v2202_v45 }
 0x255   :  { %2362 = vrot.lane.b32.xlu0 %v2246_v7, %s11548_s22  ;;  %2366 = vrot.lane.b32.xlu2 %v2248_v1, %s11548_s22 }
 0x256   :  { %2364 = vrot.lane.b32.xlu1 %v2247_v39, %s11548_s22 }
 0x257   :  { %v2035_v62 = vpop.permute.xlu0 %2034 }
 0x258   :  { %v13074_v26 = vpop.permute.xlu2 %2089  ;;  %v2040_v25 = vpop.permute.xlu1 %2039  ;;  %v2204_v10 = vmul.f32 %v2035_v62, %v13107_v53 }
 0x259   :  { %v2205_v18 = vmul.f32 %v2040_v25, %v13102_v34  ;;  %v2209_v25 = vmul.f32 %v13044_v21, %v13130_v60  ;;  %v13147_v21 = vld [vmem:[#allocation2 + $0x110] sm:$0xff] }
 0x25a   :  { %v2256_v36 = vpack.c.bf16 %v2204_v10, %v2204_v10 }
 0x25b   :  { %v2257_v8 = vpack.c.bf16 %v2205_v18, %v2205_v18 }
 0x25d   :  { %2368 = vrot.lane.b32.xlu0 %v2249_v42, %s11548_s22  ;;  %2372 = vrot.lane.b32.xlu2 %v2251_v4, %s11548_s22  ;;  %v13137_v42 = vld [vmem:[#allocation2 + $0xf0] sm:$0xff] }
 0x25e   :  { %2370 = vrot.lane.b32.xlu1 %v2250_v35, %s11548_s22 }
 0x25f   :  { %v2050_v11 = vpop.permute.xlu0 %2049 }
 0x260   :  { %v13095_v52 = vpop.permute.xlu2 %2104  ;;  %v2055_v33 = vpop.permute.xlu1 %2054  ;;  %v2207_v7 = vmul.f32 %v2050_v11, %v13122_v58  ;;  %v2261_v11 = vpack.c.bf16 %v2209_v25, %v2209_v25 }
 0x261   :  { %v2208_v14 = vmul.f32 %v2055_v33, %v13117_v47  ;;  %v13145_v33 = vld [vmem:[#allocation2 + $0x100] sm:$0xff] }
 0x262   :  { %v2259_v62 = vpack.c.bf16 %v2207_v7, %v2207_v7  ;;  %v2212_v5 = vmul.f32 %v13059_v56, %v13145_v33  ;;  %v13162_v56 = vld [vmem:[#allocation2 + $0x128] sm:$0xff] }
 0x263   :  { %v2260_v46 = vpack.c.bf16 %v2208_v14, %v2208_v14 }
 0x264   :  { %v2264_v10 = vpack.c.bf16 %v2212_v5, %v2212_v5 }
 0x265   :  { %2374 = vrot.lane.b32.xlu0 %v2252_v0, %s11548_s22  ;;  %2378 = vrot.lane.b32.xlu2 %v2254_v61, %s11548_s22  ;;  %v13152_v0 = vld [vmem:[#allocation2 + $0x108] sm:$0xff] }
 0x266   :  { %2376 = vrot.lane.b32.xlu1 %v2253_v31, %s11548_s22 }
 0x267   :  { %v2065_v17 = vpop.permute.xlu0 %2064 }
 0x268   :  { %v13111_v29 = vpop.permute.xlu2 %2119  ;;  %v2070_v27 = vpop.permute.xlu1 %2069  ;;  %v2210_v59 = vmul.f32 %v2065_v17, %v13137_v42 }
 0x269   :  { %v2211_v4 = vmul.f32 %v2070_v27, %v13132_v12 }
 0x26a   :  { %v2262_v49 = vpack.c.bf16 %v2210_v59, %v2210_v59  ;;  %v13182_v59 = vld [vmem:[#allocation2 + $0x138] sm:$0xff] }
 0x26b   :  { %v2263_v30 = vpack.c.bf16 %v2211_v4, %v2211_v4  ;;  %v13175_v4 = vld [vmem:[#allocation2 + $0x130] sm:$0xff] }
 0x26d   :  { %2380 = vrot.lane.b32.xlu0 %v2255_v63, %s11548_s22  ;;  %2384 = vrot.lane.b32.xlu2 %v2257_v8, %s11548_s22  ;;  %v13160_v8 = vld [vmem:[#allocation2 + $0x118] sm:$0xff] }
 0x26e   :  { %2382 = vrot.lane.b32.xlu1 %v2256_v36, %s11548_s22  ;;  %v2215_v36 = vmul.f32 %v13074_v26, %v13160_v8  ;;  %v13177_v26 = vld [vmem:[#allocation2 + $0x140] sm:$0xff] }
 0x26f   :  { %v2080_v43 = vpop.permute.xlu0 %2079 }
 0x270   :  { %v13126_v1 = vpop.permute.xlu2 %2134  ;;  %v2085_v39 = vpop.permute.xlu1 %2084  ;;  %v2213_v57 = vmul.f32 %v2080_v43, %v13152_v0 }
 0x271   :  { %v2214_v61 = vmul.f32 %v2085_v39, %v13147_v21 }
 0x272   :  { %v2265_v63 = vpack.c.bf16 %v2213_v57, %v2213_v57 }
 0x273   :  { %v2266_v27 = vpack.c.bf16 %v2214_v61, %v2214_v61 }
 0x275   :  { %2386 = vrot.lane.b32.xlu0 %v2258_v51, %s11548_s22  ;;  %2390 = vrot.lane.b32.xlu2 %v2260_v46, %s11548_s22  ;;  %v2267_v46 = vpack.c.bf16 %v2215_v36, %v2215_v36 }
 0x276   :  { %2388 = vrot.lane.b32.xlu1 %v2259_v62, %s11548_s22 }
 0x277   :  { %v2095_v35 = vpop.permute.xlu0 %2094 }
 0x278   :  { %v13141_v41 = vpop.permute.xlu2 %2149  ;;  %v2100_v45 = vpop.permute.xlu1 %2099  ;;  %v2216_v7 = vmul.f32 %v2095_v35, %v13167_v20  ;;  %v2218_v35 = vmul.f32 %v13095_v52, %v13175_v4  ;;  %v13189_v52 = vld [vmem:[#allocation2 + $0x158] sm:$0xff] }
 0x279   :  { %v2217_v14 = vmul.f32 %v2100_v45, %v13162_v56 }
 0x27a   :  { %v2268_v25 = vpack.c.bf16 %v2216_v7, %v2216_v7  ;;  %v2270_v61 = vpack.c.bf16 %v2218_v35, %v2218_v35  ;;  %v11549_v35 = vmov 3  }
 0x27b   :  { %v2269_v62 = vpack.c.bf16 %v2217_v14, %v2217_v14  ;;  %11378 = vset.pattern.permute.xlu2 %v11549_v35  ;;  %11377 = vset.pattern.permute.xlu1 %v11549_v35 }
 0x27c   :  { %11379 = vset.pattern.permute.xlu0 %v11549_v35  ;;  %v13219_v35 = vld [vmem:[#allocation2 + $0x180] sm:$0xff] }
 0x27d   :  { %2392 = vrot.lane.b32.xlu0 %v2261_v11, %s11548_s22  ;;  %2396 = vrot.lane.b32.xlu2 %v2263_v30, %s11548_s22 }
 0x27e   :  { %2394 = vrot.lane.b32.xlu1 %v2262_v49, %s11548_s22 }
 0x27f   :  { %v2110_v31 = vpop.permute.xlu0 %2109 }
 0x280   :  { %v13156_v18 = vpop.permute.xlu2 %2164  ;;  %v2115_v17 = vpop.permute.xlu1 %2114  ;;  %v2219_v30 = vmul.f32 %v2110_v31, %v13182_v59 }
 0x281   :  { %v2220_v45 = vmul.f32 %v2115_v17, %v13177_v26 }
 0x283   :  { %v2272_v57 = vpack.c.bf16 %v2220_v45, %v2220_v45 }
 0x285   :  { %2398 = vrot.lane.b32.xlu0 %v2264_v10, %s11548_s22  ;;  %2402 = vrot.lane.b32.xlu2 %v2266_v27, %s11548_s22  ;;  %v2271_v10 = vpack.c.bf16 %v2219_v30, %v2219_v30  ;;  %v1857_v27 = vld [vmem:[#allocation2 + $0x148] sm:$0xff] }
 0x286   :  { %2400 = vrot.lane.b32.xlu1 %v2265_v63, %s11548_s22  ;;  %v2221_v17 = vmul.f32 %v13111_v29, %v1857_v27  ;;  %v13193_v63 = vld [vmem:[#allocation2 + $0x150] sm:$0xff]  ;;  %v3470_v30 = vld [vmem:[#allocation2 + $0x1a8] sm:$0xff] }
 0x287   :  { %v2125_v43 = vpop.permute.xlu0 %2124  ;;  %v3367_v29 = vpack.c.bf16 %v3470_v30, %v3470_v30 }
 0x288   :  { %v13171_v39 = vpop.permute.xlu2 %2179  ;;  %v2130_v51 = vpop.permute.xlu1 %2129  ;;  %v2222_v14 = vmul.f32 %v2125_v43, %v13193_v63 }
 0x289   :  { %v2223_v31 = vmul.f32 %v2130_v51, %v13189_v52  ;;  %v1860_v51 = vld [vmem:[#allocation2 + $0x160] sm:$0xff]  ;;  %3419 = vst.msk [vmem:[#allocation3 + $0x1d8] sm:$0xf] %vm1036_vm3, %v3367_v29 }
 0x28a   :  { %v2274_v45 = vpack.c.bf16 %v2222_v14, %v2222_v14  ;;  %v2224_v43 = vmul.f32 %v13126_v1, %v1860_v51  ;;  %v1863_v1 = vld [vmem:[#allocation2 + $0x178] sm:$0xff] }
 0x28c   :  { %v2276_v14 = vpack.c.bf16 %v2224_v43, %v2224_v43 }
 0x28d   :  { %2404 = vrot.lane.b32.xlu0 %v2267_v46, %s11548_s22  ;;  %2408 = vrot.lane.b32.xlu2 %v2269_v62, %s11548_s22  ;;  %v2273_v62 = vpack.c.bf16 %v2221_v17, %v2221_v17 }
 0x28e   :  { %2406 = vrot.lane.b32.xlu1 %v2268_v25, %s11548_s22  ;;  %v2275_v25 = vpack.c.bf16 %v2223_v31, %v2223_v31 }
 0x28f   :  { %v2140_v11 = vpop.permute.xlu0 %2139 }
 0x290   :  { %v2343_v49 = vpop.permute.xlu2 %2342  ;;  %v2145_v5 = vpop.permute.xlu1 %2144 }
 0x291   :  { %2497 = vst.msk [vmem:[#allocation3 + $0x18] sm:$0xf] %vm2494_vm5, %v2343_v49  ;;  %v13200_v49 = vld [vmem:[#allocation2 + $0x170] sm:$0xff] }
 0x295   :  { %2410 = vrot.lane.b32.xlu0 %v2270_v61, %s11548_s22  ;;  %2414 = vrot.lane.b32.xlu2 %v2272_v57, %s11548_s22  ;;  %v13204_v61 = vld [vmem:[#allocation2 + $0x168] sm:$0xff]  ;;  %v2226_v57 = vmul.f32 %v2145_v5, %v13200_v49  ;;  %v2227_v5 = vmul.f32 %v13141_v41, %v1863_v1 }
 0x296   :  { %2412 = vrot.lane.b32.xlu1 %v2271_v10, %s11548_s22  ;;  %v2225_v27 = vmul.f32 %v2140_v11, %v13204_v61  ;;  %v82_v11 = vld [vmem:[%s16356_s0 + $0x140] sm:$0xff] }
 0x297   :  { %v2155_v36 = vpop.permute.xlu0 %2154  ;;  %9798 = vmatmul.msk.f32.gmra.mxu0 %vm101_vm1, %v82_v11 }
 0x298   :  { %v2349_v7 = vpop.permute.xlu2 %2348  ;;  %v2160_v46 = vpop.permute.xlu1 %2159  ;;  %v2228_v29 = vmul.f32 %v2155_v36, %v13219_v35  ;;  %v83_v36 = vld [vmem:[%s16356_s0 + $0x148] sm:$0xff] }
 0x299   :  { %2500 = vst.msk [vmem:[#allocation3 + $0x3c] sm:$0xf] %vm2494_vm5, %v2349_v7  ;;  %v2278_v7 = vpack.c.bf16 %v2226_v57, %v2226_v57  ;;  %v2279_v57 = vpack.c.bf16 %v2227_v5, %v2227_v5 }
 0x29a   :  { %v2280_v41 = vpack.c.bf16 %v2228_v29, %v2228_v29 }
 0x29d   :  { %2416 = vrot.lane.b32.xlu0 %v2273_v62, %s11548_s22  ;;  %2420 = vrot.lane.b32.xlu2 %v2275_v25, %s11548_s22  ;;  %v2277_v62 = vpack.c.bf16 %v2225_v27, %v2225_v27  ;;  %v13212_v25 = vld [vmem:[#allocation2 + $0x188] sm:$0xff] }
 0x29e   :  { %2418 = vrot.lane.b32.xlu1 %v2274_v45, %s11548_s22  ;;  %v2229_v45 = vmul.f32 %v2160_v46, %v13212_v25  ;;  %v2230_v46 = vmul.f32 %v13156_v18, %v12796_v2  ;;  %v1869_v2 = vld [vmem:[#allocation2 + $0x1a8] sm:$0xff] }
 0x29f   :  { %v2170_v10 = vpop.permute.xlu0 %2169  ;;  %9799 = vmatmul.msk.f32.gmra.mxu0 %vm101_vm1, %v83_v36 }
 0x2a0   :  { %v2355_v17 = vpop.permute.xlu2 %2354  ;;  %v2175_v31 = vpop.permute.xlu1 %2174  ;;  %v2281_v27 = vpack.c.bf16 %v2229_v45, %v2229_v45  ;;  %v2282_v5 = vpack.c.bf16 %v2230_v46, %v2230_v46  ;;  %v2601_v46 = vld [vmem:[%s16355_s1 + $0x10] sm:$0xff] }
 0x2a1   :  { %2503 = vst.msk [vmem:[#allocation3 + $0x60] sm:$0xf] %vm2494_vm5, %v2355_v17  ;;  %v13235_v17 = vld [vmem:[#allocation2 + $0x198] sm:$0xff] }
 0x2a5   :  { %2422 = vrot.lane.b32.xlu0 %v2276_v14, %s11548_s22  ;;  %2426 = vrot.lane.b32.xlu2 %v2278_v7, %s11548_s22  ;;  %v2232_v14 = vmul.f32 %v2175_v31, %v12831_v15  ;;  %v84_v15 = vld [vmem:[%s16356_s0 + $0x150] sm:$0xff] }
 0x2a6   :  { %2424 = vrot.lane.b32.xlu1 %v2277_v62, %s11548_s22  ;;  %v2231_v62 = vmul.f32 %v2170_v10, %v13235_v17  ;;  %v2233_v10 = vmul.f32 %v13171_v39, %v1869_v2  ;;  %v2599_v39 = vld [vmem:[%s16355_s1] sm:$0xff]  ;;  %v2605_v2 = vld [vmem:[%s16355_s1 + $0x30] sm:$0xff] }
 0x2a7   :  { %v2339_v30 = vpop.permute.xlu0 %2338  ;;  %v2284_v45 = vpack.c.bf16 %v2232_v14, %v2232_v14  ;;  %9800 = vmatmul.msk.f32.gmra.mxu0 %vm101_vm1, %v84_v15  ;;  %v2603_v14 = vld [vmem:[%s16355_s1 + $0x20] sm:$0xff]  ;;  %v87_v15 = vld [vmem:[%s16356_s0 + $0x168] sm:$0xff] }
 0x2a8   :  { %2495 = vst.msk [vmem:[#allocation3] sm:$0xf] %vm2494_vm5, %v2339_v30  ;;  %v2361_v51 = vpop.permute.xlu2 %2360  ;;  %v2341_v43 = vpop.permute.xlu1 %2340  ;;  %v2283_v18 = vpack.c.bf16 %v2231_v62, %v2231_v62  ;;  %v86_v62 = vld [vmem:[%s16356_s0 + $0x160] sm:$0xff] }
 0x2a9   :  { %2506 = vst.msk [vmem:[#allocation3 + $0x84] sm:$0xf] %vm2494_vm5, %v2361_v51  ;;  %v2600_v51 = vld [vmem:[%s16355_s1 + $0x8] sm:$0xff] }
 0x2aa   :  { %2496 = vst.msk [vmem:[#allocation3 + $0xc] sm:$0xf] %vm2494_vm5, %v2341_v43  ;;  %v2285_v43 = vpack.c.bf16 %v2233_v10, %v2233_v10 }
 0x2ad   :  { %2428 = vrot.lane.b32.xlu0 %v2279_v57, %s11548_s22  ;;  %2432 = vrot.lane.b32.xlu2 %v2281_v27, %s11548_s22  ;;  %v85_v57 = vld [vmem:[%s16356_s0 + $0x158] sm:$0xff] }
 0x2ae   :  { %2430 = vrot.lane.b32.xlu1 %v2280_v41, %s11548_s22 }
 0x2af   :  { %v2345_v7 = vpop.permute.xlu0 %2344  ;;  %9801 = vmatmul.msk.f32.gmra.mxu0 %vm101_vm1, %v85_v57 }
 0x2b0   :  { %2498 = vst.msk [vmem:[#allocation3 + $0x24] sm:$0xf] %vm2494_vm5, %v2345_v7  ;;  %v2367_v1 = vpop.permute.xlu2 %2366  ;;  %v2347_v11 = vpop.permute.xlu1 %2346  ;;  %v2602_v7 = vld [vmem:[%s16355_s1 + $0x18] sm:$0xff] }
 0x2b1   :  { %2509 = vst.msk [vmem:[#allocation3 + $0xa8] sm:$0xf] %vm2494_vm5, %v2367_v1 }
 0x2b2   :  { %2499 = vst.msk [vmem:[#allocation3 + $0x30] sm:$0xf] %vm2494_vm5, %v2347_v11 }
 0x2b5   :  { %2434 = vrot.lane.b32.xlu0 %v2282_v5, %s11548_s22  ;;  %2438 = vrot.lane.b32.xlu2 %v2284_v45, %s11548_s22  ;;  %v2606_v45 = vld [vmem:[%s16355_s1 + $0x38] sm:$0xff] }
 0x2b6   :  { %2436 = vrot.lane.b32.xlu1 %v2283_v18, %s11548_s22  ;;  %v2604_v18 = vld [vmem:[%s16355_s1 + $0x28] sm:$0xff] }
 0x2b7   :  { %v2351_v31 = vpop.permute.xlu0 %2350  ;;  %9802 = vmatmul.msk.f32.gmra.mxu0 %vm101_vm1, %v86_v62 }
 0x2b8   :  { %2501 = vst.msk [vmem:[#allocation3 + $0x48] sm:$0xf] %vm2494_vm5, %v2351_v31  ;;  %v2373_v30 = vpop.permute.xlu2 %2372  ;;  %v2353_v29 = vpop.permute.xlu1 %2352 }
 0x2b9   :  { %2512 = vst.msk [vmem:[#allocation3 + $0xcc] sm:$0xf] %vm2494_vm5, %v2373_v30 }
 0x2ba   :  { %2502 = vst.msk [vmem:[#allocation3 + $0x54] sm:$0xf] %vm2494_vm5, %v2353_v29  ;;  %v2609_v29 = vld [vmem:[%s16355_s1 + $0x50] sm:$0xff] }
 0x2bd   :  { %2440 = vrot.lane.b32.xlu0 %v2285_v43, %s11548_s22  ;;  %2658 = vperm.xlu2 %11378, %v2600_v51   ;;  %v2608_v51 = vld [vmem:[%s16355_s1 + $0x48] sm:$0xff]  ;;  %v2607_v43 = vld [vmem:[%s16355_s1 + $0x40] sm:$0xff] }
 0x2be   :  { %2653 = vperm.xlu1 %11377, %v2599_v39   ;;  %v88_v39 = vld [vmem:[%s16356_s0 + $0x170] sm:$0xff] }
 0x2bf   :  { %v2357_v27 = vpop.permute.xlu0 %2356  ;;  %9803 = vmatmul.msk.f32.gmra.mxu0 %vm101_vm1, %v87_v15 }
 0x2c0   :  { %2504 = vst.msk [vmem:[#allocation3 + $0x6c] sm:$0xf] %vm2494_vm5, %v2357_v27  ;;  %v2379_v41 = vpop.permute.xlu2 %2378  ;;  %v2359_v36 = vpop.permute.xlu1 %2358 }
 0x2c1   :  { %2515 = vst.msk [vmem:[#allocation3 + $0xf0] sm:$0xf] %vm2494_vm5, %v2379_v41 }
 0x2c2   :  { %2505 = vst.msk [vmem:[#allocation3 + $0x78] sm:$0xf] %vm2494_vm5, %v2359_v36  ;;  %v2612_v36 = vld [vmem:[%s16355_s1 + $0x68] sm:$0xff] }
 0x2c5   :  { %2663 = vperm.xlu0 %11379, %v2601_v46   ;;  %2673 = vperm.xlu2 %11378, %v2603_v14   ;;  %v2611_v46 = vld [vmem:[%s16355_s1 + $0x60] sm:$0xff]  ;;  %v2610_v14 = vld [vmem:[%s16355_s1 + $0x58] sm:$0xff] }
 0x2c6   :  { %2668 = vperm.xlu1 %11377, %v2602_v7   ;;  %v89_v7 = vld [vmem:[%s16356_s0 + $0x178] sm:$0xff] }
 0x2c7   :  { %v2363_v1 = vpop.permute.xlu0 %2362  ;;  %9804 = vmatmul.msk.f32.gmra.mxu0 %vm101_vm1, %v88_v39 }
 0x2c8   :  { %2507 = vst.msk [vmem:[#allocation3 + $0x90] sm:$0xf] %vm2494_vm5, %v2363_v1  ;;  %v2385_v11 = vpop.permute.xlu2 %2384  ;;  %v2365_v5 = vpop.permute.xlu1 %2364 }
 0x2c9   :  { %2518 = vst.msk [vmem:[#allocation3 + $0x114] sm:$0xf] %vm2494_vm5, %v2385_v11 }
 0x2ca   :  { %2508 = vst.msk [vmem:[#allocation3 + $0x9c] sm:$0xf] %vm2494_vm5, %v2365_v5  ;;  %v2615_v5 = vld [vmem:[%s16355_s1 + $0x80] sm:$0xff] }
 0x2cd   :  { %2688 = vperm.xlu0 %11379, %v2606_v45   ;;  %2683 = vperm.xlu2 %11378, %v2605_v2   ;;  %v2614_v45 = vld [vmem:[%s16355_s1 + $0x78] sm:$0xff]  ;;  %v2613_v2 = vld [vmem:[%s16355_s1 + $0x70] sm:$0xff] }
 0x2ce   :  { %2678 = vperm.xlu1 %11377, %v2604_v18   ;;  %v90_v18 = vld [vmem:[%s16356_s0 + $0x180] sm:$0xff] }
 0x2cf   :  { %v2369_v10 = vpop.permute.xlu0 %2368  ;;  %9805 = vmatmul.msk.f32.gmra.mxu0 %vm101_vm1, %v89_v7 }
 0x2d0   :  { %2510 = vst.msk [vmem:[#allocation3 + $0xb4] sm:$0xf] %vm2494_vm5, %v2369_v10  ;;  %v2391_v31 = vpop.permute.xlu2 %2390  ;;  %v2371_v30 = vpop.permute.xlu1 %2370 }
 0x2d1   :  { %2521 = vst.msk [vmem:[#allocation3 + $0x138] sm:$0xf] %vm2494_vm5, %v2391_v31 }
 0x2d2   :  { %2511 = vst.msk [vmem:[#allocation3 + $0xc0] sm:$0xf] %vm2494_vm5, %v2371_v30  ;;  %v2618_v30 = vld [vmem:[%s16355_s1 + $0x98] sm:$0xff] }
 0x2d5   :  { %2703 = vperm.xlu0 %11379, %v2609_v29   ;;  %2698 = vperm.xlu2 %11378, %v2608_v51   ;;  %v2617_v29 = vld [vmem:[%s16355_s1 + $0x90] sm:$0xff]  ;;  %v2616_v51 = vld [vmem:[%s16355_s1 + $0x88] sm:$0xff] }
 0x2d6   :  { %2693 = vperm.xlu1 %11377, %v2607_v43   ;;  %v91_v43 = vld [vmem:[%s16356_s0 + $0x188] sm:$0xff] }
 0x2d7   :  { %v2375_v57 = vpop.permute.xlu0 %2374  ;;  %9806 = vmatmul.msk.f32.gmra.mxu0 %vm101_vm1, %v90_v18 }
 0x2d8   :  { %2513 = vst.msk [vmem:[#allocation3 + $0xd8] sm:$0xf] %vm2494_vm5, %v2375_v57  ;;  %v2397_v27 = vpop.permute.xlu2 %2396  ;;  %v2377_v41 = vpop.permute.xlu1 %2376 }
 0x2d9   :  { %2524 = vst.msk [vmem:[#allocation3 + $0x15c] sm:$0xf] %vm2494_vm5, %v2397_v27 }
 0x2da   :  { %2514 = vst.msk [vmem:[#allocation3 + $0xe4] sm:$0xf] %vm2494_vm5, %v2377_v41  ;;  %v2621_v41 = vld [vmem:[%s16355_s1 + $0xb0] sm:$0xff] }
 0x2dd   :  { %2718 = vperm.xlu0 %11379, %v2612_v36   ;;  %2713 = vperm.xlu2 %11378, %v2611_v46   ;;  %v2620_v36 = vld [vmem:[%s16355_s1 + $0xa8] sm:$0xff]  ;;  %v2619_v46 = vld [vmem:[%s16355_s1 + $0xa0] sm:$0xff] }
 0x2de   :  { %2708 = vperm.xlu1 %11377, %v2610_v14   ;;  %v92_v14 = vld [vmem:[%s16356_s0 + $0x190] sm:$0xff] }
 0x2df   :  { %v2381_v62 = vpop.permute.xlu0 %2380  ;;  %9807 = vmatmul.msk.f32.gmra.mxu0 %vm101_vm1, %v91_v43 }
 0x2e0   :  { %2516 = vst.msk [vmem:[#allocation3 + $0xfc] sm:$0xf] %vm2494_vm5, %v2381_v62  ;;  %v2403_v1 = vpop.permute.xlu2 %2402  ;;  %v2383_v11 = vpop.permute.xlu1 %2382 }
 0x2e1   :  { %2527 = vst.msk [vmem:[#allocation3 + $0x180] sm:$0xf] %vm2494_vm5, %v2403_v1 }
 0x2e2   :  { %2517 = vst.msk [vmem:[#allocation3 + $0x108] sm:$0xf] %vm2494_vm5, %v2383_v11  ;;  %v2624_v11 = vld [vmem:[%s16355_s1 + $0xc8] sm:$0xff] }
 0x2e5   :  { %2733 = vperm.xlu0 %11379, %v2615_v5   ;;  %2728 = vperm.xlu2 %11378, %v2614_v45   ;;  %v2623_v5 = vld [vmem:[%s16355_s1 + $0xc0] sm:$0xff]  ;;  %v2622_v45 = vld [vmem:[%s16355_s1 + $0xb8] sm:$0xff] }
 0x2e6   :  { %2723 = vperm.xlu1 %11377, %v2613_v2  }
 0x2e7   :  { %v2387_v15 = vpop.permute.xlu0 %2386  ;;  %9808 = vmatmul.msk.f32.gmra.mxu0 %vm101_vm1, %v92_v14  ;;  %v2632_v14 = vld [vmem:[%s16355_s1 + $0x108] sm:$0xff] }
 0x2e8   :  { %2519 = vst.msk [vmem:[#allocation3 + $0x120] sm:$0xf] %vm2494_vm5, %v2387_v15  ;;  %v2409_v10 = vpop.permute.xlu2 %2408  ;;  %v2389_v31 = vpop.permute.xlu1 %2388 }
 0x2e9   :  { %2530 = vst.msk [vmem:[#allocation3 + $0x1a4] sm:$0xf] %vm2494_vm5, %v2409_v10  ;;  %v2627_v10 = vld [vmem:[%s16355_s1 + $0xe0] sm:$0xff] }
 0x2ea   :  { %2520 = vst.msk [vmem:[#allocation3 + $0x12c] sm:$0xf] %vm2494_vm5, %v2389_v31  ;;  %v2626_v31 = vld [vmem:[%s16355_s1 + $0xd8] sm:$0xff] }
 0x2ed   :  { %2748 = vperm.xlu0 %11379, %v2618_v30   ;;  %2743 = vperm.xlu2 %11378, %v2617_v29   ;;  %v2625_v30 = vld [vmem:[%s16355_s1 + $0xd0] sm:$0xff] }
 0x2ee   :  { %2738 = vperm.xlu1 %11377, %v2616_v51  }
 0x2ef   :  { %v2393_v39 = vpop.permute.xlu0 %2392 }
 0x2f0   :  { %2522 = vst.msk [vmem:[#allocation3 + $0x144] sm:$0xf] %vm2494_vm5, %v2393_v39  ;;  %v2415_v57 = vpop.permute.xlu2 %2414  ;;  %v2395_v27 = vpop.permute.xlu1 %2394  ;;  %v2630_v39 = vld [vmem:[%s16355_s1 + $0xf8] sm:$0xff] }
 0x2f1   :  { %2533 = vst.msk [vmem:[#allocation3 + $0x1c8] sm:$0xf] %vm2494_vm5, %v2415_v57  ;;  %v2629_v57 = vld [vmem:[%s16355_s1 + $0xf0] sm:$0xff] }
 0x2f2   :  { %2523 = vst.msk [vmem:[#allocation3 + $0x150] sm:$0xf] %vm2494_vm5, %v2395_v27  ;;  %v2628_v27 = vld [vmem:[%s16355_s1 + $0xe8] sm:$0xff] }
 0x2f5   :  { %2763 = vperm.xlu0 %11379, %v2621_v41   ;;  %2758 = vperm.xlu2 %11378, %v2620_v36  }
 0x2f6   :  { %2753 = vperm.xlu1 %11377, %v2619_v46  }
 0x2f7   :  { %v2399_v7 = vpop.permute.xlu0 %2398 }
 0x2f8   :  { %2525 = vst.msk [vmem:[#allocation3 + $0x168] sm:$0xf] %vm2494_vm5, %v2399_v7  ;;  %v2421_v62 = vpop.permute.xlu2 %2420  ;;  %v2401_v1 = vpop.permute.xlu1 %2400  ;;  %v2631_v7 = vld [vmem:[%s16355_s1 + $0x100] sm:$0xff] }
 0x2f9   :  { %2536 = vst.msk [vmem:[#allocation3 + $0x1ec] sm:$0xf] %vm2494_vm5, %v2421_v62 }
 0x2fa   :  { %2526 = vst.msk [vmem:[#allocation3 + $0x174] sm:$0xf] %vm2494_vm5, %v2401_v1 }
 0x2fd   :  { %2778 = vperm.xlu0 %11379, %v2624_v11   ;;  %2773 = vperm.xlu2 %11378, %v2623_v5   ;;  %v2635_v5 = vld [vmem:[%s16355_s1 + $0x120] sm:$0xff] }
 0x2fe   :  { %2768 = vperm.xlu1 %11377, %v2622_v45   ;;  %v2634_v45 = vld [vmem:[%s16355_s1 + $0x118] sm:$0xff] }
 0x2ff   :  { %v2405_v2 = vpop.permute.xlu0 %2404 }
 0x300   :  { %2528 = vst.msk [vmem:[#allocation3 + $0x18c] sm:$0xf] %vm2494_vm5, %v2405_v2  ;;  %v2427_v18 = vpop.permute.xlu2 %2426  ;;  %v2407_v15 = vpop.permute.xlu1 %2406 }
 0x301   :  { %2539 = vst.msk [vmem:[#allocation3 + $0x210] sm:$0xf] %vm2494_vm5, %v2427_v18 }
 0x302   :  { %2529 = vst.msk [vmem:[#allocation3 + $0x198] sm:$0xf] %vm2494_vm5, %v2407_v15  ;;  %v2638_v15 = vld [vmem:[%s16355_s1 + $0x138] sm:$0xff] }
 0x305   :  { %2793 = vperm.xlu0 %11379, %v2627_v10   ;;  %2788 = vperm.xlu2 %11378, %v2626_v31   ;;  %v2637_v10 = vld [vmem:[%s16355_s1 + $0x130] sm:$0xff] }
 0x306   :  { %2783 = vperm.xlu1 %11377, %v2625_v30  }
 0x307   :  { %v2411_v29 = vpop.permute.xlu0 %2410 }
 0x308   :  { %2531 = vst.msk [vmem:[#allocation3 + $0x1b0] sm:$0xf] %vm2494_vm5, %v2411_v29  ;;  %v2433_v51 = vpop.permute.xlu2 %2432  ;;  %v2413_v43 = vpop.permute.xlu1 %2412 }
 0x309   :  { %2542 = vst.msk [vmem:[#allocation3 + $0x234] sm:$0xf] %vm2494_vm5, %v2433_v51 }
 0x30a   :  { %2532 = vst.msk [vmem:[#allocation3 + $0x1bc] sm:$0xf] %vm2494_vm5, %v2413_v43 }
 0x30d   :  { %2808 = vperm.xlu0 %11379, %v2630_v39   ;;  %2803 = vperm.xlu2 %11378, %v2629_v57   ;;  %v2641_v39 = vld [vmem:[%s16355_s1 + $0x150] sm:$0xff] }
 0x30e   :  { %2798 = vperm.xlu1 %11377, %v2628_v27  }
 0x30f   :  { %v2417_v41 = vpop.permute.xlu0 %2416 }
 0x310   :  { %2534 = vst.msk [vmem:[#allocation3 + $0x1d4] sm:$0xf] %vm2494_vm5, %v2417_v41  ;;  %v2439_v36 = vpop.permute.xlu2 %2438  ;;  %v2419_v46 = vpop.permute.xlu1 %2418 }
 0x311   :  { %2545 = vst.msk [vmem:[#allocation3 + $0x258] sm:$0xf] %vm2494_vm5, %v2439_v36 }
 0x312   :  { %2535 = vst.msk [vmem:[#allocation3 + $0x1e0] sm:$0xf] %vm2494_vm5, %v2419_v46 }
 0x314   :  { %v399_v31 = vpop.f32.mrf.mxu0 }
 0x315   :  { %2823 = vperm.xlu0 %11379, %v12939_v19   ;;  %2818 = vperm.xlu2 %11378, %v2632_v14  }
 0x316   :  { %2813 = vperm.xlu1 %11377, %v2631_v7   ;;  %v2644_v7 = vld [vmem:[%s16355_s1 + $0x168] sm:$0xff] }
 0x317   :  { %v2423_v62 = vpop.permute.xlu0 %2422 }
 0x318   :  { %2537 = vst.msk [vmem:[#allocation3 + $0x1f8] sm:$0xf] %vm2494_vm5, %v2423_v62  ;;  %v13424_v1 = vpop.permute.xlu2 %2658  ;;  %v2425_v11 = vpop.permute.xlu1 %2424 }
 0x319   :  { %2538 = vst.msk [vmem:[#allocation3 + $0x204] sm:$0xf] %vm2494_vm5, %v2425_v11  ;;  %v11483_v11 = vld [vmem:[%s16355_s1 + $0x160] sm:$0xff] }
 0x31c   :  { %v402_v57 = vpop.f32.mrf.mxu0 }
 0x31d   :  { %2838 = vperm.xlu0 %11379, %v12954_v37   ;;  %2833 = vperm.xlu2 %11378, %v2635_v5   ;;  %v400_v37 = vadd.f32 %v13091_v23, %v399_v31  ;;  %v403_v27 = vadd.f32 %v13091_v23, %v402_v57  ;;  %v11485_v31 = vld [vmem:[%s16355_s1 + $0x178] sm:$0xff] }
 0x31e   :  { %2828 = vperm.xlu1 %11377, %v2634_v45   ;;  %v11486_v57 = vld [vmem:[%s16355_s1 + $0x198] sm:$0xff] }
 0x31f   :  { %v2429_v19 = vpop.permute.xlu0 %2428  ;;  %v475_v29 = vmax.f32 %v400_v37, 0.0  ;;  %v476_v36 = vmax.f32 %v403_v27, 0.0 }
 0x320   :  { %2540 = vst.msk [vmem:[#allocation3 + $0x21c] sm:$0xf] %vm2494_vm5, %v2429_v19  ;;  %v13435_v2 = vpop.permute.xlu2 %2673  ;;  %v2431_v18 = vpop.permute.xlu1 %2430 }
 0x321   :  { %2541 = vst.msk [vmem:[#allocation3 + $0x228] sm:$0xf] %vm2494_vm5, %v2431_v18 }
 0x322   :  { %556 = vst.msk [vmem:[#allocation2 + $0x1b0] sm:$0xff] %vm487_vm2, %v475_v29 }
 0x323   :  { %557 = vst.msk [vmem:[#allocation2 + $0x1b8] sm:$0xff] %vm487_vm2, %v476_v36 }
 0x324   :  { %v405_v62 = vpop.f32.mrf.mxu0 }
 0x325   :  { %2853 = vperm.xlu0 %11379, %v12969_v38   ;;  %2848 = vperm.xlu2 %11378, %v2638_v15   ;;  %v2640_v38 = vld [vmem:[%s16355_s1 + $0x148] sm:$0xff] }
 0x326   :  { %2843 = vperm.xlu1 %11377, %v2637_v10  }
 0x327   :  { %v2435_v30 = vpop.permute.xlu0 %2434 }
 0x328   :  { %2543 = vst.msk [vmem:[#allocation3 + $0x240] sm:$0xf] %vm2494_vm5, %v2435_v30  ;;  %v13447_v51 = vpop.permute.xlu2 %2683  ;;  %v2437_v43 = vpop.permute.xlu1 %2436 }
 0x329   :  { %2544 = vst.msk [vmem:[#allocation3 + $0x24c] sm:$0xf] %vm2494_vm5, %v2437_v43 }
 0x32c   :  { %v408_v15 = vpop.f32.mrf.mxu0 }
 0x32d   :  { %2868 = vperm.xlu0 %11379, %v12982_v32   ;;  %2863 = vperm.xlu2 %11378, %v2641_v39   ;;  %v406_v32 = vadd.f32 %v13091_v23, %v405_v62  ;;  %v409_v10 = vadd.f32 %v13091_v23, %v408_v15  ;;  %v2912_v62 = vmul.f32 %v13424_v1, %v13048_v44 }
 0x32e   :  { %2858 = vperm.xlu1 %11377, %v2640_v38   ;;  %v2917_v44 = vmul.f32 %v13447_v51, %v13065_v22 }
 0x32f   :  { %v2441_v41 = vpop.permute.xlu0 %2440  ;;  %v477_v45 = vmax.f32 %v406_v32, 0.0  ;;  %v478_v29 = vmax.f32 %v409_v10, 0.0 }
 0x330   :  { %2546 = vst.msk [vmem:[#allocation3 + $0x264] sm:$0xf] %vm2494_vm5, %v2441_v41  ;;  %v13460_v46 = vpop.permute.xlu2 %2698  ;;  %v2654_v14 = vpop.permute.xlu1 %2653 }
 0x331   :  { %558 = vst.msk [vmem:[#allocation2 + $0x1c0] sm:$0xff] %vm487_vm2, %v477_v45  ;;  %v2911_v37 = vmul.f32 %v2654_v14, %v13037_v13  ;;  %v11487_v13 = vld [vmem:[%s16355_s1 + $0x190] sm:$0xff] }
 0x332   :  { %559 = vst.msk [vmem:[#allocation2 + $0x1c8] sm:$0xff] %vm487_vm2, %v478_v29  ;;  %v2969_v29 = vpack.c.bf16 %v2917_v44, %v2917_v44 }
 0x334   :  { %v411_v38 = vpop.f32.mrf.mxu0 }
 0x335   :  { %2883 = vperm.xlu0 %11379, %v12997_v24   ;;  %2878 = vperm.xlu2 %11378, %v2644_v7   ;;  %v11484_v24 = vld [vmem:[%s16355_s1 + $0x180] sm:$0xff]  ;;  %v412_v27 = vadd.f32 %v13091_v23, %v411_v38 }
 0x336   :  { %2873 = vperm.xlu1 %11377, %v11483_v11  }
 0x337   :  { %v2664_v5 = vpop.permute.xlu0 %2663  ;;  %v479_v7 = vmax.f32 %v412_v27, 0.0 }
 0x338   :  { %v13471_v19 = vpop.permute.xlu2 %2713  ;;  %v2669_v18 = vpop.permute.xlu1 %2668  ;;  %v2913_v41 = vmul.f32 %v2664_v5, %v13055_v28 }
 0x339   :  { %v2914_v36 = vmul.f32 %v2669_v18, %v13050_v16  ;;  %560 = vst.msk [vmem:[#allocation2 + $0x1d0] sm:$0xff] %vm487_vm2, %v479_v7  ;;  %v2915_v18 = vmul.f32 %v13435_v2, %v13063_v55  ;;  %v2920_v55 = vmul.f32 %v13460_v46, %v13080_v54 }
 0x33a   :  { %v2965_v45 = vpack.c.bf16 %v2913_v41, %v2913_v41 }
 0x33b   :  { %v2966_v15 = vpack.c.bf16 %v2914_v36, %v2914_v36  ;;  %v2967_v38 = vpack.c.bf16 %v2915_v18, %v2915_v18  ;;  %v2972_v41 = vpack.c.bf16 %v2920_v55, %v2920_v55  ;;  %v3472_v18 = vld [vmem:[#allocation2 + $0x1b8] sm:$0xff] }
 0x33c   :  { %v414_v10 = vpop.f32.mrf.mxu0 }
 0x33d   :  { %2898 = vperm.xlu0 %11379, %v13012_v40   ;;  %2893 = vperm.xlu2 %11378, %v11484_v24   ;;  %v2963_v40 = vpack.c.bf16 %v2911_v37, %v2911_v37  ;;  %v2964_v24 = vpack.c.bf16 %v2912_v62, %v2912_v62  ;;  %v415_v16 = vadd.f32 %v13091_v23, %v414_v10 }
 0x33e   :  { %2888 = vperm.xlu1 %11377, %v11485_v31  }
 0x33f   :  { %v2689_v30 = vpop.permute.xlu0 %2688  ;;  %v480_v5 = vmax.f32 %v415_v16, 0.0 }
 0x340   :  { %v13483_v43 = vpop.permute.xlu2 %2728  ;;  %v2679_v39 = vpop.permute.xlu1 %2678 }
 0x341   :  { %v2916_v28 = vmul.f32 %v2679_v39, %v13070_v50  ;;  %561 = vst.msk [vmem:[#allocation2 + $0x1d8] sm:$0xff] %vm487_vm2, %v480_v5  ;;  %v2918_v39 = vmul.f32 %v2689_v30, %v13078_v48  ;;  %v2923_v48 = vmul.f32 %v13471_v19, %v13102_v34 }
 0x343   :  { %v2970_v7 = vpack.c.bf16 %v2918_v39, %v2918_v39  ;;  %v2975_v16 = vpack.c.bf16 %v2923_v48, %v2923_v48 }
 0x345   :  { %2908 = vperm.xlu2 %11378, %v11486_v57   ;;  %3067 = vrot.lane.b32.xlu0 %v2963_v40, %s11550_s18  ;;  %v2968_v40 = vpack.c.bf16 %v2916_v28, %v2916_v28  ;;  %v417_v57 = vpop.f32.mrf.mxu0 }
 0x346   :  { %2903 = vperm.xlu1 %11377, %v11487_v13   ;;  %v418_v22 = vadd.f32 %v13091_v23, %v417_v57 }
 0x347   :  { %v2704_v14 = vpop.permute.xlu0 %2703 }
 0x348   :  { %v13498_v32 = vpop.permute.xlu2 %2743  ;;  %v2694_v11 = vpop.permute.xlu1 %2693  ;;  %v481_v51 = vmax.f32 %v418_v22, 0.0 }
 0x349   :  { %v2919_v50 = vmul.f32 %v2694_v11, %v13085_v6 }
 0x34a   :  { %562 = vst.msk [vmem:[#allocation2 + $0x1e0] sm:$0xff] %vm487_vm2, %v481_v51  ;;  %v3473_v51 = vld [vmem:[#allocation2 + $0x1c0] sm:$0xff] }
 0x34b   :  { %v2971_v36 = vpack.c.bf16 %v2919_v50, %v2919_v50 }
 0x34d   :  { %3071 = vrot.lane.b32.xlu2 %v2965_v45, %s11550_s18  ;;  %3073 = vrot.lane.b32.xlu0 %v2966_v15, %s11550_s18  ;;  %v420_v62 = vpop.f32.mrf.mxu0  ;;  %v3471_v45 = vld [vmem:[#allocation2 + $0x1b0] sm:$0xff]  ;;  %v2921_v15 = vmul.f32 %v2704_v14, %v13100_v3  ;;  %v2926_v3 = vmul.f32 %v13483_v43, %v13117_v47 }
 0x34e   :  { %3069 = vrot.lane.b32.xlu1 %v2964_v24, %s11550_s18  ;;  %v421_v54 = vadd.f32 %v13091_v23, %v420_v62  ;;  %v3368_v6 = vpack.c.bf16 %v3471_v45, %v3471_v45 }
 0x34f   :  { %v2719_v1 = vpop.permute.xlu0 %2718  ;;  %v2973_v28 = vpack.c.bf16 %v2921_v15, %v2921_v15  ;;  %v2978_v57 = vpack.c.bf16 %v2926_v3, %v2926_v3 }
 0x350   :  { %v13510_v31 = vpop.permute.xlu2 %2758  ;;  %v2709_v37 = vpop.permute.xlu1 %2708  ;;  %v482_v11 = vmax.f32 %v421_v54, 0.0  ;;  %3420 = vst.msk [vmem:[#allocation3 + $0x1e4] sm:$0xf] %vm1036_vm3, %v3368_v6  ;;  %v3474_v54 = vld [vmem:[#allocation2 + $0x1c8] sm:$0xff] }
 0x351   :  { %v2922_v46 = vmul.f32 %v2709_v37, %v13107_v53  ;;  %v3369_v53 = vpack.c.bf16 %v3472_v18, %v3472_v18 }
 0x352   :  { %563 = vst.msk [vmem:[#allocation2 + $0x1e8] sm:$0xff] %vm487_vm2, %v482_v11 }
 0x353   :  { %v2974_v44 = vpack.c.bf16 %v2922_v46, %v2922_v46  ;;  %3421 = vst.msk [vmem:[#allocation3 + $0x1f0] sm:$0xf] %vm1036_vm3, %v3369_v53 }
 0x355   :  { %3079 = vrot.lane.b32.xlu0 %v2969_v29, %s11550_s18  ;;  %3077 = vrot.lane.b32.xlu2 %v2968_v40, %s11550_s18  ;;  %v423_v5 = vpop.f32.mrf.mxu0  ;;  %v2924_v29 = vmul.f32 %v2719_v1, %v13115_v9  ;;  %v2929_v9 = vmul.f32 %v13498_v32, %v13132_v12  ;;  %v11488_v12 = vld [vmem:[%s16357_s3] ss:$0 sm:$0xff]  ;;  %v2932_v32 = vmul.f32 %v13510_v31, %v13147_v21 }
 0x356   :  { %3075 = vrot.lane.b32.xlu1 %v2967_v38, %s11550_s18  ;;  %v424_v34 = vadd.f32 %v13091_v23, %v423_v5 }
 0x357   :  { %v2734_v2 = vpop.permute.xlu0 %2733  ;;  %v2976_v55 = vpack.c.bf16 %v2924_v29, %v2924_v29 }
 0x358   :  { %v13521_v27 = vpop.permute.xlu2 %2773  ;;  %v2724_v13 = vpop.permute.xlu1 %2723  ;;  %v483_v37 = vmax.f32 %v424_v34, 0.0 }
 0x359   :  { %v2925_v19 = vmul.f32 %v2724_v13, %v13122_v58  ;;  %v3370_v58 = vpack.c.bf16 %v3473_v51, %v3473_v51  ;;  %v2927_v13 = vmul.f32 %v2734_v2, %v13130_v60  ;;  %v3371_v60 = vpack.c.bf16 %v3474_v54, %v3474_v54 }
 0x35a   :  { %564 = vst.msk [vmem:[#allocation2 + $0x1f0] sm:$0xff] %vm487_vm2, %v483_v37 }
 0x35b   :  { %v2977_v22 = vpack.c.bf16 %v2925_v19, %v2925_v19  ;;  %3422 = vst.msk [vmem:[#allocation3 + $0x1fc] sm:$0xf] %vm1036_vm3, %v3370_v58  ;;  %v2979_v62 = vpack.c.bf16 %v2927_v13, %v2927_v13  ;;  %v3476_v19 = vld [vmem:[#allocation2 + $0x1d8] sm:$0xff]  ;;  %v11135_v13 = vld [vmem:[%s16358_s4 + $0x28] sm:$0xff] }
 0x35c   :  { %3423 = vst.msk [vmem:[#allocation3 + $0x208] sm:$0xf] %vm1036_vm3, %v3371_v60  ;;  %v3373_v37 = vpack.c.bf16 %v3476_v19, %v3476_v19 }
 0x35d   :  { %3085 = vrot.lane.b32.xlu0 %v2972_v41, %s11550_s18  ;;  %3083 = vrot.lane.b32.xlu2 %v2971_v36, %s11550_s18  ;;  %v426_v50 = vpop.f32.mrf.mxu0 }
 0x35e   :  { %3081 = vrot.lane.b32.xlu1 %v2970_v7, %s11550_s18  ;;  %v427_v47 = vadd.f32 %v13091_v23, %v426_v50  ;;  %v2981_v23 = vpack.c.bf16 %v2929_v9, %v2929_v9  ;;  %3425 = vst.msk [vmem:[#allocation3 + $0x220] sm:$0xf] %vm1036_vm3, %v3373_v37  ;;  %v3477_v50 = vld [vmem:[#allocation2 + $0x1e0] sm:$0xff] }
 0x35f   :  { %v2749_v30 = vpop.permute.xlu0 %2748 }
 0x360   :  { %v13533_v24 = vpop.permute.xlu2 %2788  ;;  %v2739_v10 = vpop.permute.xlu1 %2738  ;;  %v484_v39 = vmax.f32 %v427_v47, 0.0  ;;  %v2930_v46 = vmul.f32 %v2749_v30, %v13145_v33 }
 0x361   :  { %v2928_v43 = vmul.f32 %v2739_v10, %v13137_v42  ;;  %v2984_v10 = vpack.c.bf16 %v2932_v32, %v2932_v32 }
 0x362   :  { %565 = vst.msk [vmem:[#allocation2 + $0x1f8] sm:$0xff] %vm487_vm2, %v484_v39 }
 0x363   :  { %v2980_v7 = vpack.c.bf16 %v2928_v43, %v2928_v43 }
 0x365   :  { %3091 = vrot.lane.b32.xlu0 %v2975_v16, %s11550_s18  ;;  %3089 = vrot.lane.b32.xlu2 %v2974_v44, %s11550_s18  ;;  %v429_v45 = vpop.f32.mrf.mxu0  ;;  %v2982_v44 = vpack.c.bf16 %v2930_v46, %v2930_v46  ;;  %v2581_v46 = vld [vmem:[#allocation2 + $0x178] sm:$0xff] }
 0x366   :  { %3087 = vrot.lane.b32.xlu1 %v2973_v28, %s11550_s18  ;;  %v430_v42 = vadd.f32 %v11488_v12, %v429_v45  ;;  %v3475_v28 = vld [vmem:[#allocation2 + $0x1d0] sm:$0xff] }
 0x367   :  { %v2764_v14 = vpop.permute.xlu0 %2763  ;;  %v3372_v21 = vpack.c.bf16 %v3475_v28, %v3475_v28 }
 0x368   :  { %v13545_v40 = vpop.permute.xlu2 %2803  ;;  %v2754_v38 = vpop.permute.xlu1 %2753  ;;  %v485_v48 = vmax.f32 %v430_v42, 0.0  ;;  %v2933_v30 = vmul.f32 %v2764_v14, %v13160_v8 }
 0x369   :  { %v2931_v2 = vmul.f32 %v2754_v38, %v13152_v0  ;;  %v2935_v0 = vmul.f32 %v13521_v27, %v13162_v56  ;;  %3424 = vst.msk [vmem:[#allocation3 + $0x214] sm:$0xf] %vm1036_vm3, %v3372_v21  ;;  %v2938_v56 = vmul.f32 %v13533_v24, %v13177_v26  ;;  %v3374_v26 = vpack.c.bf16 %v3477_v50, %v3477_v50  ;;  %v2575_v24 = vld [vmem:[#allocation2 + $0x148] sm:$0xff] }
 0x36a   :  { %566 = vst.msk [vmem:[#allocation2 + $0x200] sm:$0xff] %vm487_vm2, %v485_v48  ;;  %v2985_v3 = vpack.c.bf16 %v2933_v30, %v2933_v30  ;;  %v11131_v21 = vld [vmem:[%s16358_s4 + $0x8] sm:$0xff]  ;;  %v11130_v30 = vld [vmem:[%s16358_s4] sm:$0xff] }
 0x36b   :  { %v2983_v16 = vpack.c.bf16 %v2931_v2, %v2931_v2  ;;  %v2987_v34 = vpack.c.bf16 %v2935_v0, %v2935_v0  ;;  %v2990_v38 = vpack.c.bf16 %v2938_v56, %v2938_v56  ;;  %3426 = vst.msk [vmem:[#allocation3 + $0x22c] sm:$0xf] %vm1036_vm3, %v3374_v26  ;;  %v11133_v2 = vld [vmem:[%s16358_s4 + $0x18] sm:$0xff] }
 0x36d   :  { %3097 = vrot.lane.b32.xlu0 %v2978_v57, %s11550_s18  ;;  %3095 = vrot.lane.b32.xlu2 %v2977_v22, %s11550_s18  ;;  %v11137_v22 = vld [vmem:[%s16358_s4 + $0x38] sm:$0xff] }
 0x36e   :  { %3093 = vrot.lane.b32.xlu1 %v2976_v55, %s11550_s18  ;;  %6856 = vmatpush.bf16.msra.mxu1 %v11137_v22  ;;  %v2587_v22 = vld [vmem:[#allocation2 + $0x1a8] sm:$0xff] }
 0x36f   :  { %v2779_v1 = vpop.permute.xlu0 %2778 }
 0x370   :  { %v13557_v41 = vpop.permute.xlu2 %2818  ;;  %v2769_v36 = vpop.permute.xlu1 %2768  ;;  %v2936_v27 = vmul.f32 %v2779_v1, %v13175_v4  ;;  %v11136_v4 = vld [vmem:[%s16358_s4 + $0x30] sm:$0xff] }
 0x371   :  { %v2934_v33 = vmul.f32 %v2769_v36, %v13167_v20 }
 0x372   :  { %v2988_v55 = vpack.c.bf16 %v2936_v27, %v2936_v27  ;;  %6857 = vmatpush.bf16.msra.mxu1 %v11136_v4 }
 0x373   :  { %v2986_v53 = vpack.c.bf16 %v2934_v33, %v2934_v33 }
 0x375   :  { %3103 = vrot.lane.b32.xlu0 %v2981_v23, %s11550_s18  ;;  %3101 = vrot.lane.b32.xlu2 %v2980_v7, %s11550_s18  ;;  %v2944_v23 = vmul.f32 %v13557_v41, %v13200_v49  ;;  %v2578_v7 = vld [vmem:[#allocation2 + $0x160] sm:$0xff]  ;;  %v3479_v49 = vld [vmem:[#allocation2 + $0x1f0] sm:$0xff] }
 0x376   :  { %3099 = vrot.lane.b32.xlu1 %v2979_v62, %s11550_s18  ;;  %6858 = vmatpush.bf16.msra.mxu1 %v11135_v13  ;;  %v11132_v41 = vld [vmem:[%s16358_s4 + $0x10] sm:$0xff] }
 0x377   :  { %v2794_v6 = vpop.permute.xlu0 %2793  ;;  %v2996_v60 = vpack.c.bf16 %v2944_v23, %v2944_v23 }
 0x378   :  { %v13571_v11 = vpop.permute.xlu2 %2833  ;;  %v2784_v15 = vpop.permute.xlu1 %2783  ;;  %v2939_v58 = vmul.f32 %v2794_v6, %v2575_v24 }
 0x379   :  { %v2937_v20 = vmul.f32 %v2784_v15, %v13182_v59  ;;  %v2941_v59 = vmul.f32 %v13545_v40, %v13189_v52  ;;  %v3478_v52 = vld [vmem:[#allocation2 + $0x1e8] sm:$0xff]  ;;  %v11134_v40 = vld [vmem:[%s16358_s4 + $0x20] sm:$0xff]  ;;  %v2947_v48 = vmul.f32 %v13571_v11, %v13212_v25  ;;  %v3480_v25 = vld [vmem:[#allocation2 + $0x1f8] sm:$0xff] }
 0x37a   :  { %v2991_v36 = vpack.c.bf16 %v2939_v58, %v2939_v58  ;;  %6859 = vmatpush.bf16.msra.mxu1 %v11134_v40  ;;  %v2586_v11 = vld [vmem:[#allocation2 + $0x1a0] sm:$0xff]  ;;  %v2592_v58 = vld [vmem:[#allocation2 + $0x1d0] sm:$0xff] }
 0x37b   :  { %v2989_v57 = vpack.c.bf16 %v2937_v20, %v2937_v20  ;;  %v2993_v1 = vpack.c.bf16 %v2941_v59, %v2941_v59  ;;  %v2999_v0 = vpack.c.bf16 %v2947_v48, %v2947_v48  ;;  %v2598_v48 = vld [vmem:[#allocation2 + $0x200] sm:$0xff] }
 0x37d   :  { %3109 = vrot.lane.b32.xlu0 %v2984_v10, %s11550_s18  ;;  %3107 = vrot.lane.b32.xlu2 %v2983_v16, %s11550_s18 }
 0x37e   :  { %3105 = vrot.lane.b32.xlu1 %v2982_v44, %s11550_s18  ;;  %6860 = vmatpush.bf16.msra.mxu1 %v11133_v2 }
 0x37f   :  { %v2809_v31 = vpop.permute.xlu0 %2808 }
 0x380   :  { %v13582_v5 = vpop.permute.xlu2 %2848  ;;  %v2799_v18 = vpop.permute.xlu1 %2798  ;;  %v2942_v54 = vmul.f32 %v2809_v31, %v2578_v7 }
 0x381   :  { %v2940_v51 = vmul.f32 %v2799_v18, %v13193_v63  ;;  %v3375_v63 = vpack.c.bf16 %v3478_v52, %v3478_v52  ;;  %v2950_v18 = vmul.f32 %v13582_v5, %v2586_v11 }
 0x382   :  { %v2994_v6 = vpack.c.bf16 %v2942_v54, %v2942_v54  ;;  %6861 = vmatpush.bf16.msra.mxu1 %v11132_v41 }
 0x383   :  { %v2992_v39 = vpack.c.bf16 %v2940_v51, %v2940_v51  ;;  %3427 = vst.msk [vmem:[#allocation3 + $0x238] sm:$0xf] %vm1036_vm3, %v3375_v63  ;;  %v3002_v20 = vpack.c.bf16 %v2950_v18, %v2950_v18 }
 0x385   :  { %3115 = vrot.lane.b32.xlu0 %v2987_v34, %s11550_s18  ;;  %3113 = vrot.lane.b32.xlu2 %v2986_v53, %s11550_s18  ;;  %v2584_v34 = vld [vmem:[#allocation2 + $0x190] sm:$0xff] }
 0x386   :  { %3111 = vrot.lane.b32.xlu1 %v2985_v3, %s11550_s18  ;;  %6862 = vmatpush.bf16.msra.mxu1 %v11131_v21 }
 0x387   :  { %v2824_v8 = vpop.permute.xlu0 %2823 }
 0x388   :  { %v13592_v14 = vpop.permute.xlu2 %2863  ;;  %v2814_v29 = vpop.permute.xlu1 %2813  ;;  %v2945_v16 = vmul.f32 %v2824_v8, %v2581_v46 }
 0x389   :  { %v2943_v62 = vmul.f32 %v2814_v29, %v13204_v61  ;;  %v3376_v61 = vpack.c.bf16 %v3479_v49, %v3479_v49  ;;  %v3481_v29 = vld [vmem:[#allocation2 + $0x200] sm:$0xff] }
 0x38a   :  { %v2997_v31 = vpack.c.bf16 %v2945_v16, %v2945_v16  ;;  %6863 = vmatpush.bf16.msra.mxu1 %v11130_v30  ;;  %v3378_v5 = vpack.c.bf16 %v3481_v29, %v3481_v29 }
 0x38b   :  { %v2995_v32 = vpack.c.bf16 %v2943_v62, %v2943_v62  ;;  %3428 = vst.msk [vmem:[#allocation3 + $0x244] sm:$0xf] %vm1036_vm3, %v3376_v61  ;;  %v2595_v62 = vld [vmem:[#allocation2 + $0x1e8] sm:$0xff] }
 0x38c   :  { %3430 = vst.msk [vmem:[#allocation3 + $0x25c] sm:$0xf] %vm1036_vm3, %v3378_v5 }
 0x38d   :  { %3121 = vrot.lane.b32.xlu0 %v2990_v38, %s11550_s18  ;;  %3119 = vrot.lane.b32.xlu2 %v2989_v57, %s11550_s18  ;;  %v2588_v38 = vld [vmem:[#allocation2 + $0x1b0] sm:$0xff] }
 0x38e   :  { %3117 = vrot.lane.b32.xlu1 %v2988_v55, %s11550_s18 }
 0x38f   :  { %v13606_v47 = vpop.permute.xlu0 %2838 }
 0x390   :  { %v13609_v9 = vpop.permute.xlu2 %2878  ;;  %v2829_v43 = vpop.permute.xlu1 %2828  ;;  %v2948_v19 = vmul.f32 %v13606_v47, %v2584_v34  ;;  %v11551_v47 = vmov 5  }
 0x391   :  { %v2946_v15 = vmul.f32 %v2829_v43, %v13219_v35  ;;  %v3377_v35 = vpack.c.bf16 %v3480_v25, %v3480_v25  ;;  %11382 = vset.pattern.permute.xlu0 %v11551_v47  ;;  %11380 = vset.pattern.permute.xlu1 %v11551_v47 }
 0x392   :  { %v3000_v27 = vpack.c.bf16 %v2948_v19, %v2948_v19  ;;  %11381 = vset.pattern.permute.xlu2 %v11551_v47  ;;  %v3485_v19 = vld [vmem:[%s16355_s1 + $0x8] sm:$0xff] }
 0x393   :  { %v2998_v33 = vpack.c.bf16 %v2946_v15, %v2946_v15  ;;  %3429 = vst.msk [vmem:[#allocation3 + $0x250] sm:$0xf] %vm1036_vm3, %v3377_v35  ;;  %v2597_v15 = vld [vmem:[#allocation2 + $0x1f8] sm:$0xff] }
 0x395   :  { %3127 = vrot.lane.b32.xlu0 %v2993_v1, %s11550_s18  ;;  %3125 = vrot.lane.b32.xlu2 %v2992_v39, %s11550_s18  ;;  %v2956_v1 = vmul.f32 %v13609_v9, %v2592_v58  ;;  %v2590_v39 = vld [vmem:[#allocation2 + $0x1c0] sm:$0xff] }
 0x396   :  { %3123 = vrot.lane.b32.xlu1 %v2991_v36, %s11550_s18  ;;  %v2594_v9 = vld [vmem:[#allocation2 + $0x1e0] sm:$0xff] }
 0x397   :  { %v13623_v45 = vpop.permute.xlu0 %2853  ;;  %v3008_v23 = vpack.c.bf16 %v2956_v1, %v2956_v1  ;;  %v3497_v1 = vld [vmem:[%s16355_s1 + $0x68] sm:$0xff] }
 0x398   :  { %v13626_v12 = vpop.permute.xlu2 %2893  ;;  %v2844_v42 = vpop.permute.xlu1 %2843  ;;  %v2951_v26 = vmul.f32 %v13623_v45, %v2587_v22 }
 0x399   :  { %v2949_v53 = vmul.f32 %v2844_v42, %v13235_v17  ;;  %v2589_v17 = vld [vmem:[#allocation2 + $0x1b8] sm:$0xff]  ;;  %v2959_v54 = vmul.f32 %v13626_v12, %v2595_v62 }
 0x39a   :  { %v2953_v57 = vmul.f32 %v13592_v14, %v2589_v17  ;;  %v3003_v43 = vpack.c.bf16 %v2951_v26, %v2951_v26  ;;  %v2591_v14 = vld [vmem:[#allocation2 + $0x1c8] sm:$0xff]  ;;  %v2593_v42 = vld [vmem:[#allocation2 + $0x1d8] sm:$0xff]  ;;  %v3494_v26 = vld [vmem:[%s16355_s1 + $0x50] sm:$0xff] }
 0x39b   :  { %v3001_v8 = vpack.c.bf16 %v2949_v53, %v2949_v53  ;;  %v3011_v61 = vpack.c.bf16 %v2959_v54, %v2959_v54  ;;  %v3491_v17 = vld [vmem:[%s16355_s1 + $0x38] sm:$0xff] }
 0x39c   :  { %v3005_v24 = vpack.c.bf16 %v2953_v57, %v2953_v57  ;;  %v3487_v57 = vld [vmem:[%s16355_s1 + $0x18] sm:$0xff] }
 0x39d   :  { %3133 = vrot.lane.b32.xlu0 %v2996_v60, %s11550_s18  ;;  %3131 = vrot.lane.b32.xlu2 %v2995_v32, %s11550_s18 }
 0x39e   :  { %3129 = vrot.lane.b32.xlu1 %v2994_v6, %s11550_s18 }
 0x39f   :  { %v13640_v10 = vpop.permute.xlu0 %2868 }
 0x3a0   :  { %v13643_v44 = vpop.permute.xlu2 %2908  ;;  %v2859_v28 = vpop.permute.xlu1 %2858  ;;  %v2954_v52 = vmul.f32 %v13640_v10, %v2590_v39  ;;  %v2596_v10 = vld [vmem:[#allocation2 + $0x1f0] sm:$0xff]  ;;  %v3493_v39 = vld [vmem:[%s16355_s1 + $0x48] sm:$0xff] }
 0x3a1   :  { %v2952_v55 = vmul.f32 %v2859_v28, %v2588_v38  ;;  %v2962_v12 = vmul.f32 %v13643_v44, %v2598_v48  ;;  %v3488_v38 = vld [vmem:[%s16355_s1 + $0x20] sm:$0xff]  ;;  %v3506_v48 = vld [vmem:[%s16355_s1 + $0xb0] sm:$0xff] }
 0x3a2   :  { %v3006_v45 = vpack.c.bf16 %v2954_v52, %v2954_v52 }
 0x3a3   :  { %v3004_v51 = vpack.c.bf16 %v2952_v55, %v2952_v55  ;;  %v3014_v11 = vpack.c.bf16 %v2962_v12, %v2962_v12 }
 0x3a5   :  { %3139 = vrot.lane.b32.xlu0 %v2999_v0, %s11550_s18  ;;  %3137 = vrot.lane.b32.xlu2 %v2998_v33, %s11550_s18 }
 0x3a6   :  { %3135 = vrot.lane.b32.xlu1 %v2997_v31, %s11550_s18 }
 0x3a7   :  { %v2884_v3 = vpop.permute.xlu0 %2883 }
 0x3a8   :  { %v3072_v37 = vpop.permute.xlu2 %3071  ;;  %v2874_v56 = vpop.permute.xlu1 %2873  ;;  %v2957_v2 = vmul.f32 %v2884_v3, %v2593_v42  ;;  %v3486_v3 = vld [vmem:[%s16355_s1 + $0x10] sm:$0xff] }
 0x3a9   :  { %3226 = vst.msk [vmem:[#allocation3 + $0x18] sm:$0xf] %vm3223_vm6, %v3072_v37  ;;  %v2955_v13 = vmul.f32 %v2874_v56, %v2591_v14  ;;  %v3484_v37 = vld [vmem:[%s16355_s1] sm:$0xff] }
 0x3aa   :  { %v3009_v46 = vpack.c.bf16 %v2957_v2, %v2957_v2  ;;  %v3499_v2 = vld [vmem:[%s16355_s1 + $0x78] sm:$0xff] }
 0x3ab   :  { %v3007_v7 = vpack.c.bf16 %v2955_v13, %v2955_v13  ;;  %v3492_v13 = vld [vmem:[%s16355_s1 + $0x40] sm:$0xff] }
 0x3ad   :  { %3145 = vrot.lane.b32.xlu0 %v3002_v20, %s11550_s18  ;;  %3143 = vrot.lane.b32.xlu2 %v3001_v8, %s11550_s18 }
 0x3ae   :  { %3141 = vrot.lane.b32.xlu1 %v3000_v27, %s11550_s18 }
 0x3af   :  { %v2899_v50 = vpop.permute.xlu0 %2898 }
 0x3b0   :  { %v3078_v4 = vpop.permute.xlu2 %3077  ;;  %v2889_v59 = vpop.permute.xlu1 %2888  ;;  %v2960_v21 = vmul.f32 %v2899_v50, %v2596_v10  ;;  %v9824_v29 = vld [vmem:[#allocation3 + $0x18] sm:$0xf] }
 0x3b1   :  { %3229 = vst.msk [vmem:[#allocation3 + $0x3c] sm:$0xf] %vm3223_vm6, %v3078_v4  ;;  %v2958_v60 = vmul.f32 %v2889_v59, %v2594_v9  ;;  %v3490_v4 = vld [vmem:[%s16355_s1 + $0x30] sm:$0xff]  ;;  %v3489_v59 = vld [vmem:[%s16355_s1 + $0x28] sm:$0xff] }
 0x3b2   :  { %v3012_v18 = vpack.c.bf16 %v2960_v21, %v2960_v21 }
 0x3b3   :  { %v3010_v41 = vpack.c.bf16 %v2958_v60, %v2958_v60 }
 0x3b5   :  { %3151 = vrot.lane.b32.xlu0 %v3005_v24, %s11550_s18  ;;  %3149 = vrot.lane.b32.xlu2 %v3004_v51, %s11550_s18 }
 0x3b6   :  { %3147 = vrot.lane.b32.xlu1 %v3003_v43, %s11550_s18 }
 0x3b7   :  { %v3068_v36 = vpop.permute.xlu0 %3067 }
 0x3b8   :  { %3224 = vst.msk [vmem:[#allocation3] sm:$0xf] %vm3223_vm6, %v3068_v36  ;;  %v3084_v63 = vpop.permute.xlu2 %3083  ;;  %v2904_v40 = vpop.permute.xlu1 %2903  ;;  %v11059_v43 = vld [vmem:[#allocation3 + $0x38] sm:$0xf0] }
 0x3b9   :  { %3232 = vst.msk [vmem:[#allocation3 + $0x60] sm:$0xf] %vm3223_vm6, %v3084_v63  ;;  %v2961_v16 = vmul.f32 %v2904_v40, %v2597_v15  ;;  %v3500_v40 = vld [vmem:[%s16355_s1 + $0x80] sm:$0xff]  ;;  %v3501_v15 = vld [vmem:[%s16355_s1 + $0x88] sm:$0xff] }
 0x3bb   :  { %v3013_v30 = vpack.c.bf16 %v2961_v16, %v2961_v16 }
 0x3bd   :  { %3157 = vrot.lane.b32.xlu0 %v3008_v23, %s11550_s18  ;;  %3155 = vrot.lane.b32.xlu2 %v3007_v7, %s11550_s18  ;;  %v3496_v23 = vld [vmem:[%s16355_s1 + $0x60] sm:$0xff]  ;;  %v3495_v7 = vld [vmem:[%s16355_s1 + $0x58] sm:$0xff] }
 0x3be   :  { %3153 = vrot.lane.b32.xlu1 %v3006_v45, %s11550_s18 }
 0x3bf   :  { %v3074_v32 = vpop.permute.xlu0 %3073  ;;  %v9812_v31 = vld [vmem:[#allocation3] sm:$0xf] }
 0x3c0   :  { %3227 = vst.msk [vmem:[#allocation3 + $0x24] sm:$0xf] %vm3223_vm6, %v3074_v32  ;;  %v3090_v6 = vpop.permute.xlu2 %3089  ;;  %v3070_v49 = vpop.permute.xlu1 %3069  ;;  %v3503_v32 = vld [vmem:[%s16355_s1 + $0x98] sm:$0xff]  ;;  %v9860_v21 = vld [vmem:[#allocation3 + $0x60] sm:$0xf] }
 0x3c1   :  { %3235 = vst.msk [vmem:[#allocation3 + $0x84] sm:$0xf] %vm3223_vm6, %v3090_v6  ;;  %v3498_v6 = vld [vmem:[%s16355_s1 + $0x70] sm:$0xff] }
 0x3c2   :  { %3225 = vst.msk [vmem:[#allocation3 + $0xc] sm:$0xf] %vm3223_vm6, %v3070_v49 }
 0x3c5   :  { %3163 = vrot.lane.b32.xlu0 %v3011_v61, %s11550_s18  ;;  %3161 = vrot.lane.b32.xlu2 %v3010_v41, %s11550_s18 }
 0x3c6   :  { %3159 = vrot.lane.b32.xlu1 %v3009_v46, %s11550_s18  ;;  %v3502_v46 = vld [vmem:[%s16355_s1 + $0x90] sm:$0xff] }
 0x3c7   :  { %v3080_v28 = vpop.permute.xlu0 %3079  ;;  %v11056_v20 = vld [vmem:[#allocation3 + $0x20] sm:$0xf0] }
 0x3c8   :  { %3230 = vst.msk [vmem:[#allocation3 + $0x48] sm:$0xf] %vm3223_vm6, %v3080_v28  ;;  %v3096_v0 = vpop.permute.xlu2 %3095  ;;  %v3076_v33 = vpop.permute.xlu1 %3075  ;;  %v9825_v5 = vor.u32 %v11056_v20, %v9824_v29  ;;  %v3510_v29 = vld [vmem:[%s16355_s1 + $0xd0] sm:$0xff] }
 0x3c9   :  { %3238 = vst.msk [vmem:[#allocation3 + $0xa8] sm:$0xf] %vm3223_vm6, %v3096_v0  ;;  %v11053_v25 = vld [vmem:[#allocation3 + $0x8] sm:$0xf0] }
 0x3ca   :  { %3228 = vst.msk [vmem:[#allocation3 + $0x30] sm:$0xf] %vm3223_vm6, %v3076_v33  ;;  %v9813_v35 = vor.u32 %v11053_v25, %v9812_v31  ;;  %v3509_v33 = vld [vmem:[%s16355_s1 + $0xc8] sm:$0xff]  ;;  %v3504_v25 = vld [vmem:[%s16355_s1 + $0xa0] sm:$0xff] }
 0x3cb   :  { %v3505_v31 = vld [vmem:[%s16355_s1 + $0xa8] sm:$0xff] }
 0x3cc   :  { %6864 = vmatmul.bf16.vlgmr.msra.gmra.mxu1 %v9813_v35 }
 0x3cd   :  { %3169 = vrot.lane.b32.xlu0 %v3014_v11, %s11550_s18  ;;  %3167 = vrot.lane.b32.xlu2 %v3013_v30, %s11550_s18 }
 0x3ce   :  { %3165 = vrot.lane.b32.xlu1 %v3012_v18, %s11550_s18  ;;  %v3512_v18 = vld [vmem:[%s16355_s1 + $0xe0] sm:$0xff] }
 0x3cf   :  { %v3086_v44 = vpop.permute.xlu0 %3085  ;;  %v9848_v42 = vld [vmem:[#allocation3 + $0x48] sm:$0xf] }
 0x3d0   :  { %3233 = vst.msk [vmem:[#allocation3 + $0x6c] sm:$0xf] %vm3223_vm6, %v3086_v44  ;;  %v3102_v34 = vpop.permute.xlu2 %3101  ;;  %v3082_v53 = vpop.permute.xlu1 %3081  ;;  %v3508_v44 = vld [vmem:[%s16355_s1 + $0xc0] sm:$0xff] }
 0x3d1   :  { %3241 = vst.msk [vmem:[#allocation3 + $0xcc] sm:$0xf] %vm3223_vm6, %v3102_v34  ;;  %v9836_v51 = vld [vmem:[#allocation3 + $0x30] sm:$0xf]  ;;  %v3507_v34 = vld [vmem:[%s16355_s1 + $0xb8] sm:$0xff] }
 0x3d2   :  { %3231 = vst.msk [vmem:[#allocation3 + $0x54] sm:$0xf] %vm3223_vm6, %v3082_v53  ;;  %v9837_v14 = vor.u32 %v11059_v43, %v9836_v51  ;;  %v3517_v43 = vld [vmem:[%s16355_s1 + $0x108] sm:$0xff] }
 0x3d5   :  { %3548 = vperm.xlu0 %11382, %v3486_v3   ;;  %3543 = vperm.xlu2 %11381, %v3485_v19  }
 0x3d6   :  { %3538 = vperm.xlu1 %11380, %v3484_v37  }
 0x3d7   :  { %v3092_v56 = vpop.permute.xlu0 %3091  ;;  %v11065_v12 = vld [vmem:[#allocation3 + $0x68] sm:$0xf0] }
 0x3d8   :  { %3236 = vst.msk [vmem:[#allocation3 + $0x90] sm:$0xf] %vm3223_vm6, %v3092_v56  ;;  %v3108_v8 = vpop.permute.xlu2 %3107  ;;  %v3088_v27 = vpop.permute.xlu1 %3087  ;;  %v9861_v0 = vor.u32 %v11065_v12, %v9860_v21  ;;  %v11068_v56 = vld [vmem:[#allocation3 + $0x80] sm:$0xf0]  ;;  %v11077_v12 = vld [vmem:[#allocation3 + $0xc8] sm:$0xf0] }
 0x3d9   :  { %3244 = vst.msk [vmem:[#allocation3 + $0xf0] sm:$0xf] %vm3223_vm6, %v3108_v8  ;;  %v11062_v45 = vld [vmem:[#allocation3 + $0x50] sm:$0xf0]  ;;  %v3515_v8 = vld [vmem:[%s16355_s1 + $0xf8] sm:$0xff]  ;;  %v3529_v21 = vld [vmem:[%s16355_s1 + $0x168] sm:$0xff] }
 0x3da   :  { %3234 = vst.msk [vmem:[#allocation3 + $0x78] sm:$0xf] %vm3223_vm6, %v3088_v27  ;;  %v9849_v60 = vor.u32 %v11062_v45, %v9848_v42  ;;  %v3511_v27 = vld [vmem:[%s16355_s1 + $0xd8] sm:$0xff]  ;;  %v9896_v45 = vld [vmem:[#allocation3 + $0xa8] sm:$0xf] }
 0x3db   :  { %v3523_v42 = vld [vmem:[%s16355_s1 + $0x138] sm:$0xff] }
 0x3dc   :  { %6869 = vmatmul.bf16.gmra.mxu1 %v9825_v5 }
 0x3dd   :  { %3573 = vperm.xlu0 %11382, %v3491_v17   ;;  %3558 = vperm.xlu2 %11381, %v3488_v38  }
 0x3de   :  { %3553 = vperm.xlu1 %11380, %v3487_v57   ;;  %v3518_v57 = vld [vmem:[%s16355_s1 + $0x110] sm:$0xff] }
 0x3df   :  { %v3098_v22 = vpop.permute.xlu0 %3097  ;;  %v9884_v51 = vld [vmem:[#allocation3 + $0x90] sm:$0xf] }
 0x3e0   :  { %3239 = vst.msk [vmem:[#allocation3 + $0xb4] sm:$0xf] %vm3223_vm6, %v3098_v22  ;;  %v3114_v55 = vpop.permute.xlu2 %3113  ;;  %v3094_v50 = vpop.permute.xlu1 %3093  ;;  %v3514_v22 = vld [vmem:[%s16355_s1 + $0xf0] sm:$0xff] }
 0x3e1   :  { %3247 = vst.msk [vmem:[#allocation3 + $0x114] sm:$0xf] %vm3223_vm6, %v3114_v55  ;;  %v9872_v3 = vld [vmem:[#allocation3 + $0x78] sm:$0xf]  ;;  %v3513_v55 = vld [vmem:[%s16355_s1 + $0xe8] sm:$0xff] }
 0x3e2   :  { %3237 = vst.msk [vmem:[#allocation3 + $0x9c] sm:$0xf] %vm3223_vm6, %v3094_v50  ;;  %v9873_v20 = vor.u32 %v11068_v56, %v9872_v3  ;;  %v93_v50 = vld [vmem:[%s16356_s0 + $0x198] sm:$0xff]  ;;  %v11490_v3 = vld [vmem:[#allocation2 + $0x90] sm:$0xff] }
 0x3e3   :  { %9809 = vmatmul.msk.f32.gmra.mxu0 %vm101_vm1, %v93_v50 }
 0x3e5   :  { %3588 = vperm.xlu0 %11382, %v3494_v26   ;;  %3568 = vperm.xlu2 %11381, %v3490_v4  }
 0x3e6   :  { %3563 = vperm.xlu1 %11380, %v3489_v59  }
 0x3e7   :  { %v3104_v24 = vpop.permute.xlu0 %3103 }
 0x3e8   :  { %3242 = vst.msk [vmem:[#allocation3 + $0xd8] sm:$0xf] %vm3223_vm6, %v3104_v24  ;;  %v3120_v47 = vpop.permute.xlu2 %3119  ;;  %v3100_v58 = vpop.permute.xlu1 %3099 }
 0x3e9   :  { %3250 = vst.msk [vmem:[#allocation3 + $0x138] sm:$0xf] %vm3223_vm6, %v3120_v47  ;;  %v11071_v4 = vld [vmem:[#allocation3 + $0x98] sm:$0xf0] }
 0x3ea   :  { %3240 = vst.msk [vmem:[#allocation3 + $0xc0] sm:$0xf] %vm3223_vm6, %v3100_v58  ;;  %v9885_v47 = vor.u32 %v11071_v4, %v9884_v51  ;;  %v3521_v58 = vld [vmem:[%s16355_s1 + $0x128] sm:$0xff]  ;;  %v11493_v4 = vld [vmem:[#allocation2 + $0x80] sm:$0xff] }
 0x3ec   :  { %6874 = vmatmul.bf16.gmra.mxu1 %v9837_v14  ;;  %v3516_v14 = vld [vmem:[%s16355_s1 + $0x100] sm:$0xff] }
 0x3ed   :  { %3603 = vperm.xlu0 %11382, %v3497_v1   ;;  %3583 = vperm.xlu2 %11381, %v3493_v39  }
 0x3ee   :  { %3578 = vperm.xlu1 %11380, %v3492_v13  }
 0x3ef   :  { %v3110_v36 = vpop.permute.xlu0 %3109 }
 0x3f0   :  { %3245 = vst.msk [vmem:[#allocation3 + $0xfc] sm:$0xf] %vm3223_vm6, %v3110_v36  ;;  %v3126_v52 = vpop.permute.xlu2 %3125  ;;  %v3106_v63 = vpop.permute.xlu1 %3105  ;;  %v3524_v36 = vld [vmem:[%s16355_s1 + $0x140] sm:$0xff] }
 0x3f1   :  { %3253 = vst.msk [vmem:[#allocation3 + $0x15c] sm:$0xf] %vm3223_vm6, %v3126_v52  ;;  %v3520_v52 = vld [vmem:[%s16355_s1 + $0x120] sm:$0xff] }
 0x3f2   :  { %3243 = vst.msk [vmem:[#allocation3 + $0xe4] sm:$0xf] %vm3223_vm6, %v3106_v63  ;;  %v3519_v63 = vld [vmem:[%s16355_s1 + $0x118] sm:$0xff] }
 0x3f5   :  { %3618 = vperm.xlu0 %11382, %v3500_v40   ;;  %3598 = vperm.xlu2 %11381, %v3496_v23   ;;  %v11074_v23 = vld [vmem:[#allocation3 + $0xb0] sm:$0xf0] }
 0x3f6   :  { %3593 = vperm.xlu1 %11380, %v3495_v7  }
 0x3f7   :  { %v3116_v62 = vpop.permute.xlu0 %3115 }
 0x3f8   :  { %3248 = vst.msk [vmem:[#allocation3 + $0x120] sm:$0xf] %vm3223_vm6, %v3116_v62  ;;  %v3132_v9 = vpop.permute.xlu2 %3131  ;;  %v3112_v54 = vpop.permute.xlu1 %3111 }
 0x3f9   :  { %3256 = vst.msk [vmem:[#allocation3 + $0x180] sm:$0xf] %vm3223_vm6, %v3132_v9  ;;  %v9897_v9 = vor.u32 %v11074_v23, %v9896_v45  ;;  %v11080_v56 = vld [vmem:[#allocation3 + $0xe0] sm:$0xf0] }
 0x3fa   :  { %3246 = vst.msk [vmem:[#allocation3 + $0x108] sm:$0xf] %vm3223_vm6, %v3112_v54  ;;  %v3527_v54 = vld [vmem:[%s16355_s1 + $0x158] sm:$0xff] }
 0x3fc   :  { %6879 = vmatmul.bf16.gmra.mxu1 %v9849_v60  ;;  %v3522_v60 = vld [vmem:[%s16355_s1 + $0x130] sm:$0xff] }
 0x3fd   :  { %3633 = vperm.xlu0 %11382, %v3503_v32   ;;  %3613 = vperm.xlu2 %11381, %v3499_v2  }
 0x3fe   :  { %3608 = vperm.xlu1 %11380, %v3498_v6  }
 0x3ff   :  { %v3122_v49 = vpop.permute.xlu0 %3121 }
 0x400   :  { %3251 = vst.msk [vmem:[#allocation3 + $0x144] sm:$0xf] %vm3223_vm6, %v3122_v49  ;;  %v3138_v61 = vpop.permute.xlu2 %3137  ;;  %v3118_v41 = vpop.permute.xlu1 %3117  ;;  %v3530_v49 = vld [vmem:[%s16355_s1 + $0x170] sm:$0xff] }
 0x401   :  { %3259 = vst.msk [vmem:[#allocation3 + $0x1a4] sm:$0xf] %vm3223_vm6, %v3138_v61  ;;  %v3526_v61 = vld [vmem:[%s16355_s1 + $0x150] sm:$0xff] }
 0x402   :  { %3249 = vst.msk [vmem:[#allocation3 + $0x12c] sm:$0xf] %vm3223_vm6, %v3118_v41  ;;  %v3525_v41 = vld [vmem:[%s16355_s1 + $0x148] sm:$0xff] }
 0x405   :  { %3648 = vperm.xlu0 %11382, %v3506_v48   ;;  %3628 = vperm.xlu2 %11381, %v3502_v46   ;;  %v9908_v46 = vld [vmem:[#allocation3 + $0xc0] sm:$0xf] }
 0x406   :  { %3623 = vperm.xlu1 %11380, %v3501_v15  }
 0x407   :  { %v3128_v10 = vpop.permute.xlu0 %3127 }
 0x408   :  { %3254 = vst.msk [vmem:[#allocation3 + $0x168] sm:$0xf] %vm3223_vm6, %v3128_v10  ;;  %v3144_v16 = vpop.permute.xlu2 %3143  ;;  %v3124_v28 = vpop.permute.xlu1 %3123 }
 0x409   :  { %3262 = vst.msk [vmem:[#allocation3 + $0x1c8] sm:$0xf] %vm3223_vm6, %v3144_v16  ;;  %v9909_v16 = vor.u32 %v11077_v12, %v9908_v46 }
 0x40a   :  { %3252 = vst.msk [vmem:[#allocation3 + $0x150] sm:$0xf] %vm3223_vm6, %v3124_v28  ;;  %v3533_v28 = vld [vmem:[%s16355_s1 + $0x188] sm:$0xff] }
 0x40c   :  { %6884 = vmatmul.bf16.gmra.mxu1 %v9861_v0  ;;  %v3528_v0 = vld [vmem:[%s16355_s1 + $0x160] sm:$0xff] }
 0x40d   :  { %3663 = vperm.xlu0 %11382, %v3509_v33   ;;  %3643 = vperm.xlu2 %11381, %v3505_v31   ;;  %v11489_v31 = vld [vmem:[#allocation2 + $0x78] sm:$0xff] }
 0x40e   :  { %3638 = vperm.xlu1 %11380, %v3504_v25  }
 0x40f   :  { %v3134_v35 = vpop.permute.xlu0 %3133 }
 0x410   :  { %3257 = vst.msk [vmem:[#allocation3 + $0x18c] sm:$0xf] %vm3223_vm6, %v3134_v35  ;;  %v3150_v11 = vpop.permute.xlu2 %3149  ;;  %v3130_v30 = vpop.permute.xlu1 %3129 }
 0x411   :  { %3265 = vst.msk [vmem:[#allocation3 + $0x1ec] sm:$0xf] %vm3223_vm6, %v3150_v11 }
 0x412   :  { %3255 = vst.msk [vmem:[#allocation3 + $0x174] sm:$0xf] %vm3223_vm6, %v3130_v30 }
 0x415   :  { %3678 = vperm.xlu0 %11382, %v3512_v18   ;;  %3658 = vperm.xlu2 %11381, %v3508_v44   ;;  %v3532_v18 = vld [vmem:[%s16355_s1 + $0x180] sm:$0xff] }
 0x416   :  { %3653 = vperm.xlu1 %11380, %v3507_v34   ;;  %v3531_v34 = vld [vmem:[%s16355_s1 + $0x178] sm:$0xff] }
 0x417   :  { %v3140_v53 = vpop.permute.xlu0 %3139 }
 0x418   :  { %3260 = vst.msk [vmem:[#allocation3 + $0x1b0] sm:$0xf] %vm3223_vm6, %v3140_v53  ;;  %v3156_v19 = vpop.permute.xlu2 %3155  ;;  %v3136_v37 = vpop.permute.xlu1 %3135 }
 0x419   :  { %3268 = vst.msk [vmem:[#allocation3 + $0x210] sm:$0xf] %vm3223_vm6, %v3156_v19 }
 0x41a   :  { %3258 = vst.msk [vmem:[#allocation3 + $0x198] sm:$0xf] %vm3223_vm6, %v3136_v37 }
 0x41c   :  { %6889 = vmatmul.bf16.gmra.mxu1 %v9873_v20 }
 0x41d   :  { %3693 = vperm.xlu0 %11382, %v3515_v8   ;;  %3673 = vperm.xlu2 %11381, %v3511_v27   ;;  %v9920_v27 = vld [vmem:[#allocation3 + $0xd8] sm:$0xf] }
 0x41e   :  { %3668 = vperm.xlu1 %11380, %v3510_v29   ;;  %v9921_v29 = vor.u32 %v11080_v56, %v9920_v27 }
 0x41f   :  { %v3146_v5 = vpop.permute.xlu0 %3145 }
 0x420   :  { %3263 = vst.msk [vmem:[#allocation3 + $0x1d4] sm:$0xf] %vm3223_vm6, %v3146_v5  ;;  %v3162_v17 = vpop.permute.xlu2 %3161  ;;  %v3142_v38 = vpop.permute.xlu1 %3141  ;;  %v3535_v5 = vld [vmem:[%s16355_s1 + $0x198] sm:$0xff] }
 0x421   :  { %3271 = vst.msk [vmem:[#allocation3 + $0x234] sm:$0xf] %vm3223_vm6, %v3162_v17 }
 0x422   :  { %3261 = vst.msk [vmem:[#allocation3 + $0x1bc] sm:$0xf] %vm3223_vm6, %v3142_v38  ;;  %v3534_v38 = vld [vmem:[%s16355_s1 + $0x190] sm:$0xff] }
 0x425   :  { %3708 = vperm.xlu0 %11382, %v3518_v57   ;;  %3688 = vperm.xlu2 %11381, %v3514_v22   ;;  %v11491_v57 = vld [vmem:[#allocation2 + $0xa8] sm:$0xff] }
 0x426   :  { %3683 = vperm.xlu1 %11380, %v3513_v55   ;;  %v11492_v55 = vld [vmem:[#allocation2 + $0x88] sm:$0xff] }
 0x427   :  { %v3152_v26 = vpop.permute.xlu0 %3151 }
 0x428   :  { %3266 = vst.msk [vmem:[#allocation3 + $0x1f8] sm:$0xf] %vm3223_vm6, %v3152_v26  ;;  %v3168_v59 = vpop.permute.xlu2 %3167  ;;  %v3148_v24 = vpop.permute.xlu1 %3147 }
 0x429   :  { %3274 = vst.msk [vmem:[#allocation3 + $0x258] sm:$0xf] %vm3223_vm6, %v3168_v59 }
 0x42a   :  { %3264 = vst.msk [vmem:[#allocation3 + $0x1e0] sm:$0xf] %vm3223_vm6, %v3148_v24 }
 0x42c   :  { %6894 = vmatmul.bf16.gmra.mxu1 %v9885_v47 }
 0x42d   :  { %3723 = vperm.xlu0 %11382, %v3521_v58   ;;  %3703 = vperm.xlu2 %11381, %v3517_v43  }
 0x42e   :  { %3698 = vperm.xlu1 %11380, %v3516_v14  }
 0x42f   :  { %v3158_v1 = vpop.permute.xlu0 %3157 }
 0x430   :  { %3269 = vst.msk [vmem:[#allocation3 + $0x21c] sm:$0xf] %vm3223_vm6, %v3158_v1  ;;  %v13839_v39 = vpop.permute.xlu2 %3543  ;;  %v3154_v13 = vpop.permute.xlu1 %3153  ;;  %v11494_v1 = vld [vmem:[#allocation2 + $0xc0] sm:$0xff] }
 0x431   :  { %3267 = vst.msk [vmem:[#allocation3 + $0x204] sm:$0xf] %vm3223_vm6, %v3154_v13  ;;  %v3797_v59 = vmul.f32 %v11493_v4, %v13839_v39  ;;  %v11083_v39 = vld [vmem:[#allocation3 + $0xf8] sm:$0xf0] }
 0x433   :  { %v3849_v14 = vpack.c.bf16 %v3797_v59, %v3797_v59 }
 0x435   :  { %3738 = vperm.xlu0 %11382, %v3524_v36   ;;  %3718 = vperm.xlu2 %11381, %v3520_v52   ;;  %v11495_v36 = vld [vmem:[#allocation2 + $0xa0] sm:$0xff] }
 0x436   :  { %3713 = vperm.xlu1 %11380, %v3519_v63  }
 0x437   :  { %v3164_v40 = vpop.permute.xlu0 %3163 }
 0x438   :  { %3272 = vst.msk [vmem:[#allocation3 + $0x240] sm:$0xf] %vm3223_vm6, %v3164_v40  ;;  %v13852_v7 = vpop.permute.xlu2 %3558  ;;  %v3160_v62 = vpop.permute.xlu1 %3159  ;;  %v11496_v40 = vld [vmem:[#allocation2 + $0x98] sm:$0xff] }
 0x439   :  { %3270 = vst.msk [vmem:[#allocation3 + $0x228] sm:$0xf] %vm3223_vm6, %v3160_v62  ;;  %v3800_v23 = vmul.f32 %v11496_v40, %v13852_v7  ;;  %v11498_v7 = vld [vmem:[#allocation2 + $0xb8] sm:$0xff] }
 0x43c   :  { %6899 = vmatmul.bf16.gmra.mxu1 %v9897_v9  ;;  %v9932_v9 = vld [vmem:[#allocation3 + $0xf0] sm:$0xf] }
 0x43d   :  { %3753 = vperm.xlu0 %11382, %v3527_v54   ;;  %3733 = vperm.xlu2 %11381, %v3523_v42   ;;  %v9933_v54 = vor.u32 %v11083_v39, %v9932_v9 }
 0x43e   :  { %3728 = vperm.xlu1 %11380, %v3522_v60  }
 0x43f   :  { %v3170_v32 = vpop.permute.xlu0 %3169 }
 0x440   :  { %3275 = vst.msk [vmem:[#allocation3 + $0x264] sm:$0xf] %vm3223_vm6, %v3170_v32  ;;  %v3569_v2 = vpop.permute.xlu2 %3568  ;;  %v3166_v6 = vpop.permute.xlu1 %3165 }
 0x441   :  { %3273 = vst.msk [vmem:[#allocation3 + $0x24c] sm:$0xf] %vm3223_vm6, %v3166_v6  ;;  %v3802_v22 = vmul.f32 %v11491_v57, %v3569_v2  ;;  %v3852_v2 = vpack.c.bf16 %v3800_v23, %v3800_v23  ;;  %v11497_v6 = vld [vmem:[#allocation2 + $0xd8] sm:$0xff] }
 0x443   :  { %v3854_v58 = vpack.c.bf16 %v3802_v22, %v3802_v22  ;;  %v11505_v22 = vld [vmem:[#allocation2 + $0xe0] sm:$0xff] }
 0x445   :  { %3768 = vperm.xlu0 %11382, %v3530_v49   ;;  %3748 = vperm.xlu2 %11381, %v3526_v61  }
 0x446   :  { %3743 = vperm.xlu1 %11380, %v3525_v41  }
 0x447   :  { %v3549_v48 = vpop.permute.xlu0 %3548 }
 0x448   :  { %v3584_v15 = vpop.permute.xlu2 %3583  ;;  %v3539_v10 = vpop.permute.xlu1 %3538  ;;  %v3798_v50 = vmul.f32 %v11492_v55, %v3549_v48  ;;  %v11499_v48 = vld [vmem:[#allocation2 + $0xb0] sm:$0xff] }
 0x449   :  { %v13884_v33 = vpop.f32.mrf.mxu1  ;;  %v3796_v25 = vmul.f32 %v11489_v31, %v3539_v10  ;;  %v3805_v13 = vmul.f32 %v11494_v1, %v3584_v15 }
 0x44a   :  { %v3850_v43 = vpack.c.bf16 %v3798_v50, %v3798_v50 }
 0x44b   :  { %v3848_v44 = vpack.c.bf16 %v3796_v25, %v3796_v25  ;;  %v3857_v42 = vpack.c.bf16 %v3805_v13, %v3805_v13  ;;  %v11501_v25 = vld [vmem:[#allocation2 + $0xd0] sm:$0xff] }
 0x44c   :  { %6904 = vmatmul.bf16.gmra.mxu1 %v9909_v16 }
 0x44d   :  { %3783 = vperm.xlu0 %11382, %v3533_v28   ;;  %3763 = vperm.xlu2 %11381, %v3529_v21  }
 0x44e   :  { %3758 = vperm.xlu1 %11380, %v3528_v0   ;;  %v11500_v0 = vld [vmem:[#allocation2 + $0xf0] sm:$0xff] }
 0x44f   :  { %v13886_v35 = vpop.permute.xlu0 %3573 }
 0x450   :  { %v3599_v11 = vpop.permute.xlu2 %3598  ;;  %v3554_v30 = vpop.permute.xlu1 %3553  ;;  %v3803_v46 = vmul.f32 %v11499_v48, %v13886_v35 }
 0x451   :  { %v13895_v53 = vpop.f32.mrf.mxu1  ;;  %v3799_v19 = vmul.f32 %v11490_v3, %v3554_v30  ;;  %v3808_v49 = vmul.f32 %v11497_v6, %v3599_v11  ;;  %v9944_v30 = vld [vmem:[#allocation3 + $0x108] sm:$0xf] }
 0x452   :  { %v3855_v28 = vpack.c.bf16 %v3803_v46, %v3803_v46 }
 0x453   :  { %v3851_v17 = vpack.c.bf16 %v3799_v19, %v3799_v19  ;;  %v3860_v12 = vpack.c.bf16 %v3808_v49, %v3808_v49  ;;  %v11086_v19 = vld [vmem:[#allocation3 + $0x110] sm:$0xf0] }
 0x454   :  { %v9945_v56 = vor.u32 %v11086_v19, %v9944_v30  ;;  %v11514_v30 = vld [vmem:[#allocation2 + $0x128] sm:$0xff]  ;;  %v9968_v19 = vld [vmem:[#allocation3 + $0x138] sm:$0xf] }
 0x455   :  { %3778 = vperm.xlu2 %11381, %v3532_v18   ;;  %3952 = vrot.lane.b32.xlu0 %v3848_v44, %s11546_s14  ;;  %v11502_v18 = vld [vmem:[#allocation2 + $0xc8] sm:$0xff] }
 0x456   :  { %3773 = vperm.xlu1 %11380, %v3531_v34  }
 0x457   :  { %v13897_v37 = vpop.permute.xlu0 %3588 }
 0x458   :  { %v13899_v20 = vpop.permute.xlu2 %3613  ;;  %v3564_v8 = vpop.permute.xlu1 %3563  ;;  %v3806_v44 = vmul.f32 %v11502_v18, %v13897_v37  ;;  %v11504_v37 = vld [vmem:[#allocation2 + $0xe8] sm:$0xff] }
 0x459   :  { %v13913_v47 = vpop.f32.mrf.mxu1  ;;  %v3801_v52 = vmul.f32 %v11495_v36, %v3564_v8  ;;  %v3811_v31 = vmul.f32 %v11500_v0, %v13899_v20  ;;  %v11503_v20 = vld [vmem:[#allocation2 + $0x108] sm:$0xff]  ;;  %v11508_v36 = vld [vmem:[#allocation2 + $0xf8] sm:$0xff] }
 0x45b   :  { %v3853_v60 = vpack.c.bf16 %v3801_v52, %v3801_v52  ;;  %v3863_v8 = vpack.c.bf16 %v3811_v31, %v3811_v31  ;;  %v11513_v31 = vld [vmem:[#allocation2 + $0x130] sm:$0xff] }
 0x45c   :  { %6909 = vmatmul.bf16.gmra.mxu1 %v9921_v29  ;;  %v3858_v29 = vpack.c.bf16 %v3806_v44, %v3806_v44 }
 0x45d   :  { %3793 = vperm.xlu2 %11381, %v3535_v5   ;;  %3958 = vrot.lane.b32.xlu0 %v3851_v17, %s11546_s14 }
 0x45e   :  { %3788 = vperm.xlu1 %11380, %v3534_v38  }
 0x45f   :  { %v13908_v26 = vpop.permute.xlu0 %3603 }
 0x460   :  { %v13911_v24 = vpop.permute.xlu2 %3628  ;;  %v3579_v51 = vpop.permute.xlu1 %3578  ;;  %v3809_v55 = vmul.f32 %v11505_v22, %v13908_v26  ;;  %v11089_v26 = vld [vmem:[#allocation3 + $0x128] sm:$0xf0]  ;;  %v11517_v22 = vld [vmem:[#allocation2 + $0x140] sm:$0xff] }
 0x461   :  { %v13923_v32 = vpop.f32.mrf.mxu1  ;;  %v3804_v61 = vmul.f32 %v11498_v7, %v3579_v51  ;;  %v3814_v5 = vmul.f32 %v11503_v20, %v13911_v24  ;;  %v11506_v24 = vld [vmem:[#allocation2 + $0x120] sm:$0xff]  ;;  %v11511_v7 = vld [vmem:[#allocation2 + $0x110] sm:$0xff] }
 0x463   :  { %v3856_v16 = vpack.c.bf16 %v3804_v61, %v3804_v61  ;;  %v3866_v59 = vpack.c.bf16 %v3814_v5, %v3814_v5  ;;  %v11516_v5 = vld [vmem:[#allocation2 + $0x148] sm:$0xff] }
 0x465   :  { %3956 = vrot.lane.b32.xlu2 %v3850_v43, %s11546_s14  ;;  %3964 = vrot.lane.b32.xlu0 %v3854_v58, %s11546_s14  ;;  %v3861_v58 = vpack.c.bf16 %v3809_v55, %v3809_v55 }
 0x466   :  { %3954 = vrot.lane.b32.xlu1 %v3849_v14, %s11546_s14  ;;  %v11507_v14 = vld [vmem:[#allocation2 + $0x100] sm:$0xff] }
 0x467   :  { %v13918_v63 = vpop.permute.xlu0 %3618 }
 0x468   :  { %v13921_v62 = vpop.permute.xlu2 %3643  ;;  %v3594_v45 = vpop.permute.xlu1 %3593  ;;  %v3812_v52 = vmul.f32 %v11508_v36, %v13918_v63  ;;  %v11520_v36 = vld [vmem:[#allocation2 + $0x160] sm:$0xff] }
 0x469   :  { %v13933_v21 = vpop.f32.mrf.mxu1  ;;  %v3807_v11 = vmul.f32 %v11501_v25, %v3594_v45  ;;  %v3817_v43 = vmul.f32 %v11506_v24, %v13921_v62  ;;  %v9956_v45 = vld [vmem:[#allocation3 + $0x120] sm:$0xf]  ;;  %v11509_v62 = vld [vmem:[#allocation2 + $0x138] sm:$0xff] }
 0x46a   :  { %v9957_v9 = vor.u32 %v11089_v26, %v9956_v45  ;;  %v9980_v45 = vld [vmem:[#allocation3 + $0x150] sm:$0xf] }
 0x46b   :  { %v3859_v27 = vpack.c.bf16 %v3807_v11, %v3807_v11  ;;  %v11092_v11 = vld [vmem:[#allocation3 + $0x140] sm:$0xf0] }
 0x46c   :  { %6914 = vmatmul.bf16.gmra.mxu1 %v9933_v54  ;;  %v3869_v54 = vpack.c.bf16 %v3817_v43, %v3817_v43  ;;  %v432_v43 = vpop.f32.mrf.mxu0 }
 0x46d   :  { %3970 = vrot.lane.b32.xlu0 %v3857_v42, %s11546_s14  ;;  %3962 = vrot.lane.b32.xlu2 %v3853_v60, %s11546_s14  ;;  %v3864_v60 = vpack.c.bf16 %v3812_v52, %v3812_v52 }
 0x46e   :  { %3960 = vrot.lane.b32.xlu1 %v3852_v2, %s11546_s14  ;;  %v11510_v2 = vld [vmem:[#allocation2 + $0x118] sm:$0xff] }
 0x46f   :  { %v13928_v41 = vpop.permute.xlu0 %3633 }
 0x470   :  { %v13931_v15 = vpop.permute.xlu2 %3658  ;;  %v3609_v10 = vpop.permute.xlu1 %3608  ;;  %v3815_v61 = vmul.f32 %v11511_v7, %v13928_v41 }
 0x471   :  { %v13948_v17 = vpop.f32.mrf.mxu1  ;;  %v3810_v38 = vmul.f32 %v11504_v37, %v3609_v10  ;;  %v3820_v63 = vmul.f32 %v11509_v62, %v13931_v15  ;;  %v11512_v15 = vld [vmem:[#allocation2 + $0x150] sm:$0xff] }
 0x472   :  { %16431 = vst [vmem:[#allocation8_spill] sm:$0xff] %v13948_v17 }
 0x473   :  { %v3862_v51 = vpack.c.bf16 %v3810_v38, %v3810_v38  ;;  %v3872_v10 = vpack.c.bf16 %v3820_v63, %v3820_v63  ;;  %v11095_v63 = vld [vmem:[#allocation3 + $0x158] sm:$0xf0] }
 0x475   :  { %3976 = vrot.lane.b32.xlu0 %v3860_v12, %s11546_s14  ;;  %3968 = vrot.lane.b32.xlu2 %v3856_v16, %s11546_s14 }
 0x476   :  { %3966 = vrot.lane.b32.xlu1 %v3855_v28, %s11546_s14  ;;  %v3867_v28 = vpack.c.bf16 %v3815_v61, %v3815_v61  ;;  %v11522_v61 = vld [vmem:[#allocation2 + $0x198] sm:$0xff] }
 0x477   :  { %v13939_v35 = vpop.permute.xlu0 %3648 }
 0x478   :  { %v13942_v34 = vpop.permute.xlu2 %3673  ;;  %v3624_v3 = vpop.permute.xlu1 %3623  ;;  %v3818_v18 = vmul.f32 %v11514_v30, %v13939_v35 }
 0x479   :  { %v3813_v1 = vmul.f32 %v11507_v14, %v3624_v3  ;;  %v13964_v23 = vpop.f32.mrf.mxu1  ;;  %v3823_v0 = vmul.f32 %v11512_v15, %v13942_v34  ;;  %v11515_v34 = vld [vmem:[#allocation2 + $0x168] sm:$0xff] }
 0x47b   :  { %v3865_v42 = vpack.c.bf16 %v3813_v1, %v3813_v1  ;;  %v11519_v1 = vld [vmem:[#allocation2 + $0x180] sm:$0xff] }
 0x47c   :  { %6919 = vmatmul.bf16.gmra.mxu1 %v9945_v56  ;;  %v9969_v56 = vor.u32 %v11092_v11, %v9968_v19  ;;  %v11526_v19 = vld [vmem:[#allocation2 + $0x190] sm:$0xff] }
 0x47d   :  { %3982 = vrot.lane.b32.xlu0 %v3863_v8, %s11546_s14  ;;  %3974 = vrot.lane.b32.xlu2 %v3859_v27, %s11546_s14  ;;  %v3875_v8 = vpack.c.bf16 %v3823_v0, %v3823_v0 }
 0x47e   :  { %3972 = vrot.lane.b32.xlu1 %v3858_v29, %s11546_s14  ;;  %v3870_v29 = vpack.c.bf16 %v3818_v18, %v3818_v18 }
 0x47f   :  { %v13950_v57 = vpop.permute.xlu0 %3663 }
 0x480   :  { %v13953_v50 = vpop.permute.xlu2 %3688  ;;  %v3639_v4 = vpop.permute.xlu1 %3638  ;;  %v3821_v55 = vmul.f32 %v11517_v22, %v13950_v57 }
 0x481   :  { %v3816_v6 = vmul.f32 %v11510_v2, %v3639_v4  ;;  %v13975_v12 = vpop.f32.mrf.mxu1  ;;  %v3826_v35 = vmul.f32 %v11515_v34, %v13953_v50  ;;  %v11518_v50 = vld [vmem:[%s16357_s3] ss:$0 sm:$0xff]  ;;  %v9981_v2 = vor.u32 %v11095_v63, %v9980_v45  ;;  %v16383_v45 = vmov 6  }
 0x482   :  { %16432 = vst [vmem:[#allocation12_spill] sm:$0xff] %v13975_v12  ;;  %v3873_v24 = vpack.c.bf16 %v3821_v55, %v3821_v55  ;;  %v433_v14 = vadd.f32 %v11518_v50, %v432_v43  ;;  %v11530_v50 = vld [vmem:[#allocation2 + $0x1a0] sm:$0xff]  ;;  %11385 = vset.pattern.permute.xlu0 %v16383_v45  ;;  %11383 = vset.pattern.permute.xlu1 %v16383_v45 }
 0x483   :  { %v3868_v16 = vpack.c.bf16 %v3816_v6, %v3816_v6  ;;  %11384 = vset.pattern.permute.xlu2 %v16383_v45  ;;  %v11532_v63 = vld [vmem:[#allocation2 + $0x1c0] sm:$0xff] }
 0x485   :  { %3988 = vrot.lane.b32.xlu0 %v3866_v59, %s11546_s14  ;;  %3980 = vrot.lane.b32.xlu2 %v3862_v51, %s11546_s14  ;;  %v3878_v51 = vpack.c.bf16 %v3826_v35, %v3826_v35 }
 0x486   :  { %3978 = vrot.lane.b32.xlu1 %v3861_v58, %s11546_s14 }
 0x487   :  { %v13959_v13 = vpop.permute.xlu0 %3678 }
 0x488   :  { %v13962_v39 = vpop.permute.xlu2 %3703  ;;  %v3654_v40 = vpop.permute.xlu1 %3653 }
 0x489   :  { %v3819_v25 = vmul.f32 %v11513_v31, %v3654_v40  ;;  %v13986_v20 = vpop.f32.mrf.mxu1  ;;  %v3829_v57 = vmul.f32 %v11519_v1, %v13962_v39 }
 0x48b   :  { %v3871_v27 = vpack.c.bf16 %v3819_v25, %v3819_v25  ;;  %v3881_v6 = vpack.c.bf16 %v3829_v57, %v3829_v57 }
 0x48c   :  { %6924 = vmatmul.bf16.gmra.mxu1 %v9957_v9  ;;  %v486_v9 = vmax.f32 %v433_v14, 0.0 }
 0x48d   :  { %3994 = vrot.lane.b32.xlu0 %v3869_v54, %s11546_s14  ;;  %3986 = vrot.lane.b32.xlu2 %v3865_v42, %s11546_s14  ;;  %v11521_v54 = vld [vmem:[#allocation2 + $0x158] sm:$0xff] }
 0x48e   :  { %3984 = vrot.lane.b32.xlu1 %v3864_v60, %s11546_s14  ;;  %v3824_v42 = vmul.f32 %v11521_v54, %v13959_v13  ;;  %567 = vst.msk [vmem:[#allocation2 + $0x208] sm:$0xff] %vm487_vm2, %v486_v9 }
 0x48f   :  { %v13970_v49 = vpop.permute.xlu0 %3693 }
 0x490   :  { %v13973_v48 = vpop.permute.xlu2 %3718  ;;  %v3669_v46 = vpop.permute.xlu1 %3668  ;;  %v3876_v7 = vpack.c.bf16 %v3824_v42, %v3824_v42  ;;  %v11531_v42 = vld [vmem:[#allocation2 + $0x1e0] sm:$0xff] }
 0x491   :  { %v3822_v37 = vmul.f32 %v11516_v5, %v3669_v46  ;;  %v14004_v26 = vpop.f32.mrf.mxu1  ;;  %v3832_v13 = vmul.f32 %v11522_v61, %v13973_v48  ;;  %v11523_v46 = vld [vmem:[#allocation2 + $0x178] sm:$0xff]  ;;  %v11525_v48 = vld [vmem:[#allocation2 + $0x1b0] sm:$0xff]  ;;  %v9992_v5 = vld [vmem:[#allocation3 + $0x168] sm:$0xf] }
 0x493   :  { %v3874_v58 = vpack.c.bf16 %v3822_v37, %v3822_v37  ;;  %v3884_v11 = vpack.c.bf16 %v3832_v13, %v3832_v13 }
 0x495   :  { %4000 = vrot.lane.b32.xlu0 %v3872_v10, %s11546_s14  ;;  %3992 = vrot.lane.b32.xlu2 %v3868_v16, %s11546_s14 }
 0x496   :  { %3990 = vrot.lane.b32.xlu1 %v3867_v28, %s11546_s14  ;;  %v11524_v28 = vld [vmem:[#allocation2 + $0x170] sm:$0xff] }
 0x497   :  { %v13981_v41 = vpop.permute.xlu0 %3708  ;;  %v3827_v15 = vmul.f32 %v11524_v28, %v13970_v49 }
 0x498   :  { %v13984_v44 = vpop.permute.xlu2 %3733  ;;  %v3684_v3 = vpop.permute.xlu1 %3683 }
 0x499   :  { %v3825_v52 = vmul.f32 %v11520_v36, %v3684_v3  ;;  %v14021_v25 = vpop.f32.mrf.mxu1  ;;  %v3879_v18 = vpack.c.bf16 %v3827_v15, %v3827_v15  ;;  %v3835_v3 = vmul.f32 %v11525_v48, %v13984_v44  ;;  %v11528_v44 = vld [vmem:[#allocation2 + $0x1c8] sm:$0xff] }
 0x49b   :  { %v3877_v39 = vpack.c.bf16 %v3825_v52, %v3825_v52  ;;  %v3887_v22 = vpack.c.bf16 %v3835_v3, %v3835_v3 }
 0x49c   :  { %6929 = vmatmul.bf16.gmra.mxu1 %v9969_v56 }
 0x49d   :  { %4006 = vrot.lane.b32.xlu0 %v3875_v8, %s11546_s14  ;;  %3998 = vrot.lane.b32.xlu2 %v3871_v27, %s11546_s14  ;;  %v11098_v8 = vld [vmem:[#allocation3 + $0x170] sm:$0xf0]  ;;  %v11527_v27 = vld [vmem:[#allocation2 + $0x188] sm:$0xff] }
 0x49e   :  { %3996 = vrot.lane.b32.xlu1 %v3870_v29, %s11546_s14  ;;  %v3830_v29 = vmul.f32 %v11527_v27, %v13981_v41  ;;  %v9993_v37 = vor.u32 %v11098_v8, %v9992_v5 }
 0x49f   :  { %v13992_v38 = vpop.permute.xlu0 %3723 }
 0x4a0   :  { %v13995_v4 = vpop.permute.xlu2 %3748  ;;  %v3699_v59 = vpop.permute.xlu1 %3698  ;;  %v3833_v14 = vmul.f32 %v11530_v50, %v13992_v38 }
 0x4a1   :  { %v3828_v10 = vmul.f32 %v11523_v46, %v3699_v59  ;;  %v14032_v55 = vpop.f32.mrf.mxu1  ;;  %v3838_v41 = vmul.f32 %v11528_v44, %v13995_v4  ;;  %v14044_v4 = vld [vmem:[#allocation2 + $0x208] sm:$0xff] }
 0x4a2   :  { %16433 = vst [vmem:[#allocation17_spill] sm:$0xff] %v14032_v55  ;;  %v3885_v9 = vpack.c.bf16 %v3833_v14, %v3833_v14  ;;  %v3379_v38 = vpack.c.bf16 %v14044_v4, %v14044_v4  ;;  %v11538_v44 = vld [vmem:[#allocation2 + $0x1e8] sm:$0xff]  ;;  %v11104_v14 = vld [vmem:[#allocation3 + $0x1a0] sm:$0xf0] }
 0x4a3   :  { %v3880_v30 = vpack.c.bf16 %v3828_v10, %v3828_v10  ;;  %v3890_v36 = vpack.c.bf16 %v3838_v41, %v3838_v41  ;;  %v10004_v10 = vld [vmem:[#allocation3 + $0x180] sm:$0xf] }
 0x4a4   :  { %3431 = vst.msk [vmem:[#allocation3 + $0x268] sm:$0xf] %vm1036_vm3, %v3379_v38 }
 0x4a5   :  { %4012 = vrot.lane.b32.xlu0 %v3878_v51, %s11546_s14  ;;  %4004 = vrot.lane.b32.xlu2 %v3874_v58, %s11546_s14  ;;  %v3882_v51 = vpack.c.bf16 %v3830_v29, %v3830_v29  ;;  %v11529_v58 = vld [vmem:[#allocation2 + $0x1a8] sm:$0xff] }
 0x4a6   :  { %4002 = vrot.lane.b32.xlu1 %v3873_v24, %s11546_s14 }
 0x4a7   :  { %v14006_v40 = vpop.permute.xlu0 %3738 }
 0x4a8   :  { %v14009_v60 = vpop.permute.xlu2 %3763  ;;  %v3714_v62 = vpop.permute.xlu1 %3713 }
 0x4a9   :  { %v3831_v56 = vmul.f32 %v11526_v19, %v3714_v62  ;;  %v14047_v54 = vpop.f32.mrf.mxu1  ;;  %v3841_v62 = vmul.f32 %v11531_v42, %v14009_v60  ;;  %v11536_v19 = vld [vmem:[#allocation2 + $0x1d0] sm:$0xff] }
 0x4ab   :  { %v3883_v59 = vpack.c.bf16 %v3831_v56, %v3831_v56  ;;  %v3893_v15 = vpack.c.bf16 %v3841_v62, %v3841_v62 }
 0x4ac   :  { %6934 = vmatmul.bf16.gmra.mxu1 %v9981_v2 }
 0x4ad   :  { %4018 = vrot.lane.b32.xlu0 %v3881_v6, %s11546_s14  ;;  %4010 = vrot.lane.b32.xlu2 %v3877_v39, %s11546_s14  ;;  %v11101_v39 = vld [vmem:[#allocation3 + $0x188] sm:$0xf0] }
 0x4ae   :  { %4008 = vrot.lane.b32.xlu1 %v3876_v7, %s11546_s14  ;;  %v11533_v7 = vld [vmem:[#allocation2 + $0x1b8] sm:$0xff]  ;;  %v10005_v28 = vor.u32 %v11101_v39, %v10004_v10 }
 0x4af   :  { %v14016_v16 = vpop.permute.xlu0 %3753  ;;  %v3836_v61 = vmul.f32 %v11533_v7, %v14006_v40  ;;  %v11107_v39 = vld [vmem:[#allocation3 + $0x1b8] sm:$0xf0] }
 0x4b0   :  { %v14019_v0 = vpop.permute.xlu2 %3778  ;;  %v3729_v31 = vpop.permute.xlu1 %3728  ;;  %v3839_v56 = vmul.f32 %v11536_v19, %v14016_v16  ;;  %v14102_v10 = vld [vmem:[%s16355_s1 + $0x38] sm:$0xff] }
 0x4b1   :  { %v3834_v24 = vmul.f32 %v11529_v58, %v3729_v31  ;;  %v3888_v60 = vpack.c.bf16 %v3836_v61, %v3836_v61 }
 0x4b2   :  { %v3891_v5 = vpack.c.bf16 %v3839_v56, %v3839_v56 }
 0x4b3   :  { %v3886_v52 = vpack.c.bf16 %v3834_v24, %v3834_v24 }
 0x4b5   :  { %4024 = vrot.lane.b32.xlu0 %v3884_v11, %s11546_s14  ;;  %4016 = vrot.lane.b32.xlu2 %v3880_v30, %s11546_s14  ;;  %v11534_v11 = vld [vmem:[#allocation2 + $0x1f8] sm:$0xff]  ;;  %v14063_v30 = vpop.f32.mrf.mxu1 }
 0x4b6   :  { %4014 = vrot.lane.b32.xlu1 %v3879_v18, %s11546_s14  ;;  %v3844_v40 = vmul.f32 %v11534_v11, %v14019_v0  ;;  %16434 = vst [vmem:[#allocation11_spill] sm:$0xff] %v14063_v30  ;;  %v11535_v18 = vld [vmem:[#allocation2 + $0x1d8] sm:$0xff] }
 0x4b7   :  { %v14027_v49 = vpop.permute.xlu0 %3768 }
 0x4b8   :  { %v14030_v34 = vpop.permute.xlu2 %3793  ;;  %v3744_v35 = vpop.permute.xlu1 %3743  ;;  %v3896_v29 = vpack.c.bf16 %v3844_v40, %v3844_v40  ;;  %v3842_v41 = vmul.f32 %v11538_v44, %v14027_v49 }
 0x4b9   :  { %v3837_v2 = vmul.f32 %v11532_v63, %v3744_v35  ;;  %v14089_v63 = vld [vmem:[%s16355_s1 + $0x10] sm:$0xff] }
 0x4bb   :  { %v3889_v31 = vpack.c.bf16 %v3837_v2, %v3837_v2 }
 0x4bc   :  { %6939 = vmatmul.bf16.gmra.mxu1 %v9993_v37  ;;  %v3483_v37 = vld [vmem:[#allocation2 + $0x210] sm:$0xff] }
 0x4bd   :  { %4030 = vrot.lane.b32.xlu0 %v3887_v22, %s11546_s14  ;;  %4022 = vrot.lane.b32.xlu2 %v3883_v59, %s11546_s14  ;;  %v3847_v0 = vmul.f32 %v14030_v34, %v3483_v37  ;;  %v11537_v22 = vld [vmem:[#allocation2 + $0x1f0] sm:$0xff]  ;;  %v14074_v50 = vpop.f32.mrf.mxu1  ;;  %v14148_v37 = vld [vmem:[%s16355_s1 + $0x68] sm:$0xff] }
 0x4be   :  { %4020 = vrot.lane.b32.xlu1 %v3882_v51, %s11546_s14  ;;  %v10016_v51 = vld [vmem:[#allocation3 + $0x198] sm:$0xf] }
 0x4bf   :  { %v14038_v43 = vpop.permute.xlu0 %3783  ;;  %v3899_v34 = vpack.c.bf16 %v3847_v0, %v3847_v0  ;;  %v14153_v0 = vld [vmem:[%s16355_s1 + $0x30] sm:$0xff] }
 0x4c0   :  { %v3957_v1 = vpop.permute.xlu2 %3956  ;;  %v3759_v57 = vpop.permute.xlu1 %3758 }
 0x4c1   :  { %4110 = vst.msk [vmem:[#allocation3 + $0x1c] sm:$0xf] %vm1765_vm4, %v3957_v1  ;;  %v3840_v48 = vmul.f32 %v11535_v18, %v3759_v57  ;;  %v10017_v1 = vor.u32 %v11104_v14, %v10016_v51  ;;  %v14125_v18 = vld [vmem:[%s16355_s1 + $0x50] sm:$0xff] }
 0x4c3   :  { %v3892_v35 = vpack.c.bf16 %v3840_v48, %v3840_v48  ;;  %v14130_v48 = vld [vmem:[%s16355_s1 + $0x20] sm:$0xff] }
 0x4c5   :  { %4036 = vrot.lane.b32.xlu0 %v3890_v36, %s11546_s14  ;;  %4028 = vrot.lane.b32.xlu2 %v3886_v52, %s11546_s14  ;;  %v3894_v36 = vpack.c.bf16 %v3842_v41, %v3842_v41  ;;  %v14091_v2 = vpop.f32.mrf.mxu1  ;;  %v4228_v41 = vld [vmem:[%s16355_s1 + $0x80] sm:$0xff] }
 0x4c6   :  { %4026 = vrot.lane.b32.xlu1 %v3885_v9, %s11546_s14  ;;  %v11539_v9 = vld [vmem:[#allocation2 + $0x200] sm:$0xff] }
 0x4c7   :  { %v3953_v6 = vpop.permute.xlu0 %3952  ;;  %v3845_v38 = vmul.f32 %v11539_v9, %v14038_v43  ;;  %v14192_v9 = vld [vmem:[%s16355_s1 + $0x60] sm:$0xff] }
 0x4c8   :  { %4108 = vst.msk [vmem:[#allocation3 + $0x4] sm:$0xf] %vm1765_vm4, %v3953_v6  ;;  %v3963_v13 = vpop.permute.xlu2 %3962  ;;  %v3774_v46 = vpop.permute.xlu1 %3773 }
 0x4c9   :  { %4113 = vst.msk [vmem:[#allocation3 + $0x40] sm:$0xf] %vm1765_vm4, %v3963_v13  ;;  %v3843_v16 = vmul.f32 %v11537_v22, %v3774_v46  ;;  %v3897_v6 = vpack.c.bf16 %v3845_v38, %v3845_v38  ;;  %v10028_v13 = vld [vmem:[#allocation3 + $0x1b0] sm:$0xf]  ;;  %v14158_v22 = vld [vmem:[%s16355_s1 + $0x28] sm:$0xff] }
 0x4ca   :  { %v10029_v46 = vor.u32 %v11107_v39, %v10028_v13  ;;  %v14214_v39 = vld [vmem:[%s16355_s1 + $0x70] sm:$0xff] }
 0x4cb   :  { %v3895_v57 = vpack.c.bf16 %v3843_v16, %v3843_v16 }
 0x4cc   :  { %6944 = vmatmul.bf16.gmra.mxu1 %v10005_v28  ;;  %v14107_v28 = vld [vmem:[%s16355_s1 + $0x8] sm:$0xff] }
 0x4cd   :  { %4042 = vrot.lane.b32.xlu0 %v3893_v15, %s11546_s14  ;;  %4034 = vrot.lane.b32.xlu2 %v3889_v31, %s11546_s14  ;;  %v14112_v15 = vld [vmem:[%s16355_s1] sm:$0xff]  ;;  %v14114_v31 = vpop.f32.mrf.mxu1 }
 0x4ce   :  { %4032 = vrot.lane.b32.xlu1 %v3888_v60, %s11546_s14 }
 0x4cf   :  { %v3959_v3 = vpop.permute.xlu0 %3958 }
 0x4d0   :  { %4111 = vst.msk [vmem:[#allocation3 + $0x28] sm:$0xf] %vm1765_vm4, %v3959_v3  ;;  %v3969_v8 = vpop.permute.xlu2 %3968  ;;  %v3789_v27 = vpop.permute.xlu1 %3788  ;;  %v14135_v3 = vld [vmem:[%s16355_s1 + $0x18] sm:$0xff] }
 0x4d1   :  { %4116 = vst.msk [vmem:[#allocation3 + $0x64] sm:$0xf] %vm1765_vm4, %v3969_v8  ;;  %v3846_v49 = vmul.f32 %v3789_v27, %v14044_v4  ;;  %v11110_v8 = vld [vmem:[#allocation3 + $0x1d0] sm:$0xf0] }
 0x4d3   :  { %v3898_v4 = vpack.c.bf16 %v3846_v49, %v3846_v49 }
 0x4d5   :  { %4048 = vrot.lane.b32.xlu0 %v3896_v29, %s11546_s14  ;;  %4040 = vrot.lane.b32.xlu2 %v3892_v35, %s11546_s14  ;;  %v14140_v19 = vpop.f32.mrf.mxu1  ;;  %v10040_v35 = vld [vmem:[#allocation3 + $0x1c8] sm:$0xf] }
 0x4d6   :  { %4038 = vrot.lane.b32.xlu1 %v3891_v5, %s11546_s14  ;;  %16435 = vst [vmem:[#allocation16_spill] sm:$0xff] %v14140_v19  ;;  %v10041_v5 = vor.u32 %v11110_v8, %v10040_v35  ;;  %v14228_v8 = vld [vmem:[%s16355_s1 + $0x90] sm:$0xff] }
 0x4d7   :  { %v3965_v59 = vpop.permute.xlu0 %3964 }
 0x4d8   :  { %4114 = vst.msk [vmem:[#allocation3 + $0x4c] sm:$0xf] %vm1765_vm4, %v3965_v59  ;;  %v3975_v58 = vpop.permute.xlu2 %3974  ;;  %v3955_v24 = vpop.permute.xlu1 %3954 }
 0x4d9   :  { %4119 = vst.msk [vmem:[#allocation3 + $0x88] sm:$0xf] %vm1765_vm4, %v3975_v58  ;;  %v14174_v58 = vld [vmem:[%s16355_s1 + $0x48] sm:$0xff] }
 0x4da   :  { %4109 = vst.msk [vmem:[#allocation3 + $0x10] sm:$0xf] %vm1765_vm4, %v3955_v24  ;;  %v14179_v24 = vld [vmem:[%s16355_s1 + $0x40] sm:$0xff] }
 0x4dc   :  { %6949 = vmatmul.bf16.gmra.mxu1 %v10017_v1  ;;  %v10052_v1 = vld [vmem:[#allocation3 + $0x1e0] sm:$0xf] }
 0x4dd   :  { %4054 = vrot.lane.b32.xlu0 %v3899_v34, %s11546_s14  ;;  %4046 = vrot.lane.b32.xlu2 %v3895_v57, %s11546_s14  ;;  %v14164_v44 = vpop.f32.mrf.mxu1 }
 0x4de   :  { %4044 = vrot.lane.b32.xlu1 %v3894_v36, %s11546_s14  ;;  %v11113_v36 = vld [vmem:[#allocation3 + $0x1e8] sm:$0xf0] }
 0x4df   :  { %v3971_v52 = vpop.permute.xlu0 %3970  ;;  %v10053_v49 = vor.u32 %v11113_v36, %v10052_v1  ;;  %v10076_v36 = vld [vmem:[#allocation3 + $0x210] sm:$0xf] }
 0x4e0   :  { %4117 = vst.msk [vmem:[#allocation3 + $0x70] sm:$0xf] %vm1765_vm4, %v3971_v52  ;;  %v3981_v42 = vpop.permute.xlu2 %3980  ;;  %v3961_v62 = vpop.permute.xlu1 %3960  ;;  %v4231_v52 = vld [vmem:[%s16355_s1 + $0x98] sm:$0xff] }
 0x4e1   :  { %4122 = vst.msk [vmem:[#allocation3 + $0xac] sm:$0xf] %vm1765_vm4, %v3981_v42  ;;  %v14199_v42 = vld [vmem:[%s16355_s1 + $0x58] sm:$0xff] }
 0x4e2   :  { %4112 = vst.msk [vmem:[#allocation3 + $0x34] sm:$0xf] %vm1765_vm4, %v3961_v62 }
 0x4e5   :  { %4276 = vperm.xlu0 %11385, %v14089_v63   ;;  %4052 = vrot.lane.b32.xlu2 %v3898_v4, %s11546_s14  ;;  %v14194_v38 = vpop.f32.mrf.mxu1 }
 0x4e6   :  { %4050 = vrot.lane.b32.xlu1 %v3897_v6, %s11546_s14  ;;  %16436 = vst [vmem:[#allocation14_spill] sm:$0xff] %v14194_v38 }
 0x4e7   :  { %v3977_v43 = vpop.permute.xlu0 %3976 }
 0x4e8   :  { %4120 = vst.msk [vmem:[#allocation3 + $0x94] sm:$0xf] %vm1765_vm4, %v3977_v43  ;;  %v3987_v7 = vpop.permute.xlu2 %3986  ;;  %v3967_v61 = vpop.permute.xlu1 %3966  ;;  %v14209_v43 = vld [vmem:[%s16355_s1 + $0x78] sm:$0xff] }
 0x4e9   :  { %4125 = vst.msk [vmem:[#allocation3 + $0xd0] sm:$0xf] %vm1765_vm4, %v3987_v7 }
 0x4ea   :  { %4115 = vst.msk [vmem:[#allocation3 + $0x58] sm:$0xf] %vm1765_vm4, %v3967_v61  ;;  %v16387_v61 = vmov 7  }
 0x4ec   :  { %6954 = vmatmul.bf16.gmra.mxu1 %v10029_v46  ;;  %v11116_v46 = vld [vmem:[#allocation3 + $0x200] sm:$0xf0] }
 0x4ed   :  { %4301 = vperm.xlu0 %11385, %v14102_v10   ;;  %4271 = vperm.xlu2 %11384, %v14107_v28   ;;  %v14216_v7 = vpop.f32.mrf.mxu1 }
 0x4ee   :  { %4266 = vperm.xlu1 %11383, %v14112_v15  }
 0x4ef   :  { %v3983_v60 = vpop.permute.xlu0 %3982 }
 0x4f0   :  { %4123 = vst.msk [vmem:[#allocation3 + $0xb8] sm:$0xf] %vm1765_vm4, %v3983_v60  ;;  %v3993_v11 = vpop.permute.xlu2 %3992  ;;  %v3973_v40 = vpop.permute.xlu1 %3972 }
 0x4f1   :  { %4128 = vst.msk [vmem:[#allocation3 + $0xf4] sm:$0xf] %vm1765_vm4, %v3993_v11 }
 0x4f2   :  { %4118 = vst.msk [vmem:[#allocation3 + $0x7c] sm:$0xf] %vm1765_vm4, %v3973_v40  ;;  %v10064_v40 = vld [vmem:[#allocation3 + $0x1f8] sm:$0xf] }
 0x4f5   :  { %4316 = vperm.xlu0 %11385, %v14125_v18   ;;  %4286 = vperm.xlu2 %11384, %v14130_v48  }
 0x4f6   :  { %4281 = vperm.xlu1 %11383, %v14135_v3  }
 0x4f7   :  { %v3989_v56 = vpop.permute.xlu0 %3988 }
 0x4f8   :  { %4126 = vst.msk [vmem:[#allocation3 + $0xdc] sm:$0xf] %vm1765_vm4, %v3989_v56  ;;  %v3999_v27 = vpop.permute.xlu2 %3998  ;;  %v3979_v29 = vpop.permute.xlu1 %3978  ;;  %v10065_v56 = vor.u32 %v11116_v46, %v10064_v40 }
 0x4f9   :  { %4131 = vst.msk [vmem:[#allocation3 + $0x118] sm:$0xf] %vm1765_vm4, %v3999_v27  ;;  %v14233_v27 = vld [vmem:[%s16355_s1 + $0x88] sm:$0xff] }
 0x4fa   :  { %4121 = vst.msk [vmem:[#allocation3 + $0xa0] sm:$0xf] %vm1765_vm4, %v3979_v29  ;;  %v14238_v29 = vpop.f32.mrf.mxu1 }
 0x4fc   :  { %6959 = vmatmul.bf16.gmra.mxu1 %v10041_v5 }
 0x4fd   :  { %4331 = vperm.xlu0 %11385, %v14148_v37   ;;  %4296 = vperm.xlu2 %11384, %v14153_v0  }
 0x4fe   :  { %4291 = vperm.xlu1 %11383, %v14158_v22  }
 0x4ff   :  { %v3995_v16 = vpop.permute.xlu0 %3994 }
 0x500   :  { %4129 = vst.msk [vmem:[#allocation3 + $0x100] sm:$0xf] %vm1765_vm4, %v3995_v16  ;;  %v4005_v59 = vpop.permute.xlu2 %4004  ;;  %v3985_v51 = vpop.permute.xlu1 %3984 }
 0x501   :  { %4134 = vst.msk [vmem:[#allocation3 + $0x13c] sm:$0xf] %vm1765_vm4, %v4005_v59  ;;  %v4233_v59 = vld [vmem:[%s16355_s1 + $0xa8] sm:$0xff] }
 0x502   :  { %4124 = vst.msk [vmem:[#allocation3 + $0xc4] sm:$0xf] %vm1765_vm4, %v3985_v51  ;;  %v14249_v51 = vld [vmem:[%s16355_s1 + $0xa0] sm:$0xff] }
 0x505   :  { %4346 = vperm.xlu0 %11385, %v4228_v41   ;;  %4311 = vperm.xlu2 %11384, %v14174_v58  }
 0x506   :  { %4306 = vperm.xlu1 %11383, %v14179_v24  }
 0x507   :  { %v4001_v14 = vpop.permute.xlu0 %4000 }
 0x508   :  { %4132 = vst.msk [vmem:[#allocation3 + $0x124] sm:$0xf] %vm1765_vm4, %v4001_v14  ;;  %v4011_v34 = vpop.permute.xlu2 %4010  ;;  %v3991_v57 = vpop.permute.xlu1 %3990  ;;  %v11119_v14 = vld [vmem:[#allocation3 + $0x218] sm:$0xf0] }
 0x509   :  { %4137 = vst.msk [vmem:[#allocation3 + $0x160] sm:$0xf] %vm1765_vm4, %v4011_v34 }
 0x50a   :  { %4127 = vst.msk [vmem:[#allocation3 + $0xe8] sm:$0xf] %vm1765_vm4, %v3991_v57  ;;  %v14253_v57 = vpop.f32.mrf.mxu1 }
 0x50c   :  { %6964 = vmatmul.bf16.gmra.mxu1 %v10053_v49  ;;  %v10077_v49 = vor.u32 %v11119_v14, %v10076_v36  ;;  %v16385_v14 = vmov 8  }
 0x50d   :  { %4361 = vperm.xlu0 %11385, %v4231_v52   ;;  %4326 = vperm.xlu2 %11384, %v14192_v9   ;;  %v4235_v52 = vld [vmem:[%s16355_s1 + $0xb8] sm:$0xff] }
 0x50e   :  { %4321 = vperm.xlu1 %11383, %v14199_v42  }
 0x50f   :  { %v4007_v62 = vpop.permute.xlu0 %4006 }
 0x510   :  { %4135 = vst.msk [vmem:[#allocation3 + $0x148] sm:$0xf] %vm1765_vm4, %v4007_v62  ;;  %v4017_v4 = vpop.permute.xlu2 %4016  ;;  %v3997_v6 = vpop.permute.xlu1 %3996 }
 0x511   :  { %4140 = vst.msk [vmem:[#allocation3 + $0x184] sm:$0xf] %vm1765_vm4, %v4017_v4 }
 0x512   :  { %4130 = vst.msk [vmem:[#allocation3 + $0x10c] sm:$0xf] %vm1765_vm4, %v3997_v6 }
 0x515   :  { %11387 = vset.pattern.permute.xlu0 %v16387_v61  ;;  %4341 = vperm.xlu2 %11384, %v14209_v43  }
 0x516   :  { %4336 = vperm.xlu1 %11383, %v14214_v39   ;;  %4999 = vperm.xlu0 %11387, %v14107_v28  }
 0x517   :  { %v4013_v13 = vpop.permute.xlu0 %4012 }
 0x518   :  { %4138 = vst.msk [vmem:[#allocation3 + $0x16c] sm:$0xf] %vm1765_vm4, %v4013_v13  ;;  %v4023_v60 = vpop.permute.xlu2 %4022  ;;  %v4003_v11 = vpop.permute.xlu1 %4002 }
 0x519   :  { %4143 = vst.msk [vmem:[#allocation3 + $0x1a8] sm:$0xf] %vm1765_vm4, %v4023_v60  ;;  %v14265_v13 = vpop.f32.mrf.mxu1  ;;  %v10088_v60 = vld [vmem:[#allocation3 + $0x228] sm:$0xf] }
 0x51a   :  { %4133 = vst.msk [vmem:[#allocation3 + $0x130] sm:$0xf] %vm1765_vm4, %v4003_v11 }
 0x51b   :  { %16437 = vst [vmem:[#allocation13_spill] sm:$0xff] %v14265_v13 }
 0x51c   :  { %6969 = vmatmul.bf16.gmra.mxu1 %v10065_v56  ;;  %v11122_v56 = vld [vmem:[#allocation3 + $0x230] sm:$0xf0] }
 0x51d   :  { %4356 = vperm.xlu2 %11384, %v14228_v8  }
 0x51e   :  { %4351 = vperm.xlu1 %11383, %v14233_v27   ;;  %5019 = vperm.xlu0 %11387, %v14158_v22  }
 0x51f   :  { %v4019_v35 = vpop.permute.xlu0 %4018 }
 0x520   :  { %4141 = vst.msk [vmem:[#allocation3 + $0x190] sm:$0xf] %vm1765_vm4, %v4019_v35  ;;  %v4029_v5 = vpop.permute.xlu2 %4028  ;;  %v4009_v16 = vpop.permute.xlu1 %4008  ;;  %v10089_v35 = vor.u32 %v11122_v56, %v10088_v60  ;;  %v11128_v56 = vld [vmem:[#allocation3 + $0x260] sm:$0xf0] }
 0x521   :  { %4146 = vst.msk [vmem:[#allocation3 + $0x1cc] sm:$0xf] %vm1765_vm4, %v4029_v5  ;;  %v14273_v5 = vpop.f32.mrf.mxu1 }
 0x522   :  { %4136 = vst.msk [vmem:[#allocation3 + $0x154] sm:$0xf] %vm1765_vm4, %v4009_v16  ;;  %v4236_v16 = vld [vmem:[%s16355_s1 + $0xc0] sm:$0xff] }
 0x525   :  { %4371 = vperm.xlu2 %11384, %v4233_v59  }
 0x526   :  { %4366 = vperm.xlu1 %11383, %v14249_v51  }
 0x527   :  { %v4025_v41 = vpop.permute.xlu0 %4024 }
 0x528   :  { %4144 = vst.msk [vmem:[#allocation3 + $0x1b4] sm:$0xf] %vm1765_vm4, %v4025_v41  ;;  %v4035_v1 = vpop.permute.xlu2 %4034  ;;  %v4015_v34 = vpop.permute.xlu1 %4014 }
 0x529   :  { %4149 = vst.msk [vmem:[#allocation3 + $0x1f0] sm:$0xf] %vm1765_vm4, %v4035_v1  ;;  %v14284_v1 = vpop.f32.mrf.mxu1 }
 0x52a   :  { %4139 = vst.msk [vmem:[#allocation3 + $0x178] sm:$0xf] %vm1765_vm4, %v4015_v34 }
 0x52b   :  { %16438 = vst [vmem:[#allocation20_spill] sm:$0xff] %v14284_v1 }
 0x52c   :  { %6974 = vmatmul.bf16.gmra.mxu1 %v10077_v49 }
 0x52d   :  { %11386 = vset.pattern.permute.xlu2 %v16387_v61 }
 0x52e   :  { %4381 = vperm.xlu1 %11383, %v4235_v52   ;;  %4994 = vperm.xlu2 %11386, %v14112_v15   ;;  %v10100_v52 = vld [vmem:[#allocation3 + $0x240] sm:$0xf] }
 0x52f   :  { %v4031_v62 = vpop.permute.xlu0 %4030 }
 0x530   :  { %4147 = vst.msk [vmem:[#allocation3 + $0x1d8] sm:$0xf] %vm1765_vm4, %v4031_v62  ;;  %v4041_v4 = vpop.permute.xlu2 %4040  ;;  %v4021_v6 = vpop.permute.xlu1 %4020  ;;  %v4161_v62 = vld [vmem:[#allocation2 + $0xd8] sm:$0xff] }
 0x531   :  { %4152 = vst.msk [vmem:[#allocation3 + $0x214] sm:$0xf] %vm1765_vm4, %v4041_v4 }
 0x532   :  { %4142 = vst.msk [vmem:[#allocation3 + $0x19c] sm:$0xf] %vm1765_vm4, %v4021_v6 }
 0x536   :  { %11388 = vset.pattern.permute.xlu1 %v16387_v61  ;;  %5009 = vperm.xlu2 %11386, %v14135_v3  }
 0x537   :  { %5004 = vperm.xlu1 %11388, %v14089_v63   ;;  %v4037_v46 = vpop.permute.xlu0 %4036 }
 0x538   :  { %4150 = vst.msk [vmem:[#allocation3 + $0x1fc] sm:$0xf] %vm1765_vm4, %v4037_v46  ;;  %v4047_v11 = vpop.permute.xlu2 %4046  ;;  %v4027_v40 = vpop.permute.xlu1 %4026 }
 0x539   :  { %4155 = vst.msk [vmem:[#allocation3 + $0x238] sm:$0xf] %vm1765_vm4, %v4047_v11 }
 0x53a   :  { %4145 = vst.msk [vmem:[#allocation3 + $0x1c0] sm:$0xf] %vm1765_vm4, %v4027_v40  ;;  %v14297_v40 = vpop.f32.mrf.mxu1 }
 0x53c   :  { %6979 = vmatmul.bf16.gmra.mxu1 %v10089_v35 }
 0x53e   :  { %5014 = vperm.xlu2 %11386, %v14130_v48   ;;  %v11125_v48 = vld [vmem:[#allocation3 + $0x248] sm:$0xf0] }
 0x53f   :  { %11389 = vset.pattern.permute.xlu1 %v16383_v45  ;;  %v4043_v63 = vpop.permute.xlu0 %4042  ;;  %v10101_v4 = vor.u32 %v11125_v48, %v10100_v52 }
 0x540   :  { %4386 = vperm.xlu1 %11389, %v4236_v16   ;;  %4153 = vst.msk [vmem:[#allocation3 + $0x220] sm:$0xf] %vm1765_vm4, %v4043_v63  ;;  %v4053_v59 = vpop.permute.xlu2 %4052  ;;  %v4033_v41 = vpop.permute.xlu1 %4032  ;;  %v10112_v63 = vld [vmem:[#allocation3 + $0x258] sm:$0xf] }
 0x541   :  { %4158 = vst.msk [vmem:[#allocation3 + $0x25c] sm:$0xf] %vm1765_vm4, %v4053_v59  ;;  %v10113_v59 = vor.u32 %v11128_v56, %v10112_v63 }
 0x542   :  { %4148 = vst.msk [vmem:[#allocation3 + $0x1e4] sm:$0xf] %vm1765_vm4, %v4033_v41  ;;  %v14304_v41 = vpop.f32.mrf.mxu1 }
 0x543   :  { %16439 = vst [vmem:[#allocation15_spill] sm:$0xff] %v14304_v41 }
 0x546   :  { %11391 = vset.pattern.permute.xlu2 %v16385_v14 }
 0x547   :  { %v4049_v34 = vpop.permute.xlu0 %4048  ;;  %5727 = vperm.xlu2 %11391, %v14107_v28  }
 0x548   :  { %11390 = vset.pattern.permute.xlu1 %v16385_v14  ;;  %4156 = vst.msk [vmem:[#allocation3 + $0x244] sm:$0xf] %vm1765_vm4, %v4049_v34  ;;  %v4272_v36 = vpop.permute.xlu2 %4271  ;;  %v4039_v49 = vpop.permute.xlu1 %4038 }
 0x549   :  { %4151 = vst.msk [vmem:[#allocation3 + $0x208] sm:$0xf] %vm1765_vm4, %v4039_v49  ;;  %5722 = vperm.xlu1 %11390, %v14112_v15   ;;  %v4525_v6 = vmul.f32 %v4272_v36, %v4161_v62  ;;  %v4160_v36 = vld [vmem:[#allocation2 + $0xd0] sm:$0xff] }
 0x54b   :  { %v4577_v46 = vpack.c.bf16 %v4525_v6, %v4525_v6 }
 0x54c   :  { %6984 = vmatmul.bf16.gmra.mxu1 %v10101_v4 }
 0x54f   :  { %v4055_v60 = vpop.permute.xlu0 %4054  ;;  %11393 = vset.pattern.permute.xlu2 %v16387_v61 }
 0x550   :  { %4159 = vst.msk [vmem:[#allocation3 + $0x268] sm:$0xf] %vm1765_vm4, %v4055_v60  ;;  %v14293_v28 = vpop.permute.xlu2 %4286  ;;  %v4045_v11 = vpop.permute.xlu1 %4044  ;;  %v4163_v60 = vld [vmem:[#allocation2 + $0xe8] sm:$0xff] }
 0x551   :  { %4154 = vst.msk [vmem:[#allocation3 + $0x22c] sm:$0xf] %vm1765_vm4, %v4045_v11  ;;  %4682 = vrot.lane.b32.xlu1 %v4577_v46, %s11548_s22 }
 0x552   :  { %11392 = vset.pattern.permute.xlu1 %v16387_v61 }
 0x557   :  { %v4277_v15 = vpop.permute.xlu0 %4276 }
 0x558   :  { %v14300_v35 = vpop.permute.xlu2 %4296  ;;  %v4051_v16 = vpop.permute.xlu1 %4050 }
 0x559   :  { %4157 = vst.msk [vmem:[#allocation3 + $0x250] sm:$0xf] %vm1765_vm4, %v4051_v16  ;;  %5024 = vperm.xlu1 %11392, %v14153_v0  }
 0x55c   :  { %6989 = vmatmul.bf16.gmra.mxu1 %v10113_v59 }
 0x55f   :  { %v14306_v34 = vpop.permute.xlu0 %4301 }
 0x560   :  { %v14308_v48 = vpop.permute.xlu2 %4311  ;;  %v4267_v49 = vpop.permute.xlu1 %4266 }
 0x561   :  { %v4524_v52 = vmul.f32 %v4267_v49, %v4160_v36  ;;  %11394 = vset.pattern.permute.xlu1 %v16385_v14 }
 0x562   :  { %5737 = vperm.xlu1 %11394, %v14135_v3  }
 0x563   :  { %v4576_v4 = vpack.c.bf16 %v4524_v52, %v4524_v52 }
 0x565   :  { %4680 = vrot.lane.b32.xlu0 %v4576_v4, %s11548_s22 }
 0x567   :  { %v14313_v6 = vpop.permute.xlu0 %4316 }
 0x568   :  { %v14315_v46 = vpop.permute.xlu2 %4326  ;;  %v4282_v11 = vpop.permute.xlu1 %4281 }
 0x569   :  { %v4527_v56 = vmul.f32 %v4282_v11, %v4163_v60 }
 0x56a   :  { %11395 = vset.pattern.permute.xlu1 %v16387_v61 }
 0x56b   :  { %v4579_v16 = vpack.c.bf16 %v4527_v56, %v4527_v56 }
 0x56d   :  { %4686 = vrot.lane.b32.xlu1 %v4579_v16, %s11548_s22  ;;  %v4162_v16 = vld [vmem:[#allocation2 + $0xe0] sm:$0xff] }
 0x56f   :  { %v14319_v63 = vpop.permute.xlu0 %4331 }
 0x570   :  { %v14321_v59 = vpop.permute.xlu2 %4341  ;;  %v4292_v3 = vpop.permute.xlu1 %4291 }
 0x575   :  { %5034 = vperm.xlu1 %11395, %v14179_v24  }
 0x577   :  { %v14324_v36 = vpop.permute.xlu0 %4346 }
 0x578   :  { %v14326_v49 = vpop.permute.xlu2 %4356  ;;  %v14328_v52 = vpop.permute.xlu1 %4306 }
 0x57d   :  { %11396 = vset.pattern.permute.xlu1 %v16385_v14  ;;  %v14345_v14 = vld [vmem:[#allocation2 + $0xf0] sm:$0xff] }
 0x57e   :  { %5747 = vperm.xlu1 %11396, %v14158_v22  }
 0x57f   :  { %v14332_v4 = vpop.permute.xlu0 %4361 }
 0x580   :  { %v14334_v11 = vpop.permute.xlu2 %4371  ;;  %v14336_v56 = vpop.permute.xlu1 %4321 }
 0x586   :  { %11397 = vset.pattern.permute.xlu1 %v16387_v61 }
 0x588   :  { %v14339_v24 = vpop.permute.xlu1 %4336  ;;  %v5000_v45 = vpop.permute.xlu0 %4999 }
 0x589   :  { %v5253_v13 = vmul.f32 %v5000_v45, %v4162_v16  ;;  %v4995_v1 = vpop.permute.xlu2 %4994  ;;  %v4526_v45 = vmul.f32 %v4277_v15, %v4162_v16  ;;  %v11147_v15 = vld [vmem:[%s16358_s4 + $0x88] sm:$0xff] }
 0x58a   :  { %v5252_v19 = vmul.f32 %v4995_v1, %v4161_v62  ;;  %v14350_v1 = vld [vmem:[#allocation2 + $0xf8] sm:$0xff]  ;;  %7140 = vmatpush.bf16.msra.mxu3 %v11147_v15 }
 0x58b   :  { %v5305_v38 = vpack.c.bf16 %v5253_v13, %v5253_v13  ;;  %v4578_v62 = vpack.c.bf16 %v4526_v45, %v4526_v45 }
 0x58c   :  { %v5304_v55 = vpack.c.bf16 %v5252_v19, %v5252_v19 }
 0x58d   :  { %5410 = vrot.lane.b32.xlu0 %v5305_v38, %s11550_s18  ;;  %v4529_v38 = vmul.f32 %v4292_v3, %v14350_v1 }
 0x58e   :  { %5408 = vrot.lane.b32.xlu2 %v5304_v55, %s11550_s18 }
 0x58f   :  { %v4581_v41 = vpack.c.bf16 %v4529_v38, %v4529_v38 }
 0x590   :  { %v14343_v22 = vpop.permute.xlu1 %4351 }
 0x591   :  { %v5010_v30 = vpop.permute.xlu2 %5009 }
 0x592   :  { %v5255_v61 = vmul.f32 %v5010_v30, %v14345_v14 }
 0x594   :  { %v5307_v17 = vpack.c.bf16 %v5255_v61, %v5255_v61 }
 0x596   :  { %5029 = vperm.xlu2 %11393, %v14102_v10   ;;  %5414 = vrot.lane.b32.xlu0 %v5307_v17, %s11550_s18 }
 0x598   :  { %v14352_v19 = vpop.permute.xlu1 %4366 }
 0x599   :  { %v5015_v55 = vpop.permute.xlu2 %5014 }
 0x59a   :  { %v5256_v13 = vmul.f32 %v5015_v55, %v14350_v1 }
 0x59c   :  { %v5308_v12 = vpack.c.bf16 %v5256_v13, %v5256_v13 }
 0x59e   :  { %4684 = vrot.lane.b32.xlu2 %v4578_v62, %s11548_s22  ;;  %5416 = vrot.lane.b32.xlu1 %v5308_v12, %s11550_s18  ;;  %v11146_v12 = vld [vmem:[%s16358_s4 + $0x80] sm:$0xff] }
 0x59f   :  { %4690 = vrot.lane.b32.xlu0 %v4581_v41, %s11548_s22  ;;  %v14370_v41 = vld [vmem:[#allocation2 + $0x108] sm:$0xff]  ;;  %7141 = vmatpush.bf16.msra.mxu3 %v11146_v12 }
 0x5a0   :  { %v14359_v17 = vpop.permute.xlu1 %4381  ;;  %v4531_v45 = vmul.f32 %v14306_v34, %v14370_v41  ;;  %v4528_v34 = vmul.f32 %v14293_v28, %v14345_v14  ;;  %v5670_v28 = vld [vmem:[%s16355_s1 + $0x10] sm:$0xff] }
 0x5a1   :  { %v5728_v30 = vpop.permute.xlu2 %5727 }
 0x5a2   :  { %v5981_v61 = vmul.f32 %v5728_v30, %v4163_v60  ;;  %v4583_v62 = vpack.c.bf16 %v4531_v45, %v4531_v45  ;;  %v16440_v30 = vmov 8   ;;  %v14386_v45 = vld [vmem:[#allocation2 + $0x100] sm:$0xff] }
 0x5a4   :  { %v6033_v3 = vpack.c.bf16 %v5981_v61, %v5981_v61  ;;  %v4580_v61 = vpack.c.bf16 %v4528_v34, %v4528_v34 }
 0x5a6   :  { %6085 = vst.msk [vmem:[#allocation3 + $0x14] sm:$0xf] %vm1036_vm3, %v6033_v3  ;;  %5049 = vperm.xlu1 %11397, %v14199_v42   ;;  %v16441_v42 = vmov 7   ;;  %v5020_v3 = vpop.permute.xlu0 %5019 }
 0x5a7   :  { %5044 = vperm.xlu0 %11387, %v14125_v18  }
 0x5a9   :  { %v5005_v38 = vpop.permute.xlu1 %5004 }
 0x5aa   :  { %v5254_v55 = vmul.f32 %v5005_v38, %v4163_v60 }
 0x5ac   :  { %v5306_v13 = vpack.c.bf16 %v5254_v55, %v5254_v55 }
 0x5ae   :  { %11399 = vset.pattern.permute.xlu1 %v16440_v30  ;;  %5412 = vrot.lane.b32.xlu2 %v5306_v13, %s11550_s18  ;;  %v11145_v13 = vld [vmem:[%s16358_s4 + $0x78] sm:$0xff] }
 0x5af   :  { %4694 = vrot.lane.b32.xlu0 %v4583_v62, %s11548_s22  ;;  %5757 = vperm.xlu1 %11399, %v14102_v10   ;;  %v5257_v10 = vmul.f32 %v5020_v3, %v14386_v45  ;;  %v11144_v3 = vld [vmem:[%s16358_s4 + $0x70] sm:$0xff] }
 0x5b0   :  { %6995 = vmatpush.bf16.msra.mxu2 %v11145_v13 }
 0x5b1   :  { %v5309_v38 = vpack.c.bf16 %v5257_v10, %v5257_v10 }
 0x5b2   :  { %v14378_v18 = vpop.permute.xlu1 %4386 }
 0x5b4   :  { %6996 = vmatpush.bf16.msra.mxu2 %v11144_v3 }
 0x5b6   :  { %5039 = vperm.xlu2 %11393, %v14174_v58  }
 0x5b7   :  { %5054 = vperm.xlu0 %11387, %v14192_v9   ;;  %11400 = vset.pattern.permute.xlu1 %v16441_v42 }
 0x5bb   :  { %v5723_v60 = vpop.permute.xlu1 %5722 }
 0x5bc   :  { %v5980_v15 = vmul.f32 %v5723_v60, %v4162_v16  ;;  %v5672_v60 = vld [vmem:[%s16355_s1 + $0x20] sm:$0xff] }
 0x5be   :  { %v6032_v12 = vpack.c.bf16 %v5980_v15, %v5980_v15  ;;  %4688 = vrot.lane.b32.xlu2 %v4580_v61, %s11548_s22  ;;  %v4530_v15 = vmul.f32 %v14300_v35, %v14386_v45 }
 0x5bf   :  { %5064 = vperm.xlu0 %11387, %v14214_v39   ;;  %11398 = vset.pattern.permute.xlu2 %v16440_v30  ;;  %v11054_v39 = vld [vmem:[#allocation3 + $0x10] sm:$0xf0] }
 0x5c0   :  { %6084 = vst.msk [vmem:[#allocation3 + $0x8] sm:$0xf] %vm1036_vm3, %v6032_v12  ;;  %v4582_v12 = vpack.c.bf16 %v4530_v15, %v4530_v15  ;;  %v11138_v15 = vld [vmem:[%s16358_s4 + $0x40] sm:$0xff] }
 0x5c3   :  { %v4683_v9 = vpop.permute.xlu1 %4682 }
 0x5c4   :  { %4837 = vst.msk [vmem:[#allocation3 + $0x10] sm:$0xf] %vm2494_vm5, %v4683_v9 }
 0x5c6   :  { %5418 = vrot.lane.b32.xlu2 %v5309_v38, %s11550_s18  ;;  %v11143_v38 = vld [vmem:[%s16358_s4 + $0x68] sm:$0xff] }
 0x5c7   :  { %11401 = vset.pattern.permute.xlu0 %v16440_v30  ;;  %v9820_v16 = vld [vmem:[#allocation3 + $0x8] sm:$0xf]  ;;  %6997 = vmatpush.bf16.msra.mxu2 %v11143_v38 }
 0x5c8   :  { %5732 = vperm.xlu0 %11401, %v5670_v28   ;;  %v9821_v55 = vor.u32 %v11054_v39, %v9820_v16  ;;  %v11142_v28 = vld [vmem:[%s16358_s4 + $0x60] sm:$0xff]  ;;  %v14426_v16 = vld [vmem:[#allocation2 + $0x128] sm:$0xff] }
 0x5ca   :  { %10194 = vmatmul.msk.bf16.vlgmr.msra.gmra.mxu3 %vm487_vm2, %v9821_v55  ;;  %v4535_v55 = vmul.f32 %v14336_v56, %v14426_v16  ;;  %v11139_v56 = vld [vmem:[%s16358_s4 + $0x48] sm:$0xff] }
 0x5cb   :  { %v5025_v62 = vpop.permute.xlu1 %5024  ;;  %6998 = vmatpush.bf16.msra.mxu2 %v11142_v28 }
 0x5cc   :  { %v5258_v34 = vmul.f32 %v5025_v62, %v14370_v41  ;;  %v4587_v13 = vpack.c.bf16 %v4535_v55, %v4535_v55 }
 0x5ce   :  { %v5310_v61 = vpack.c.bf16 %v5258_v34, %v5258_v34  ;;  %5752 = vperm.xlu2 %11398, %v14153_v0   ;;  %v5681_v34 = vld [vmem:[%s16355_s1 + $0x68] sm:$0xff] }
 0x5d0   :  { %5742 = vperm.xlu0 %11401, %v5672_v60   ;;  %5420 = vrot.lane.b32.xlu1 %v5310_v61, %s11550_s18  ;;  %v14448_v60 = vld [vmem:[#allocation2 + $0x118] sm:$0xff] }
 0x5d4   :  { %v5738_v10 = vpop.permute.xlu1 %5737 }
 0x5d5   :  { %v5983_v9 = vmul.f32 %v5738_v10, %v14350_v1  ;;  %v14424_v1 = vld [vmem:[#allocation2 + $0x110] sm:$0xff]  ;;  %v14454_v10 = vld [vmem:[#allocation2 + $0x148] sm:$0xff] }
 0x5d6   :  { %4692 = vrot.lane.b32.xlu2 %v4582_v12, %s11548_s22  ;;  %v4532_v39 = vmul.f32 %v14328_v52, %v14424_v1  ;;  %v11140_v52 = vld [vmem:[%s16358_s4 + $0x50] sm:$0xff] }
 0x5d7   :  { %v6035_v0 = vpack.c.bf16 %v5983_v9, %v5983_v9  ;;  %v4681_v35 = vpop.permute.xlu0 %4680  ;;  %v4539_v9 = vmul.f32 %v14321_v59, %v14454_v10 }
 0x5d8   :  { %4836 = vst.msk [vmem:[#allocation3 + $0x4] sm:$0xf] %vm2494_vm5, %v4681_v35  ;;  %5767 = vperm.xlu0 %11401, %v14174_v58   ;;  %5059 = vperm.xlu1 %11400, %v14148_v37   ;;  %v11141_v37 = vld [vmem:[%s16358_s4 + $0x58] sm:$0xff]  ;;  %v4584_v58 = vpack.c.bf16 %v4532_v39, %v4532_v39 }
 0x5d9   :  { %6087 = vst.msk [vmem:[#allocation3 + $0x2c] sm:$0xf] %vm1036_vm3, %v6035_v0  ;;  %6999 = vmatpush.bf16.msra.mxu2 %v11141_v37  ;;  %v4591_v0 = vpack.c.bf16 %v4539_v9, %v4539_v9 }
 0x5dd   :  { %7000 = vmatpush.bf16.msra.mxu2 %v11140_v52 }
 0x5df   :  { %v4687_v62 = vpop.permute.xlu1 %4686 }
 0x5e0   :  { %4702 = vrot.lane.b32.xlu0 %v4587_v13, %s11548_s22  ;;  %4839 = vst.msk [vmem:[#allocation3 + $0x28] sm:$0xf] %vm2494_vm5, %v4687_v62  ;;  %4696 = vrot.lane.b32.xlu1 %v4584_v58, %s11548_s22  ;;  %v5676_v13 = vld [vmem:[%s16355_s1 + $0x40] sm:$0xff] }
 0x5e1   :  { %7001 = vmatpush.bf16.msra.mxu2 %v11139_v56 }
 0x5e5   :  { %7002 = vmatpush.bf16.msra.mxu2 %v11138_v15 }
 0x5e7   :  { %v5035_v61 = vpop.permute.xlu1 %5034 }
 0x5e8   :  { %5787 = vperm.xlu0 %11401, %v5681_v34   ;;  %v5260_v3 = vmul.f32 %v5035_v61, %v14448_v60  ;;  %v5409_v12 = vpop.permute.xlu2 %5408 }
 0x5e9   :  { %5564 = vst.msk [vmem:[#allocation3 + $0x4] sm:$0xf] %vm3223_vm6, %v5409_v12 }
 0x5ea   :  { %v5312_v38 = vpack.c.bf16 %v5260_v3, %v5260_v3 }
 0x5ec   :  { %5424 = vrot.lane.b32.xlu1 %v5312_v38, %s11550_s18 }
 0x5f0   :  { %4710 = vrot.lane.b32.xlu0 %v4591_v0, %s11548_s22  ;;  %v5030_v35 = vpop.permute.xlu2 %5029  ;;  %v5748_v28 = vpop.permute.xlu1 %5747  ;;  %v11052_v56 = vld [vmem:[#allocation3 + $0x4] sm:$0xf] }
 0x5f1   :  { %v5259_v39 = vmul.f32 %v5030_v35, %v14424_v1  ;;  %v5985_v55 = vmul.f32 %v5748_v28, %v14370_v41  ;;  %v5679_v41 = vld [vmem:[%s16355_s1 + $0x58] sm:$0xff] }
 0x5f3   :  { %v5311_v37 = vpack.c.bf16 %v5259_v39, %v5259_v39  ;;  %v6037_v58 = vpack.c.bf16 %v5985_v55, %v5985_v55 }
 0x5f4   :  { %5069 = vperm.xlu1 %11400, %v14209_v43   ;;  %v14478_v43 = vld [vmem:[%s16355_s1 + $0x80] sm:$0xff] }
 0x5f5   :  { %6089 = vst.msk [vmem:[#allocation3 + $0x44] sm:$0xf] %vm1036_vm3, %v6037_v58  ;;  %5422 = vrot.lane.b32.xlu2 %v5311_v37, %s11550_s18 }
 0x5f8   :  { %5807 = vperm.xlu0 %11401, %v14233_v27   ;;  %v4685_v59 = vpop.permute.xlu2 %4684  ;;  %v4533_v27 = vmul.f32 %v14308_v48, %v14448_v60  ;;  %v14490_v48 = vld [vmem:[#allocation2 + $0x120] sm:$0xff] }
 0x5f9   :  { %4838 = vst.msk [vmem:[#allocation3 + $0x1c] sm:$0xf] %vm2494_vm5, %v4685_v59 }
 0x5fa   :  { %v4585_v52 = vpack.c.bf16 %v4533_v27, %v4533_v27 }
 0x5fc   :  { %11402 = vset.pattern.permute.xlu1 %v16440_v30 }
 0x5fd   :  { %5762 = vperm.xlu2 %11398, %v5676_v13   ;;  %5777 = vperm.xlu1 %11402, %v5679_v41   ;;  %v5678_v41 = vld [vmem:[%s16355_s1 + $0x50] sm:$0xff] }
 0x5ff   :  { %v5411_v62 = vpop.permute.xlu0 %5410 }
 0x600   :  { %11406 = vset.pattern.permute.xlu0 %v16441_v42  ;;  %5565 = vst.msk [vmem:[#allocation3 + $0x10] sm:$0xf] %vm3223_vm6, %v5411_v62 }
 0x601   :  { %5074 = vperm.xlu0 %11406, %v14478_v43  }
 0x605   :  { %4698 = vrot.lane.b32.xlu2 %v4585_v52, %s11548_s22  ;;  %11403 = vset.pattern.permute.xlu1 %v16441_v42  ;;  %v4534_v52 = vmul.f32 %v14313_v6, %v14490_v48  ;;  %v4957_v6 = vld [vmem:[%s16355_s1 + $0x88] sm:$0xff] }
 0x607   :  { %v9814_v34 = vld [vmem:[#allocation3 + $0xc] sm:$0xf0] }
 0x608   :  { %v5415_v61 = vpop.permute.xlu0 %5414  ;;  %v5413_v15 = vpop.permute.xlu2 %5412  ;;  %v9817_v3 = vor.u32 %v11052_v56, %v9814_v34 }
 0x609   :  { %5567 = vst.msk [vmem:[#allocation3 + $0x28] sm:$0xf] %vm3223_vm6, %v5415_v61  ;;  %5084 = vperm.xlu0 %11406, %v14228_v8   ;;  %v14499_v8 = vld [vmem:[%s16355_s1 + $0xb0] sm:$0xff] }
 0x60a   :  { %5566 = vst.msk [vmem:[#allocation3 + $0x1c] sm:$0xf] %vm3223_vm6, %v5413_v15  ;;  %7003 = vmatmul.bf16.vlgmr.msra.gmra.mxu2 %v9817_v3  ;;  %v14517_v3 = vld [vmem:[#allocation2 + $0x170] sm:$0xff] }
 0x610   :  { %v5040_v12 = vpop.permute.xlu2 %5039  ;;  %v5417_v9 = vpop.permute.xlu1 %5416  ;;  %v9826_v39 = vld [vmem:[#allocation3 + $0x24] sm:$0xf0] }
 0x611   :  { %v4691_v38 = vpop.permute.xlu0 %4690  ;;  %5094 = vperm.xlu0 %11406, %v14249_v51   ;;  %v5261_v0 = vmul.f32 %v5040_v12, %v14490_v48  ;;  %v11055_v28 = vld [vmem:[#allocation3 + $0x1c] sm:$0xf]  ;;  %v14503_v51 = vld [vmem:[#allocation2 + $0x168] sm:$0xff]  ;;  %v4586_v12 = vpack.c.bf16 %v4534_v52, %v4534_v52 }
 0x612   :  { %4841 = vst.msk [vmem:[#allocation3 + $0x40] sm:$0xf] %vm2494_vm5, %v4691_v38  ;;  %v9829_v58 = vor.u32 %v11055_v28, %v9826_v39  ;;  %v4543_v27 = vmul.f32 %v14332_v4, %v14503_v51 }
 0x613   :  { %v5313_v35 = vpack.c.bf16 %v5261_v0, %v5261_v0  ;;  %v14527_v0 = vld [vmem:[#allocation2 + $0x130] sm:$0xff] }
 0x614   :  { %v4595_v56 = vpack.c.bf16 %v4543_v27, %v4543_v27 }
 0x615   :  { %5426 = vrot.lane.b32.xlu2 %v5313_v35, %s11550_s18 }
 0x618   :  { %v4689_v55 = vpop.permute.xlu2 %4688  ;;  %v5050_v37 = vpop.permute.xlu1 %5049 }
 0x619   :  { %v5045_v59 = vpop.permute.xlu0 %5044  ;;  %5104 = vperm.xlu0 %11406, %v14499_v8   ;;  %4840 = vst.msk [vmem:[#allocation3 + $0x34] sm:$0xf] %vm2494_vm5, %v4689_v55  ;;  %v5263_v28 = vmul.f32 %v5050_v37, %v14527_v0 }
 0x61a   :  { %v5262_v13 = vmul.f32 %v5045_v59, %v14426_v16  ;;  %5568 = vst.msk [vmem:[#allocation3 + $0x34] sm:$0xf] %vm3223_vm6, %v5417_v9  ;;  %7008 = vmatmul.bf16.gmra.mxu2 %v9829_v58  ;;  %v4544_v9 = vmul.f32 %v14352_v19, %v14517_v3 }
 0x61c   :  { %v5314_v62 = vpack.c.bf16 %v5262_v13, %v5262_v13  ;;  %v4596_v35 = vpack.c.bf16 %v4544_v9, %v4544_v9  ;;  %v14552_v9 = vld [vmem:[%s16355_s1 + $0x98] sm:$0xff] }
 0x61d   :  { %5772 = vperm.xlu2 %11398, %v5678_v41   ;;  %v5315_v41 = vpack.c.bf16 %v5263_v28, %v5263_v28 }
 0x61e   :  { %5428 = vrot.lane.b32.xlu1 %v5314_v62, %s11550_s18 }
 0x620   :  { %v5419_v34 = vpop.permute.xlu2 %5418 }
 0x621   :  { %v4695_v61 = vpop.permute.xlu0 %4694  ;;  %4718 = vrot.lane.b32.xlu0 %v4595_v56, %s11548_s22  ;;  %5569 = vst.msk [vmem:[#allocation3 + $0x40] sm:$0xf] %vm3223_vm6, %v5419_v34  ;;  %v5758_v15 = vpop.permute.xlu1 %5757  ;;  %v11058_v19 = vld [vmem:[#allocation3 + $0x34] sm:$0xf] }
 0x622   :  { %4843 = vst.msk [vmem:[#allocation3 + $0x58] sm:$0xf] %vm2494_vm5, %v4695_v61  ;;  %v5987_v4 = vmul.f32 %v5758_v15, %v14448_v60  ;;  %v4536_v60 = vmul.f32 %v14315_v46, %v14527_v0  ;;  %v14538_v46 = vld [vmem:[#allocation2 + $0x138] sm:$0xff] }
 0x623   :  { %v4537_v61 = vmul.f32 %v14319_v63, %v14538_v46 }
 0x624   :  { %v6039_v38 = vpack.c.bf16 %v5987_v4, %v5987_v4  ;;  %v4588_v62 = vpack.c.bf16 %v4536_v60, %v4536_v60 }
 0x625   :  { %4700 = vrot.lane.b32.xlu2 %v4586_v12, %s11548_s22  ;;  %v4589_v4 = vpack.c.bf16 %v4537_v61, %v4537_v61 }
 0x626   :  { %6091 = vst.msk [vmem:[#allocation3 + $0x5c] sm:$0xf] %vm1036_vm3, %v6039_v38  ;;  %5079 = vperm.xlu1 %11403, %v4957_v6  }
 0x628   :  { %v5753_v39 = vpop.permute.xlu2 %5752  ;;  %v9838_v55 = vld [vmem:[#allocation3 + $0x3c] sm:$0xf0] }
 0x629   :  { %v5055_v58 = vpop.permute.xlu0 %5054  ;;  %4720 = vrot.lane.b32.xlu0 %v4596_v35, %s11548_s22  ;;  %v5986_v59 = vmul.f32 %v5753_v39, %v14424_v1  ;;  %v9841_v13 = vor.u32 %v11058_v19, %v9838_v55  ;;  %v5680_v1 = vld [vmem:[%s16355_s1 + $0x60] sm:$0xff]  ;;  %v11057_v39 = vld [vmem:[#allocation3 + $0x28] sm:$0xf0] }
 0x62a   :  { %v5264_v37 = vmul.f32 %v5055_v58, %v14538_v46 }
 0x62b   :  { %v6038_v27 = vpack.c.bf16 %v5986_v59, %v5986_v59  ;;  %7013 = vmatmul.bf16.gmra.mxu2 %v9841_v13 }
 0x62c   :  { %v5316_v34 = vpack.c.bf16 %v5264_v37, %v5264_v37 }
 0x62d   :  { %6090 = vst.msk [vmem:[#allocation3 + $0x50] sm:$0xf] %vm1036_vm3, %v6038_v27  ;;  %5430 = vrot.lane.b32.xlu2 %v5315_v41, %s11550_s18 }
 0x62e   :  { %4704 = vrot.lane.b32.xlu1 %v4588_v62, %s11548_s22 }
 0x630   :  { %v4693_v52 = vpop.permute.xlu2 %4692 }
 0x631   :  { %v5065_v56 = vpop.permute.xlu0 %5064  ;;  %4842 = vst.msk [vmem:[#allocation3 + $0x4c] sm:$0xf] %vm2494_vm5, %v4693_v52 }
 0x632   :  { %v5266_v55 = vmul.f32 %v5065_v56, %v14454_v10 }
 0x634   :  { %v5318_v27 = vpack.c.bf16 %v5266_v55, %v5266_v55 }
 0x635   :  { %5782 = vperm.xlu2 %11398, %v5680_v1  }
 0x636   :  { %5432 = vrot.lane.b32.xlu1 %v5316_v34, %s11550_s18  ;;  %v5682_v34 = vld [vmem:[%s16355_s1 + $0x70] sm:$0xff] }
 0x63a   :  { %v5733_v15 = vpop.permute.xlu0 %5732 }
 0x63b   :  { %v5982_v12 = vmul.f32 %v5733_v15, %v14345_v14  ;;  %v5683_v14 = vld [vmem:[%s16355_s1 + $0x78] sm:$0xff]  ;;  %v11060_v15 = vld [vmem:[#allocation3 + $0x40] sm:$0xf0] }
 0x63d   :  { %v6034_v6 = vpack.c.bf16 %v5982_v12, %v5982_v12  ;;  %4706 = vrot.lane.b32.xlu2 %v4589_v4, %s11548_s22 }
 0x63e   :  { %5089 = vperm.xlu1 %11403, %v14552_v9  }
 0x63f   :  { %6086 = vst.msk [vmem:[#allocation3 + $0x20] sm:$0xf] %vm1036_vm3, %v6034_v6 }
 0x642   :  { %v5743_v38 = vpop.permute.xlu0 %5742  ;;  %v5421_v35 = vpop.permute.xlu1 %5420 }
 0x643   :  { %v5984_v63 = vmul.f32 %v5743_v38, %v14386_v45  ;;  %5570 = vst.msk [vmem:[#allocation3 + $0x4c] sm:$0xf] %vm3223_vm6, %v5421_v35  ;;  %v14566_v45 = vld [vmem:[#allocation2 + $0x140] sm:$0xff]  ;;  %v4176_v35 = vld [vmem:[#allocation2 + $0x150] sm:$0xff] }
 0x645   :  { %v6036_v28 = vpack.c.bf16 %v5984_v63, %v5984_v63 }
 0x646   :  { %11404 = vset.pattern.permute.xlu1 %v16440_v30  ;;  %v9832_v60 = vld [vmem:[#allocation3 + $0x20] sm:$0xf] }
 0x647   :  { %6088 = vst.msk [vmem:[#allocation3 + $0x38] sm:$0xf] %vm1036_vm3, %v6036_v28  ;;  %5797 = vperm.xlu1 %11404, %v5683_v14   ;;  %v9833_v19 = vor.u32 %v11057_v39, %v9832_v60  ;;  %v4540_v28 = vmul.f32 %v14324_v36, %v4176_v35  ;;  %v4538_v60 = vmul.f32 %v14339_v24, %v14566_v45 }
 0x649   :  { %10195 = vmatmul.msk.bf16.gmra.mxu3 %vm487_vm2, %v9833_v19 }
 0x64a   :  { %v5768_v58 = vpop.permute.xlu0 %5767  ;;  %v5060_v59 = vpop.permute.xlu1 %5059  ;;  %v11061_v6 = vld [vmem:[#allocation3 + $0x4c] sm:$0xf] }
 0x64b   :  { %v5989_v13 = vmul.f32 %v5768_v58, %v14426_v16  ;;  %v5265_v41 = vmul.f32 %v5060_v59, %v14566_v45  ;;  %v14580_v16 = vld [vmem:[%s16355_s1 + $0xa8] sm:$0xff]  ;;  %v4592_v58 = vpack.c.bf16 %v4540_v28, %v4540_v28  ;;  %v4590_v59 = vpack.c.bf16 %v4538_v60, %v4538_v60 }
 0x64d   :  { %v6041_v62 = vpack.c.bf16 %v5989_v13, %v5989_v13  ;;  %v5317_v37 = vpack.c.bf16 %v5265_v41, %v5265_v41 }
 0x64e   :  { %v9844_v61 = vld [vmem:[#allocation3 + $0x38] sm:$0xf] }
 0x64f   :  { %6093 = vst.msk [vmem:[#allocation3 + $0x74] sm:$0xf] %vm1036_vm3, %v6041_v62  ;;  %5436 = vrot.lane.b32.xlu1 %v5318_v27, %s11550_s18  ;;  %v5423_v52 = vpop.permute.xlu2 %5422  ;;  %5434 = vrot.lane.b32.xlu2 %v5317_v37, %s11550_s18  ;;  %v9845_v12 = vor.u32 %v11060_v15, %v9844_v61  ;;  %v11063_v27 = vld [vmem:[#allocation3 + $0x58] sm:$0xf0] }
 0x650   :  { %5571 = vst.msk [vmem:[#allocation3 + $0x58] sm:$0xf] %vm3223_vm6, %v5423_v52  ;;  %11405 = vset.pattern.permute.xlu1 %v16441_v42 }
 0x652   :  { %v4703_v56 = vpop.permute.xlu0 %4702  ;;  %v4697_v1 = vpop.permute.xlu1 %4696 }
 0x653   :  { %4847 = vst.msk [vmem:[#allocation3 + $0x88] sm:$0xf] %vm2494_vm5, %v4703_v56 }
 0x654   :  { %4844 = vst.msk [vmem:[#allocation3 + $0x64] sm:$0xf] %vm2494_vm5, %v4697_v1 }
 0x656   :  { %v11066_v60 = vld [vmem:[#allocation3 + $0x70] sm:$0xf0] }
 0x657   :  { %5099 = vperm.xlu1 %11405, %v14580_v16   ;;  %v5763_v4 = vpop.permute.xlu2 %5762  ;;  %5792 = vperm.xlu2 %11398, %v5682_v34   ;;  %v9850_v38 = vld [vmem:[#allocation3 + $0x54] sm:$0xf0] }
 0x658   :  { %v5988_v63 = vmul.f32 %v5763_v4, %v14490_v48  ;;  %v9853_v14 = vor.u32 %v11061_v6, %v9850_v38  ;;  %v14605_v6 = vld [vmem:[#allocation2 + $0x158] sm:$0xff] }
 0x659   :  { %10196 = vmatmul.msk.bf16.gmra.mxu3 %vm487_vm2, %v9845_v12 }
 0x65a   :  { %v6040_v39 = vpack.c.bf16 %v5988_v63, %v5988_v63  ;;  %v5788_v19 = vpop.permute.xlu0 %5787  ;;  %7018 = vmatmul.bf16.gmra.mxu2 %v9853_v14  ;;  %v4541_v14 = vmul.f32 %v14343_v22, %v14605_v6  ;;  %v14620_v22 = vld [vmem:[%s16355_s1 + $0xb8] sm:$0xff] }
 0x65b   :  { %v5993_v55 = vmul.f32 %v5788_v19, %v14454_v10  ;;  %v9856_v10 = vld [vmem:[#allocation3 + $0x50] sm:$0xf] }
 0x65c   :  { %6092 = vst.msk [vmem:[#allocation3 + $0x68] sm:$0xf] %vm1036_vm3, %v6040_v39  ;;  %v9857_v37 = vor.u32 %v11063_v27, %v9856_v10 }
 0x65d   :  { %v6045_v13 = vpack.c.bf16 %v5993_v55, %v5993_v55 }
 0x65e   :  { %v5425_v41 = vpop.permute.xlu1 %5424 }
 0x65f   :  { %6097 = vst.msk [vmem:[#allocation3 + $0xa4] sm:$0xf] %vm1036_vm3, %v6045_v13  ;;  %4712 = vrot.lane.b32.xlu1 %v4592_v58, %s11548_s22  ;;  %v4699_v36 = vpop.permute.xlu2 %4698  ;;  %4708 = vrot.lane.b32.xlu2 %v4590_v59, %s11548_s22 }
 0x660   :  { %5572 = vst.msk [vmem:[#allocation3 + $0x64] sm:$0xf] %vm3223_vm6, %v5425_v41 }
 0x661   :  { %4845 = vst.msk [vmem:[#allocation3 + $0x70] sm:$0xf] %vm2494_vm5, %v4699_v36 }
 0x662   :  { %v4711_v24 = vpop.permute.xlu0 %4710 }
 0x663   :  { %4851 = vst.msk [vmem:[#allocation3 + $0xb8] sm:$0xf] %vm2494_vm5, %v4711_v24  ;;  %v9868_v63 = vld [vmem:[#allocation3 + $0x68] sm:$0xf] }
 0x664   :  { %v9869_v19 = vor.u32 %v11066_v60, %v9868_v63 }
 0x666   :  { %v5070_v48 = vpop.permute.xlu1 %5069 }
 0x667   :  { %v5267_v62 = vmul.f32 %v5070_v48, %v4176_v35  ;;  %v11064_v55 = vld [vmem:[#allocation3 + $0x64] sm:$0xf] }
 0x669   :  { %v5319_v52 = vpack.c.bf16 %v5267_v62, %v5267_v62  ;;  %10197 = vmatmul.msk.bf16.gmra.mxu3 %vm487_vm2, %v9857_v37  ;;  %v14629_v62 = vld [vmem:[%s16359_s5] ss:$0 sm:$0xff] }
 0x66a   :  { %v5808_v56 = vpop.permute.xlu0 %5807 }
 0x66b   :  { %v5997_v1 = vmul.f32 %v5808_v56, %v14503_v51  ;;  %5438 = vrot.lane.b32.xlu2 %v5319_v52, %s11550_s18  ;;  %v6866_v56 = vadd.f32 %v14629_v62, %v13884_v33 }
 0x66d   :  { %v6049_v34 = vpack.c.bf16 %v5997_v1, %v5997_v1 }
 0x66f   :  { %6101 = vst.msk [vmem:[#allocation3 + $0xd4] sm:$0xf] %vm1036_vm3, %v6049_v34  ;;  %v5427_v61 = vpop.permute.xlu2 %5426  ;;  %v5778_v15 = vpop.permute.xlu1 %5777 }
 0x670   :  { %5573 = vst.msk [vmem:[#allocation3 + $0x70] sm:$0xf] %vm3223_vm6, %v5427_v61  ;;  %v5991_v4 = vmul.f32 %v5778_v15, %v14538_v46  ;;  %v7143_v61 = vpop.f32.mrf.mxu3 }
 0x672   :  { %v6043_v12 = vpack.c.bf16 %v5991_v4, %v5991_v4 }
 0x673   :  { %v5075_v38 = vpop.permute.xlu0 %5074  ;;  %5802 = vperm.xlu2 %11398, %v14478_v43   ;;  %v4593_v43 = vpack.c.bf16 %v4541_v14, %v4541_v14  ;;  %v4178_v14 = vld [vmem:[#allocation2 + $0x160] sm:$0xff] }
 0x674   :  { %6095 = vst.msk [vmem:[#allocation3 + $0x8c] sm:$0xf] %vm1036_vm3, %v6043_v12  ;;  %v5268_v35 = vmul.f32 %v5075_v38, %v14605_v6 }
 0x676   :  { %v5320_v28 = vpack.c.bf16 %v5268_v35, %v5268_v35 }
 0x677   :  { %v5773_v39 = vpop.permute.xlu2 %5772  ;;  %v9862_v46 = vld [vmem:[#allocation3 + $0x6c] sm:$0xf0] }
 0x678   :  { %v5990_v58 = vmul.f32 %v5773_v39, %v14527_v0  ;;  %5440 = vrot.lane.b32.xlu1 %v5320_v28, %s11550_s18  ;;  %v9865_v59 = vor.u32 %v11064_v55, %v9862_v46 }
 0x679   :  { %10198 = vmatmul.msk.bf16.gmra.mxu3 %vm487_vm2, %v9869_v19 }
 0x67a   :  { %v6042_v13 = vpack.c.bf16 %v5990_v58, %v5990_v58  ;;  %7023 = vmatmul.bf16.gmra.mxu2 %v9865_v59 }
 0x67b   :  { %v5085_v41 = vpop.permute.xlu0 %5084  ;;  %4714 = vrot.lane.b32.xlu2 %v4593_v43, %s11548_s22  ;;  %v11069_v10 = vld [vmem:[#allocation3 + $0x88] sm:$0xf0] }
 0x67c   :  { %6094 = vst.msk [vmem:[#allocation3 + $0x80] sm:$0xf] %vm1036_vm3, %v6042_v13  ;;  %v5270_v37 = vmul.f32 %v5085_v41, %v14503_v51  ;;  %v11072_v13 = vld [vmem:[#allocation3 + $0xa0] sm:$0xf0] }
 0x67e   :  { %v5322_v15 = vpack.c.bf16 %v5270_v37, %v5270_v37  ;;  %v4542_v37 = vmul.f32 %v14326_v49, %v4178_v14  ;;  %v14676_v49 = vld [vmem:[%s16355_s1 + $0xd0] sm:$0xff] }
 0x67f   :  { %v4701_v36 = vpop.permute.xlu2 %4700 }
 0x680   :  { %4846 = vst.msk [vmem:[#allocation3 + $0x7c] sm:$0xf] %vm2494_vm5, %v4701_v36  ;;  %5109 = vperm.xlu1 %11405, %v14620_v22   ;;  %v5688_v36 = vld [vmem:[%s16355_s1 + $0xa0] sm:$0xff] }
 0x683   :  { %v14624_v0 = vpop.permute.xlu0 %5094  ;;  %v9880_v24 = vld [vmem:[#allocation3 + $0x80] sm:$0xf] }
 0x684   :  { %v9881_v27 = vor.u32 %v11069_v10, %v9880_v24  ;;  %v5686_v10 = vld [vmem:[%s16355_s1 + $0x90] sm:$0xff] }
 0x687   :  { %v5431_v48 = vpop.permute.xlu2 %5430 }
 0x688   :  { %11407 = vset.pattern.permute.xlu1 %v16440_v30  ;;  %5575 = vst.msk [vmem:[#allocation3 + $0x88] sm:$0xf] %vm3223_vm6, %v5431_v48  ;;  %v4181_v48 = vld [vmem:[#allocation2 + $0x178] sm:$0xff] }
 0x689   :  { %5817 = vperm.xlu1 %11407, %v14552_v9   ;;  %10199 = vmatmul.msk.bf16.gmra.mxu3 %vm487_vm2, %v9881_v27  ;;  %v4545_v27 = vmul.f32 %v14334_v11, %v4181_v48 }
 0x68b   :  { %v14636_v52 = vpop.permute.xlu0 %5104 }
 0x68d   :  { %v7004_v1 = vpop.f32.mrf.mxu2 }
 0x68e   :  { %v7005_v34 = vadd.f32 %v7004_v1, %v6866_v56  ;;  %v4597_v56 = vpack.c.bf16 %v4545_v27, %v4545_v27  ;;  %v5272_v27 = vmul.f32 %v14624_v0, %v4181_v48  ;;  %v5632_v48 = vld [vmem:[#allocation2 + $0x160] sm:$0xff] }
 0x68f   :  { %v5783_v4 = vpop.permute.xlu2 %5782  ;;  %v9874_v19 = vld [vmem:[#allocation3 + $0x84] sm:$0xf0] }
 0x690   :  { %v7144_v12 = vadd.f32 %v7143_v61, %v7005_v34  ;;  %v5992_v38 = vmul.f32 %v5783_v4, %v14566_v45  ;;  %v5429_v35 = vpop.permute.xlu1 %5428  ;;  %v14649_v45 = vld [vmem:[%s16355_s1 + $0xc0] sm:$0xff]  ;;  %v4594_v61 = vpack.c.bf16 %v4542_v37, %v4542_v37 }
 0x691   :  { %5574 = vst.msk [vmem:[#allocation3 + $0x7c] sm:$0xf] %vm3223_vm6, %v5429_v35  ;;  %5444 = vrot.lane.b32.xlu1 %v5322_v15, %s11550_s18  ;;  %v16442_v15 = vmov 6   ;;  %v14716_v37 = vld [vmem:[#allocation2 + $0x180] sm:$0xff] }
 0x692   :  { %v7273_v9 = vmax.f32 %v7144_v12, 0.0  ;;  %v6044_v51 = vpack.c.bf16 %v5992_v38, %v5992_v38  ;;  %11408 = vset.pattern.permute.xlu1 %v16441_v42  ;;  %v5630_v12 = vld [vmem:[#allocation2 + $0x150] sm:$0xff] }
 0x693   :  { %v4719_v63 = vpop.permute.xlu0 %4718 }
 0x694   :  { %v7325_v33 = vpack.c.bf16 %v7273_v9, %v7273_v9  ;;  %6096 = vst.msk [vmem:[#allocation3 + $0x98] sm:$0xf] %vm1036_vm3, %v6044_v51 }
 0x695   :  { %4855 = vst.msk [vmem:[#allocation3 + $0xe8] sm:$0xf] %vm2494_vm5, %v4719_v63 }
 0x696   :  { %7327 = vst.msk [vmem:[#allocation4] sm:$0xf] %vm7326_vm7, %v7325_v33 }
 0x697   :  { %v4707_v28 = vpop.permute.xlu2 %4706 }
 0x698   :  { %4849 = vst.msk [vmem:[#allocation3 + $0xa0] sm:$0xf] %vm2494_vm5, %v4707_v28  ;;  %v5080_v60 = vpop.permute.xlu1 %5079  ;;  %v11067_v39 = vld [vmem:[#allocation3 + $0x7c] sm:$0xf]  ;;  %v14682_v28 = vpop.f32.mrf.mxu2 }
 0x699   :  { %v5269_v55 = vmul.f32 %v5080_v60, %v4178_v14  ;;  %5114 = vperm.xlu1 %11408, %v14649_v45   ;;  %v9877_v46 = vor.u32 %v11067_v39, %v9874_v19 }
 0x69b   :  { %v5321_v58 = vpack.c.bf16 %v5269_v55, %v5269_v55  ;;  %v4721_v59 = vpop.permute.xlu0 %4720  ;;  %7028 = vmatmul.bf16.gmra.mxu2 %v9877_v46  ;;  %v9892_v43 = vld [vmem:[#allocation3 + $0x98] sm:$0xf]  ;;  %v14695_v55 = vld [vmem:[%s16355_s1 + $0xc8] sm:$0xff] }
 0x69c   :  { %4856 = vst.msk [vmem:[#allocation3 + $0xf4] sm:$0xf] %vm2494_vm5, %v4721_v59  ;;  %v9893_v41 = vor.u32 %v11072_v13, %v9892_v43  ;;  %v14705_v43 = vld [vmem:[#allocation2 + $0x188] sm:$0xff] }
 0x69d   :  { %5442 = vrot.lane.b32.xlu2 %v5321_v58, %s11550_s18 }
 0x69e   :  { %10200 = vmatmul.msk.bf16.gmra.mxu3 %vm487_vm2, %v9893_v41 }
 0x6a0   :  { %v4705_v24 = vpop.permute.xlu1 %4704  ;;  %v7009_v59 = vpop.f32.mrf.mxu2 }
 0x6a1   :  { %4848 = vst.msk [vmem:[#allocation3 + $0x94] sm:$0xf] %vm2494_vm5, %v4705_v24  ;;  %11410 = vset.pattern.permute.xlu1 %v16440_v30  ;;  %v5274_v24 = vmul.f32 %v14636_v52, %v14705_v43  ;;  %v5324_v52 = vpack.c.bf16 %v5272_v27, %v5272_v27  ;;  %v4184_v27 = vld [vmem:[#allocation2 + $0x190] sm:$0xff] }
 0x6a2   :  { %5822 = vperm.xlu1 %11410, %v5688_v36  }
 0x6a5   :  { %5812 = vperm.xlu2 %11398, %v5686_v10  }
 0x6a8   :  { %v5433_v1 = vpop.permute.xlu1 %5432 }
 0x6a9   :  { %5576 = vst.msk [vmem:[#allocation3 + $0x94] sm:$0xf] %vm3223_vm6, %v5433_v1  ;;  %v5435_v34 = vpop.permute.xlu2 %5434  ;;  %v5326_v1 = vpack.c.bf16 %v5274_v24, %v5274_v24 }
 0x6aa   :  { %4722 = vrot.lane.b32.xlu1 %v4597_v56, %s11548_s22  ;;  %5577 = vst.msk [vmem:[#allocation3 + $0xa0] sm:$0xf] %vm3223_vm6, %v5435_v34 }
 0x6ab   :  { %11412 = vset.pattern.permute.xlu1 %v16442_v15 }
 0x6ad   :  { %4716 = vrot.lane.b32.xlu2 %v4594_v61, %s11548_s22 }
 0x6ae   :  { %11409 = vset.pattern.permute.xlu2 %v16441_v42 }
 0x6b0   :  { %v5090_v11 = vpop.permute.xlu1 %5089  ;;  %v11070_v35 = vld [vmem:[#allocation3 + $0x94] sm:$0xf] }
 0x6b1   :  { %v5271_v4 = vmul.f32 %v5090_v11, %v14517_v3  ;;  %v5793_v38 = vpop.permute.xlu2 %5792  ;;  %v9886_v9 = vld [vmem:[#allocation3 + $0x9c] sm:$0xf0]  ;;  %v14687_v3 = vld [vmem:[%s16355_s1 + $0xd8] sm:$0xff]  ;;  %v14719_v11 = vpop.f32.mrf.mxu2 }
 0x6b2   :  { %4396 = vperm.xlu1 %11412, %v14676_v49   ;;  %v5994_v51 = vmul.f32 %v5793_v38, %v5630_v12  ;;  %v9889_v63 = vor.u32 %v11070_v35, %v9886_v9 }
 0x6b3   :  { %v5323_v33 = vpack.c.bf16 %v5271_v4, %v5271_v4 }
 0x6b4   :  { %v6046_v14 = vpack.c.bf16 %v5994_v51, %v5994_v51  ;;  %7033 = vmatmul.bf16.gmra.mxu2 %v9889_v63 }
 0x6b5   :  { %5446 = vrot.lane.b32.xlu2 %v5323_v33, %s11550_s18 }
 0x6b6   :  { %6098 = vst.msk [vmem:[#allocation3 + $0xb0] sm:$0xf] %vm1036_vm3, %v6046_v14 }
 0x6b9   :  { %v5798_v60 = vpop.permute.xlu1 %5797  ;;  %v4709_v39 = vpop.permute.xlu2 %4708 }
 0x6ba   :  { %v5995_v19 = vmul.f32 %v5798_v60, %v14605_v6  ;;  %11415 = vset.pattern.permute.xlu1 %v16441_v42  ;;  %4850 = vst.msk [vmem:[#allocation3 + $0xac] sm:$0xf] %vm2494_vm5, %v4709_v39  ;;  %v14702_v6 = vpop.f32.mrf.mxu3  ;;  %v14729_v60 = vld [vmem:[%s16355_s1 + $0xe8] sm:$0xff] }
 0x6bb   :  { %5129 = vperm.xlu1 %11415, %v14687_v3  }
 0x6bc   :  { %v6047_v46 = vpack.c.bf16 %v5995_v19, %v5995_v19 }
 0x6bd   :  { %5119 = vperm.xlu2 %11409, %v14695_v55   ;;  %v9904_v41 = vld [vmem:[#allocation3 + $0xb0] sm:$0xf] }
 0x6be   :  { %6099 = vst.msk [vmem:[#allocation3 + $0xbc] sm:$0xf] %vm1036_vm3, %v6047_v46  ;;  %v7014_v46 = vpop.f32.mrf.mxu2 }
 0x6c1   :  { %v5437_v58 = vpop.permute.xlu1 %5436 }
 0x6c2   :  { %5578 = vst.msk [vmem:[#allocation3 + $0xac] sm:$0xf] %vm3223_vm6, %v5437_v58  ;;  %v6876_v58 = vadd.f32 %v14629_v62, %v13933_v21 }
 0x6c3   :  { %11417 = vset.pattern.permute.xlu1 %v16440_v30 }
 0x6c4   :  { %5837 = vperm.xlu1 %11417, %v14620_v22   ;;  %v6871_v22 = vadd.f32 %v14629_v62, %v13913_v47 }
 0x6c5   :  { %11411 = vset.pattern.permute.xlu2 %v16440_v30  ;;  %v5439_v13 = vpop.permute.xlu2 %5438  ;;  %v11075_v36 = vld [vmem:[#allocation3 + $0xb8] sm:$0xf0] }
 0x6c6   :  { %5579 = vst.msk [vmem:[#allocation3 + $0xb8] sm:$0xf] %vm3223_vm6, %v5439_v13  ;;  %5827 = vperm.xlu2 %11411, %v14580_v16   ;;  %v9905_v10 = vor.u32 %v11075_v36, %v9904_v41  ;;  %v7010_v61 = vadd.f32 %v7009_v59, %v6871_v22  ;;  %v11078_v13 = vld [vmem:[#allocation3 + $0xd0] sm:$0xf0]  ;;  %v7015_v36 = vadd.f32 %v7014_v46, %v6876_v58 }
 0x6c7   :  { %v4548_v22 = vmul.f32 %v14378_v18, %v4184_v27 }
 0x6c8   :  { %10201 = vmatmul.msk.bf16.gmra.mxu3 %vm487_vm2, %v9905_v10 }
 0x6c9   :  { %v5100_v56 = vpop.permute.xlu1 %5099  ;;  %v11073_v38 = vld [vmem:[#allocation3 + $0xac] sm:$0xf] }
 0x6ca   :  { %v5273_v34 = vmul.f32 %v5100_v56, %v14716_v37  ;;  %v14750_v56 = vpop.f32.mrf.mxu2 }
 0x6cc   :  { %v5325_v4 = vpack.c.bf16 %v5273_v34, %v5273_v34  ;;  %v7148_v16 = vpop.f32.mrf.mxu3  ;;  %5452 = vrot.lane.b32.xlu1 %v5326_v1, %s11550_s18  ;;  %v4600_v34 = vpack.c.bf16 %v4548_v22, %v4548_v22 }
 0x6cd   :  { %v7149_v0 = vadd.f32 %v7148_v16, %v7010_v61  ;;  %v5803_v12 = vpop.permute.xlu2 %5802  ;;  %v9898_v35 = vld [vmem:[#allocation3 + $0xb4] sm:$0xf0]  ;;  %11418 = vset.pattern.permute.xlu1 %v16442_v15 }
 0x6ce   :  { %v5996_v47 = vmul.f32 %v5803_v12, %v5632_v48  ;;  %5448 = vrot.lane.b32.xlu2 %v5324_v52, %s11550_s18  ;;  %5450 = vrot.lane.b32.xlu0 %v5325_v4, %s11550_s18  ;;  %v9901_v9 = vor.u32 %v11073_v38, %v9898_v35  ;;  %v4547_v52 = vmul.f32 %v14359_v17, %v14705_v43 }
 0x6cf   :  { %v7275_v51 = vmax.f32 %v7149_v0, 0.0  ;;  %11413 = vset.pattern.permute.xlu2 %v16442_v15 }
 0x6d0   :  { %v6048_v63 = vpack.c.bf16 %v5996_v47, %v5996_v47  ;;  %7038 = vmatmul.bf16.gmra.mxu2 %v9901_v9  ;;  %v4599_v48 = vpack.c.bf16 %v4547_v52, %v4547_v52 }
 0x6d1   :  { %v7335_v33 = vpack.c.bf16 %v7275_v51, %v7275_v51  ;;  %v4713_v14 = vpop.permute.xlu1 %4712  ;;  %v5635_v51 = vld [vmem:[#allocation2 + $0x178] sm:$0xff] }
 0x6d2   :  { %6100 = vst.msk [vmem:[#allocation3 + $0xc8] sm:$0xf] %vm1036_vm3, %v6048_v63 }
 0x6d3   :  { %7336 = vst.msk [vmem:[#allocation4 + $0x4] sm:$0xf] %vm7326_vm7, %v7335_v33  ;;  %v6886_v33 = vadd.f32 %v14629_v62, %v13986_v20 }
 0x6d4   :  { %4852 = vst.msk [vmem:[#allocation3 + $0xc4] sm:$0xf] %vm2494_vm5, %v4713_v14  ;;  %v14734_v39 = vpop.f32.mrf.mxu3  ;;  %4411 = vperm.xlu1 %11418, %v14729_v60  }
 0x6d5   :  { %v4715_v19 = vpop.permute.xlu2 %4714 }
 0x6d6   :  { %4853 = vst.msk [vmem:[#allocation3 + $0xd0] sm:$0xf] %vm2494_vm5, %v4715_v19  ;;  %4401 = vperm.xlu2 %11413, %v14687_v3   ;;  %5124 = vperm.xlu0 %11406, %v14676_v49   ;;  %v14784_v19 = vld [vmem:[%s16355_s1 + $0xf0] sm:$0xff] }
 0x6d9   :  { %v9916_v59 = vld [vmem:[#allocation3 + $0xc8] sm:$0xf] }
 0x6da   :  { %v9917_v41 = vor.u32 %v11078_v13, %v9916_v59 }
 0x6dc   :  { %11420 = vset.pattern.permute.xlu1 %v16441_v42  ;;  %v7153_v24 = vpop.f32.mrf.mxu3  ;;  %10202 = vmatmul.msk.bf16.gmra.mxu3 %vm487_vm2, %v9917_v41  ;;  %v5634_v41 = vld [vmem:[#allocation2 + $0x170] sm:$0xff] }
 0x6dd   :  { %v7154_v10 = vadd.f32 %v7153_v24, %v7015_v36  ;;  %5139 = vperm.xlu1 %11420, %v14729_v60   ;;  %v7019_v18 = vpop.f32.mrf.mxu2 }
 0x6de   :  { %11416 = vset.pattern.permute.xlu2 %v16440_v30  ;;  %11414 = vset.pattern.permute.xlu0 %v16442_v15 }
 0x6df   :  { %v7277_v21 = vmax.f32 %v7154_v10, 0.0  ;;  %5832 = vperm.xlu2 %11416, %v14499_v8   ;;  %4376 = vperm.xlu0 %11414, %v14499_v8   ;;  %v6881_v8 = vadd.f32 %v14629_v62, %v13964_v23  ;;  %v14771_v23 = vld [vmem:[%s16355_s1 + $0xe0] sm:$0xff] }
 0x6e1   :  { %v7343_v1 = vpack.c.bf16 %v7277_v21, %v7277_v21  ;;  %v7020_v16 = vadd.f32 %v7019_v18, %v6881_v8  ;;  %v14792_v8 = vld [vmem:[%s16355_s1 + $0x100] sm:$0xff] }
 0x6e3   :  { %7344 = vst.msk [vmem:[#allocation4 + $0x8] sm:$0xf] %vm7326_vm7, %v7343_v1 }
 0x6e4   :  { %v14753_v61 = vpop.f32.mrf.mxu3 }
 0x6e5   :  { %4728 = vrot.lane.b32.xlu1 %v4600_v34, %s11548_s22  ;;  %v14773_v17 = vpop.f32.mrf.mxu2 }
 0x6e6   :  { %11422 = vset.pattern.permute.xlu1 %v16442_v15 }
 0x6e7   :  { %4391 = vperm.xlu0 %11414, %v14695_v55   ;;  %11419 = vset.pattern.permute.xlu2 %v16441_v42 }
 0x6ea   :  { %v5441_v4 = vpop.permute.xlu1 %5440 }
 0x6eb   :  { %5580 = vst.msk [vmem:[#allocation3 + $0xc4] sm:$0xf] %vm3223_vm6, %v5441_v4  ;;  %v14798_v4 = vld [vmem:[#allocation2 + $0x198] sm:$0xff] }
 0x6ec   :  { %v7158_v0 = vpop.f32.mrf.mxu3 }
 0x6ed   :  { %v7159_v12 = vadd.f32 %v7158_v0, %v7020_v16 }
 0x6ef   :  { %v7279_v38 = vmax.f32 %v7159_v12, 0.0  ;;  %4726 = vrot.lane.b32.xlu0 %v4599_v48, %s11548_s22 }
 0x6f1   :  { %v7351_v35 = vpack.c.bf16 %v7279_v38, %v7279_v38 }
 0x6f2   :  { %v14765_v47 = vpop.permute.xlu1 %5109  ;;  %v11076_v24 = vld [vmem:[#allocation3 + $0xc4] sm:$0xf] }
 0x6f3   :  { %7352 = vst.msk [vmem:[#allocation4 + $0xc] sm:$0xf] %vm7326_vm7, %v7351_v35  ;;  %v14804_v35 = vld [vmem:[%s16355_s1 + $0x110] sm:$0xff] }
 0x6f4   :  { %v14775_v43 = vpop.f32.mrf.mxu3 }
 0x6f7   :  { %v5443_v9 = vpop.permute.xlu2 %5442  ;;  %4406 = vperm.xlu0 %11414, %v14771_v23  }
 0x6f8   :  { %5581 = vst.msk [vmem:[#allocation3 + $0xd0] sm:$0xf] %vm3223_vm6, %v5443_v9 }
 0x6fb   :  { %v5818_v63 = vpop.permute.xlu1 %5817 }
 0x6fc   :  { %v5999_v14 = vmul.f32 %v5818_v63, %v5635_v51  ;;  %v7163_v13 = vpop.f32.mrf.mxu3 }
 0x6fd   :  { %v7024_v46 = vpop.f32.mrf.mxu2 }
 0x6fe   :  { %v6051_v58 = vpack.c.bf16 %v5999_v14, %v5999_v14  ;;  %v7025_v59 = vadd.f32 %v7024_v46, %v6886_v33  ;;  %v4243_v14 = vld [vmem:[%s16355_s1 + $0xf8] sm:$0xff] }
 0x6ff   :  { %v5813_v36 = vpop.permute.xlu2 %5812  ;;  %4416 = vperm.xlu0 %11414, %v14784_v19   ;;  %v9910_v10 = vld [vmem:[#allocation3 + $0xcc] sm:$0xf0] }
 0x700   :  { %6103 = vst.msk [vmem:[#allocation3 + $0xec] sm:$0xf] %vm1036_vm3, %v6051_v58  ;;  %v7164_v27 = vadd.f32 %v7163_v13, %v7025_v59  ;;  %v5998_v20 = vmul.f32 %v5813_v36, %v5634_v41  ;;  %v9913_v22 = vor.u32 %v11076_v24, %v9910_v10 }
 0x702   :  { %v7281_v21 = vmax.f32 %v7164_v27, 0.0  ;;  %v6050_v1 = vpack.c.bf16 %v5998_v20, %v5998_v20  ;;  %7043 = vmatmul.bf16.gmra.mxu2 %v9913_v22  ;;  %v6891_v27 = vadd.f32 %v14629_v62, %v14021_v25 }
 0x703   :  { %v5445_v34 = vpop.permute.xlu1 %5444 }
 0x704   :  { %v7359_v18 = vpack.c.bf16 %v7281_v21, %v7281_v21  ;;  %6102 = vst.msk [vmem:[#allocation3 + $0xe0] sm:$0xf] %vm1036_vm3, %v6050_v1  ;;  %v14814_v46 = vpop.f32.mrf.mxu3  ;;  %v5637_v1 = vld [vmem:[#allocation2 + $0x188] sm:$0xff] }
 0x705   :  { %v14816_v58 = vpop.f32.mrf.mxu2 }
 0x706   :  { %7360 = vst.msk [vmem:[#allocation4 + $0x10] sm:$0xf] %vm7326_vm7, %v7359_v18 }
 0x707   :  { %v4717_v52 = vpop.permute.xlu2 %4716  ;;  %4426 = vperm.xlu0 %11414, %v14792_v8   ;;  %v11081_v48 = vld [vmem:[#allocation3 + $0xe8] sm:$0xf0] }
 0x708   :  { %4854 = vst.msk [vmem:[#allocation3 + $0xdc] sm:$0xf] %vm2494_vm5, %v4717_v52 }
 0x709   :  { %5582 = vst.msk [vmem:[#allocation3 + $0xdc] sm:$0xf] %vm3223_vm6, %v5445_v34 }
 0x70b   :  { %v5115_v16 = vpop.permute.xlu1 %5114  ;;  %v9928_v0 = vld [vmem:[#allocation3 + $0xe0] sm:$0xf] }
 0x70c   :  { %v5276_v12 = vmul.f32 %v5115_v16, %v14798_v4  ;;  %v9929_v38 = vor.u32 %v11081_v48, %v9928_v0  ;;  %v7168_v21 = vpop.f32.mrf.mxu3  ;;  %v14828_v0 = vld [vmem:[#allocation2 + $0x1a0] sm:$0xff] }
 0x70e   :  { %v5328_v9 = vpack.c.bf16 %v5276_v12, %v5276_v12  ;;  %10203 = vmatmul.msk.bf16.gmra.mxu3 %vm487_vm2, %v9929_v38 }
 0x70f   :  { %v5447_v51 = vpop.permute.xlu2 %5446  ;;  %4436 = vperm.xlu0 %11414, %v14804_v35  }
 0x710   :  { %5583 = vst.msk [vmem:[#allocation3 + $0xe8] sm:$0xf] %vm3223_vm6, %v5447_v51  ;;  %5456 = vrot.lane.b32.xlu1 %v5328_v9, %s11550_s18  ;;  %v11079_v41 = vld [vmem:[#allocation3 + $0xdc] sm:$0xf] }
 0x714   :  { %v5823_v63 = vpop.permute.xlu1 %5822 }
 0x715   :  { %v6000_v33 = vmul.f32 %v5823_v63, %v14716_v37 }
 0x717   :  { %v6052_v59 = vpack.c.bf16 %v6000_v33, %v6000_v33  ;;  %v14818_v13 = vpop.permute.xlu2 %5119  ;;  %11430 = vset.pattern.permute.xlu0 %v16440_v30  ;;  %v9922_v36 = vld [vmem:[#allocation3 + $0xe4] sm:$0xf0] }
 0x718   :  { %5847 = vperm.xlu0 %11430, %v14695_v55   ;;  %4421 = vperm.xlu1 %11422, %v4243_v14   ;;  %v9925_v24 = vor.u32 %v11079_v41, %v9922_v36  ;;  %v14844_v36 = vpop.f32.mrf.mxu3 }
 0x719   :  { %6104 = vst.msk [vmem:[#allocation3 + $0xf8] sm:$0xf] %vm1036_vm3, %v6052_v59 }
 0x71a   :  { %7048 = vmatmul.bf16.gmra.mxu2 %v9925_v24  ;;  %16443 = vst [vmem:[#allocation10_spill] sm:$0xff] %v14844_v36  ;;  %v6896_v24 = vadd.f32 %v14629_v62, %v14047_v54  ;;  %v14859_v54 = vld [vmem:[%s16355_s1 + $0x118] sm:$0xff] }
 0x71c   :  { %v4723_v10 = vpop.permute.xlu1 %4722 }
 0x71d   :  { %4857 = vst.msk [vmem:[#allocation3 + $0x100] sm:$0xf] %vm2494_vm5, %v4723_v10 }
 0x71e   :  { %v7029_v20 = vpop.f32.mrf.mxu2 }
 0x71f   :  { %v7030_v22 = vadd.f32 %v7029_v20, %v6891_v27 }
 0x720   :  { %v5828_v34 = vpop.permute.xlu2 %5827  ;;  %5857 = vperm.xlu0 %11430, %v14687_v3   ;;  %11424 = vset.pattern.permute.xlu1 %v16441_v42  ;;  %v9940_v3 = vld [vmem:[#allocation3 + $0xf8] sm:$0xf] }
 0x721   :  { %v7169_v55 = vadd.f32 %v7168_v21, %v7030_v22  ;;  %v6001_v18 = vmul.f32 %v5828_v34, %v5637_v1  ;;  %5149 = vperm.xlu1 %11424, %v4243_v14   ;;  %v4911_v21 = vld [vmem:[#allocation2 + $0x190] sm:$0xff]  ;;  %v7173_v1 = vpop.f32.mrf.mxu3 }
 0x723   :  { %v7283_v52 = vmax.f32 %v7169_v55, 0.0  ;;  %v6053_v16 = vpack.c.bf16 %v6001_v18, %v6001_v18 }
 0x724   :  { %v4397_v48 = vpop.permute.xlu1 %4396 }
 0x725   :  { %v7367_v25 = vpack.c.bf16 %v7283_v52, %v7283_v52  ;;  %6105 = vst.msk [vmem:[#allocation3 + $0x104] sm:$0xf] %vm1036_vm3, %v6053_v16  ;;  %v4550_v12 = vmul.f32 %v14828_v0, %v4397_v48 }
 0x726   :  { %v14839_v59 = vpop.f32.mrf.mxu2 }
 0x727   :  { %7368 = vst.msk [vmem:[#allocation4 + $0x14] sm:$0xf] %vm7326_vm7, %v7367_v25  ;;  %v4602_v38 = vpack.c.bf16 %v4550_v12, %v4550_v12 }
 0x728   :  { %v5449_v9 = vpop.permute.xlu2 %5448  ;;  %5867 = vperm.xlu0 %11430, %v14729_v60   ;;  %v14849_v60 = vld [vmem:[%s16355_s1 + $0x108] sm:$0xff] }
 0x729   :  { %5584 = vst.msk [vmem:[#allocation3 + $0xf4] sm:$0xf] %vm3223_vm6, %v5449_v9  ;;  %4732 = vrot.lane.b32.xlu1 %v4602_v38, %s11548_s22  ;;  %v14870_v38 = vld [vmem:[%s16355_s1 + $0x128] sm:$0xff] }
 0x72a   :  { %11426 = vset.pattern.permute.xlu1 %v16442_v15 }
 0x72c   :  { %v11084_v51 = vld [vmem:[#allocation3 + $0x100] sm:$0xf0] }
 0x72d   :  { %v14837_v63 = vpop.permute.xlu1 %5129  ;;  %v9941_v33 = vor.u32 %v11084_v51, %v9940_v3 }
 0x72f   :  { %10204 = vmatmul.msk.bf16.gmra.mxu3 %vm487_vm2, %v9941_v33 }
 0x730   :  { %v14842_v41 = vpop.permute.xlu2 %4401  ;;  %5877 = vperm.xlu0 %11430, %v4243_v14  }
 0x736   :  { %v5838_v10 = vpop.permute.xlu1 %5837 }
 0x737   :  { %v6003_v27 = vmul.f32 %v5838_v10, %v14798_v4  ;;  %v7034_v20 = vpop.f32.mrf.mxu2 }
 0x738   :  { %v7035_v22 = vadd.f32 %v7034_v20, %v6896_v24  ;;  %5887 = vperm.xlu0 %11430, %v14849_v60   ;;  %v14874_v24 = vld [vmem:[#allocation2 + $0x1a8] sm:$0xff] }
 0x739   :  { %v6055_v14 = vpack.c.bf16 %v6003_v27, %v6003_v27  ;;  %v5833_v34 = vpop.permute.xlu2 %5832  ;;  %v11082_v27 = vld [vmem:[#allocation3 + $0xf4] sm:$0xf] }
 0x73a   :  { %v7174_v55 = vadd.f32 %v7173_v1, %v7035_v22  ;;  %v6002_v18 = vmul.f32 %v5833_v34, %v4911_v21 }
 0x73b   :  { %6107 = vst.msk [vmem:[#allocation3 + $0x11c] sm:$0xf] %vm1036_vm3, %v6055_v14 }
 0x73c   :  { %v7285_v52 = vmax.f32 %v7174_v55, 0.0  ;;  %v6054_v16 = vpack.c.bf16 %v6002_v18, %v6002_v18  ;;  %v14881_v55 = vpop.f32.mrf.mxu3  ;;  %v14887_v18 = vld [vmem:[%s16355_s1 + $0x120] sm:$0xff] }
 0x73e   :  { %v7375_v48 = vpack.c.bf16 %v7285_v52, %v7285_v52  ;;  %6106 = vst.msk [vmem:[#allocation3 + $0x110] sm:$0xf] %vm1036_vm3, %v6054_v16  ;;  %v14862_v25 = vpop.permute.xlu1 %5452 }
 0x73f   :  { %v14879_v14 = vpop.f32.mrf.mxu2 }
 0x740   :  { %7376 = vst.msk [vmem:[#allocation4 + $0x18] sm:$0xf] %vm7326_vm7, %v7375_v48  ;;  %5897 = vperm.xlu0 %11430, %v14859_v54   ;;  %v5451_v12 = vpop.permute.xlu0 %5450  ;;  %v6901_v48 = vadd.f32 %v14629_v62, %v14074_v50 }
 0x741   :  { %5585 = vst.msk [vmem:[#allocation3 + $0x100] sm:$0xf] %vm3223_vm6, %v5451_v12 }
 0x742   :  { %v11087_v3 = vld [vmem:[#allocation3 + $0x118] sm:$0xf0] }
 0x745   :  { %v9952_v9 = vld [vmem:[#allocation3 + $0x110] sm:$0xf] }
 0x746   :  { %v14872_v51 = vpop.permute.xlu1 %4411  ;;  %v9953_v33 = vor.u32 %v11087_v3, %v9952_v9 }
 0x748   :  { %5907 = vperm.xlu0 %11430, %v14870_v38   ;;  %v5125_v10 = vpop.permute.xlu0 %5124  ;;  %10205 = vmatmul.msk.bf16.gmra.mxu3 %vm487_vm2, %v9953_v33  ;;  %v9934_v20 = vld [vmem:[#allocation3 + $0xfc] sm:$0xf0] }
 0x749   :  { %v5278_v22 = vmul.f32 %v5125_v10, %v14874_v24  ;;  %v9937_v1 = vor.u32 %v11082_v27, %v9934_v20  ;;  %v14901_v20 = vld [vmem:[%s16355_s1 + $0x130] sm:$0xff] }
 0x74b   :  { %v5330_v34 = vpack.c.bf16 %v5278_v22, %v5278_v22  ;;  %7053 = vmatmul.bf16.gmra.mxu2 %v9937_v1  ;;  %v7178_v10 = vpop.f32.mrf.mxu3  ;;  %v5275_v1 = vmul.f32 %v14765_v47, %v4911_v21  ;;  %v14913_v47 = vld [vmem:[#allocation2 + $0x1b0] sm:$0xff] }
 0x74d   :  { %5460 = vrot.lane.b32.xlu1 %v5330_v34, %s11550_s18 }
 0x74f   :  { %v14889_v52 = vpop.permute.xlu1 %5139 }
 0x750   :  { %11447 = vset.pattern.permute.xlu0 %v16442_v15 }
 0x751   :  { %4446 = vperm.xlu0 %11447, %v14887_v18   ;;  %v4377_v16 = vpop.permute.xlu0 %4376 }
 0x752   :  { %v4546_v12 = vmul.f32 %v14716_v37, %v4377_v16  ;;  %v5327_v16 = vpack.c.bf16 %v5275_v1, %v5275_v1 }
 0x753   :  { %v7039_v9 = vpop.f32.mrf.mxu2 }
 0x754   :  { %v4598_v3 = vpack.c.bf16 %v4546_v12, %v4546_v12  ;;  %v7040_v33 = vadd.f32 %v7039_v9, %v6901_v48 }
 0x755   :  { %4431 = vperm.xlu1 %11426, %v14849_v60  }
 0x756   :  { %v7179_v27 = vadd.f32 %v7178_v10, %v7040_v33  ;;  %4724 = vrot.lane.b32.xlu2 %v4598_v3, %s11548_s22  ;;  %v5277_v10 = vmul.f32 %v14818_v13, %v14828_v0 }
 0x757   :  { %v4729_v22 = vpop.permute.xlu1 %4728 }
 0x758   :  { %v7287_v50 = vmax.f32 %v7179_v27, 0.0  ;;  %4860 = vst.msk [vmem:[#allocation3 + $0x124] sm:$0xf] %vm2494_vm5, %v4729_v22  ;;  %v5329_v22 = vpack.c.bf16 %v5277_v10, %v5277_v10 }
 0x759   :  { %4456 = vperm.xlu0 %11447, %v14901_v20   ;;  %v4392_v37 = vpop.permute.xlu0 %4391 }
 0x75a   :  { %v7383_v34 = vpack.c.bf16 %v7287_v50, %v7287_v50  ;;  %v14930_v50 = vpop.f32.mrf.mxu3 }
 0x75b   :  { %v14928_v1 = vpop.f32.mrf.mxu2 }
 0x75c   :  { %7384 = vst.msk [vmem:[#allocation4 + $0x1c] sm:$0xf] %vm7326_vm7, %v7383_v34 }
 0x75d   :  { %11428 = vset.pattern.permute.xlu1 %v16441_v42 }
 0x75e   :  { %5454 = vrot.lane.b32.xlu2 %v5327_v16, %s11550_s18  ;;  %5159 = vperm.xlu1 %11428, %v14849_v60   ;;  %v4549_v60 = vmul.f32 %v14798_v4, %v4392_v37  ;;  %v6906_v37 = vadd.f32 %v14629_v62, %v14114_v31  ;;  %v4551_v31 = vmul.f32 %v14842_v41, %v14874_v24  ;;  %v14962_v41 = vld [vmem:[#allocation2 + $0x1c8] sm:$0xff] }
 0x760   :  { %v4601_v33 = vpack.c.bf16 %v4549_v60, %v4549_v60 }
 0x761   :  { %v4727_v48 = vpop.permute.xlu0 %4726 }
 0x762   :  { %4859 = vst.msk [vmem:[#allocation3 + $0x118] sm:$0xf] %vm2494_vm5, %v4727_v48  ;;  %v7183_v13 = vpop.f32.mrf.mxu3 }
 0x766   :  { %5134 = vperm.xlu2 %11419, %v14771_v23   ;;  %11431 = vset.pattern.permute.xlu1 %v16442_v15 }
 0x769   :  { %v4407_v21 = vpop.permute.xlu0 %4406 }
 0x76a   :  { %v4552_v12 = vmul.f32 %v14913_v47, %v4407_v21 }
 0x76c   :  { %v4604_v9 = vpack.c.bf16 %v4552_v12, %v4552_v12 }
 0x76e   :  { %11421 = vset.pattern.permute.xlu2 %v16440_v30  ;;  %4736 = vrot.lane.b32.xlu1 %v4604_v9, %s11548_s22 }
 0x76f   :  { %5842 = vperm.xlu2 %11421, %v14649_v45  }
 0x771   :  { %v14920_v3 = vpop.permute.xlu0 %4416 }
 0x777   :  { %4730 = vrot.lane.b32.xlu2 %v4601_v33, %s11548_s22 }
 0x778   :  { %11423 = vset.pattern.permute.xlu2 %v16441_v42 }
 0x779   :  { %v14926_v27 = vpop.permute.xlu0 %4426 }
 0x77f   :  { %5458 = vrot.lane.b32.xlu2 %v5329_v22, %s11550_s18  ;;  %v14948_v22 = vld [vmem:[#allocation2 + $0x1b8] sm:$0xff] }
 0x781   :  { %v14933_v45 = vpop.permute.xlu0 %4436 }
 0x782   :  { %v5457_v4 = vpop.permute.xlu1 %5456 }
 0x783   :  { %5588 = vst.msk [vmem:[#allocation3 + $0x124] sm:$0xf] %vm3223_vm6, %v5457_v4 }
 0x785   :  { %v7044_v34 = vpop.f32.mrf.mxu2 }
 0x786   :  { %v7045_v16 = vadd.f32 %v7044_v34, %v6906_v37 }
 0x787   :  { %5144 = vperm.xlu2 %11423, %v14784_v19  }
 0x788   :  { %v7184_v48 = vadd.f32 %v7183_v13, %v7045_v16 }
 0x78a   :  { %v7289_v21 = vmax.f32 %v7184_v48, 0.0  ;;  %v5848_v12 = vpop.permute.xlu0 %5847  ;;  %v14939_v9 = vpop.permute.xlu1 %4421  ;;  %v4603_v48 = vpack.c.bf16 %v4551_v31, %v4551_v31 }
 0x78b   :  { %v6005_v60 = vmul.f32 %v5848_v12, %v14874_v24 }
 0x78c   :  { %v7391_v33 = vpack.c.bf16 %v7289_v21, %v7289_v21  ;;  %v14955_v21 = vpop.f32.mrf.mxu3 }
 0x78d   :  { %v6057_v10 = vpack.c.bf16 %v6005_v60, %v6005_v60  ;;  %v14953_v16 = vpop.f32.mrf.mxu2  ;;  %16445 = vst [vmem:[#allocation19_spill] sm:$0xff] %v14955_v21  ;;  %v14970_v21 = vld [vmem:[#allocation2 + $0x1d8] sm:$0xff] }
 0x78e   :  { %7392 = vst.msk [vmem:[#allocation4 + $0x20] sm:$0xf] %vm7326_vm7, %v7391_v33  ;;  %v6911_v33 = vadd.f32 %v14629_v62, %v14164_v44 }
 0x78f   :  { %6109 = vst.msk [vmem:[#allocation3 + $0x134] sm:$0xf] %vm1036_vm3, %v6057_v10  ;;  %11425 = vset.pattern.permute.xlu2 %v16440_v30 }
 0x790   :  { %5852 = vperm.xlu2 %11425, %v14676_v49   ;;  %16444 = vst [vmem:[#allocation5_spill] sm:$0xff] %v14953_v16  ;;  %v5279_v49 = vmul.f32 %v14837_v63, %v14913_v47 }
 0x792   :  { %v5858_v4 = vpop.permute.xlu0 %5857 }
 0x793   :  { %v6007_v37 = vmul.f32 %v5858_v4, %v14948_v22  ;;  %v14951_v34 = vpop.permute.xlu1 %5149  ;;  %v5331_v4 = vpack.c.bf16 %v5279_v49, %v5279_v49  ;;  %v14976_v49 = vld [vmem:[#allocation2 + $0x1e8] sm:$0xff] }
 0x795   :  { %v6059_v13 = vpack.c.bf16 %v6007_v37, %v6007_v37 }
 0x797   :  { %6111 = vst.msk [vmem:[#allocation3 + $0x14c] sm:$0xf] %vm1036_vm3, %v6059_v13  ;;  %v7188_v13 = vpop.f32.mrf.mxu3 }
 0x798   :  { %4734 = vrot.lane.b32.xlu2 %v4603_v48, %s11548_s22 }
 0x799   :  { %11427 = vset.pattern.permute.xlu2 %v16441_v42 }
 0x79a   :  { %v5868_v24 = vpop.permute.xlu0 %5867 }
 0x79b   :  { %v6009_v12 = vmul.f32 %v5868_v24, %v14962_v41  ;;  %v4733_v60 = vpop.permute.xlu1 %4732 }
 0x79c   :  { %4862 = vst.msk [vmem:[#allocation3 + $0x13c] sm:$0xf] %vm2494_vm5, %v4733_v60 }
 0x79d   :  { %v6061_v10 = vpack.c.bf16 %v6009_v12, %v6009_v12  ;;  %v7049_v31 = vpop.f32.mrf.mxu2 }
 0x79e   :  { %v7050_v37 = vadd.f32 %v7049_v31, %v6911_v33 }
 0x79f   :  { %6113 = vst.msk [vmem:[#allocation3 + $0x164] sm:$0xf] %vm1036_vm3, %v6061_v10 }
 0x7a0   :  { %v7189_v48 = vadd.f32 %v7188_v13, %v7050_v37  ;;  %5462 = vrot.lane.b32.xlu2 %v5331_v4, %s11550_s18  ;;  %v4553_v4 = vmul.f32 %v14872_v51, %v14948_v22  ;;  %v15007_v51 = vld [vmem:[#allocation2 + $0x208] sm:$0xff] }
 0x7a2   :  { %v7291_v63 = vmax.f32 %v7189_v48, 0.0  ;;  %v5878_v24 = vpop.permute.xlu0 %5877  ;;  %v4605_v48 = vpack.c.bf16 %v4553_v4, %v4553_v4 }
 0x7a3   :  { %v6011_v16 = vmul.f32 %v5878_v24, %v14970_v21 }
 0x7a4   :  { %v7399_v36 = vpack.c.bf16 %v7291_v63, %v7291_v63 }
 0x7a5   :  { %v6063_v44 = vpack.c.bf16 %v6011_v16, %v6011_v16  ;;  %v14984_v16 = vld [vmem:[%s16355_s1 + $0x140] sm:$0xff] }
 0x7a6   :  { %7400 = vst.msk [vmem:[#allocation4 + $0x24] sm:$0xf] %vm7326_vm7, %v7399_v36  ;;  %4466 = vperm.xlu0 %11447, %v14984_v16   ;;  %v14991_v36 = vld [vmem:[#allocation2 + $0x1f8] sm:$0xff] }
 0x7a7   :  { %6115 = vst.msk [vmem:[#allocation3 + $0x17c] sm:$0xf] %vm1036_vm3, %v6063_v44 }
 0x7a8   :  { %5154 = vperm.xlu2 %11427, %v14792_v8  }
 0x7aa   :  { %v5888_v12 = vpop.permute.xlu0 %5887 }
 0x7ab   :  { %v6013_v60 = vmul.f32 %v5888_v12, %v14976_v49 }
 0x7ad   :  { %v6065_v33 = vpack.c.bf16 %v6013_v60, %v6013_v60 }
 0x7af   :  { %6117 = vst.msk [vmem:[#allocation3 + $0x194] sm:$0xf] %vm1036_vm3, %v6065_v33  ;;  %v15016_v33 = vld [vmem:[%s16355_s1 + $0x160] sm:$0xff] }
 0x7b0   :  { %v4725_v10 = vpop.permute.xlu2 %4724  ;;  %11429 = vset.pattern.permute.xlu2 %v16440_v30 }
 0x7b1   :  { %4858 = vst.msk [vmem:[#allocation3 + $0x10c] sm:$0xf] %vm2494_vm5, %v4725_v10  ;;  %5862 = vperm.xlu2 %11429, %v14771_v23   ;;  %v15000_v23 = vld [vmem:[%s16355_s1 + $0x150] sm:$0xff] }
 0x7b2   :  { %5586 = vst.msk [vmem:[#allocation3 + $0x10c] sm:$0xf] %vm3223_vm6, %v14862_v25  ;;  %v5898_v31 = vpop.permute.xlu0 %5897  ;;  %4476 = vperm.xlu0 %11447, %v15000_v23   ;;  %v15005_v25 = vld [vmem:[#allocation2 + $0x1c0] sm:$0xff] }
 0x7b3   :  { %v6015_v37 = vmul.f32 %v5898_v31, %v14991_v36  ;;  %v5281_v44 = vmul.f32 %v14889_v52, %v15005_v25 }
 0x7b5   :  { %v6067_v13 = vpack.c.bf16 %v6015_v37, %v6015_v37  ;;  %v5333_v10 = vpack.c.bf16 %v5281_v44, %v5281_v44  ;;  %v15029_v44 = vld [vmem:[%s16355_s1 + $0x170] sm:$0xff] }
 0x7b7   :  { %6119 = vst.msk [vmem:[#allocation3 + $0x1ac] sm:$0xf] %vm1036_vm3, %v6067_v13 }
 0x7b8   :  { %v5455_v63 = vpop.permute.xlu2 %5454 }
 0x7b9   :  { %5587 = vst.msk [vmem:[#allocation3 + $0x118] sm:$0xf] %vm3223_vm6, %v5455_v63  ;;  %4738 = vrot.lane.b32.xlu2 %v4605_v48, %s11548_s22  ;;  %v11085_v37 = vld [vmem:[#allocation3 + $0x10c] sm:$0xf] }
 0x7ba   :  { %v5908_v24 = vpop.permute.xlu0 %5907  ;;  %11432 = vset.pattern.permute.xlu2 %v16441_v42  ;;  %4486 = vperm.xlu0 %11447, %v15016_v33  }
 0x7bb   :  { %v6017_v12 = vmul.f32 %v5908_v24, %v15007_v51  ;;  %v15024_v24 = vpop.f32.mrf.mxu2 }
 0x7bd   :  { %v6069_v60 = vpack.c.bf16 %v6017_v12, %v6017_v12  ;;  %v15031_v12 = vpop.f32.mrf.mxu3 }
 0x7bf   :  { %6121 = vst.msk [vmem:[#allocation3 + $0x1c4] sm:$0xf] %vm1036_vm3, %v6069_v60  ;;  %v5461_v31 = vpop.permute.xlu1 %5460 }
 0x7c0   :  { %5590 = vst.msk [vmem:[#allocation3 + $0x13c] sm:$0xf] %vm3223_vm6, %v5461_v31  ;;  %v5135_v4 = vpop.permute.xlu2 %5134  ;;  %v9946_v13 = vld [vmem:[#allocation3 + $0x114] sm:$0xf0]  ;;  %v6916_v31 = vadd.f32 %v14629_v62, %v14216_v7  ;;  %v4555_v7 = vmul.f32 %v14939_v9, %v14962_v41  ;;  %v15054_v9 = vld [vmem:[#allocation2 + $0x1d0] sm:$0xff] }
 0x7c1   :  { %v5280_v48 = vmul.f32 %v5135_v4, %v14948_v22  ;;  %5466 = vrot.lane.b32.xlu2 %v5333_v10, %s11550_s18  ;;  %v9949_v52 = vor.u32 %v11085_v37, %v9946_v13 }
 0x7c2   :  { %4496 = vperm.xlu0 %11447, %v15029_v44  }
 0x7c3   :  { %v5332_v63 = vpack.c.bf16 %v5280_v48, %v5280_v48  ;;  %7058 = vmatmul.bf16.gmra.mxu2 %v9949_v52 }
 0x7c5   :  { %5464 = vrot.lane.b32.xlu1 %v5332_v63, %s11550_s18  ;;  %v7193_v48 = vpop.f32.mrf.mxu3 }
 0x7c7   :  { %v4432_v4 = vpop.permute.xlu1 %4431 }
 0x7c9   :  { %v5843_v60 = vpop.permute.xlu2 %5842  ;;  %5164 = vperm.xlu2 %11432, %v14804_v35  }
 0x7ca   :  { %v6004_v22 = vmul.f32 %v5843_v60, %v14828_v0  ;;  %11456 = vset.pattern.permute.xlu0 %v16440_v30 }
 0x7cc   :  { %v6056_v10 = vpack.c.bf16 %v6004_v22, %v6004_v22  ;;  %v11090_v22 = vld [vmem:[#allocation3 + $0x130] sm:$0xf0] }
 0x7cd   :  { %4441 = vperm.xlu1 %11431, %v14859_v54  }
 0x7ce   :  { %6108 = vst.msk [vmem:[#allocation3 + $0x128] sm:$0xf] %vm1036_vm3, %v6056_v10  ;;  %v7054_v37 = vpop.f32.mrf.mxu2 }
 0x7cf   :  { %v7055_v13 = vadd.f32 %v7054_v37, %v6916_v31  ;;  %v4554_v31 = vmul.f32 %v15005_v25, %v14920_v3  ;;  %v4607_v37 = vpack.c.bf16 %v4555_v7, %v4555_v7 }
 0x7d1   :  { %v7194_v52 = vadd.f32 %v7193_v48, %v7055_v13  ;;  %v4731_v63 = vpop.permute.xlu2 %4730  ;;  %11434 = vset.pattern.permute.xlu2 %v16440_v30  ;;  %v5160_v13 = vpop.permute.xlu1 %5159  ;;  %v5283_v48 = vmul.f32 %v14951_v34, %v15054_v9 }
 0x7d2   :  { %4861 = vst.msk [vmem:[#allocation3 + $0x130] sm:$0xf] %vm2494_vm5, %v4731_v63  ;;  %5872 = vperm.xlu2 %11434, %v14784_v19  }
 0x7d3   :  { %v7293_v0 = vmax.f32 %v7194_v52, 0.0  ;;  %v5335_v3 = vpack.c.bf16 %v5283_v48, %v5283_v48 }
 0x7d5   :  { %v7407_v62 = vpack.c.bf16 %v7293_v0, %v7293_v0  ;;  %11433 = vset.pattern.permute.xlu1 %v16441_v42  ;;  %v9964_v60 = vld [vmem:[#allocation3 + $0x128] sm:$0xf]  ;;  %v11088_v0 = vld [vmem:[#allocation3 + $0x124] sm:$0xf] }
 0x7d6   :  { %5169 = vperm.xlu1 %11433, %v14859_v54   ;;  %v9965_v10 = vor.u32 %v11090_v22, %v9964_v60  ;;  %v4606_v54 = vpack.c.bf16 %v4554_v31, %v4554_v31 }
 0x7d7   :  { %7408 = vst.msk [vmem:[#allocation4 + $0x28] sm:$0xf] %vm7326_vm7, %v7407_v62 }
 0x7d8   :  { %10206 = vmatmul.msk.bf16.gmra.mxu3 %vm487_vm2, %v9965_v10 }
 0x7d9   :  { %v5459_v19 = vpop.permute.xlu2 %5458 }
 0x7da   :  { %5589 = vst.msk [vmem:[#allocation3 + $0x130] sm:$0xf] %vm3223_vm6, %v5459_v19  ;;  %4742 = vrot.lane.b32.xlu2 %v4607_v37, %s11548_s22  ;;  %v4557_v19 = vmul.f32 %v14970_v21, %v4432_v4 }
 0x7db   :  { %11436 = vset.pattern.permute.xlu2 %v16441_v42 }
 0x7de   :  { %4740 = vrot.lane.b32.xlu1 %v4606_v54, %s11548_s22  ;;  %v11093_v54 = vld [vmem:[#allocation3 + $0x148] sm:$0xf0] }
 0x7df   :  { %11435 = vset.pattern.permute.xlu1 %v16442_v15 }
 0x7e0   :  { %v4737_v52 = vpop.permute.xlu1 %4736 }
 0x7e1   :  { %4864 = vst.msk [vmem:[#allocation3 + $0x154] sm:$0xf] %vm2494_vm5, %v4737_v52  ;;  %v5145_v63 = vpop.permute.xlu2 %5144  ;;  %v9958_v7 = vld [vmem:[#allocation3 + $0x12c] sm:$0xf0]  ;;  %v4609_v52 = vpack.c.bf16 %v4557_v19, %v4557_v19 }
 0x7e2   :  { %v5282_v62 = vmul.f32 %v5145_v63, %v14962_v41  ;;  %5470 = vrot.lane.b32.xlu2 %v5335_v3, %s11550_s18  ;;  %v9961_v60 = vor.u32 %v11088_v0, %v9958_v7  ;;  %v4251_v41 = vld [vmem:[%s16355_s1 + $0x138] sm:$0xff]  ;;  %v4556_v3 = vmul.f32 %v14926_v27, %v15054_v9 }
 0x7e3   :  { %5917 = vperm.xlu0 %11456, %v4251_v41   ;;  %v11091_v7 = vld [vmem:[#allocation3 + $0x13c] sm:$0xf] }
 0x7e4   :  { %v5334_v22 = vpack.c.bf16 %v5282_v62, %v5282_v62  ;;  %7063 = vmatmul.bf16.gmra.mxu2 %v9961_v60  ;;  %v4608_v4 = vpack.c.bf16 %v4556_v3, %v4556_v3 }
 0x7e6   :  { %5468 = vrot.lane.b32.xlu1 %v5334_v22, %s11550_s18 }
 0x7ea   :  { %v5853_v34 = vpop.permute.xlu2 %5852  ;;  %5174 = vperm.xlu2 %11436, %v14887_v18  }
 0x7eb   :  { %v6006_v10 = vmul.f32 %v5853_v34, %v14913_v47 }
 0x7ed   :  { %v6058_v31 = vpack.c.bf16 %v6006_v10, %v6006_v10 }
 0x7ee   :  { %4451 = vperm.xlu1 %11435, %v14870_v38  }
 0x7ef   :  { %6110 = vst.msk [vmem:[#allocation3 + $0x140] sm:$0xf] %vm1036_vm3, %v6058_v31 }
 0x7f2   :  { %v4735_v37 = vpop.permute.xlu2 %4734  ;;  %11438 = vset.pattern.permute.xlu2 %v16440_v30 }
 0x7f3   :  { %4863 = vst.msk [vmem:[#allocation3 + $0x148] sm:$0xf] %vm2494_vm5, %v4735_v37  ;;  %5882 = vperm.xlu2 %11438, %v14792_v8   ;;  %v15083_v8 = vld [vmem:[#allocation2 + $0x1e0] sm:$0xff] }
 0x7f4   :  { %v5285_v0 = vmul.f32 %v5160_v13, %v15083_v8 }
 0x7f6   :  { %11437 = vset.pattern.permute.xlu1 %v16441_v42  ;;  %v9976_v47 = vld [vmem:[#allocation3 + $0x140] sm:$0xf] }
 0x7f7   :  { %5179 = vperm.xlu1 %11437, %v14870_v38   ;;  %v9977_v48 = vor.u32 %v11093_v54, %v9976_v47  ;;  %v5337_v38 = vpack.c.bf16 %v5285_v0, %v5285_v0  ;;  %v4558_v54 = vmul.f32 %v14933_v45, %v15083_v8  ;;  %v15116_v0 = vld [vmem:[%s16355_s1 + $0x158] sm:$0xff] }
 0x7f9   :  { %10207 = vmatmul.msk.bf16.gmra.mxu3 %vm487_vm2, %v9977_v48  ;;  %v4610_v3 = vpack.c.bf16 %v4558_v54, %v4558_v54 }
 0x7fa   :  { %v5463_v63 = vpop.permute.xlu2 %5462 }
 0x7fb   :  { %5591 = vst.msk [vmem:[#allocation3 + $0x148] sm:$0xf] %vm3223_vm6, %v5463_v63  ;;  %4746 = vrot.lane.b32.xlu2 %v4609_v52, %s11548_s22 }
 0x7fc   :  { %11440 = vset.pattern.permute.xlu2 %v16441_v42 }
 0x7ff   :  { %4744 = vrot.lane.b32.xlu1 %v4608_v4, %s11548_s22 }
 0x800   :  { %11439 = vset.pattern.permute.xlu1 %v16442_v15 }
 0x802   :  { %v5155_v27 = vpop.permute.xlu2 %5154  ;;  %v9970_v62 = vld [vmem:[#allocation3 + $0x144] sm:$0xf0] }
 0x803   :  { %v5284_v60 = vmul.f32 %v14970_v21, %v5155_v27  ;;  %5474 = vrot.lane.b32.xlu2 %v5337_v38, %s11550_s18  ;;  %v9973_v22 = vor.u32 %v11091_v7, %v9970_v62  ;;  %v4253_v21 = vld [vmem:[%s16355_s1 + $0x148] sm:$0xff]  ;;  %v4447_v7 = vpop.permute.xlu0 %4446  ;;  %v11099_v62 = vld [vmem:[#allocation3 + $0x178] sm:$0xf0] }
 0x804   :  { %5927 = vperm.xlu0 %11456, %v4253_v21  }
 0x805   :  { %v5336_v34 = vpack.c.bf16 %v5284_v60, %v5284_v60  ;;  %7068 = vmatmul.bf16.gmra.mxu2 %v9973_v22  ;;  %v15122_v22 = vld [vmem:[#allocation2 + $0x1f0] sm:$0xff] }
 0x807   :  { %5472 = vrot.lane.b32.xlu1 %v5336_v34, %s11550_s18  ;;  %v4560_v34 = vmul.f32 %v4447_v7, %v15122_v22 }
 0x80b   :  { %v5863_v10 = vpop.permute.xlu2 %5862  ;;  %5184 = vperm.xlu2 %11440, %v14901_v20  }
 0x80c   :  { %v6008_v13 = vmul.f32 %v5863_v10, %v15005_v25  ;;  %v11096_v25 = vld [vmem:[#allocation3 + $0x160] sm:$0xf0]  ;;  %5937 = vperm.xlu0 %11456, %v15116_v0  }
 0x80e   :  { %v6060_v31 = vpack.c.bf16 %v6008_v13, %v6008_v13  ;;  %v15127_v13 = vpop.f32.mrf.mxu2 }
 0x80f   :  { %4461 = vperm.xlu1 %11439, %v4251_v41  }
 0x810   :  { %6112 = vst.msk [vmem:[#allocation3 + $0x158] sm:$0xf] %vm1036_vm3, %v6060_v31  ;;  %v4612_v31 = vpack.c.bf16 %v4560_v34, %v4560_v34 }
 0x813   :  { %v4739_v37 = vpop.permute.xlu2 %4738  ;;  %11442 = vset.pattern.permute.xlu2 %v16440_v30 }
 0x814   :  { %4865 = vst.msk [vmem:[#allocation3 + $0x160] sm:$0xf] %vm2494_vm5, %v4739_v37  ;;  %5892 = vperm.xlu2 %11442, %v14804_v35  }
 0x817   :  { %11441 = vset.pattern.permute.xlu1 %v16441_v42  ;;  %v9988_v19 = vld [vmem:[#allocation3 + $0x158] sm:$0xf] }
 0x818   :  { %5189 = vperm.xlu1 %11441, %v4251_v41   ;;  %v9989_v47 = vor.u32 %v11096_v25, %v9988_v19 }
 0x81a   :  { %10208 = vmatmul.msk.bf16.gmra.mxu3 %vm487_vm2, %v9989_v47  ;;  %v15129_v47 = vpop.f32.mrf.mxu3 }
 0x81b   :  { %v5467_v48 = vpop.permute.xlu2 %5466 }
 0x81c   :  { %5593 = vst.msk [vmem:[#allocation3 + $0x160] sm:$0xf] %vm3223_vm6, %v5467_v48  ;;  %11444 = vset.pattern.permute.xlu2 %v16441_v42 }
 0x820   :  { %4748 = vrot.lane.b32.xlu1 %v4610_v3, %s11548_s22 }
 0x821   :  { %11443 = vset.pattern.permute.xlu1 %v16442_v15 }
 0x823   :  { %v5165_v35 = vpop.permute.xlu2 %5164  ;;  %v9982_v25 = vld [vmem:[#allocation3 + $0x15c] sm:$0xf0] }
 0x824   :  { %v5286_v52 = vmul.f32 %v14976_v49, %v5165_v35  ;;  %v15138_v35 = vld [vmem:[%s16359_s5] ss:$0 sm:$0xff] }
 0x826   :  { %v5338_v41 = vpack.c.bf16 %v5286_v52, %v5286_v52  ;;  %v6921_v52 = vadd.f32 %v15138_v35, %v14253_v57 }
 0x828   :  { %5476 = vrot.lane.b32.xlu1 %v5338_v41, %s11550_s18 }
 0x82c   :  { %v5873_v63 = vpop.permute.xlu2 %5872 }
 0x82d   :  { %v6010_v45 = vmul.f32 %v5873_v63, %v15054_v9 }
 0x82f   :  { %v6062_v4 = vpack.c.bf16 %v6010_v45, %v6010_v45 }
 0x830   :  { %4471 = vperm.xlu1 %11443, %v4253_v21  }
 0x831   :  { %6114 = vst.msk [vmem:[#allocation3 + $0x170] sm:$0xf] %vm1036_vm3, %v6062_v4  ;;  %v7198_v4 = vpop.f32.mrf.mxu3 }
 0x834   :  { %v4743_v38 = vpop.permute.xlu2 %4742 }
 0x835   :  { %4867 = vst.msk [vmem:[#allocation3 + $0x178] sm:$0xf] %vm2494_vm5, %v4743_v38 }
 0x837   :  { %v5465_v27 = vpop.permute.xlu1 %5464 }
 0x838   :  { %5592 = vst.msk [vmem:[#allocation3 + $0x154] sm:$0xf] %vm3223_vm6, %v5465_v27  ;;  %11445 = vset.pattern.permute.xlu1 %v16441_v42  ;;  %v10000_v9 = vld [vmem:[#allocation3 + $0x170] sm:$0xf] }
 0x839   :  { %5199 = vperm.xlu1 %11445, %v4253_v21   ;;  %v10001_v60 = vor.u32 %v11099_v62, %v10000_v9 }
 0x83b   :  { %10209 = vmatmul.msk.bf16.gmra.mxu3 %vm487_vm2, %v10001_v60 }
 0x83c   :  { %v5471_v10 = vpop.permute.xlu2 %5470 }
 0x83d   :  { %5595 = vst.msk [vmem:[#allocation3 + $0x178] sm:$0xf] %vm3223_vm6, %v5471_v10 }
 0x83f   :  { %v4442_v37 = vpop.permute.xlu1 %4441  ;;  %v11094_v19 = vld [vmem:[#allocation3 + $0x154] sm:$0xf] }
 0x840   :  { %v4559_v21 = vmul.f32 %v14976_v49, %v4442_v37  ;;  %v9985_v54 = vor.u32 %v11094_v19, %v9982_v25  ;;  %v15154_v37 = vld [vmem:[%s16355_s1 + $0x168] sm:$0xff]  ;;  %v4457_v25 = vpop.permute.xlu0 %4456 }
 0x841   :  { %4752 = vrot.lane.b32.xlu1 %v4612_v31, %s11548_s22  ;;  %5947 = vperm.xlu0 %11456, %v15154_v37  }
 0x842   :  { %v4611_v48 = vpack.c.bf16 %v4559_v21, %v4559_v21  ;;  %7073 = vmatmul.bf16.gmra.mxu2 %v9985_v54  ;;  %11448 = vset.pattern.permute.xlu1 %v16442_v15  ;;  %v11102_v54 = vld [vmem:[#allocation3 + $0x190] sm:$0xf0] }
 0x844   :  { %v5175_v3 = vpop.permute.xlu2 %5174  ;;  %4750 = vrot.lane.b32.xlu2 %v4611_v48, %s11548_s22 }
 0x845   :  { %v5288_v49 = vmul.f32 %v14991_v36, %v5175_v3  ;;  %v15162_v3 = vld [vmem:[#allocation2 + $0x200] sm:$0xff] }
 0x846   :  { %v7059_v41 = vpop.f32.mrf.mxu2 }
 0x847   :  { %v5340_v63 = vpack.c.bf16 %v5288_v49, %v5288_v49  ;;  %v7060_v45 = vadd.f32 %v7059_v41, %v6921_v52  ;;  %v4562_v52 = vmul.f32 %v4457_v25, %v15162_v3 }
 0x848   :  { %v5170_v38 = vpop.permute.xlu1 %5169 }
 0x849   :  { %v7199_v27 = vadd.f32 %v7198_v4, %v7060_v45  ;;  %v5287_v7 = vmul.f32 %v5170_v38, %v15122_v22  ;;  %5480 = vrot.lane.b32.xlu1 %v5340_v63, %s11550_s18  ;;  %11465 = vset.pattern.permute.xlu0 %v16442_v15  ;;  %v4614_v63 = vpack.c.bf16 %v4562_v52, %v4562_v52  ;;  %v9994_v4 = vld [vmem:[#allocation3 + $0x174] sm:$0xf0]  ;;  %v15172_v38 = vpop.f32.mrf.mxu3 }
 0x84b   :  { %v7295_v9 = vmax.f32 %v7199_v27, 0.0  ;;  %v5339_v62 = vpack.c.bf16 %v5287_v7, %v5287_v7 }
 0x84d   :  { %v7415_v60 = vpack.c.bf16 %v7295_v9, %v7295_v9  ;;  %v5883_v34 = vpop.permute.xlu2 %5882  ;;  %5478 = vrot.lane.b32.xlu2 %v5339_v62, %s11550_s18 }
 0x84e   :  { %v6012_v57 = vmul.f32 %v5883_v34, %v15083_v8  ;;  %v15170_v41 = vpop.f32.mrf.mxu2 }
 0x84f   :  { %7416 = vst.msk [vmem:[#allocation4 + $0x2c] sm:$0xf] %vm7326_vm7, %v7415_v60 }
 0x850   :  { %v6064_v10 = vpack.c.bf16 %v6012_v57, %v6012_v57  ;;  %v4741_v31 = vpop.permute.xlu1 %4740 }
 0x851   :  { %4866 = vst.msk [vmem:[#allocation3 + $0x16c] sm:$0xf] %vm2494_vm5, %v4741_v31  ;;  %4481 = vperm.xlu1 %11448, %v15116_v0  }
 0x852   :  { %6116 = vst.msk [vmem:[#allocation3 + $0x188] sm:$0xf] %vm1036_vm3, %v6064_v10 }
 0x855   :  { %v4747_v19 = vpop.permute.xlu2 %4746  ;;  %5194 = vperm.xlu2 %11444, %v14984_v16  }
 0x856   :  { %4869 = vst.msk [vmem:[#allocation3 + $0x190] sm:$0xf] %vm2494_vm5, %v4747_v19 }
 0x858   :  { %v5469_v8 = vpop.permute.xlu1 %5468 }
 0x859   :  { %5594 = vst.msk [vmem:[#allocation3 + $0x16c] sm:$0xf] %vm3223_vm6, %v5469_v8  ;;  %11450 = vset.pattern.permute.xlu1 %v16441_v42  ;;  %v10012_v21 = vld [vmem:[#allocation3 + $0x188] sm:$0xf] }
 0x85a   :  { %5209 = vperm.xlu1 %11450, %v15116_v0   ;;  %v10013_v48 = vor.u32 %v11102_v54, %v10012_v21 }
 0x85b   :  { %v7203_v10 = vpop.f32.mrf.mxu3 }
 0x85c   :  { %10210 = vmatmul.msk.bf16.gmra.mxu3 %vm487_vm2, %v10013_v48 }
 0x85d   :  { %v5475_v49 = vpop.permute.xlu2 %5474  ;;  %11446 = vset.pattern.permute.xlu2 %v16440_v30 }
 0x85e   :  { %5597 = vst.msk [vmem:[#allocation3 + $0x190] sm:$0xf] %vm3223_vm6, %v5475_v49  ;;  %5902 = vperm.xlu2 %11446, %v14887_v18   ;;  %v6926_v18 = vadd.f32 %v15138_v35, %v14273_v5 }
 0x860   :  { %v4452_v0 = vpop.permute.xlu1 %4451  ;;  %v11097_v45 = vld [vmem:[#allocation3 + $0x16c] sm:$0xf] }
 0x861   :  { %v4561_v27 = vmul.f32 %v14991_v36, %v4452_v0  ;;  %v9997_v7 = vor.u32 %v11097_v45, %v9994_v4  ;;  %v11105_v0 = vld [vmem:[#allocation3 + $0x1a8] sm:$0xf0]  ;;  %v15191_v45 = vld [vmem:[#allocation2 + $0x210] sm:$0xff] }
 0x862   :  { %4756 = vrot.lane.b32.xlu1 %v4614_v63, %s11548_s22 }
 0x863   :  { %v4613_v9 = vpack.c.bf16 %v4561_v27, %v4561_v27  ;;  %7078 = vmatmul.bf16.gmra.mxu2 %v9997_v7  ;;  %11452 = vset.pattern.permute.xlu1 %v16442_v15  ;;  %v4467_v27 = vpop.permute.xlu0 %4466 }
 0x864   :  { %v4564_v7 = vmul.f32 %v4467_v27, %v15191_v45 }
 0x865   :  { %v5185_v62 = vpop.permute.xlu2 %5184 }
 0x866   :  { %v5290_v60 = vmul.f32 %v15007_v51, %v5185_v62  ;;  %4754 = vrot.lane.b32.xlu2 %v4613_v9, %s11548_s22  ;;  %v4616_v62 = vpack.c.bf16 %v4564_v7, %v4564_v7 }
 0x867   :  { %v7064_v34 = vpop.f32.mrf.mxu2  ;;  %11449 = vset.pattern.permute.xlu2 %v16441_v42 }
 0x868   :  { %v5342_v57 = vpack.c.bf16 %v5290_v60, %v5290_v60  ;;  %v7065_v36 = vadd.f32 %v7064_v34, %v6926_v18  ;;  %v10006_v34 = vld [vmem:[#allocation3 + $0x18c] sm:$0xf0] }
 0x869   :  { %v5180_v31 = vpop.permute.xlu1 %5179 }
 0x86a   :  { %v7204_v19 = vadd.f32 %v7203_v10, %v7065_v36  ;;  %v5289_v8 = vmul.f32 %v5180_v31, %v15162_v3  ;;  %5484 = vrot.lane.b32.xlu1 %v5342_v57, %s11550_s18  ;;  %v15202_v57 = vpop.f32.mrf.mxu3 }
 0x86c   :  { %v7297_v25 = vmax.f32 %v7204_v19, 0.0  ;;  %v5341_v21 = vpack.c.bf16 %v5289_v8, %v5289_v8 }
 0x86e   :  { %v7423_v54 = vpack.c.bf16 %v7297_v25, %v7297_v25  ;;  %v5893_v5 = vpop.permute.xlu2 %5892  ;;  %5482 = vrot.lane.b32.xlu2 %v5341_v21, %s11550_s18 }
 0x86f   :  { %v6014_v48 = vmul.f32 %v5893_v5, %v15122_v22  ;;  %v15200_v9 = vpop.f32.mrf.mxu2 }
 0x870   :  { %7424 = vst.msk [vmem:[#allocation4 + $0x30] sm:$0xf] %vm7326_vm7, %v7423_v54 }
 0x871   :  { %v6066_v52 = vpack.c.bf16 %v6014_v48, %v6014_v48  ;;  %v4745_v49 = vpop.permute.xlu1 %4744 }
 0x872   :  { %4868 = vst.msk [vmem:[#allocation3 + $0x184] sm:$0xf] %vm2494_vm5, %v4745_v49  ;;  %4491 = vperm.xlu1 %11452, %v15154_v37  }
 0x873   :  { %6118 = vst.msk [vmem:[#allocation3 + $0x1a0] sm:$0xf] %vm1036_vm3, %v6066_v52 }
 0x876   :  { %5204 = vperm.xlu2 %11449, %v15000_v23  }
 0x879   :  { %v5473_v63 = vpop.permute.xlu1 %5472 }
 0x87a   :  { %5596 = vst.msk [vmem:[#allocation3 + $0x184] sm:$0xf] %vm3223_vm6, %v5473_v63  ;;  %11454 = vset.pattern.permute.xlu1 %v16441_v42  ;;  %v10024_v22 = vld [vmem:[#allocation3 + $0x1a0] sm:$0xf] }
 0x87b   :  { %5219 = vperm.xlu1 %11454, %v15154_v37   ;;  %v10025_v4 = vor.u32 %v11105_v0, %v10024_v22  ;;  %v4201_v0 = vld [vmem:[#allocation2 + $0x218] sm:$0xff] }
 0x87c   :  { %v7208_v8 = vpop.f32.mrf.mxu3 }
 0x87d   :  { %10211 = vmatmul.msk.bf16.gmra.mxu3 %vm487_vm2, %v10025_v4 }
 0x87e   :  { %11451 = vset.pattern.permute.xlu2 %v16440_v30 }
 0x87f   :  { %5912 = vperm.xlu2 %11451, %v14901_v20   ;;  %v6931_v20 = vadd.f32 %v15138_v35, %v14297_v40  ;;  %v15216_v40 = vpop.permute.xlu0 %4476 }
 0x881   :  { %v4462_v18 = vpop.permute.xlu1 %4461  ;;  %v11100_v60 = vld [vmem:[#allocation3 + $0x184] sm:$0xf] }
 0x882   :  { %v4563_v37 = vmul.f32 %v15007_v51, %v4462_v18  ;;  %v10009_v36 = vor.u32 %v11100_v60, %v10006_v34  ;;  %v15227_v18 = vld [vmem:[#allocation2 + $0x220] sm:$0xff] }
 0x883   :  { %4760 = vrot.lane.b32.xlu1 %v4616_v62, %s11548_s22 }
 0x884   :  { %v4615_v10 = vpack.c.bf16 %v4563_v37, %v4563_v37  ;;  %7083 = vmatmul.bf16.gmra.mxu2 %v10009_v36  ;;  %11457 = vset.pattern.permute.xlu1 %v16442_v15 }
 0x887   :  { %4758 = vrot.lane.b32.xlu2 %v4615_v10, %s11548_s22  ;;  %v15222_v4 = vpop.permute.xlu0 %4486 }
 0x888   :  { %v7069_v31 = vpop.f32.mrf.mxu2  ;;  %11453 = vset.pattern.permute.xlu2 %v16441_v42 }
 0x889   :  { %v7070_v19 = vadd.f32 %v7069_v31, %v6931_v20 }
 0x88a   :  { %v5190_v25 = vpop.permute.xlu1 %5189 }
 0x88b   :  { %v7209_v21 = vadd.f32 %v7208_v8, %v7070_v19  ;;  %v5291_v51 = vmul.f32 %v5190_v25, %v15191_v45 }
 0x88d   :  { %v7299_v54 = vmax.f32 %v7209_v21, 0.0  ;;  %v5343_v5 = vpack.c.bf16 %v5291_v51, %v5291_v51 }
 0x88f   :  { %v7431_v48 = vpack.c.bf16 %v7299_v54, %v7299_v54  ;;  %5486 = vrot.lane.b32.xlu2 %v5343_v5, %s11550_s18  ;;  %v15230_v37 = vpop.permute.xlu0 %4496 }
 0x891   :  { %7432 = vst.msk [vmem:[#allocation4 + $0x34] sm:$0xf] %vm7326_vm7, %v7431_v48 }
 0x892   :  { %v4749_v52 = vpop.permute.xlu1 %4748 }
 0x893   :  { %4870 = vst.msk [vmem:[#allocation3 + $0x19c] sm:$0xf] %vm2494_vm5, %v4749_v52  ;;  %v15240_v52 = vld [vmem:[%s16355_s1 + $0x178] sm:$0xff] }
 0x897   :  { %5214 = vperm.xlu2 %11453, %v15016_v33   ;;  %v5918_v21 = vpop.permute.xlu0 %5917 }
 0x898   :  { %v6019_v51 = vmul.f32 %v5918_v21, %v4201_v0 }
 0x89a   :  { %v5477_v49 = vpop.permute.xlu1 %5476  ;;  %v6071_v5 = vpack.c.bf16 %v6019_v51, %v6019_v51 }
 0x89b   :  { %5598 = vst.msk [vmem:[#allocation3 + $0x19c] sm:$0xf] %vm3223_vm6, %v5477_v49  ;;  %v15246_v49 = vld [vmem:[%s16355_s1 + $0x180] sm:$0xff] }
 0x89c   :  { %6123 = vst.msk [vmem:[#allocation3 + $0x1dc] sm:$0xf] %vm1036_vm3, %v6071_v5  ;;  %4506 = vperm.xlu0 %11465, %v15246_v49  }
 0x89e   :  { %v4751_v63 = vpop.permute.xlu2 %4750 }
 0x89f   :  { %4871 = vst.msk [vmem:[#allocation3 + $0x1a8] sm:$0xf] %vm2494_vm5, %v4751_v63  ;;  %11455 = vset.pattern.permute.xlu2 %v16440_v30 }
 0x8a0   :  { %5922 = vperm.xlu2 %11455, %v14984_v16  }
 0x8a2   :  { %v4472_v22 = vpop.permute.xlu1 %4471  ;;  %v11103_v10 = vld [vmem:[#allocation3 + $0x19c] sm:$0xf] }
 0x8a3   :  { %v4565_v27 = vmul.f32 %v4472_v22, %v4201_v0  ;;  %v15254_v22 = vpop.f32.mrf.mxu3 }
 0x8a5   :  { %v4617_v7 = vpack.c.bf16 %v4565_v27, %v4565_v27 }
 0x8a7   :  { %v5479_v62 = vpop.permute.xlu2 %5478 }
 0x8a8   :  { %5599 = vst.msk [vmem:[#allocation3 + $0x1a8] sm:$0xf] %vm3223_vm6, %v5479_v62  ;;  %4762 = vrot.lane.b32.xlu2 %v4617_v7, %s11548_s22  ;;  %v6935_v7 = vpop.f32.mrf.mxu1  ;;  %v15259_v62 = vld [vmem:[#allocation2 + $0x228] sm:$0xff] }
 0x8a9   :  { %11458 = vset.pattern.permute.xlu2 %v16441_v42 }
 0x8ab   :  { %v5200_v60 = vpop.permute.xlu1 %5199 }
 0x8ac   :  { %v5293_v34 = vmul.f32 %v5200_v60, %v15227_v18 }
 0x8ae   :  { %v5345_v16 = vpack.c.bf16 %v5293_v34, %v5293_v34  ;;  %v6936_v34 = vadd.f32 %v15138_v35, %v6935_v7 }
 0x8af   :  { %v5195_v36 = vpop.permute.xlu2 %5194  ;;  %v10018_v20 = vld [vmem:[#allocation3 + $0x1a4] sm:$0xf0] }
 0x8b0   :  { %v5292_v31 = vmul.f32 %v5195_v36, %v4201_v0  ;;  %5490 = vrot.lane.b32.xlu2 %v5345_v16, %s11550_s18  ;;  %v10021_v19 = vor.u32 %v11103_v10, %v10018_v20  ;;  %v11108_v10 = vld [vmem:[#allocation3 + $0x1c0] sm:$0xf0] }
 0x8b2   :  { %v5344_v8 = vpack.c.bf16 %v5292_v31, %v5292_v31  ;;  %7088 = vmatmul.bf16.gmra.mxu2 %v10021_v19 }
 0x8b3   :  { %v4753_v25 = vpop.permute.xlu1 %4752 }
 0x8b4   :  { %4872 = vst.msk [vmem:[#allocation3 + $0x1b4] sm:$0xf] %vm2494_vm5, %v4753_v25  ;;  %5488 = vrot.lane.b32.xlu1 %v5344_v8, %s11550_s18  ;;  %v7213_v25 = vpop.f32.mrf.mxu3 }
 0x8b8   :  { %v5903_v54 = vpop.permute.xlu2 %5902  ;;  %5224 = vperm.xlu2 %11458, %v15029_v44  }
 0x8b9   :  { %v6016_v48 = vmul.f32 %v5903_v54, %v15162_v3  ;;  %v15251_v3 = vpop.f32.mrf.mxu2 }
 0x8bb   :  { %v6068_v63 = vpack.c.bf16 %v6016_v48, %v6016_v48  ;;  %v5481_v0 = vpop.permute.xlu1 %5480  ;;  %v15271_v48 = vld [vmem:[#allocation2 + $0x230] sm:$0xff] }
 0x8bc   :  { %5600 = vst.msk [vmem:[#allocation3 + $0x1b4] sm:$0xf] %vm3223_vm6, %v5481_v0  ;;  %4501 = vperm.xlu1 %11457, %v15240_v52  }
 0x8bd   :  { %6120 = vst.msk [vmem:[#allocation3 + $0x1b8] sm:$0xf] %vm1036_vm3, %v6068_v63 }
 0x8c0   :  { %v4755_v27 = vpop.permute.xlu2 %4754  ;;  %11460 = vset.pattern.permute.xlu2 %v16440_v30 }
 0x8c1   :  { %4873 = vst.msk [vmem:[#allocation3 + $0x1c0] sm:$0xf] %vm2494_vm5, %v4755_v27  ;;  %5932 = vperm.xlu2 %11460, %v15000_v23   ;;  %v4566_v23 = vmul.f32 %v15216_v40, %v15227_v18 }
 0x8c3   :  { %v4482_v60 = vpop.permute.xlu1 %4481  ;;  %v4618_v5 = vpack.c.bf16 %v4566_v23, %v4566_v23 }
 0x8c4   :  { %11459 = vset.pattern.permute.xlu1 %v16441_v42  ;;  %v4567_v16 = vmul.f32 %v4482_v60, %v15259_v62  ;;  %v10036_v36 = vld [vmem:[#allocation3 + $0x1b8] sm:$0xf]  ;;  %v11106_v60 = vld [vmem:[#allocation3 + $0x1b4] sm:$0xf] }
 0x8c5   :  { %v7074_v20 = vpop.f32.mrf.mxu2  ;;  %5229 = vperm.xlu1 %11459, %v15240_v52   ;;  %v10037_v31 = vor.u32 %v11108_v10, %v10036_v36 }
 0x8c6   :  { %v4619_v19 = vpack.c.bf16 %v4567_v16, %v4567_v16  ;;  %v7075_v8 = vadd.f32 %v7074_v20, %v6936_v34 }
 0x8c7   :  { %10212 = vmatmul.msk.bf16.gmra.mxu3 %vm487_vm2, %v10037_v31  ;;  %v15284_v31 = vld [vmem:[%s16355_s1 + $0x190] sm:$0xff] }
 0x8c8   :  { %v7214_v21 = vadd.f32 %v7213_v25, %v7075_v8  ;;  %v5483_v51 = vpop.permute.xlu2 %5482  ;;  %4516 = vperm.xlu0 %11465, %v15284_v31   ;;  %v15294_v25 = vld [vmem:[%s16355_s1 + $0x188] sm:$0xff] }
 0x8c9   :  { %5601 = vst.msk [vmem:[#allocation3 + $0x1c0] sm:$0xf] %vm3223_vm6, %v5483_v51  ;;  %4766 = vrot.lane.b32.xlu2 %v4619_v19, %s11548_s22  ;;  %v15287_v19 = vpop.f32.mrf.mxu1 }
 0x8ca   :  { %v7301_v54 = vmax.f32 %v7214_v21, 0.0  ;;  %11462 = vset.pattern.permute.xlu2 %v16441_v42 }
 0x8cc   :  { %v7439_v63 = vpack.c.bf16 %v7301_v54, %v7301_v54  ;;  %v5210_v0 = vpop.permute.xlu1 %5209 }
 0x8cd   :  { %v5295_v27 = vmul.f32 %v5210_v0, %v15271_v48  ;;  %4764 = vrot.lane.b32.xlu1 %v4618_v5, %s11548_s22  ;;  %v15298_v54 = vpop.f32.mrf.mxu2  ;;  %v15302_v5 = vpop.f32.mrf.mxu3  ;;  %v15308_v0 = vld [vmem:[#allocation2 + $0x238] sm:$0xff] }
 0x8ce   :  { %7440 = vst.msk [vmem:[#allocation4 + $0x38] sm:$0xf] %vm7326_vm7, %v7439_v63  ;;  %11461 = vset.pattern.permute.xlu1 %v16442_v15 }
 0x8cf   :  { %v5347_v40 = vpack.c.bf16 %v5295_v27, %v5295_v27  ;;  %v11111_v27 = vld [vmem:[#allocation3 + $0x1d8] sm:$0xf0] }
 0x8d0   :  { %v5205_v7 = vpop.permute.xlu2 %5204  ;;  %v10030_v34 = vld [vmem:[#allocation3 + $0x1bc] sm:$0xf0]  ;;  %11470 = vset.pattern.permute.xlu0 %v16440_v30 }
 0x8d1   :  { %v5294_v16 = vmul.f32 %v5205_v7, %v15259_v62  ;;  %5494 = vrot.lane.b32.xlu2 %v5347_v40, %s11550_s18  ;;  %v10033_v36 = vor.u32 %v11106_v60, %v10030_v34  ;;  %5957 = vperm.xlu0 %11470, %v15240_v52   ;;  %v6940_v63 = vpop.f32.mrf.mxu1  ;;  %v11163_v40 = vld [vmem:[%s16360_s6 + $0x78] sm:$0xff] }
 0x8d2   :  { %v6941_v60 = vadd.f32 %v15138_v35, %v6940_v63  ;;  %9320 = vmatpush.bf16.msrb.mxu3 %v11163_v40  ;;  %v15324_v63 = vld [vmem:[#allocation2 + $0x240] sm:$0xff] }
 0x8d3   :  { %v5346_v10 = vpack.c.bf16 %v5294_v16, %v5294_v16  ;;  %7093 = vmatmul.bf16.gmra.mxu2 %v10033_v36 }
 0x8d4   :  { %v4757_v20 = vpop.permute.xlu1 %4756 }
 0x8d5   :  { %4874 = vst.msk [vmem:[#allocation3 + $0x1cc] sm:$0xf] %vm2494_vm5, %v4757_v20  ;;  %5492 = vrot.lane.b32.xlu1 %v5346_v10, %s11550_s18  ;;  %v4568_v20 = vmul.f32 %v15222_v4, %v15271_v48 }
 0x8d9   :  { %v5913_v8 = vpop.permute.xlu2 %5912  ;;  %5234 = vperm.xlu2 %11462, %v15246_v49   ;;  %5962 = vperm.xlu0 %11470, %v15246_v49  }
 0x8da   :  { %v6018_v23 = vmul.f32 %v5913_v8, %v15191_v45  ;;  %v7218_v8 = vpop.f32.mrf.mxu3 }
 0x8dc   :  { %v6070_v21 = vpack.c.bf16 %v6018_v23, %v6018_v23  ;;  %v5485_v51 = vpop.permute.xlu1 %5484 }
 0x8dd   :  { %5602 = vst.msk [vmem:[#allocation3 + $0x1cc] sm:$0xf] %vm3223_vm6, %v5485_v51  ;;  %4511 = vperm.xlu1 %11461, %v15294_v25  }
 0x8de   :  { %6122 = vst.msk [vmem:[#allocation3 + $0x1d0] sm:$0xf] %vm1036_vm3, %v6070_v21 }
 0x8e1   :  { %v4759_v45 = vpop.permute.xlu2 %4758  ;;  %11464 = vset.pattern.permute.xlu2 %v16440_v30 }
 0x8e2   :  { %4875 = vst.msk [vmem:[#allocation3 + $0x1d8] sm:$0xf] %vm2494_vm5, %v4759_v45  ;;  %5942 = vperm.xlu2 %11464, %v15016_v33   ;;  %v4620_v45 = vpack.c.bf16 %v4568_v20, %v4568_v20 }
 0x8e4   :  { %v4492_v7 = vpop.permute.xlu1 %4491 }
 0x8e5   :  { %11463 = vset.pattern.permute.xlu1 %v16441_v42  ;;  %v4569_v52 = vmul.f32 %v4492_v7, %v15308_v0  ;;  %v10048_v34 = vld [vmem:[#allocation3 + $0x1d0] sm:$0xf]  ;;  %v11155_v7 = vld [vmem:[%s16360_s6 + $0x38] sm:$0xff] }
 0x8e6   :  { %v7079_v16 = vpop.f32.mrf.mxu2  ;;  %5239 = vperm.xlu1 %11463, %v15294_v25   ;;  %v10049_v33 = vor.u32 %v11111_v27, %v10048_v34  ;;  %v11109_v34 = vld [vmem:[#allocation3 + $0x1cc] sm:$0xf]  ;;  %9307 = vmatpush.bf16.msrb.mxu0 %v11155_v7 }
 0x8e7   :  { %v4621_v36 = vpack.c.bf16 %v4569_v52, %v4569_v52  ;;  %v7080_v10 = vadd.f32 %v7079_v16, %v6941_v60  ;;  %v5928_v60 = vpop.permute.xlu0 %5927 }
 0x8e8   :  { %10213 = vmatmul.msk.bf16.gmra.mxu3 %vm487_vm2, %v10049_v33  ;;  %v6021_v33 = vmul.f32 %v5928_v60, %v15259_v62  ;;  %v11179_v62 = vld [vmem:[%s16360_s6 + $0xf8] sm:$0xff] }
 0x8e9   :  { %v7219_v23 = vadd.f32 %v7218_v8, %v7080_v10  ;;  %v5487_v21 = vpop.permute.xlu2 %5486  ;;  %9346 = vmatpush.bf16.msrb.mxu2 %v11179_v62 }
 0x8ea   :  { %5603 = vst.msk [vmem:[#allocation3 + $0x1d8] sm:$0xf] %vm3223_vm6, %v5487_v21  ;;  %4770 = vrot.lane.b32.xlu2 %v4621_v36, %s11548_s22  ;;  %v6073_v20 = vpack.c.bf16 %v6021_v33, %v6021_v33  ;;  %v15345_v21 = vpop.f32.mrf.mxu1 }
 0x8eb   :  { %v7303_v51 = vmax.f32 %v7219_v23, 0.0  ;;  %11467 = vset.pattern.permute.xlu2 %v16441_v42  ;;  %v11171_v23 = vld [vmem:[%s16360_s6 + $0xb8] sm:$0xff] }
 0x8ec   :  { %6125 = vst.msk [vmem:[#allocation3 + $0x1f4] sm:$0xf] %vm1036_vm3, %v6073_v20  ;;  %9333 = vmatpush.bf16.msrb.mxu1 %v11171_v23 }
 0x8ed   :  { %v7447_v27 = vpack.c.bf16 %v7303_v51, %v7303_v51  ;;  %v5220_v40 = vpop.permute.xlu1 %5219 }
 0x8ee   :  { %v5297_v4 = vmul.f32 %v5220_v40, %v15324_v63  ;;  %4768 = vrot.lane.b32.xlu1 %v4620_v45, %s11548_s22 }
 0x8ef   :  { %7448 = vst.msk [vmem:[#allocation4 + $0x3c] sm:$0xf] %vm7326_vm7, %v7447_v27  ;;  %11466 = vset.pattern.permute.xlu1 %v16442_v15  ;;  %v15352_v27 = vld [vmem:[%s16355_s1 + $0x198] sm:$0xff] }
 0x8f0   :  { %v5349_v49 = vpack.c.bf16 %v5297_v4, %v5297_v4  ;;  %v15355_v4 = vpop.f32.mrf.mxu2 }
 0x8f1   :  { %v5215_v52 = vpop.permute.xlu2 %5214  ;;  %v10042_v16 = vld [vmem:[#allocation3 + $0x1d4] sm:$0xf0] }
 0x8f2   :  { %v5296_v36 = vmul.f32 %v5215_v52, %v15308_v0  ;;  %5498 = vrot.lane.b32.xlu2 %v5349_v49, %s11550_s18  ;;  %v10045_v10 = vor.u32 %v11109_v34, %v10042_v16  ;;  %v15358_v49 = vpop.f32.mrf.mxu3  ;;  %v6945_v60 = vpop.f32.mrf.mxu1 }
 0x8f3   :  { %v6946_v52 = vadd.f32 %v15138_v35, %v6945_v60 }
 0x8f4   :  { %v5348_v8 = vpack.c.bf16 %v5296_v36, %v5296_v36  ;;  %7098 = vmatmul.bf16.gmra.mxu2 %v10045_v10  ;;  %v4570_v10 = vmul.f32 %v15230_v37, %v15324_v63 }
 0x8f5   :  { %v4761_v15 = vpop.permute.xlu1 %4760 }
 0x8f6   :  { %4876 = vst.msk [vmem:[#allocation3 + $0x1e4] sm:$0xf] %vm2494_vm5, %v4761_v15  ;;  %5496 = vrot.lane.b32.xlu1 %v5348_v8, %s11550_s18  ;;  %v4622_v62 = vpack.c.bf16 %v4570_v10, %v4570_v10 }
 0x8fa   :  { %5244 = vperm.xlu2 %11467, %v15284_v31   ;;  %v5923_v51 = vpop.permute.xlu2 %5922  ;;  %v7223_v20 = vpop.f32.mrf.mxu3 }
 0x8fb   :  { %v6020_v45 = vmul.f32 %v5923_v51, %v15227_v18  ;;  %v11114_v18 = vld [vmem:[#allocation3 + $0x1f0] sm:$0xf0]  ;;  %v5938_v51 = vpop.permute.xlu0 %5937  ;;  %v15389_v10 = vpop.f32.mrf.mxu1 }
 0x8fc   :  { %v6023_v37 = vmul.f32 %v5938_v51, %v15308_v0  ;;  %v11154_v0 = vld [vmem:[%s16360_s6 + $0x30] sm:$0xff] }
 0x8fd   :  { %v6072_v40 = vpack.c.bf16 %v6020_v45, %v6020_v45  ;;  %9308 = vmatpush.bf16.msrb.mxu0 %v11154_v0 }
 0x8fe   :  { %4521 = vperm.xlu1 %11466, %v15352_v27  }
 0x8ff   :  { %6124 = vst.msk [vmem:[#allocation3 + $0x1e8] sm:$0xf] %vm1036_vm3, %v6072_v40 }
 0x902   :  { %v4763_v7 = vpop.permute.xlu2 %4762  ;;  %11469 = vset.pattern.permute.xlu2 %v16440_v30 }
 0x903   :  { %4877 = vst.msk [vmem:[#allocation3 + $0x1f0] sm:$0xf] %vm2494_vm5, %v4763_v7  ;;  %5952 = vperm.xlu2 %11469, %v15029_v44   ;;  %v6075_v7 = vpack.c.bf16 %v6023_v37, %v6023_v37 }
 0x905   :  { %6127 = vst.msk [vmem:[#allocation3 + $0x20c] sm:$0xf] %vm1036_vm3, %v6075_v7  ;;  %v15400_v7 = vpop.f32.mrf.mxu3 }
 0x906   :  { %11468 = vset.pattern.permute.xlu1 %v16441_v42  ;;  %v10060_v34 = vld [vmem:[#allocation3 + $0x1e8] sm:$0xf] }
 0x907   :  { %v7084_v16 = vpop.f32.mrf.mxu2  ;;  %5249 = vperm.xlu1 %11468, %v15352_v27   ;;  %v10061_v33 = vor.u32 %v11114_v18, %v10060_v34  ;;  %v4934_v42 = vld [vmem:[#allocation2 + $0x248] sm:$0xff] }
 0x908   :  { %v7085_v36 = vadd.f32 %v7084_v16, %v6946_v52  ;;  %v11162_v16 = vld [vmem:[%s16360_s6 + $0x70] sm:$0xff] }
 0x909   :  { %10214 = vmatmul.msk.bf16.gmra.mxu3 %vm487_vm2, %v10061_v33 }
 0x90a   :  { %v7224_v8 = vadd.f32 %v7223_v20, %v7085_v36  ;;  %v5491_v15 = vpop.permute.xlu2 %5490  ;;  %9321 = vmatpush.bf16.msrb.mxu3 %v11162_v16  ;;  %v15402_v16 = vld [vmem:[#allocation2 + $0x258] sm:$0xff] }
 0x90b   :  { %5605 = vst.msk [vmem:[#allocation3 + $0x1f0] sm:$0xf] %vm3223_vm6, %v5491_v15 }
 0x90c   :  { %v7305_v44 = vmax.f32 %v7224_v8, 0.0  ;;  %v11117_v33 = vld [vmem:[#allocation3 + $0x208] sm:$0xf0]  ;;  %v5948_v8 = vpop.permute.xlu0 %5947 }
 0x90d   :  { %v6025_v15 = vmul.f32 %v5948_v8, %v4934_v42  ;;  %v7228_v8 = vpop.f32.mrf.mxu3 }
 0x90e   :  { %v7455_v23 = vpack.c.bf16 %v7305_v44, %v7305_v44  ;;  %v11170_v44 = vld [vmem:[%s16360_s6 + $0xb0] sm:$0xff] }
 0x90f   :  { %4772 = vrot.lane.b32.xlu1 %v4622_v62, %s11548_s22  ;;  %9334 = vmatpush.bf16.msrb.mxu1 %v11170_v44 }
 0x910   :  { %7456 = vst.msk [vmem:[#allocation4 + $0x40] sm:$0xf] %vm7326_vm7, %v7455_v23  ;;  %11471 = vset.pattern.permute.xlu1 %v16440_v30  ;;  %v6077_v23 = vpack.c.bf16 %v6025_v15, %v6025_v15 }
 0x912   :  { %v5225_v45 = vpop.permute.xlu2 %5224  ;;  %v10054_v51 = vld [vmem:[#allocation3 + $0x1ec] sm:$0xf0]  ;;  %6129 = vst.msk [vmem:[#allocation3 + $0x224] sm:$0xf] %vm1036_vm3, %v6077_v23 }
 0x913   :  { %v5298_v40 = vmul.f32 %v5225_v45, %v4934_v42  ;;  %v15397_v45 = vpop.f32.mrf.mxu2 }
 0x915   :  { %v5350_v60 = vpack.c.bf16 %v5298_v40, %v5298_v40 }
 0x917   :  { %5500 = vrot.lane.b32.xlu1 %v5350_v60, %s11550_s18 }
 0x91b   :  { %v5933_v18 = vpop.permute.xlu2 %5932 }
 0x91c   :  { %v6022_v52 = vmul.f32 %v5933_v18, %v15271_v48  ;;  %v11178_v48 = vld [vmem:[%s16360_s6 + $0xf0] sm:$0xff] }
 0x91d   :  { %9347 = vmatpush.bf16.msrb.mxu2 %v11178_v48 }
 0x91e   :  { %v6074_v34 = vpack.c.bf16 %v6022_v52, %v6022_v52  ;;  %v6950_v52 = vpop.f32.mrf.mxu1 }
 0x91f   :  { %5967 = vperm.xlu1 %11471, %v15294_v25   ;;  %v6951_v0 = vadd.f32 %v15138_v35, %v6950_v52 }
 0x920   :  { %6126 = vst.msk [vmem:[#allocation3 + $0x200] sm:$0xf] %vm1036_vm3, %v6074_v34 }
 0x923   :  { %v4767_v30 = vpop.permute.xlu2 %4766 }
 0x924   :  { %4879 = vst.msk [vmem:[#allocation3 + $0x208] sm:$0xf] %vm2494_vm5, %v4767_v30 }
 0x926   :  { %v5489_v36 = vpop.permute.xlu1 %5488 }
 0x927   :  { %5604 = vst.msk [vmem:[#allocation3 + $0x1e4] sm:$0xf] %vm3223_vm6, %v5489_v36  ;;  %v10072_v25 = vld [vmem:[#allocation3 + $0x200] sm:$0xf]  ;;  %v15407_v36 = vld [vmem:[#allocation2 + $0x250] sm:$0xff] }
 0x928   :  { %v10073_v20 = vor.u32 %v11117_v33, %v10072_v25 }
 0x92a   :  { %10215 = vmatmul.msk.bf16.gmra.mxu3 %vm487_vm2, %v10073_v20 }
 0x92b   :  { %v5495_v62 = vpop.permute.xlu2 %5494 }
 0x92c   :  { %5607 = vst.msk [vmem:[#allocation3 + $0x208] sm:$0xf] %vm3223_vm6, %v5495_v62  ;;  %v4507_v62 = vpop.permute.xlu0 %4506 }
 0x92e   :  { %v4502_v37 = vpop.permute.xlu1 %4501  ;;  %v11112_v40 = vld [vmem:[#allocation3 + $0x1e4] sm:$0xf] }
 0x92f   :  { %v4571_v60 = vmul.f32 %v4934_v42, %v4502_v37  ;;  %v10057_v18 = vor.u32 %v11112_v40, %v10054_v51 }
 0x931   :  { %v4623_v34 = vpack.c.bf16 %v4571_v60, %v4571_v60  ;;  %7103 = vmatmul.bf16.gmra.mxu2 %v10057_v18  ;;  %v4572_v60 = vmul.f32 %v15407_v36, %v4507_v62 }
 0x933   :  { %4774 = vrot.lane.b32.xlu2 %v4623_v34, %s11548_s22  ;;  %v5235_v30 = vpop.permute.xlu2 %5234 }
 0x934   :  { %v5300_v33 = vmul.f32 %v5235_v30, %v15402_v16  ;;  %v4624_v30 = vpack.c.bf16 %v4572_v60, %v4572_v60 }
 0x935   :  { %v7089_v48 = vpop.f32.mrf.mxu2 }
 0x936   :  { %v5352_v25 = vpack.c.bf16 %v5300_v33, %v5300_v33  ;;  %v7090_v20 = vadd.f32 %v7089_v48, %v6951_v0  ;;  %v11120_v33 = vld [vmem:[#allocation3 + $0x220] sm:$0xf0] }
 0x937   :  { %v5230_v42 = vpop.permute.xlu1 %5229 }
 0x938   :  { %v7229_v15 = vadd.f32 %v7228_v8, %v7090_v20  ;;  %v5299_v44 = vmul.f32 %v5230_v42, %v15407_v36  ;;  %5504 = vrot.lane.b32.xlu1 %v5352_v25, %s11550_s18  ;;  %v15420_v25 = vpop.f32.mrf.mxu1  ;;  %v10066_v42 = vld [vmem:[#allocation3 + $0x204] sm:$0xf0] }
 0x93a   :  { %v7307_v23 = vmax.f32 %v7229_v15, 0.0  ;;  %v5351_v51 = vpack.c.bf16 %v5299_v44, %v5299_v44 }
 0x93c   :  { %v7463_v37 = vpack.c.bf16 %v7307_v23, %v7307_v23  ;;  %v5943_v40 = vpop.permute.xlu2 %5942  ;;  %5502 = vrot.lane.b32.xlu2 %v5351_v51, %s11550_s18  ;;  %v15430_v23 = vpop.f32.mrf.mxu3 }
 0x93d   :  { %v6024_v18 = vmul.f32 %v5943_v40, %v15324_v63  ;;  %v15428_v15 = vpop.f32.mrf.mxu2 }
 0x93e   :  { %7464 = vst.msk [vmem:[#allocation4 + $0x44] sm:$0xf] %vm7326_vm7, %v7463_v37 }
 0x93f   :  { %v6076_v52 = vpack.c.bf16 %v6024_v18, %v6024_v18  ;;  %v4765_v34 = vpop.permute.xlu1 %4764  ;;  %v15433_v18 = vld [vmem:[#allocation2 + $0x268] sm:$0xff] }
 0x940   :  { %4878 = vst.msk [vmem:[#allocation3 + $0x1fc] sm:$0xf] %vm2494_vm5, %v4765_v34  ;;  %5977 = vperm.xlu1 %11471, %v15352_v27   ;;  %v11161_v27 = vld [vmem:[%s16360_s6 + $0x68] sm:$0xff]  ;;  %v6955_v40 = vpop.f32.mrf.mxu1 }
 0x941   :  { %6128 = vst.msk [vmem:[#allocation3 + $0x218] sm:$0xf] %vm1036_vm3, %v6076_v52  ;;  %9322 = vmatpush.bf16.msrb.mxu3 %v11161_v27  ;;  %v6873_v52 = vadd.f32 %v15138_v35, %v13923_v32  ;;  %v11153_v34 = vld [vmem:[%s16360_s6 + $0x28] sm:$0xff] }
 0x942   :  { %9309 = vmatpush.bf16.msrb.mxu0 %v11153_v34 }
 0x944   :  { %v4771_v0 = vpop.permute.xlu2 %4770  ;;  %4776 = vrot.lane.b32.xlu2 %v4624_v30, %s11548_s22 }
 0x945   :  { %4881 = vst.msk [vmem:[#allocation3 + $0x220] sm:$0xf] %vm2494_vm5, %v4771_v0  ;;  %v6956_v0 = vadd.f32 %v15138_v35, %v6955_v40 }
 0x947   :  { %v5493_v48 = vpop.permute.xlu1 %5492 }
 0x948   :  { %5606 = vst.msk [vmem:[#allocation3 + $0x1fc] sm:$0xf] %vm3223_vm6, %v5493_v48  ;;  %v10084_v63 = vld [vmem:[#allocation3 + $0x218] sm:$0xf] }
 0x949   :  { %v10085_v20 = vor.u32 %v11120_v33, %v10084_v63  ;;  %v7012_v33 = vadd.f32 %v14719_v11, %v6873_v52  ;;  %v4517_v11 = vpop.permute.xlu0 %4516 }
 0x94b   :  { %10216 = vmatmul.msk.bf16.gmra.mxu3 %vm487_vm2, %v10085_v20  ;;  %v15444_v20 = vld [vmem:[#allocation2 + $0x260] sm:$0xff]  ;;  %v7151_v27 = vadd.f32 %v14734_v39, %v7012_v33 }
 0x94c   :  { %v5499_v8 = vpop.permute.xlu2 %5498 }
 0x94d   :  { %5609 = vst.msk [vmem:[#allocation3 + $0x220] sm:$0xf] %vm3223_vm6, %v5499_v8  ;;  %v7276_v40 = vmax.f32 %v7151_v27, 0.0 }
 0x94f   :  { %v4512_v44 = vpop.permute.xlu1 %4511  ;;  %v11115_v62 = vld [vmem:[#allocation3 + $0x1fc] sm:$0xf] }
 0x950   :  { %v4573_v51 = vmul.f32 %v15402_v16, %v4512_v44  ;;  %v10069_v37 = vor.u32 %v11115_v62, %v10066_v42  ;;  %v7233_v42 = vpop.f32.mrf.mxu3  ;;  %v6888_v62 = vadd.f32 %v15138_v35, %v14004_v26 }
 0x952   :  { %v4625_v60 = vpack.c.bf16 %v4573_v51, %v4573_v51  ;;  %7108 = vmatmul.bf16.gmra.mxu2 %v10069_v37 }
 0x954   :  { %v5245_v30 = vpop.permute.xlu2 %5244  ;;  %4778 = vrot.lane.b32.xlu0 %v4625_v60, %s11548_s22  ;;  %v7027_v60 = vadd.f32 %v14816_v58, %v6888_v62  ;;  %v11169_v58 = vld [vmem:[%s16360_s6 + $0xa8] sm:$0xff] }
 0x955   :  { %v5302_v48 = vmul.f32 %v5245_v30, %v15433_v18  ;;  %v4574_v30 = vmul.f32 %v15444_v20, %v4517_v11  ;;  %9335 = vmatpush.bf16.msrb.mxu1 %v11169_v58 }
 0x956   :  { %v7094_v63 = vpop.f32.mrf.mxu2  ;;  %v7166_v26 = vadd.f32 %v14814_v46, %v7027_v60 }
 0x957   :  { %v5354_v32 = vpack.c.bf16 %v5302_v48, %v5302_v48  ;;  %v7095_v8 = vadd.f32 %v7094_v63, %v6956_v0  ;;  %v7337_v0 = vpack.c.bf16 %v7276_v40, %v7276_v40  ;;  %v11177_v48 = vld [vmem:[%s16360_s6 + $0xe8] sm:$0xff]  ;;  %v4626_v63 = vpack.c.bf16 %v4574_v30, %v4574_v30 }
 0x958   :  { %v5240_v44 = vpop.permute.xlu1 %5239  ;;  %9348 = vmatpush.bf16.msrb.mxu2 %v11177_v48  ;;  %v7282_v46 = vmax.f32 %v7166_v26, 0.0  ;;  %v16446_v30 = vld [vmem:[#allocation15_spill] sm:$0xff]  ;;  %v15487_v26 = vpop.f32.mrf.mxu3 }
 0x959   :  { %v7234_v51 = vadd.f32 %v7233_v42, %v7095_v8  ;;  %v5301_v37 = vmul.f32 %v5240_v44, %v15444_v20  ;;  %5508 = vrot.lane.b32.xlu1 %v5354_v32, %s11550_s18 }
 0x95a   :  { %v7361_v8 = vpack.c.bf16 %v7282_v46, %v7282_v46 }
 0x95b   :  { %v7309_v52 = vmax.f32 %v7234_v51, 0.0  ;;  %v5353_v34 = vpack.c.bf16 %v5301_v37, %v5301_v37  ;;  %v15473_v51 = vpop.f32.mrf.mxu1 }
 0x95c   :  { %5972 = vperm.xlu0 %11470, %v15284_v31   ;;  %v6903_v31 = vadd.f32 %v15138_v35, %v14091_v2  ;;  %v6918_v2 = vadd.f32 %v15138_v35, %v14238_v29 }
 0x95d   :  { %v7471_v39 = vpack.c.bf16 %v7309_v52, %v7309_v52  ;;  %5506 = vrot.lane.b32.xlu2 %v5353_v34, %s11550_s18  ;;  %v5953_v32 = vpop.permute.xlu2 %5952 }
 0x95e   :  { %v7042_v27 = vadd.f32 %v14928_v1, %v6903_v31  ;;  %v6026_v44 = vmul.f32 %v5953_v32, %v15407_v36  ;;  %v7057_v11 = vadd.f32 %v15127_v13, %v6918_v2  ;;  %v10078_v36 = vld [vmem:[#allocation3 + $0x21c] sm:$0xf0]  ;;  %v15483_v52 = vpop.f32.mrf.mxu2  ;;  %v16447_v32 = vld [vmem:[#allocation12_spill] sm:$0xff] }
 0x95f   :  { %7472 = vst.msk [vmem:[#allocation4 + $0x48] sm:$0xf] %vm7326_vm7, %v7471_v39  ;;  %v16448_v2 = vld [vmem:[#allocation8_spill] sm:$0xff] }
 0x960   :  { %v4769_v33 = vpop.permute.xlu1 %4768  ;;  %v7181_v42 = vadd.f32 %v14930_v50, %v7042_v27  ;;  %v6078_v37 = vpack.c.bf16 %v6026_v44, %v6026_v44  ;;  %v6868_v50 = vadd.f32 %v15138_v35, %v13895_v53  ;;  %v7196_v29 = vadd.f32 %v15129_v47, %v7057_v11 }
 0x961   :  { %4880 = vst.msk [vmem:[#allocation3 + $0x214] sm:$0xf] %vm2494_vm5, %v4769_v33  ;;  %7339 = vrot.lane.b32.xlu1 %v7337_v0, %s11548_s22  ;;  %v6933_v0 = vadd.f32 %v15138_v35, %v16446_v30  ;;  %v5958_v33 = vpop.permute.xlu0 %5957 }
 0x962   :  { %v7288_v1 = vmax.f32 %v7181_v42, 0.0  ;;  %6130 = vst.msk [vmem:[#allocation3 + $0x230] sm:$0xf] %vm1036_vm3, %v6078_v37  ;;  %v7007_v40 = vadd.f32 %v14682_v28, %v6868_v50  ;;  %v6027_v28 = vmul.f32 %v5958_v33, %v15402_v16  ;;  %v7294_v58 = vmax.f32 %v7196_v29, 0.0  ;;  %v16450_v33 = vld [vmem:[#allocation17_spill] sm:$0xff] }
 0x963   :  { %v6960_v48 = vpop.f32.mrf.mxu1  ;;  %v7072_v31 = vadd.f32 %v15251_v3, %v6933_v0  ;;  %v15505_v3 = vld [vmem:[%s16359_s5] ss:$0 sm:$0xff] }
 0x964   :  { %v7385_v60 = vpack.c.bf16 %v7288_v1, %v7288_v1  ;;  %v7146_v47 = vadd.f32 %v14702_v6, %v7007_v40  ;;  %v6079_v46 = vpack.c.bf16 %v6027_v28, %v6027_v28  ;;  %v6961_v27 = vadd.f32 %v15138_v35, %v6960_v48 }
 0x965   :  { %4780 = vrot.lane.b32.xlu2 %v4626_v63, %s11548_s22  ;;  %v7409_v16 = vpack.c.bf16 %v7294_v58, %v7294_v58  ;;  %v7211_v44 = vadd.f32 %v15254_v22, %v7072_v31  ;;  %v6878_v37 = vadd.f32 %v15505_v3, %v16448_v2  ;;  %v6948_v11 = vadd.f32 %v15505_v3, %v15389_v10  ;;  %v16451_v2 = vld [vmem:[#allocation10_spill] sm:$0xff] }
 0x966   :  { %6131 = vst.msk [vmem:[#allocation3 + $0x23c] sm:$0xf] %vm1036_vm3, %v6079_v46  ;;  %v7274_v42 = vmax.f32 %v7146_v47, 0.0 }
 0x967   :  { %v7017_v22 = vadd.f32 %v14750_v56, %v6878_v37  ;;  %v7087_v30 = vadd.f32 %v15397_v45, %v6948_v11  ;;  %v6893_v56 = vadd.f32 %v15505_v3, %v16450_v33  ;;  %v16455_v33 = vld [vmem:[#allocation19_spill] sm:$0xff] }
 0x968   :  { %v5497_v62 = vpop.permute.xlu1 %5496  ;;  %v7328_v29 = vpack.c.bf16 %v7274_v42, %v7274_v42 }
 0x969   :  { %5608 = vst.msk [vmem:[#allocation3 + $0x214] sm:$0xf] %vm3223_vm6, %v5497_v62  ;;  %7363 = vrot.lane.b32.xlu1 %v7361_v8, %s11548_s22  ;;  %v6883_v8 = vadd.f32 %v15138_v35, %v16447_v32  ;;  %v15500_v62 = vld [vmem:[#allocation2 + $0x270] sm:$0xff]  ;;  %v7156_v0 = vadd.f32 %v14753_v61, %v7017_v22  ;;  %v7226_v61 = vadd.f32 %v15400_v7, %v7087_v30  ;;  %v11160_v32 = vld [vmem:[%s16360_s6 + $0x60] sm:$0xff] }
 0x96a   :  { %v7032_v31 = vadd.f32 %v14839_v59, %v6893_v56  ;;  %9323 = vmatpush.bf16.msrb.mxu3 %v11160_v32 }
 0x96b   :  { %v7022_v35 = vadd.f32 %v14773_v17, %v6883_v8  ;;  %v7238_v50 = vpop.f32.mrf.mxu3  ;;  %v16449_v17 = vld [vmem:[#allocation11_spill] sm:$0xff]  ;;  %v6962_v28 = vpop.f32.mrf.mxu1  ;;  %v7278_v58 = vmax.f32 %v7156_v0, 0.0  ;;  %v10096_v8 = vld [vmem:[#allocation3 + $0x230] sm:$0xf] }
 0x96c   :  { %v6963_v46 = vadd.f32 %v15505_v3, %v6962_v28  ;;  %v7171_v37 = vadd.f32 %v16451_v2, %v7032_v31  ;;  %v16456_v28 = vld [vmem:[#allocation20_spill] sm:$0xff] }
 0x970   :  { %v4522_v34 = vpop.permute.xlu1 %4521  ;;  %v11118_v39 = vld [vmem:[#allocation3 + $0x214] sm:$0xf] }
 0x971   :  { %v4575_v13 = vmul.f32 %v15433_v18, %v4522_v34  ;;  %7387 = vrot.lane.b32.xlu1 %v7385_v60, %s11548_s22  ;;  %v10081_v53 = vor.u32 %v11118_v39, %v10078_v36  ;;  %v7161_v34 = vadd.f32 %v14775_v43, %v7022_v35  ;;  %v7300_v39 = vmax.f32 %v7211_v44, 0.0  ;;  %v11152_v35 = vld [vmem:[%s16360_s6 + $0x20] sm:$0xff] }
 0x972   :  { %9310 = vmatpush.bf16.msrb.mxu0 %v11152_v35 }
 0x973   :  { %v4627_v63 = vpack.c.bf16 %v4575_v13, %v4575_v13  ;;  %7113 = vmatmul.bf16.gmra.mxu2 %v10081_v53  ;;  %v6898_v53 = vadd.f32 %v15505_v3, %v16449_v17  ;;  %v7280_v43 = vmax.f32 %v7161_v34, 0.0  ;;  %v7433_v45 = vpack.c.bf16 %v7300_v39, %v7300_v39  ;;  %v16454_v39 = vld [vmem:[#allocation5_spill] sm:$0xff] }
 0x974   :  { %v7284_v34 = vmax.f32 %v7171_v37, 0.0 }
 0x975   :  { %4782 = vrot.lane.b32.xlu0 %v4627_v63, %s11548_s22  ;;  %v7037_v47 = vadd.f32 %v14879_v14, %v6898_v53  ;;  %v11123_v14 = vld [vmem:[#allocation3 + $0x238] sm:$0xf0]  ;;  %v7353_v42 = vpack.c.bf16 %v7280_v43, %v7280_v43  ;;  %v11176_v43 = vld [vmem:[%s16360_s6 + $0xe0] sm:$0xff] }
 0x976   :  { %v10097_v7 = vor.u32 %v11123_v14, %v10096_v8  ;;  %v7369_v53 = vpack.c.bf16 %v7284_v34, %v7284_v34  ;;  %9349 = vmatpush.bf16.msrb.mxu2 %v11176_v43 }
 0x977   :  { %v7099_v6 = vpop.f32.mrf.mxu2  ;;  %v7176_v59 = vadd.f32 %v14881_v55, %v7037_v47  ;;  %v16457_v47 = vld [vmem:[#allocation13_spill] sm:$0xff] }
 0x978   :  { %v7100_v1 = vadd.f32 %v7099_v6, %v6961_v27  ;;  %v7345_v6 = vpack.c.bf16 %v7278_v58, %v7278_v58  ;;  %10217 = vmatmul.msk.bf16.gmra.mxu3 %vm487_vm2, %v10097_v7 }
 0x979   :  { %v5250_v36 = vpop.permute.xlu1 %5249  ;;  %7411 = vrot.lane.b32.xlu1 %v7409_v16, %s11548_s22  ;;  %v7306_v16 = vmax.f32 %v7226_v61, 0.0  ;;  %v7286_v22 = vmax.f32 %v7176_v59, 0.0 }
 0x97a   :  { %v7239_v40 = vadd.f32 %v7238_v50, %v7100_v1  ;;  %v5303_v60 = vmul.f32 %v5250_v36, %v15500_v62  ;;  %v16452_v1 = vld [vmem:[#allocation14_spill] sm:$0xff]  ;;  %v16453_v50 = vld [vmem:[#allocation16_spill] sm:$0xff]  ;;  %v7240_v36 = vpop.f32.mrf.mxu3 }
 0x97b   :  { %v6913_v11 = vadd.f32 %v15505_v3, %v16452_v1  ;;  %v6908_v55 = vadd.f32 %v15505_v3, %v16453_v50  ;;  %v6958_v1 = vadd.f32 %v15505_v3, %v15473_v51 }
 0x97c   :  { %v7311_v10 = vmax.f32 %v7239_v40, 0.0  ;;  %v5355_v13 = vpack.c.bf16 %v5303_v60, %v5303_v60  ;;  %v7457_v60 = vpack.c.bf16 %v7306_v16, %v7306_v16 }
 0x97d   :  { %7330 = vrot.lane.b32.xlu0 %v7328_v29, %s11548_s22  ;;  %v7052_v40 = vadd.f32 %v15024_v24, %v6913_v11  ;;  %v7047_v30 = vadd.f32 %v16454_v39, %v6908_v55  ;;  %v6928_v24 = vadd.f32 %v15505_v3, %v16456_v28  ;;  %v7097_v50 = vadd.f32 %v15483_v52, %v6958_v1  ;;  %v11186_v1 = vld [vmem:[%s16360_s6 + $0x130] sm:$0xff] }
 0x97e   :  { %v7479_v48 = vpack.c.bf16 %v7311_v10, %v7311_v10  ;;  %5510 = vrot.lane.b32.xlu2 %v5355_v13, %s11550_s18  ;;  %v7377_v10 = vpack.c.bf16 %v7286_v22, %v7286_v22 }
 0x97f   :  { %v7101_v63 = vpop.f32.mrf.mxu2  ;;  %v7191_v13 = vadd.f32 %v15031_v12, %v7052_v40  ;;  %v7186_v56 = vadd.f32 %v16455_v33, %v7047_v30  ;;  %v11168_v12 = vld [vmem:[%s16360_s6 + $0xa0] sm:$0xff]  ;;  %v7067_v58 = vadd.f32 %v15200_v9, %v6928_v24  ;;  %v6943_v9 = vadd.f32 %v15505_v3, %v15345_v21 }
 0x980   :  { %7480 = vst.msk [vmem:[#allocation4 + $0x4c] sm:$0xf] %vm7326_vm7, %v7479_v48  ;;  %v7102_v44 = vadd.f32 %v7101_v63, %v6963_v46  ;;  %9336 = vmatpush.bf16.msrb.mxu1 %v11168_v12 }
 0x981   :  { %v4773_v27 = vpop.permute.xlu1 %4772  ;;  %7435 = vrot.lane.b32.xlu1 %v7433_v45, %s11548_s22  ;;  %v6923_v45 = vadd.f32 %v15505_v3, %v16457_v47  ;;  %v7292_v61 = vmax.f32 %v7191_v13, 0.0  ;;  %v7290_v63 = vmax.f32 %v7186_v56, 0.0  ;;  %v7206_v14 = vadd.f32 %v15202_v57, %v7067_v58  ;;  %v11150_v47 = vld [vmem:[%s16360_s6 + $0x10] sm:$0xff] }
 0x982   :  { %4882 = vst.msk [vmem:[#allocation3 + $0x22c] sm:$0xf] %vm2494_vm5, %v4773_v27  ;;  %v7241_v29 = vadd.f32 %v7240_v36, %v7102_v44  ;;  %v7082_v57 = vadd.f32 %v15355_v4, %v6943_v9  ;;  %v6953_v4 = vadd.f32 %v15505_v3, %v15420_v25  ;;  %v5963_v36 = vpop.permute.xlu0 %5962  ;;  %v7236_v25 = vadd.f32 %v15487_v26, %v7097_v50  ;;  %v11148_v9 = vld [vmem:[%s16360_s6] sm:$0xff]  ;;  %v11185_v50 = vld [vmem:[%s16360_s6 + $0x128] sm:$0xff] }
 0x983   :  { %v7062_v46 = vadd.f32 %v15170_v41, %v6923_v45  ;;  %v7401_v8 = vpack.c.bf16 %v7292_v61, %v7292_v61  ;;  %v7393_v7 = vpack.c.bf16 %v7290_v63, %v7290_v63  ;;  %v6938_v41 = vadd.f32 %v15505_v3, %v15287_v19  ;;  %v11158_v45 = vld [vmem:[%s16360_s6 + $0x50] sm:$0xff]  ;;  %v11149_v63 = vld [vmem:[%s16360_s6 + $0x8] sm:$0xff] }
 0x984   :  { %v7312_v17 = vmax.f32 %v7241_v29, 0.0  ;;  %v7221_v21 = vadd.f32 %v15358_v49, %v7082_v57  ;;  %v7092_v55 = vadd.f32 %v15428_v15, %v6953_v4  ;;  %v6028_v51 = vmul.f32 %v5963_v36, %v15444_v20  ;;  %v11166_v57 = vld [vmem:[%s16360_s6 + $0x90] sm:$0xff]  ;;  %v11184_v36 = vld [vmem:[%s16360_s6 + $0x120] sm:$0xff] }
 0x985   :  { %7355 = vrot.lane.b32.xlu0 %v7353_v42, %s11548_s22  ;;  %v7201_v42 = vadd.f32 %v15172_v38, %v7062_v46  ;;  %v7077_v44 = vadd.f32 %v15298_v54, %v6938_v41  ;;  %v7310_v52 = vmax.f32 %v7236_v25, 0.0  ;;  %v11157_v46 = vld [vmem:[%s16360_s6 + $0x48] sm:$0xff]  ;;  %v11156_v41 = vld [vmem:[%s16360_s6 + $0x40] sm:$0xff]  ;;  %v11194_v4 = vld [vmem:[%s16360_s6 + $0x170] sm:$0xff] }
 0x986   :  { %7347 = vrot.lane.b32.xlu2 %v7345_v6, %s11548_s22  ;;  %v7481_v31 = vpack.c.bf16 %v7312_v17, %v7312_v17  ;;  %v7304_v54 = vmax.f32 %v7221_v21, 0.0  ;;  %v6080_v40 = vpack.c.bf16 %v6028_v51, %v6028_v51  ;;  %v7231_v29 = vadd.f32 %v15430_v23, %v7092_v55  ;;  %v5667_v23 = vld [vmem:[#allocation2 + $0x278] sm:$0xff]  ;;  %v11202_v25 = vld [vmem:[%s16360_s6 + $0x1b0] sm:$0xff] }
 0x987   :  { %v7296_v38 = vmax.f32 %v7201_v42, 0.0  ;;  %v7216_v37 = vadd.f32 %v15302_v5, %v7077_v44  ;;  %v7473_v39 = vpack.c.bf16 %v7310_v52, %v7310_v52  ;;  %v11151_v17 = vld [vmem:[%s16360_s6 + $0x18] sm:$0xff] }
 0x988   :  { %v7449_v22 = vpack.c.bf16 %v7304_v54, %v7304_v54  ;;  %6132 = vst.msk [vmem:[#allocation3 + $0x248] sm:$0xf] %vm1036_vm3, %v6080_v40  ;;  %v7308_v34 = vmax.f32 %v7231_v29, 0.0  ;;  %9311 = vmatpush.bf16.msrb.mxu0 %v11151_v17  ;;  %v11187_v44 = vld [vmem:[%s16360_s6 + $0x138] sm:$0xff]  ;;  %v11172_v54 = vld [vmem:[%s16360_s6 + $0xc0] sm:$0xff]  ;;  %v11210_v40 = vld [vmem:[%s16360_s6 + $0x1f0] sm:$0xff] }
 0x989   :  { %7459 = vrot.lane.b32.xlu1 %v7457_v60, %s11548_s22  ;;  %v5501_v0 = vpop.permute.xlu1 %5500  ;;  %v7417_v2 = vpack.c.bf16 %v7296_v38, %v7296_v38  ;;  %v7302_v5 = vmax.f32 %v7216_v37, 0.0  ;;  %v11174_v38 = vld [vmem:[%s16360_s6 + $0xd0] sm:$0xff]  ;;  %v11173_v37 = vld [vmem:[%s16360_s6 + $0xc8] sm:$0xff]  ;;  %v11211_v55 = vld [vmem:[%s16360_s6 + $0x1f8] sm:$0xff] }
 0x98a   :  { %5610 = vst.msk [vmem:[#allocation3 + $0x22c] sm:$0xf] %vm3223_vm6, %v5501_v0  ;;  %v7465_v30 = vpack.c.bf16 %v7308_v34, %v7308_v34  ;;  %v11183_v52 = vld [vmem:[%s16360_s6 + $0x118] sm:$0xff] }
 0x98b   :  { %v7441_v60 = vpack.c.bf16 %v7302_v5, %v7302_v5  ;;  %v11203_v5 = vld [vmem:[%s16360_s6 + $0x1b8] sm:$0xff] }
 0x98c   :  { %v7243_v28 = vpop.f32.mrf.mxu3  ;;  %9312 = vmatpush.bf16.msrb.mxu0 %v11150_v47  ;;  %v11199_v47 = vld [vmem:[%s16360_s6 + $0x198] sm:$0xff] }
 0x98d   :  { %v4775_v48 = vpop.permute.xlu2 %4774  ;;  %7379 = vrot.lane.b32.xlu0 %v7377_v10, %s11548_s22  ;;  %v6965_v10 = vpop.f32.mrf.mxu1 }
 0x98e   :  { %4883 = vst.msk [vmem:[#allocation3 + $0x238] sm:$0xf] %vm2494_vm5, %v4775_v48  ;;  %7371 = vrot.lane.b32.xlu2 %v7369_v53, %s11548_s22  ;;  %v11159_v53 = vld [vmem:[%s16360_s6 + $0x58] sm:$0xff]  ;;  %v6966_v33 = vadd.f32 %v15505_v3, %v6965_v10 }
 0x98f   :  { %v10108_v0 = vld [vmem:[#allocation3 + $0x248] sm:$0xf]  ;;  %9324 = vmatpush.bf16.msrb.mxu3 %v11159_v53  ;;  %v11200_v53 = vld [vmem:[%s16360_s6 + $0x1a0] sm:$0xff] }
 0x990   :  { %9313 = vmatpush.bf16.msrb.mxu0 %v11149_v63 }
 0x991   :  { %7483 = vrot.lane.b32.xlu1 %v7481_v31, %s11548_s22  ;;  %v5968_v27 = vpop.permute.xlu1 %5967  ;;  %v11121_v19 = vld [vmem:[#allocation3 + $0x22c] sm:$0xf] }
 0x992   :  { %v6029_v32 = vmul.f32 %v5968_v27, %v15433_v18  ;;  %v7298_v18 = vmax.f32 %v7206_v14, 0.0  ;;  %v11167_v27 = vld [vmem:[%s16360_s6 + $0x98] sm:$0xff] }
 0x993   :  { %9325 = vmatpush.bf16.msrb.mxu3 %v11158_v45  ;;  %v11175_v14 = vld [vmem:[%s16360_s6 + $0xd8] sm:$0xff]  ;;  %9337 = vmatpush.bf16.msrb.mxu1 %v11167_v27 }
 0x994   :  { %v6081_v59 = vpack.c.bf16 %v6029_v32, %v6029_v32  ;;  %v7425_v6 = vpack.c.bf16 %v7298_v18, %v7298_v18  ;;  %9350 = vmatpush.bf16.msrb.mxu2 %v11175_v14  ;;  %9314 = vmatpush.bf16.msrb.mxu0 %v11148_v9  ;;  %v11188_v14 = vld [vmem:[%s16360_s6 + $0x140] sm:$0xff]  ;;  %v11206_v9 = vld [vmem:[%s16360_s6 + $0x1d0] sm:$0xff] }
 0x995   :  { %7403 = vrot.lane.b32.xlu0 %v7401_v8, %s11548_s22  ;;  %v6967_v58 = vpop.f32.mrf.mxu1 }
 0x996   :  { %v5503_v16 = vpop.permute.xlu2 %5502  ;;  %7395 = vrot.lane.b32.xlu2 %v7393_v7, %s11548_s22  ;;  %6133 = vst.msk [vmem:[#allocation3 + $0x254] sm:$0xf] %vm1036_vm3, %v6081_v59  ;;  %v6968_v32 = vadd.f32 %v15505_v3, %v6967_v58  ;;  %v7245_v59 = vpop.f32.mrf.mxu3  ;;  %v11207_v58 = vld [vmem:[%s16360_s6 + $0x1d8] sm:$0xff] }
 0x997   :  { %5611 = vst.msk [vmem:[#allocation3 + $0x238] sm:$0xf] %vm3223_vm6, %v5503_v16  ;;  %9326 = vmatpush.bf16.msrb.mxu3 %v11157_v46  ;;  %9338 = vmatpush.bf16.msrb.mxu1 %v11166_v57  ;;  %v11197_v57 = vld [vmem:[%s16360_s6 + $0x188] sm:$0xff] }
 0x998   :  { %9351 = vmatpush.bf16.msrb.mxu2 %v11174_v38  ;;  %9359 = vmatpush.bf16.msra.mxu0 %v11187_v44 }
 0x99b   :  { %9327 = vmatpush.bf16.msrb.mxu3 %v11156_v41 }
 0x99c   :  { %9352 = vmatpush.bf16.msrb.mxu2 %v11173_v37  ;;  %9360 = vmatpush.bf16.msra.mxu0 %v11186_v1  ;;  %v11196_v37 = vld [vmem:[%s16360_s6 + $0x180] sm:$0xff] }
 0x99d   :  { %7427 = vrot.lane.b32.xlu0 %v7425_v6, %s11548_s22  ;;  %v11126_v20 = vld [vmem:[#allocation3 + $0x250] sm:$0xf0]  ;;  %v11195_v6 = vld [vmem:[%s16360_s6 + $0x178] sm:$0xff]  ;;  %v6970_v34 = vpop.f32.mrf.mxu1  ;;  %v11204_v1 = vld [vmem:[%s16360_s6 + $0x1c0] sm:$0xff] }
 0x99e   :  { %7419 = vrot.lane.b32.xlu2 %v7417_v2, %s11548_s22  ;;  %v10090_v11 = vld [vmem:[#allocation3 + $0x234] sm:$0xf0]  ;;  %v4777_v35 = vpop.permute.xlu2 %4776  ;;  %v10109_v26 = vor.u32 %v11126_v20, %v10108_v0  ;;  %v11165_v2 = vld [vmem:[%s16360_s6 + $0x88] sm:$0xff]  ;;  %v6971_v17 = vadd.f32 %v15505_v3, %v6970_v34 }
 0x99f   :  { %v10093_v49 = vor.u32 %v11121_v19, %v10090_v11  ;;  %4884 = vst.msk [vmem:[#allocation3 + $0x244] sm:$0xf] %vm2494_vm5, %v4777_v35  ;;  %9372 = vmatpush.bf16.msra.mxu3 %v11195_v6  ;;  %9339 = vmatpush.bf16.msrb.mxu1 %v11165_v2  ;;  %v11164_v11 = vld [vmem:[%s16360_s6 + $0x80] sm:$0xff]  ;;  %v11191_v20 = vld [vmem:[%s16360_s6 + $0x158] sm:$0xff]  ;;  %v11205_v6 = vld [vmem:[%s16360_s6 + $0x1c8] sm:$0xff] }
 0x9a0   :  { %10218 = vmatmul.msk.bf16.gmra.mxu3 %vm487_vm2, %v10109_v26  ;;  %9353 = vmatpush.bf16.msrb.mxu2 %v11172_v54  ;;  %v11209_v26 = vld [vmem:[%s16360_s6 + $0x1e8] sm:$0xff] }
 0x9a1   :  { %7118 = vmatmul.bf16.gmra.mxu2 %v10093_v49  ;;  %v11193_v49 = vld [vmem:[%s16360_s6 + $0x168] sm:$0xff]  ;;  %9361 = vmatpush.bf16.msra.mxu0 %v11185_v50 }
 0x9a3   :  { %9373 = vmatpush.bf16.msra.mxu3 %v11194_v4  ;;  %9340 = vmatpush.bf16.msrb.mxu1 %v11164_v11 }
 0x9a4   :  { %9398 = vmatpush.bf16.msra.mxu2 %v11211_v55 }
 0x9a5   :  { %7451 = vrot.lane.b32.xlu0 %v7449_v22, %s11548_s22  ;;  %v11192_v22 = vld [vmem:[%s16360_s6 + $0x160] sm:$0xff]  ;;  %9362 = vmatpush.bf16.msra.mxu0 %v11184_v36 }
 0x9a6   :  { %7443 = vrot.lane.b32.xlu2 %v7441_v60, %s11548_s22 }
 0x9a7   :  { %9374 = vmatpush.bf16.msra.mxu3 %v11193_v49  ;;  %9385 = vmatpush.bf16.msra.mxu1 %v11203_v5 }
 0x9a8   :  { %9399 = vmatpush.bf16.msra.mxu2 %v11210_v40 }
 0x9a9   :  { %9363 = vmatpush.bf16.msra.mxu0 %v11183_v52 }
 0x9aa   :  { %v5505_v15 = vpop.permute.xlu1 %5504 }
 0x9ab   :  { %5612 = vst.msk [vmem:[#allocation3 + $0x244] sm:$0xf] %vm3223_vm6, %v5505_v15  ;;  %9375 = vmatpush.bf16.msra.mxu3 %v11192_v22  ;;  %9386 = vmatpush.bf16.msra.mxu1 %v11202_v25 }
 0x9ac   :  { %9400 = vmatpush.bf16.msra.mxu2 %v11209_v26 }
 0x9ad   :  { %7475 = vrot.lane.b32.xlu0 %v7473_v39, %s11548_s22 }
 0x9ae   :  { %7467 = vrot.lane.b32.xlu2 %v7465_v30, %s11548_s22  ;;  %v11201_v30 = vld [vmem:[%s16360_s6 + $0x1a8] sm:$0xff] }
 0x9af   :  { %9376 = vmatpush.bf16.msra.mxu3 %v11191_v20  ;;  %9387 = vmatpush.bf16.msra.mxu1 %v11201_v30  ;;  %v11219_v30 = vld [vmem:[%s16360_s6 + $0x238] sm:$0xff] }
 0x9b2   :  { %v5978_v13 = vpop.permute.xlu1 %5977  ;;  %v11124_v60 = vld [vmem:[#allocation3 + $0x244] sm:$0xf] }
 0x9b3   :  { %v6031_v56 = vmul.f32 %v5978_v13, %v5667_v23  ;;  %v11182_v23 = vld [vmem:[%s16360_s6 + $0x110] sm:$0xff]  ;;  %9388 = vmatpush.bf16.msra.mxu1 %v11200_v53 }
 0x9b4   :  { %v7104_v24 = vpop.f32.mrf.mxu2  ;;  %v11190_v13 = vld [vmem:[%s16360_s6 + $0x150] sm:$0xff]  ;;  %9364 = vmatpush.bf16.msra.mxu0 %v11182_v23 }
 0x9b5   :  { %v7105_v48 = vadd.f32 %v7104_v24, %v6966_v33  ;;  %v6083_v43 = vpack.c.bf16 %v6031_v56, %v6031_v56  ;;  %v11208_v33 = vld [vmem:[%s16360_s6 + $0x1e0] sm:$0xff]  ;;  %v7248_v56 = vpop.f32.mrf.mxu3  ;;  %9377 = vmatpush.bf16.msra.mxu3 %v11190_v13 }
 0x9b6   :  { %9401 = vmatpush.bf16.msra.mxu2 %v11208_v33  ;;  %v11218_v33 = vld [vmem:[%s16360_s6 + $0x230] sm:$0xff] }
 0x9b7   :  { %v7244_v12 = vadd.f32 %v7243_v28, %v7105_v48  ;;  %v5507_v61 = vpop.permute.xlu2 %5506  ;;  %6135 = vst.msk [vmem:[#allocation3 + $0x26c] sm:$0xf] %vm1036_vm3, %v6083_v43  ;;  %v11181_v48 = vld [vmem:[%s16360_s6 + $0x108] sm:$0xff]  ;;  %9389 = vmatpush.bf16.msra.mxu1 %v11199_v47 }
 0x9b8   :  { %v11189_v43 = vld [vmem:[%s16360_s6 + $0x148] sm:$0xff]  ;;  %9365 = vmatpush.bf16.msra.mxu0 %v11181_v48 }
 0x9b9   :  { %v7313_v31 = vmax.f32 %v7244_v12, 0.0  ;;  %9378 = vmatpush.bf16.msra.mxu3 %v11189_v43 }
 0x9ba   :  { %9402 = vmatpush.bf16.msra.mxu2 %v11207_v58 }
 0x9bb   :  { %v7487_v8 = vpack.c.bf16 %v7313_v31, %v7313_v31  ;;  %v6972_v31 = vpop.f32.mrf.mxu1 }
 0x9bc   :  { %v7106_v7 = vpop.f32.mrf.mxu2 }
 0x9bd   :  { %7488 = vst.msk [vmem:[#allocation4 + $0x50] sm:$0xf] %vm7326_vm7, %v7487_v8  ;;  %v7107_v42 = vadd.f32 %v7106_v7, %v6968_v32  ;;  %v11180_v8 = vld [vmem:[%s16360_s6 + $0x100] sm:$0xff]  ;;  %v11198_v7 = vld [vmem:[%s16360_s6 + $0x190] sm:$0xff]  ;;  %9379 = vmatpush.bf16.msra.mxu3 %v11188_v14 }
 0x9be   :  { %9366 = vmatpush.bf16.msra.mxu0 %v11180_v8  ;;  %9390 = vmatpush.bf16.msra.mxu1 %v11198_v7  ;;  %v11243_v8 = vld [vmem:[%s16360_s6 + $0x2f8] sm:$0xff] }
 0x9bf   :  { %v7246_v16 = vadd.f32 %v7245_v59, %v7107_v42  ;;  %v4781_v18 = vpop.permute.xlu2 %4780  ;;  %v6973_v42 = vadd.f32 %v15505_v3, %v6972_v31  ;;  %9403 = vmatpush.bf16.msra.mxu2 %v11206_v9  ;;  %v11217_v31 = vld [vmem:[%s16360_s6 + $0x228] sm:$0xff]  ;;  %v11216_v9 = vld [vmem:[%s16360_s6 + $0x220] sm:$0xff] }
 0x9c0   :  { %4886 = vst.msk [vmem:[#allocation3 + $0x25c] sm:$0xf] %vm2494_vm5, %v4781_v18  ;;  %v7250_v18 = vpop.f32.mrf.mxu3 }
 0x9c1   :  { %v7314_v21 = vmax.f32 %v7246_v16, 0.0 }
 0x9c2   :  { %9391 = vmatpush.bf16.msra.mxu1 %v11197_v57 }
 0x9c3   :  { %v7489_v19 = vpack.c.bf16 %v7314_v21, %v7314_v21  ;;  %9404 = vmatpush.bf16.msra.mxu2 %v11205_v6  ;;  %v6975_v49 = vpop.f32.mrf.mxu1 }
 0x9c4   :  { %v6976_v22 = vadd.f32 %v15505_v3, %v6975_v49  ;;  %v11240_v49 = vld [vmem:[%s16360_s6 + $0x2e0] sm:$0xff] }
 0x9c5   :  { %7491 = vrot.lane.b32.xlu2 %v7489_v19, %s11548_s22 }
 0x9c6   :  { %v4779_v35 = vpop.permute.xlu0 %4778  ;;  %9392 = vmatpush.bf16.msra.mxu1 %v11196_v37 }
 0x9c7   :  { %4885 = vst.msk [vmem:[#allocation3 + $0x250] sm:$0xf] %vm2494_vm5, %v4779_v35  ;;  %9405 = vmatpush.bf16.msra.mxu2 %v11204_v1  ;;  %v11233_v1 = vld [vmem:[%s16360_s6 + $0x2a8] sm:$0xff] }
 0x9c8   :  { %5613 = vst.msk [vmem:[#allocation3 + $0x250] sm:$0xf] %vm3223_vm6, %v5507_v61  ;;  %v11129_v61 = vld [vmem:[#allocation3 + $0x268] sm:$0xf0] }
 0x9cb   :  { %v5509_v51 = vpop.permute.xlu1 %5508  ;;  %v6977_v26 = vpop.f32.mrf.mxu1 }
 0x9cc   :  { %5614 = vst.msk [vmem:[#allocation3 + $0x25c] sm:$0xf] %vm3223_vm6, %v5509_v51 }
 0x9ce   :  { %v5973_v29 = vpop.permute.xlu0 %5972  ;;  %v7253_v25 = vpop.f32.mrf.mxu3 }
 0x9cf   :  { %v6030_v15 = vmul.f32 %v5973_v29, %v15500_v62  ;;  %v10102_v39 = vld [vmem:[#allocation3 + $0x24c] sm:$0xf0] }
 0x9d0   :  { %v10105_v0 = vor.u32 %v11124_v60, %v10102_v39 }
 0x9d1   :  { %v6082_v10 = vpack.c.bf16 %v6030_v15, %v6030_v15 }
 0x9d2   :  { %7123 = vmatmul.bf16.gmra.mxu2 %v10105_v0  ;;  %v11227_v0 = vld [vmem:[%s16360_s6 + $0x278] sm:$0xff] }
 0x9d3   :  { %6134 = vst.msk [vmem:[#allocation3 + $0x260] sm:$0xf] %vm1036_vm3, %v6082_v10  ;;  %v7340_v62 = vpop.permute.xlu1 %7339  ;;  %v11127_v54 = vld [vmem:[#allocation3 + $0x25c] sm:$0xf] }
 0x9d4   :  { %7342 = vst.msk [vmem:[#allocation4 + $0x4] sm:$0xf] %vm7333_vm8, %v7340_v62 }
 0x9d5   :  { %v7109_v28 = vpop.f32.mrf.mxu2 }
 0x9d6   :  { %v7110_v24 = vadd.f32 %v7109_v28, %v6971_v17  ;;  %v6978_v17 = vadd.f32 %v15505_v3, %v6977_v26  ;;  %v7255_v47 = vpop.f32.mrf.mxu3 }
 0x9d8   :  { %v7249_v45 = vadd.f32 %v7248_v56, %v7110_v24  ;;  %v5511_v12 = vpop.permute.xlu2 %5510  ;;  %v11226_v56 = vld [vmem:[%s16360_s6 + $0x270] sm:$0xff] }
 0x9da   :  { %v7315_v63 = vmax.f32 %v7249_v45, 0.0  ;;  %v10120_v46 = vld [vmem:[#allocation3 + $0x260] sm:$0xf] }
 0x9db   :  { %v7364_v27 = vpop.permute.xlu1 %7363  ;;  %v10121_v32 = vor.u32 %v11129_v61, %v10120_v46 }
 0x9dc   :  { %v7495_v59 = vpack.c.bf16 %v7315_v63, %v7315_v63  ;;  %7366 = vst.msk [vmem:[#allocation4 + $0x10] sm:$0xf] %vm7333_vm8, %v7364_v27  ;;  %v11225_v63 = vld [vmem:[%s16360_s6 + $0x268] sm:$0xff] }
 0x9dd   :  { %v7111_v41 = vpop.f32.mrf.mxu2  ;;  %10219 = vmatmul.msk.bf16.gmra.mxu3 %vm487_vm2, %v10121_v32  ;;  %v11235_v32 = vld [vmem:[%s16360_s6 + $0x2b8] sm:$0xff] }
 0x9de   :  { %7496 = vst.msk [vmem:[#allocation4 + $0x54] sm:$0xf] %vm7326_vm7, %v7495_v59  ;;  %v7112_v16 = vadd.f32 %v7111_v41, %v6973_v42  ;;  %v11224_v41 = vld [vmem:[%s16360_s6 + $0x260] sm:$0xff] }
 0x9e0   :  { %v7251_v38 = vadd.f32 %v7250_v18, %v7112_v16  ;;  %v7348_v44 = vpop.permute.xlu2 %7347  ;;  %v11234_v16 = vld [vmem:[%s16360_s6 + $0x2b0] sm:$0xff] }
 0x9e1   :  { %7350 = vst.msk [vmem:[#allocation4 + $0x8] sm:$0xf] %vm7333_vm8, %v7348_v44  ;;  %v11242_v18 = vld [vmem:[%s16360_s6 + $0x2f0] sm:$0xff] }
 0x9e2   :  { %v7316_v21 = vmax.f32 %v7251_v38, 0.0 }
 0x9e3   :  { %v7388_v2 = vpop.permute.xlu1 %7387 }
 0x9e4   :  { %v7497_v19 = vpack.c.bf16 %v7316_v21, %v7316_v21  ;;  %7390 = vst.msk [vmem:[#allocation4 + $0x1c] sm:$0xf] %vm7333_vm8, %v7388_v2  ;;  %v11215_v21 = vld [vmem:[%s16360_s6 + $0x218] sm:$0xff] }
 0x9e5   :  { %v11223_v2 = vld [vmem:[%s16360_s6 + $0x258] sm:$0xff] }
 0x9e6   :  { %7499 = vrot.lane.b32.xlu0 %v7497_v19, %s11548_s22 }
 0x9e7   :  { %v4783_v4 = vpop.permute.xlu0 %4782 }
 0x9e8   :  { %4887 = vst.msk [vmem:[#allocation3 + $0x268] sm:$0xf] %vm2494_vm5, %v4783_v4  ;;  %v7372_v11 = vpop.permute.xlu2 %7371  ;;  %v11241_v4 = vld [vmem:[%s16360_s6 + $0x2e8] sm:$0xff] }
 0x9e9   :  { %5615 = vst.msk [vmem:[#allocation3 + $0x268] sm:$0xf] %vm3223_vm6, %v5511_v12 }
 0x9ea   :  { %7374 = vst.msk [vmem:[#allocation4 + $0x14] sm:$0xf] %vm7333_vm8, %v7372_v11 }
 0x9eb   :  { %v7412_v35 = vpop.permute.xlu1 %7411 }
 0x9ec   :  { %7414 = vst.msk [vmem:[#allocation4 + $0x28] sm:$0xf] %vm7333_vm8, %v7412_v35  ;;  %v11214_v35 = vld [vmem:[%s16360_s6 + $0x210] sm:$0xff] }
 0x9ef   :  { %v7331_v50 = vpop.permute.xlu0 %7330 }
 0x9f0   :  { %7334 = vst.msk [vmem:[#allocation4] sm:$0xf] %vm7333_vm8, %v7331_v50  ;;  %v7396_v5 = vpop.permute.xlu2 %7395  ;;  %v10114_v55 = vld [vmem:[#allocation3 + $0x264] sm:$0xf0]  ;;  %v11232_v50 = vld [vmem:[%s16360_s6 + $0x2a0] sm:$0xff] }
 0x9f1   :  { %7398 = vst.msk [vmem:[#allocation4 + $0x20] sm:$0xf] %vm7333_vm8, %v7396_v5  ;;  %v10117_v36 = vor.u32 %v11127_v54, %v10114_v55  ;;  %v7537_v42 = vld [vmem:[#allocation4 + $0x10] sm:$0xff]  ;;  %v11222_v54 = vld [vmem:[%s16360_s6 + $0x250] sm:$0xff] }
 0x9f2   :  { %v7985_v57 = vunpack.c.l.b16 %v7537_v42  ;;  %v7986_v38 = vunpack.c.h.b16 %v7537_v42  ;;  %v11256_v42 = vld [vmem:[%s16360_s6 + $0x360] sm:$0xff] }
 0x9f3   :  { %7128 = vmatmul.bf16.gmra.mxu2 %v10117_v36  ;;  %v7436_v51 = vpop.permute.xlu1 %7435 }
 0x9f4   :  { %7438 = vst.msk [vmem:[#allocation4 + $0x34] sm:$0xf] %vm7333_vm8, %v7436_v51  ;;  %v8011_v37 = vpack.c.b16 %v7985_v57, %v7985_v57  ;;  %v8012_v19 = vpack.c.b16 %v7986_v38, %v7986_v38  ;;  %v11213_v51 = vld [vmem:[%s16360_s6 + $0x208] sm:$0xff]  ;;  %v11255_v57 = vld [vmem:[%s16360_s6 + $0x358] sm:$0xff] }
 0x9f6   :  { %v7114_v40 = vpop.f32.mrf.mxu2 }
 0x9f7   :  { %v7115_v60 = vadd.f32 %v7114_v40, %v6976_v22  ;;  %v7356_v29 = vpop.permute.xlu0 %7355  ;;  %v7535_v52 = vld [vmem:[#allocation4] sm:$0xff]  ;;  %v11221_v22 = vld [vmem:[%s16360_s6 + $0x248] sm:$0xff] }
 0x9f8   :  { %7358 = vst.msk [vmem:[#allocation4 + $0xc] sm:$0xf] %vm7333_vm8, %v7356_v29  ;;  %v7420_v34 = vpop.permute.xlu2 %7419  ;;  %v7981_v15 = vunpack.c.l.b16 %v7535_v52  ;;  %v7982_v39 = vunpack.c.h.b16 %v7535_v52  ;;  %v11239_v29 = vld [vmem:[%s16360_s6 + $0x2d8] sm:$0xff] }
 0x9f9   :  { %v7254_v20 = vadd.f32 %v7253_v25, %v7115_v60  ;;  %7422 = vst.msk [vmem:[#allocation4 + $0x2c] sm:$0xf] %vm7333_vm8, %v7420_v34  ;;  %v11231_v60 = vld [vmem:[%s16360_s6 + $0x298] sm:$0xff]  ;;  %v11212_v34 = vld [vmem:[%s16360_s6 + $0x200] sm:$0xff] }
 0x9fa   :  { %v8007_v10 = vpack.c.b16 %v7981_v15, %v7981_v15  ;;  %v8008_v62 = vpack.c.b16 %v7982_v39, %v7982_v39  ;;  %v11220_v15 = vld [vmem:[%s16360_s6 + $0x240] sm:$0xff]  ;;  %v11230_v39 = vld [vmem:[%s16360_s6 + $0x290] sm:$0xff] }
 0x9fb   :  { %v7317_v23 = vmax.f32 %v7254_v20, 0.0  ;;  %v7460_v13 = vpop.permute.xlu1 %7459  ;;  %v11238_v20 = vld [vmem:[%s16360_s6 + $0x2d0] sm:$0xff] }
 0x9fc   :  { %7462 = vst.msk [vmem:[#allocation4 + $0x40] sm:$0xf] %vm7333_vm8, %v7460_v13  ;;  %9315 = vmatmul.bf16.vlgmr.msrb.gmra.mxu0 %v8007_v10  ;;  %9328 = vmatmul.bf16.vlgmr.msrb.gmra.mxu3 %v8008_v62  ;;  %v11251_v10 = vld [vmem:[%s16360_s6 + $0x338] sm:$0xff] }
 0x9fd   :  { %v7503_v53 = vpack.c.bf16 %v7317_v23, %v7317_v23  ;;  %9411 = vmatpush.bf16.msrb.mxu0 %v11219_v30  ;;  %9424 = vmatpush.bf16.msrb.mxu3 %v11227_v0  ;;  %v11259_v62 = vld [vmem:[%s16360_s6 + $0x378] sm:$0xff] }
 0x9fe   :  { %v7116_v28 = vpop.f32.mrf.mxu2 }
 0x9ff   :  { %7504 = vst.msk [vmem:[#allocation4 + $0x58] sm:$0xf] %vm7326_vm7, %v7503_v53  ;;  %v7117_v24 = vadd.f32 %v7116_v28, %v6978_v17  ;;  %v7380_v48 = vpop.permute.xlu0 %7379  ;;  %v7536_v43 = vld [vmem:[#allocation4 + $0x8] sm:$0xff]  ;;  %v11229_v17 = vld [vmem:[%s16360_s6 + $0x288] sm:$0xff] }
 0xa00   :  { %7382 = vst.msk [vmem:[#allocation4 + $0x18] sm:$0xf] %vm7333_vm8, %v7380_v48  ;;  %v7444_v45 = vpop.permute.xlu2 %7443  ;;  %v7983_v12 = vunpack.c.l.b16 %v7536_v43  ;;  %v7984_v61 = vunpack.c.h.b16 %v7536_v43  ;;  %v11237_v53 = vld [vmem:[%s16360_s6 + $0x2c8] sm:$0xff]  ;;  %v7540_v28 = vld [vmem:[#allocation4 + $0x28] sm:$0xff]  ;;  %v11228_v48 = vld [vmem:[%s16360_s6 + $0x280] sm:$0xff] }
 0xa01   :  { %v7256_v58 = vadd.f32 %v7255_v47, %v7117_v24  ;;  %9412 = vmatpush.bf16.msrb.mxu0 %v11218_v33  ;;  %9425 = vmatpush.bf16.msrb.mxu3 %v11226_v56  ;;  %7446 = vst.msk [vmem:[#allocation4 + $0x38] sm:$0xf] %vm7333_vm8, %v7444_v45  ;;  %v11250_v33 = vld [vmem:[%s16360_s6 + $0x330] sm:$0xff]  ;;  %v6980_v24 = vpop.f32.mrf.mxu1  ;;  %v11236_v43 = vld [vmem:[%s16360_s6 + $0x2c0] sm:$0xff] }
 0xa02   :  { %v8009_v46 = vpack.c.b16 %v7983_v12, %v7983_v12  ;;  %v8010_v27 = vpack.c.b16 %v7984_v61, %v7984_v61  ;;  %v11258_v56 = vld [vmem:[%s16360_s6 + $0x370] sm:$0xff]  ;;  %v11249_v12 = vld [vmem:[%s16360_s6 + $0x328] sm:$0xff] }
 0xa03   :  { %v7318_v14 = vmax.f32 %v7256_v58, 0.0  ;;  %v7484_v7 = vpop.permute.xlu1 %7483  ;;  %v11257_v61 = vld [vmem:[%s16360_s6 + $0x368] sm:$0xff]  ;;  %v7991_v58 = vunpack.c.l.b16 %v7540_v28 }
 0xa04   :  { %7486 = vst.msk [vmem:[#allocation4 + $0x4c] sm:$0xf] %vm7333_vm8, %v7484_v7  ;;  %9341 = vmatmul.bf16.vlgmr.msrb.gmra.mxu1 %v8009_v46  ;;  %9354 = vmatmul.bf16.vlgmr.msrb.gmra.mxu2 %v8010_v27  ;;  %v11275_v46 = vld [vmem:[%s16360_s6 + $0x3f8] sm:$0xff]  ;;  %v7258_v27 = vpop.f32.mrf.mxu3  ;;  %v11248_v7 = vld [vmem:[%s16360_s6 + $0x320] sm:$0xff] }
 0xa05   :  { %v7505_v59 = vpack.c.bf16 %v7318_v14, %v7318_v14  ;;  %9413 = vmatpush.bf16.msrb.mxu0 %v11217_v31  ;;  %9426 = vmatpush.bf16.msrb.mxu3 %v11225_v63  ;;  %v7992_v31 = vunpack.c.h.b16 %v7540_v28  ;;  %v11267_v63 = vld [vmem:[%s16360_s6 + $0x3b8] sm:$0xff]  ;;  %v11281_v28 = vld [vmem:[%s16360_s6 + $0x428] sm:$0xff] }
 0xa06   :  { %9437 = vmatpush.bf16.msrb.mxu1 %v11235_v32  ;;  %9450 = vmatpush.bf16.msrb.mxu2 %v11243_v8  ;;  %v6981_v32 = vadd.f32 %v15505_v3, %v6980_v24  ;;  %v8017_v8 = vpack.c.b16 %v7991_v58, %v7991_v58  ;;  %v11274_v3 = vld [vmem:[%s16360_s6 + $0x3f0] sm:$0xff]  ;;  %v11289_v24 = vld [vmem:[%s16360_s6 + $0x468] sm:$0xff]  ;;  %v11280_v58 = vld [vmem:[%s16360_s6 + $0x420] sm:$0xff] }
 0xa07   :  { %v7404_v44 = vpop.permute.xlu0 %7403  ;;  %7507 = vrot.lane.b32.xlu1 %v7505_v59, %s11548_s22  ;;  %v7538_v11 = vld [vmem:[#allocation4 + $0x18] sm:$0xff]  ;;  %v8018_v14 = vpack.c.b16 %v7992_v31, %v7992_v31  ;;  %v11288_v31 = vld [vmem:[%s16360_s6 + $0x460] sm:$0xff] }
 0xa08   :  { %7406 = vst.msk [vmem:[#allocation4 + $0x24] sm:$0xf] %vm7333_vm8, %v7404_v44  ;;  %v7468_v6 = vpop.permute.xlu2 %7467  ;;  %v7987_v5 = vunpack.c.l.b16 %v7538_v11  ;;  %v7988_v55 = vunpack.c.h.b16 %v7538_v11  ;;  %v11265_v44 = vld [vmem:[%s16360_s6 + $0x3a8] sm:$0xff] }
 0xa09   :  { %9414 = vmatpush.bf16.msrb.mxu0 %v11216_v9  ;;  %9427 = vmatpush.bf16.msrb.mxu3 %v11224_v41  ;;  %7470 = vst.msk [vmem:[#allocation4 + $0x44] sm:$0xf] %vm7333_vm8, %v7468_v6  ;;  %v11266_v9 = vld [vmem:[%s16360_s6 + $0x3b0] sm:$0xff]  ;;  %v6982_v38 = vpop.f32.mrf.mxu1  ;;  %v11273_v6 = vld [vmem:[%s16360_s6 + $0x3e8] sm:$0xff] }
 0xa0a   :  { %9438 = vmatpush.bf16.msrb.mxu1 %v11234_v16  ;;  %9451 = vmatpush.bf16.msrb.mxu2 %v11242_v18  ;;  %v8013_v25 = vpack.c.b16 %v7987_v5, %v7987_v5  ;;  %v8014_v40 = vpack.c.b16 %v7988_v55, %v7988_v55  ;;  %v11247_v18 = vld [vmem:[%s16360_s6 + $0x318] sm:$0xff]  ;;  %v11245_v55 = vld [vmem:[%s16360_s6 + $0x308] sm:$0xff] }
 0xa0c   :  { %9367 = vmatmul.bf16.vlgmr.msra.gmra.mxu0 %v8011_v37  ;;  %9380 = vmatmul.bf16.vlgmr.msra.gmra.mxu3 %v8012_v19 }
 0xa0d   :  { %9415 = vmatpush.bf16.msrb.mxu0 %v11215_v21  ;;  %9428 = vmatpush.bf16.msrb.mxu3 %v11223_v2  ;;  %v15937_v2 = vld [vmem:[%s16359_s5] ss:$0 sm:$0xff] }
 0xa0e   :  { %9439 = vmatpush.bf16.msrb.mxu1 %v11233_v1  ;;  %9452 = vmatpush.bf16.msrb.mxu2 %v11241_v4  ;;  %v6983_v37 = vadd.f32 %v15937_v2, %v6982_v38  ;;  %v11246_v1 = vld [vmem:[%s16360_s6 + $0x310] sm:$0xff] }
 0xa0f   :  { %v7428_v36 = vpop.permute.xlu0 %7427  ;;  %v7539_v52 = vld [vmem:[#allocation4 + $0x20] sm:$0xff] }
 0xa10   :  { %7430 = vst.msk [vmem:[#allocation4 + $0x30] sm:$0xf] %vm7333_vm8, %v7428_v36  ;;  %v7989_v30 = vunpack.c.l.b16 %v7539_v52  ;;  %v7990_v0 = vunpack.c.h.b16 %v7539_v52  ;;  %v11254_v4 = vld [vmem:[%s16360_s6 + $0x350] sm:$0xff]  ;;  %v11253_v36 = vld [vmem:[%s16360_s6 + $0x348] sm:$0xff]  ;;  %v11252_v52 = vld [vmem:[%s16360_s6 + $0x340] sm:$0xff] }
 0xa11   :  { %9416 = vmatpush.bf16.msrb.mxu0 %v11214_v35  ;;  %9429 = vmatpush.bf16.msrb.mxu3 %v11222_v54  ;;  %v11264_v35 = vld [vmem:[%s16360_s6 + $0x3a0] sm:$0xff]  ;;  %v7543_v38 = vld [vmem:[#allocation4 + $0x40] sm:$0xff] }
 0xa12   :  { %9440 = vmatpush.bf16.msrb.mxu1 %v11232_v50  ;;  %9453 = vmatpush.bf16.msrb.mxu2 %v11240_v49  ;;  %v8015_v23 = vpack.c.b16 %v7989_v30, %v7989_v30  ;;  %v8016_v13 = vpack.c.b16 %v7990_v0, %v7990_v0  ;;  %v11272_v54 = vld [vmem:[%s16360_s6 + $0x3e0] sm:$0xff]  ;;  %v7260_v50 = vpop.f32.mrf.mxu3  ;;  %v11283_v30 = vld [vmem:[%s16360_s6 + $0x438] sm:$0xff] }
 0xa13   :  { %v11291_v0 = vld [vmem:[%s16360_s6 + $0x478] sm:$0xff] }
 0xa14   :  { %9393 = vmatmul.bf16.vlgmr.msra.gmra.mxu1 %v8013_v25  ;;  %9406 = vmatmul.bf16.vlgmr.msra.gmra.mxu2 %v8014_v40 }
 0xa15   :  { %9417 = vmatpush.bf16.msrb.mxu0 %v11213_v51  ;;  %9430 = vmatpush.bf16.msrb.mxu3 %v11221_v22  ;;  %v11263_v51 = vld [vmem:[%s16360_s6 + $0x398] sm:$0xff] }
 0xa16   :  { %9441 = vmatpush.bf16.msrb.mxu1 %v11231_v60  ;;  %9454 = vmatpush.bf16.msrb.mxu2 %v11239_v29  ;;  %v11271_v22 = vld [vmem:[%s16360_s6 + $0x3d8] sm:$0xff]  ;;  %v11244_v29 = vld [vmem:[%s16360_s6 + $0x300] sm:$0xff] }
 0xa17   :  { %v7452_v26 = vpop.permute.xlu0 %7451  ;;  %v7541_v40 = vld [vmem:[#allocation4 + $0x30] sm:$0xff] }
 0xa18   :  { %7454 = vst.msk [vmem:[#allocation4 + $0x3c] sm:$0xf] %vm7333_vm8, %v7452_v26 }
 0xa19   :  { %9418 = vmatpush.bf16.msrb.mxu0 %v11212_v34  ;;  %9431 = vmatpush.bf16.msrb.mxu3 %v11220_v15  ;;  %v11262_v34 = vld [vmem:[%s16360_s6 + $0x390] sm:$0xff] }
 0xa1a   :  { %9442 = vmatpush.bf16.msrb.mxu1 %v11230_v39  ;;  %9455 = vmatpush.bf16.msrb.mxu2 %v11238_v20  ;;  %v11270_v15 = vld [vmem:[%s16360_s6 + $0x3d0] sm:$0xff]  ;;  %v7993_v39 = vunpack.c.l.b16 %v7541_v40  ;;  %v7994_v20 = vunpack.c.h.b16 %v7541_v40 }
 0xa1c   :  { %9419 = vmatmul.bf16.vlgmr.msrb.gmra.mxu0 %v8015_v23  ;;  %9432 = vmatmul.bf16.vlgmr.msrb.gmra.mxu3 %v8016_v13  ;;  %v8019_v26 = vpack.c.b16 %v7993_v39, %v7993_v39  ;;  %v11269_v23 = vld [vmem:[%s16360_s6 + $0x3c8] sm:$0xff]  ;;  %v11282_v13 = vld [vmem:[%s16360_s6 + $0x430] sm:$0xff]  ;;  %v11300_v39 = vld [vmem:[%s16360_s6 + $0x4c0] sm:$0xff] }
 0xa1d   :  { %9463 = vmatpush.bf16.msra.mxu0 %v11251_v10  ;;  %9476 = vmatpush.bf16.msra.mxu3 %v11259_v62  ;;  %v8020_v10 = vpack.c.b16 %v7994_v20, %v7994_v20  ;;  %v11261_v62 = vld [vmem:[%s16360_s6 + $0x388] sm:$0xff] }
 0xa1e   :  { %9443 = vmatpush.bf16.msrb.mxu1 %v11229_v17  ;;  %9456 = vmatpush.bf16.msrb.mxu2 %v11237_v53  ;;  %v11290_v17 = vld [vmem:[%s16360_s6 + $0x470] sm:$0xff]  ;;  %v11313_v20 = vld [vmem:[%s16360_s6 + $0x528] sm:$0xff] }
 0xa1f   :  { %v7476_v47 = vpop.permute.xlu0 %7475  ;;  %v7492_v45 = vpop.permute.xlu2 %7491  ;;  %v7542_v53 = vld [vmem:[#allocation4 + $0x38] sm:$0xff] }
 0xa20   :  { %7478 = vst.msk [vmem:[#allocation4 + $0x48] sm:$0xf] %vm7333_vm8, %v7476_v47  ;;  %v11299_v47 = vld [vmem:[%s16360_s6 + $0x4b8] sm:$0xff] }
 0xa21   :  { %9464 = vmatpush.bf16.msra.mxu0 %v11250_v33  ;;  %9477 = vmatpush.bf16.msra.mxu3 %v11258_v56  ;;  %7494 = vst.msk [vmem:[#allocation4 + $0x50] sm:$0xf] %vm7333_vm8, %v7492_v45  ;;  %v11260_v33 = vld [vmem:[%s16360_s6 + $0x380] sm:$0xff]  ;;  %v11307_v45 = vld [vmem:[%s16360_s6 + $0x4f8] sm:$0xff] }
 0xa22   :  { %9444 = vmatpush.bf16.msrb.mxu1 %v11228_v48  ;;  %9457 = vmatpush.bf16.msrb.mxu2 %v11236_v43  ;;  %v11268_v56 = vld [vmem:[%s16360_s6 + $0x3c0] sm:$0xff]  ;;  %v7995_v48 = vunpack.c.l.b16 %v7542_v53  ;;  %v7996_v43 = vunpack.c.h.b16 %v7542_v53 }
 0xa24   :  { %v7119_v59 = vpop.f32.mrf.mxu2 }
 0xa25   :  { %9465 = vmatpush.bf16.msra.mxu0 %v11249_v12  ;;  %9478 = vmatpush.bf16.msra.mxu3 %v11257_v61  ;;  %v7120_v41 = vadd.f32 %v7119_v59, %v6981_v32  ;;  %v8021_v12 = vpack.c.b16 %v7995_v48, %v7995_v48  ;;  %v8022_v61 = vpack.c.b16 %v7996_v43, %v7996_v43  ;;  %v11287_v32 = vld [vmem:[%s16360_s6 + $0x458] sm:$0xff]  ;;  %v11296_v59 = vld [vmem:[%s16360_s6 + $0x4a0] sm:$0xff] }
 0xa26   :  { %9489 = vmatpush.bf16.msra.mxu1 %v11267_v63  ;;  %9502 = vmatpush.bf16.msra.mxu2 %v11275_v46  ;;  %v11298_v63 = vld [vmem:[%s16360_s6 + $0x4b0] sm:$0xff]  ;;  %v11339_v48 = vld [vmem:[%s16360_s6 + $0x5f8] sm:$0xff] }
 0xa27   :  { %9445 = vmatmul.bf16.vlgmr.msrb.gmra.mxu1 %v8017_v8  ;;  %9458 = vmatmul.bf16.vlgmr.msrb.gmra.mxu2 %v8018_v14  ;;  %v7259_v16 = vadd.f32 %v7258_v27, %v7120_v41  ;;  %v11306_v46 = vld [vmem:[%s16360_s6 + $0x4f0] sm:$0xff]  ;;  %v11279_v27 = vld [vmem:[%s16360_s6 + $0x418] sm:$0xff]  ;;  %v11297_v8 = vld [vmem:[%s16360_s6 + $0x4a8] sm:$0xff] }
 0xa28   :  { %v11305_v14 = vld [vmem:[%s16360_s6 + $0x4e8] sm:$0xff] }
 0xa29   :  { %9466 = vmatpush.bf16.msra.mxu0 %v11248_v7  ;;  %9479 = vmatpush.bf16.msra.mxu3 %v11256_v42  ;;  %v7319_v21 = vmax.f32 %v7259_v16, 0.0  ;;  %v11278_v7 = vld [vmem:[%s16360_s6 + $0x410] sm:$0xff]  ;;  %v11285_v41 = vld [vmem:[%s16360_s6 + $0x448] sm:$0xff]  ;;  %v11295_v16 = vld [vmem:[%s16360_s6 + $0x498] sm:$0xff] }
 0xa2a   :  { %9490 = vmatpush.bf16.msra.mxu1 %v11266_v9  ;;  %9503 = vmatpush.bf16.msra.mxu2 %v11274_v3  ;;  %v11286_v42 = vld [vmem:[%s16360_s6 + $0x450] sm:$0xff]  ;;  %v11304_v9 = vld [vmem:[%s16360_s6 + $0x4e0] sm:$0xff]  ;;  %v11277_v3 = vld [vmem:[%s16360_s6 + $0x408] sm:$0xff] }
 0xa2b   :  { %v7511_v19 = vpack.c.bf16 %v7319_v21, %v7319_v21  ;;  %v11294_v21 = vld [vmem:[%s16360_s6 + $0x490] sm:$0xff] }
 0xa2c   :  { %v7121_v11 = vpop.f32.mrf.mxu2 }
 0xa2d   :  { %9467 = vmatpush.bf16.msra.mxu0 %v11247_v18  ;;  %9480 = vmatpush.bf16.msra.mxu3 %v11255_v57  ;;  %7512 = vst.msk [vmem:[#allocation4 + $0x5c] sm:$0xf] %vm7326_vm7, %v7511_v19  ;;  %v7122_v49 = vadd.f32 %v7121_v11, %v6983_v37  ;;  %v11303_v18 = vld [vmem:[%s16360_s6 + $0x4d8] sm:$0xff]  ;;  %v6985_v57 = vpop.f32.mrf.mxu1  ;;  %v11302_v37 = vld [vmem:[%s16360_s6 + $0x4d0] sm:$0xff]  ;;  %v7997_v19 = vunpack.c.l.b16 %v7543_v38 }
 0xa2e   :  { %9491 = vmatpush.bf16.msra.mxu1 %v11265_v44  ;;  %9504 = vmatpush.bf16.msra.mxu2 %v11273_v6  ;;  %v11276_v44 = vld [vmem:[%s16360_s6 + $0x400] sm:$0xff]  ;;  %v11323_v11 = vld [vmem:[%s16360_s6 + $0x578] sm:$0xff] }
 0xa2f   :  { %v7261_v5 = vadd.f32 %v7260_v50, %v7122_v49  ;;  %v11284_v6 = vld [vmem:[%s16360_s6 + $0x440] sm:$0xff] }
 0xa31   :  { %9468 = vmatpush.bf16.msra.mxu0 %v11246_v1  ;;  %9481 = vmatpush.bf16.msra.mxu3 %v11254_v4  ;;  %v7320_v25 = vmax.f32 %v7261_v5, 0.0  ;;  %v7998_v1 = vunpack.c.h.b16 %v7543_v38  ;;  %v11315_v4 = vld [vmem:[%s16360_s6 + $0x538] sm:$0xff]  ;;  %v8023_v5 = vpack.c.b16 %v7997_v19, %v7997_v19  ;;  %v11334_v19 = vld [vmem:[%s16360_s6 + $0x5d0] sm:$0xff] }
 0xa32   :  { %9492 = vmatpush.bf16.msra.mxu1 %v11264_v35  ;;  %9505 = vmatpush.bf16.msra.mxu2 %v11272_v54  ;;  %v6986_v35 = vadd.f32 %v15937_v2, %v6985_v57  ;;  %v7263_v54 = vpop.f32.mrf.mxu3 }
 0xa33   :  { %v7513_v60 = vpack.c.bf16 %v7320_v25, %v7320_v25  ;;  %v11322_v25 = vld [vmem:[%s16360_s6 + $0x570] sm:$0xff] }
 0xa35   :  { %9469 = vmatpush.bf16.msra.mxu0 %v11245_v55  ;;  %9482 = vmatpush.bf16.msra.mxu3 %v11253_v36  ;;  %v8024_v55 = vpack.c.b16 %v7998_v1, %v7998_v1  ;;  %v11293_v36 = vld [vmem:[%s16360_s6 + $0x488] sm:$0xff] }
 0xa36   :  { %9493 = vmatpush.bf16.msra.mxu1 %v11263_v51  ;;  %9506 = vmatpush.bf16.msra.mxu2 %v11271_v22  ;;  %v11301_v51 = vld [vmem:[%s16360_s6 + $0x4c8] sm:$0xff]  ;;  %v11314_v22 = vld [vmem:[%s16360_s6 + $0x530] sm:$0xff] }
 0xa37   :  { %7515 = vrot.lane.b32.xlu2 %v7513_v60, %s11548_s22 }
 0xa39   :  { %9470 = vmatpush.bf16.msra.mxu0 %v11244_v29  ;;  %9483 = vmatpush.bf16.msra.mxu3 %v11252_v52  ;;  %v7544_v29 = vld [vmem:[#allocation4 + $0x48] sm:$0xff]  ;;  %v6987_v52 = vpop.f32.mrf.mxu1 }
 0xa3a   :  { %9494 = vmatpush.bf16.msra.mxu1 %v11262_v34  ;;  %9507 = vmatpush.bf16.msra.mxu2 %v11270_v15  ;;  %v11292_v15 = vld [vmem:[%s16360_s6 + $0x480] sm:$0xff]  ;;  %v7265_v53 = vpop.f32.mrf.mxu3 }
 0xa3c   :  { %9471 = vmatmul.bf16.vlgmr.msra.gmra.mxu0 %v8019_v26  ;;  %9484 = vmatmul.bf16.vlgmr.msra.gmra.mxu3 %v8020_v10  ;;  %v8000_v26 = vunpack.c.h.b16 %v7544_v29  ;;  %v6988_v10 = vadd.f32 %v15937_v2, %v6987_v52 }
 0xa3d   :  { %9515 = vmatpush.bf16.msrb.mxu0 %v11283_v30  ;;  %9528 = vmatpush.bf16.msrb.mxu3 %v11291_v0  ;;  %v11321_v30 = vld [vmem:[%s16360_s6 + $0x568] sm:$0xff]  ;;  %v7999_v0 = vunpack.c.l.b16 %v7544_v29 }
 0xa3e   :  { %9495 = vmatpush.bf16.msra.mxu1 %v11261_v62  ;;  %9508 = vmatpush.bf16.msra.mxu2 %v11269_v23 }
 0xa41   :  { %9516 = vmatpush.bf16.msrb.mxu0 %v11282_v13  ;;  %9529 = vmatpush.bf16.msrb.mxu3 %v11290_v17  ;;  %v11312_v17 = vld [vmem:[%s16360_s6 + $0x520] sm:$0xff] }
 0xa42   :  { %9496 = vmatpush.bf16.msra.mxu1 %v11260_v33  ;;  %9509 = vmatpush.bf16.msra.mxu2 %v11268_v56  ;;  %v8025_v33 = vpack.c.b16 %v7999_v0, %v7999_v0  ;;  %v8026_v56 = vpack.c.b16 %v8000_v26, %v8000_v26 }
 0xa45   :  { %9517 = vmatpush.bf16.msrb.mxu0 %v11281_v28  ;;  %9530 = vmatpush.bf16.msrb.mxu3 %v11289_v24  ;;  %v11320_v28 = vld [vmem:[%s16360_s6 + $0x560] sm:$0xff]  ;;  %v11331_v24 = vld [vmem:[%s16360_s6 + $0x5b8] sm:$0xff] }
 0xa46   :  { %9541 = vmatpush.bf16.msrb.mxu1 %v11299_v47  ;;  %9554 = vmatpush.bf16.msrb.mxu2 %v11307_v45  ;;  %v11311_v45 = vld [vmem:[%s16360_s6 + $0x518] sm:$0xff] }
 0xa47   :  { %9497 = vmatmul.bf16.vlgmr.msra.gmra.mxu1 %v8021_v12  ;;  %9510 = vmatmul.bf16.vlgmr.msra.gmra.mxu2 %v8022_v61  ;;  %v11319_v12 = vld [vmem:[%s16360_s6 + $0x558] sm:$0xff]  ;;  %v11330_v61 = vld [vmem:[%s16360_s6 + $0x5b0] sm:$0xff] }
 0xa49   :  { %9518 = vmatpush.bf16.msrb.mxu0 %v11280_v58  ;;  %9531 = vmatpush.bf16.msrb.mxu3 %v11288_v31  ;;  %v11338_v31 = vld [vmem:[%s16360_s6 + $0x5f0] sm:$0xff] }
 0xa4a   :  { %9542 = vmatpush.bf16.msrb.mxu1 %v11298_v63  ;;  %9555 = vmatpush.bf16.msrb.mxu2 %v11306_v46  ;;  %v11329_v63 = vld [vmem:[%s16360_s6 + $0x5a8] sm:$0xff]  ;;  %v11310_v46 = vld [vmem:[%s16360_s6 + $0x510] sm:$0xff] }
 0xa4d   :  { %9519 = vmatpush.bf16.msrb.mxu0 %v11279_v27  ;;  %9532 = vmatpush.bf16.msrb.mxu3 %v11287_v32  ;;  %v11318_v27 = vld [vmem:[%s16360_s6 + $0x550] sm:$0xff]  ;;  %v11337_v32 = vld [vmem:[%s16360_s6 + $0x5e8] sm:$0xff] }
 0xa4e   :  { %9543 = vmatpush.bf16.msrb.mxu1 %v11297_v8  ;;  %9556 = vmatpush.bf16.msrb.mxu2 %v11305_v14  ;;  %v11328_v8 = vld [vmem:[%s16360_s6 + $0x5a0] sm:$0xff]  ;;  %v11309_v14 = vld [vmem:[%s16360_s6 + $0x508] sm:$0xff] }
 0xa51   :  { %9520 = vmatpush.bf16.msrb.mxu0 %v11278_v7  ;;  %9533 = vmatpush.bf16.msrb.mxu3 %v11286_v42  ;;  %v11317_v7 = vld [vmem:[%s16360_s6 + $0x548] sm:$0xff]  ;;  %v11336_v42 = vld [vmem:[%s16360_s6 + $0x5e0] sm:$0xff] }
 0xa52   :  { %9544 = vmatpush.bf16.msrb.mxu1 %v11296_v59  ;;  %9557 = vmatpush.bf16.msrb.mxu2 %v11304_v9 }
 0xa55   :  { %9521 = vmatpush.bf16.msrb.mxu0 %v11277_v3  ;;  %9534 = vmatpush.bf16.msrb.mxu3 %v11285_v41  ;;  %v7124_v50 = vpop.f32.mrf.mxu2  ;;  %v6990_v3 = vpop.f32.mrf.mxu1  ;;  %v11327_v41 = vld [vmem:[%s16360_s6 + $0x598] sm:$0xff] }
 0xa56   :  { %9545 = vmatpush.bf16.msrb.mxu1 %v11295_v16  ;;  %9558 = vmatpush.bf16.msrb.mxu2 %v11303_v18  ;;  %v7125_v49 = vadd.f32 %v7124_v50, %v6986_v35  ;;  %v11308_v16 = vld [vmem:[%s16360_s6 + $0x500] sm:$0xff]  ;;  %v6991_v1 = vadd.f32 %v15937_v2, %v6990_v3 }
 0xa57   :  { %v11316_v18 = vld [vmem:[%s16360_s6 + $0x540] sm:$0xff] }
 0xa58   :  { %v7264_v40 = vadd.f32 %v7263_v54, %v7125_v49  ;;  %v7500_v60 = vpop.permute.xlu0 %7499  ;;  %v11325_v54 = vld [vmem:[%s16360_s6 + $0x588] sm:$0xff] }
 0xa59   :  { %9522 = vmatpush.bf16.msrb.mxu0 %v11276_v44  ;;  %9535 = vmatpush.bf16.msrb.mxu3 %v11284_v6  ;;  %7502 = vst.msk [vmem:[#allocation4 + $0x54] sm:$0xf] %vm7333_vm8, %v7500_v60  ;;  %v11335_v44 = vld [vmem:[%s16360_s6 + $0x5d8] sm:$0xff]  ;;  %v11326_v6 = vld [vmem:[%s16360_s6 + $0x590] sm:$0xff]  ;;  %v11333_v49 = vld [vmem:[%s16360_s6 + $0x5c8] sm:$0xff] }
 0xa5a   :  { %9546 = vmatpush.bf16.msrb.mxu1 %v11294_v21  ;;  %9559 = vmatpush.bf16.msrb.mxu2 %v11302_v37  ;;  %v7321_v34 = vmax.f32 %v7264_v40, 0.0  ;;  %v11332_v40 = vld [vmem:[%s16360_s6 + $0x5c0] sm:$0xff] }
 0xa5c   :  { %9523 = vmatmul.bf16.vlgmr.msrb.gmra.mxu0 %v8023_v5  ;;  %9536 = vmatmul.bf16.vlgmr.msrb.gmra.mxu3 %v8024_v55  ;;  %v7519_v62 = vpack.c.bf16 %v7321_v34, %v7321_v34 }
 0xa5d   :  { %9567 = vmatpush.bf16.msra.mxu0 %v11315_v4  ;;  %9580 = vmatpush.bf16.msra.mxu3 %v11323_v11  ;;  %v7126_v23 = vpop.f32.mrf.mxu2  ;;  %v6992_v50 = vpop.f32.mrf.mxu1 }
 0xa5e   :  { %9547 = vmatpush.bf16.msrb.mxu1 %v11293_v36  ;;  %9560 = vmatpush.bf16.msrb.mxu2 %v11301_v51  ;;  %7520 = vst.msk [vmem:[#allocation4 + $0x60] sm:$0xf] %vm7326_vm7, %v7519_v62  ;;  %v7127_v13 = vadd.f32 %v7126_v23, %v6988_v10  ;;  %v11474_v51 = vld [vmem:[%s16361_s7] ss:$0 sm:$0xff]  ;;  %v6993_v60 = vadd.f32 %v15937_v2, %v6992_v50 }
 0xa60   :  { %v7266_v43 = vadd.f32 %v7265_v53, %v7127_v13  ;;  %v7268_v59 = vpop.f32.mrf.mxu3  ;;  %v7545_v9 = vld [vmem:[#allocation4 + $0x50] sm:$0xff] }
 0xa61   :  { %9568 = vmatpush.bf16.msra.mxu0 %v11314_v22  ;;  %9581 = vmatpush.bf16.msra.mxu3 %v11322_v25  ;;  %v8001_v57 = vunpack.c.l.b16 %v7545_v9  ;;  %v8002_v38 = vunpack.c.h.b16 %v7545_v9  ;;  %v11324_v25 = vld [vmem:[%s16360_s6 + $0x580] sm:$0xff] }
 0xa62   :  { %9548 = vmatpush.bf16.msrb.mxu1 %v11292_v15  ;;  %9561 = vmatpush.bf16.msrb.mxu2 %v11300_v39  ;;  %v7322_v47 = vmax.f32 %v7266_v43, 0.0 }
 0xa63   :  { %v8027_v21 = vpack.c.b16 %v8001_v57, %v8001_v57  ;;  %v8028_v37 = vpack.c.b16 %v8002_v38, %v8002_v38 }
 0xa64   :  { %v7521_v58 = vpack.c.bf16 %v7322_v47, %v7322_v47 }
 0xa65   :  { %9569 = vmatpush.bf16.msra.mxu0 %v11313_v20  ;;  %9582 = vmatpush.bf16.msra.mxu3 %v11321_v30 }
 0xa66   :  { %9549 = vmatmul.bf16.vlgmr.msrb.gmra.mxu1 %v8025_v33  ;;  %9562 = vmatmul.bf16.vlgmr.msrb.gmra.mxu2 %v8026_v56 }
 0xa67   :  { %9593 = vmatpush.bf16.msra.mxu1 %v11331_v24  ;;  %9606 = vmatpush.bf16.msra.mxu2 %v11339_v48 }
 0xa68   :  { %7523 = vrot.lane.b32.xlu0 %v7521_v58, %s11548_s22  ;;  %v7270_v11 = vpop.f32.mrf.mxu3 }
 0xa69   :  { %9570 = vmatpush.bf16.msra.mxu0 %v11312_v17  ;;  %9583 = vmatpush.bf16.msra.mxu3 %v11320_v28 }
 0xa6b   :  { %9594 = vmatpush.bf16.msra.mxu1 %v11330_v61  ;;  %9607 = vmatpush.bf16.msra.mxu2 %v11338_v31 }
 0xa6d   :  { %9571 = vmatpush.bf16.msra.mxu0 %v11311_v45  ;;  %9584 = vmatpush.bf16.msra.mxu3 %v11319_v12 }
 0xa6f   :  { %9595 = vmatpush.bf16.msra.mxu1 %v11329_v63  ;;  %9608 = vmatpush.bf16.msra.mxu2 %v11337_v32 }
 0xa71   :  { %9572 = vmatpush.bf16.msra.mxu0 %v11310_v46  ;;  %9585 = vmatpush.bf16.msra.mxu3 %v11318_v27 }
 0xa73   :  { %9596 = vmatpush.bf16.msra.mxu1 %v11328_v8  ;;  %9609 = vmatpush.bf16.msra.mxu2 %v11336_v42 }
 0xa75   :  { %9573 = vmatpush.bf16.msra.mxu0 %v11309_v14  ;;  %9586 = vmatpush.bf16.msra.mxu3 %v11317_v7 }
 0xa76   :  { %v7129_v4 = vpop.f32.mrf.mxu2 }
 0xa77   :  { %9597 = vmatpush.bf16.msra.mxu1 %v11327_v41  ;;  %9610 = vmatpush.bf16.msra.mxu2 %v11335_v44  ;;  %v7130_v35 = vadd.f32 %v7129_v4, %v6991_v1 }
 0xa79   :  { %9574 = vmatpush.bf16.msra.mxu0 %v11308_v16  ;;  %9587 = vmatpush.bf16.msra.mxu3 %v11316_v18  ;;  %v7269_v5 = vadd.f32 %v7268_v59, %v7130_v35  ;;  %v9316_v55 = vpop.f32.mrf.mxu0  ;;  %v7508_v36 = vpop.permute.xlu1 %7507 }
 0xa7a   :  { %7510 = vst.msk [vmem:[#allocation4 + $0x58] sm:$0xf] %vm7333_vm8, %v7508_v36  ;;  %v9317_v52 = vadd.f32 %v11474_v51, %v9316_v55  ;;  %v11355_v55 = vld [vmem:[%s16360_s6 + $0x678] sm:$0xff] }
 0xa7b   :  { %9598 = vmatpush.bf16.msra.mxu1 %v11326_v6  ;;  %9611 = vmatpush.bf16.msra.mxu2 %v11334_v19  ;;  %v7323_v22 = vmax.f32 %v7269_v5, 0.0  ;;  %v11347_v5 = vld [vmem:[%s16360_s6 + $0x638] sm:$0xff] }
 0xa7c   :  { %9575 = vmatmul.bf16.vlgmr.msra.gmra.mxu0 %v8027_v21  ;;  %9588 = vmatmul.bf16.vlgmr.msra.gmra.mxu3 %v8028_v37 }
 0xa7d   :  { %v7527_v29 = vpack.c.bf16 %v7323_v22, %v7323_v22  ;;  %9619 = vmatpush.bf16.msrb.mxu0 %v11347_v5  ;;  %9632 = vmatpush.bf16.msrb.mxu3 %v11355_v55  ;;  %v11346_v22 = vld [vmem:[%s16360_s6 + $0x630] sm:$0xff]  ;;  %v9647_v5 = vld [vmem:[%s16362_s8 + $0x8] sm:$0xff]  ;;  %v9646_v55 = vld [vmem:[%s16362_s8] sm:$0xff] }
 0xa7e   :  { %v7131_v34 = vpop.f32.mrf.mxu2 }
 0xa7f   :  { %9599 = vmatpush.bf16.msra.mxu1 %v11325_v54  ;;  %9612 = vmatpush.bf16.msra.mxu2 %v11333_v49  ;;  %7528 = vst.msk [vmem:[#allocation4 + $0x64] sm:$0xf] %vm7326_vm7, %v7527_v29  ;;  %v7132_v15 = vadd.f32 %v7131_v34, %v6993_v60  ;;  %v9329_v39 = vpop.f32.mrf.mxu3  ;;  %v11345_v60 = vld [vmem:[%s16360_s6 + $0x628] sm:$0xff]  ;;  %v11352_v34 = vld [vmem:[%s16360_s6 + $0x660] sm:$0xff] }
 0xa80   :  { %v9330_v20 = vadd.f32 %v9329_v39, %v9317_v52  ;;  %v11353_v29 = vld [vmem:[%s16360_s6 + $0x668] sm:$0xff]  ;;  %v11344_v52 = vld [vmem:[%s16360_s6 + $0x620] sm:$0xff] }
 0xa81   :  { %v7271_v30 = vadd.f32 %v7270_v11, %v7132_v15  ;;  %v9318_v0 = vpop.f32.mrf.mxu0  ;;  %v9342_v26 = vpop.f32.mrf.mxu1  ;;  %9620 = vmatpush.bf16.msrb.mxu0 %v11346_v22  ;;  %v9700_v22 = vld [vmem:[%s16364_s10 + $0x68] sm:$0xff] }
 0xa82   :  { %v9343_v10 = vadd.f32 %v9342_v26, %v9330_v20  ;;  %v11351_v0 = vld [vmem:[%s16360_s6 + $0x658] sm:$0xff] }
 0xa83   :  { %9600 = vmatpush.bf16.msra.mxu1 %v11324_v25  ;;  %9613 = vmatpush.bf16.msra.mxu2 %v11332_v40  ;;  %v7324_v62 = vmax.f32 %v7271_v30, 0.0  ;;  %v11354_v25 = vld [vmem:[%s16360_s6 + $0x670] sm:$0xff]  ;;  %v11343_v30 = vld [vmem:[%s16360_s6 + $0x618] sm:$0xff] }
 0xa84   :  { %9633 = vmatpush.bf16.msrb.mxu3 %v11354_v25  ;;  %v9699_v25 = vld [vmem:[%s16364_s10 + $0x60] sm:$0xff] }
 0xa85   :  { %v7529_v23 = vpack.c.bf16 %v7324_v62, %v7324_v62  ;;  %9621 = vmatpush.bf16.msrb.mxu0 %v11345_v60  ;;  %v11350_v62 = vld [vmem:[%s16360_s6 + $0x650] sm:$0xff] }
 0xa86   :  { %v9697_v60 = vld [vmem:[%s16364_s10 + $0x50] sm:$0xff] }
 0xa87   :  { %v9331_v13 = vpop.f32.mrf.mxu3  ;;  %v9355_v17 = vpop.f32.mrf.mxu2  ;;  %7531 = vrot.lane.b32.xlu1 %v7529_v23, %s11548_s22 }
 0xa88   :  { %v9356_v2 = vadd.f32 %v9355_v17, %v9343_v10  ;;  %9634 = vmatpush.bf16.msrb.mxu3 %v11353_v29  ;;  %v11342_v10 = vld [vmem:[%s16360_s6 + $0x610] sm:$0xff]  ;;  %v9696_v29 = vld [vmem:[%s16364_s10 + $0x48] sm:$0xff] }
 0xa89   :  { %v9344_v53 = vpop.f32.mrf.mxu1  ;;  %v9368_v33 = vpop.f32.mrf.mxu0  ;;  %9622 = vmatpush.bf16.msrb.mxu0 %v11344_v52  ;;  %v9695_v52 = vld [vmem:[%s16364_s10 + $0x40] sm:$0xff] }
 0xa8a   :  { %v9369_v56 = vadd.f32 %v9368_v33, %v9356_v2  ;;  %v11341_v53 = vld [vmem:[%s16360_s6 + $0x608] sm:$0xff] }
 0xa8b   :  { %v11349_v33 = vld [vmem:[%s16360_s6 + $0x648] sm:$0xff] }
 0xa8c   :  { %9635 = vmatpush.bf16.msrb.mxu3 %v11352_v34  ;;  %v9694_v34 = vld [vmem:[%s16364_s10 + $0x38] sm:$0xff] }
 0xa8d   :  { %9623 = vmatpush.bf16.msrb.mxu0 %v11343_v30  ;;  %v9691_v30 = vld [vmem:[%s16364_s10 + $0x20] sm:$0xff] }
 0xa8f   :  { %v9357_v28 = vpop.f32.mrf.mxu2  ;;  %v9381_v24 = vpop.f32.mrf.mxu3 }
 0xa90   :  { %v9382_v48 = vadd.f32 %v9381_v24, %v9369_v56  ;;  %9636 = vmatpush.bf16.msrb.mxu3 %v11351_v0  ;;  %v11340_v28 = vld [vmem:[%s16360_s6 + $0x600] sm:$0xff]  ;;  %v9690_v0 = vld [vmem:[%s16364_s10 + $0x18] sm:$0xff] }
 0xa91   :  { %v7516_v43 = vpop.permute.xlu2 %7515  ;;  %v9370_v47 = vpop.f32.mrf.mxu0  ;;  %9624 = vmatpush.bf16.msrb.mxu0 %v11342_v10  ;;  %v11348_v24 = vld [vmem:[%s16360_s6 + $0x640] sm:$0xff] }
 0xa92   :  { %7518 = vst.msk [vmem:[#allocation4 + $0x5c] sm:$0xf] %vm7333_vm8, %v7516_v43  ;;  %v9394_v45 = vpop.f32.mrf.mxu1 }
 0xa93   :  { %v9395_v12 = vadd.f32 %v9394_v45, %v9382_v48 }
 0xa94   :  { %9637 = vmatpush.bf16.msrb.mxu3 %v11350_v62 }
 0xa95   :  { %9625 = vmatpush.bf16.msrb.mxu0 %v11341_v53  ;;  %v9688_v53 = vld [vmem:[%s16364_s10 + $0x8] sm:$0xff] }
 0xa97   :  { %v9383_v61 = vpop.f32.mrf.mxu3  ;;  %v9407_v58 = vpop.f32.mrf.mxu2 }
 0xa98   :  { %v9408_v31 = vadd.f32 %v9407_v58, %v9395_v12  ;;  %9638 = vmatpush.bf16.msrb.mxu3 %v11349_v33  ;;  %v9687_v33 = vld [vmem:[%s16364_s10] sm:$0xff] }
 0xa99   :  { %v7546_v63 = vld [vmem:[#allocation4 + $0x58] sm:$0xff]  ;;  %v9420_v27 = vpop.f32.mrf.mxu0  ;;  %9626 = vmatpush.bf16.msrb.mxu0 %v11340_v28 }
 0xa9a   :  { %v9396_v46 = vpop.f32.mrf.mxu1  ;;  %v8003_v32 = vunpack.c.l.b16 %v7546_v63  ;;  %v8004_v8 = vunpack.c.h.b16 %v7546_v63  ;;  %v9421_v14 = vadd.f32 %v9420_v27, %v9408_v31 }
 0xa9c   :  { %v8029_v7 = vpack.c.b16 %v8003_v32, %v8003_v32  ;;  %v8030_v42 = vpack.c.b16 %v8004_v8, %v8004_v8  ;;  %9639 = vmatpush.bf16.msrb.mxu3 %v11348_v24 }
 0xa9e   :  { %9601 = vmatmul.bf16.vlgmr.msra.gmra.mxu1 %v8029_v7  ;;  %9614 = vmatmul.bf16.vlgmr.msra.gmra.mxu2 %v8030_v42 }
 0xa9f   :  { %v9409_v59 = vpop.f32.mrf.mxu2  ;;  %v9433_v9 = vpop.f32.mrf.mxu3 }
 0xaa0   :  { %v9434_v3 = vadd.f32 %v9433_v9, %v9421_v14  ;;  %v9661_v59 = vld [vmem:[%s16362_s8 + $0x78] sm:$0xff]  ;;  %v9660_v9 = vld [vmem:[%s16362_s8 + $0x70] sm:$0xff] }
 0xaa1   :  { %v9422_v41 = vpop.f32.mrf.mxu0  ;;  %9666 = vmatpush.msrb.mxu1 %v9661_v59 }
 0xaa2   :  { %v9658_v41 = vld [vmem:[%s16362_s8 + $0x60] sm:$0xff] }
 0xaa3   :  { %9667 = vmatpush.msrb.mxu1 %v9660_v9 }
 0xaa4   :  { %v9446_v16 = vpop.f32.mrf.mxu1 }
 0xaa5   :  { %v9447_v18 = vadd.f32 %v9446_v16, %v9434_v3  ;;  %v9659_v3 = vld [vmem:[%s16362_s8 + $0x68] sm:$0xff]  ;;  %v9657_v16 = vld [vmem:[%s16362_s8 + $0x58] sm:$0xff] }
 0xaa6   :  { %9668 = vmatpush.msrb.mxu1 %v9659_v3 }
 0xaa7   :  { %v9435_v57 = vpop.f32.mrf.mxu3 }
 0xaa8   :  { %9669 = vmatpush.msrb.mxu1 %v9658_v41  ;;  %v9655_v57 = vld [vmem:[%s16362_s8 + $0x48] sm:$0xff] }
 0xaaa   :  { %v9459_v38 = vpop.f32.mrf.mxu2  ;;  %9670 = vmatpush.msrb.mxu1 %v9657_v16 }
 0xaab   :  { %v9460_v44 = vadd.f32 %v9459_v38, %v9447_v18  ;;  %v9656_v18 = vld [vmem:[%s16362_s8 + $0x50] sm:$0xff]  ;;  %v9654_v38 = vld [vmem:[%s16362_s8 + $0x40] sm:$0xff] }
 0xaac   :  { %v9448_v6 = vpop.f32.mrf.mxu1  ;;  %9671 = vmatpush.msrb.mxu1 %v9656_v18 }
 0xaad   :  { %v9652_v6 = vld [vmem:[%s16362_s8 + $0x30] sm:$0xff] }
 0xaae   :  { %9672 = vmatpush.msrb.mxu1 %v9655_v57 }
 0xab0   :  { %9673 = vmatpush.msrb.mxu1 %v9654_v38 }
 0xab2   :  { %v9461_v21 = vpop.f32.mrf.mxu2 }
 0xab9   :  { %v9472_v37 = vpop.f32.mrf.mxu0 }
 0xaba   :  { %v9473_v19 = vadd.f32 %v9472_v37, %v9460_v44  ;;  %v9653_v44 = vld [vmem:[%s16362_s8 + $0x38] sm:$0xff] }
 0xabb   :  { %9674 = vmatpush.msrb.mxu1 %v9653_v44 }
 0xabd   :  { %9675 = vmatpush.msrb.mxu1 %v9652_v6 }
 0xabf   :  { %v9485_v1 = vpop.f32.mrf.mxu3 }
 0xac0   :  { %v9486_v4 = vadd.f32 %v9485_v1, %v9473_v19 }
 0xac1   :  { %v9474_v11 = vpop.f32.mrf.mxu0 }
 0xac4   :  { %v9498_v35 = vpop.f32.mrf.mxu1 }
 0xac5   :  { %v9499_v54 = vadd.f32 %v9498_v35, %v9486_v4  ;;  %v9651_v35 = vld [vmem:[%s16362_s8 + $0x28] sm:$0xff] }
 0xac6   :  { %9676 = vmatpush.msrb.mxu1 %v9651_v35 }
 0xac7   :  { %v9487_v50 = vpop.f32.mrf.mxu3 }
 0xac8   :  { %v9649_v50 = vld [vmem:[%s16362_s8 + $0x18] sm:$0xff] }
 0xaca   :  { %v9511_v49 = vpop.f32.mrf.mxu2 }
 0xacb   :  { %v9512_v36 = vadd.f32 %v9511_v49, %v9499_v54  ;;  %v9650_v54 = vld [vmem:[%s16362_s8 + $0x20] sm:$0xff]  ;;  %v9648_v49 = vld [vmem:[%s16362_s8 + $0x10] sm:$0xff] }
 0xacc   :  { %v9500_v51 = vpop.f32.mrf.mxu1  ;;  %9677 = vmatpush.msrb.mxu1 %v9650_v54 }
 0xacd   :  { %v9701_v51 = vld [vmem:[%s16364_s10 + $0x70] sm:$0xff] }
 0xace   :  { %9678 = vmatpush.msrb.mxu1 %v9649_v50 }
 0xad0   :  { %9679 = vmatpush.msrb.mxu1 %v9648_v49 }
 0xad2   :  { %v9513_v40 = vpop.f32.mrf.mxu2  ;;  %9680 = vmatpush.msrb.mxu1 %v9647_v5 }
 0xad3   :  { %v9698_v40 = vld [vmem:[%s16364_s10 + $0x58] sm:$0xff] }
 0xad4   :  { %9681 = vmatpush.msrb.mxu1 %v9646_v55 }
 0xad9   :  { %v9524_v15 = vpop.f32.mrf.mxu0 }
 0xada   :  { %v9525_v39 = vadd.f32 %v9524_v15, %v9512_v36  ;;  %v7524_v20 = vpop.permute.xlu0 %7523  ;;  %v9702_v36 = vld [vmem:[%s16364_s10 + $0x78] sm:$0xff]  ;;  %v9693_v15 = vld [vmem:[%s16364_s10 + $0x30] sm:$0xff] }
 0xadb   :  { %7526 = vst.msk [vmem:[#allocation4 + $0x60] sm:$0xf] %vm7333_vm8, %v7524_v20  ;;  %9707 = vmatpush.msrb.mxu2 %v9702_v36  ;;  %v9692_v20 = vld [vmem:[%s16364_s10 + $0x28] sm:$0xff] }
 0xadd   :  { %9708 = vmatpush.msrb.mxu2 %v9701_v51 }
 0xadf   :  { %v9537_v26 = vpop.f32.mrf.mxu3  ;;  %9709 = vmatpush.msrb.mxu2 %v9700_v22 }
 0xae0   :  { %v9538_v23 = vadd.f32 %v9537_v26, %v9525_v39 }
 0xae1   :  { %v9526_v13 = vpop.f32.mrf.mxu0  ;;  %9710 = vmatpush.msrb.mxu2 %v9699_v25 }
 0xae3   :  { %v9550_v17 = vpop.f32.mrf.mxu1  ;;  %9711 = vmatpush.msrb.mxu2 %v9698_v40 }
 0xae4   :  { %v9551_v2 = vadd.f32 %v9550_v17, %v9538_v23 }
 0xae5   :  { %9712 = vmatpush.msrb.mxu2 %v9697_v60 }
 0xae7   :  { %v9539_v56 = vpop.f32.mrf.mxu3  ;;  %9713 = vmatpush.msrb.mxu2 %v9696_v29 }
 0xae8   :  { %v11475_v56 = vld [vmem:[%s16363_s9] ss:$0 sm:$0xff] }
 0xae9   :  { %v9563_v48 = vpop.f32.mrf.mxu2  ;;  %9714 = vmatpush.msrb.mxu2 %v9695_v52 }
 0xaea   :  { %v9564_v43 = vadd.f32 %v9563_v48, %v9551_v2  ;;  %v9689_v2 = vld [vmem:[%s16364_s10 + $0x10] sm:$0xff] }
 0xaeb   :  { %v9552_v47 = vpop.f32.mrf.mxu1  ;;  %9715 = vmatpush.msrb.mxu2 %v9694_v34 }
 0xaed   :  { %9716 = vmatpush.msrb.mxu2 %v9693_v15 }
 0xaef   :  { %9717 = vmatpush.msrb.mxu2 %v9692_v20 }
 0xaf1   :  { %v9565_v45 = vpop.f32.mrf.mxu2  ;;  %9718 = vmatpush.msrb.mxu2 %v9691_v30 }
 0xaf3   :  { %9719 = vmatpush.msrb.mxu2 %v9690_v0 }
 0xaf5   :  { %9720 = vmatpush.msrb.mxu2 %v9689_v2 }
 0xaf7   :  { %9721 = vmatpush.msrb.mxu2 %v9688_v53 }
 0xaf9   :  { %v9576_v12 = vpop.f32.mrf.mxu0  ;;  %v7532_v31 = vpop.permute.xlu1 %7531  ;;  %9722 = vmatpush.msrb.mxu2 %v9687_v33 }
 0xafa   :  { %v9577_v61 = vadd.f32 %v9576_v12, %v9564_v43  ;;  %7534 = vst.msk [vmem:[#allocation4 + $0x64] sm:$0xf] %vm7333_vm8, %v7532_v31  ;;  %v11476_v43 = vld [vmem:[%s16365_s11] ss:$0 sm:$0xff] }
 0xaff   :  { %v9589_v58 = vpop.f32.mrf.mxu3 }
 0xb00   :  { %v9590_v63 = vadd.f32 %v9589_v58, %v9577_v61 }
 0xb01   :  { %v9578_v46 = vpop.f32.mrf.mxu0  ;;  %v7547_v32 = vld [vmem:[#allocation4 + $0x60] sm:$0xff] }
 0xb02   :  { %v8005_v8 = vunpack.c.l.b16 %v7547_v32  ;;  %v8006_v14 = vunpack.c.h.b16 %v7547_v32 }
 0xb04   :  { %v8031_v7 = vpack.c.b16 %v8005_v8, %v8005_v8  ;;  %v8032_v42 = vpack.c.b16 %v8006_v14, %v8006_v14 }
 0xb06   :  { %9627 = vmatmul.bf16.vlgmr.msrb.gmra.mxu0 %v8031_v7  ;;  %9640 = vmatmul.bf16.vlgmr.msrb.gmra.mxu3 %v8032_v42 }
 0xb07   :  { %v9591_v27 = vpop.f32.mrf.mxu3 }
 0xb1b   :  { %v9602_v21 = vpop.f32.mrf.mxu1 }
 0xb1c   :  { %v9603_v37 = vadd.f32 %v9602_v21, %v9590_v63 }
 0xb21   :  { %v9615_v19 = vpop.f32.mrf.mxu2 }
 0xb22   :  { %v9616_v1 = vadd.f32 %v9615_v19, %v9603_v37 }
 0xb23   :  { %v9604_v4 = vpop.f32.mrf.mxu1 }
 0xb29   :  { %v9617_v11 = vpop.f32.mrf.mxu2 }
 0xb83   :  { %v9628_v39 = vpop.f32.mrf.mxu0 }
 0xb84   :  { %v9629_v26 = vadd.f32 %v9628_v39, %v9616_v1 }
 0xb89   :  { %v9641_v10 = vpop.f32.mrf.mxu3 }
 0xb8a   :  { %v9642_v62 = vadd.f32 %v9641_v10, %v9629_v26 }
 0xb8b   :  { %v9630_v23 = vpop.f32.mrf.mxu0 }
 0xb8c   :  { %v9645_v13 = vmax.f32 %v9642_v62, 0.0 }
 0xb8e   :  { %9682 = vmatmul.f32.vlgmr.msrb.gmra.mxu1 %v9645_v13 }
 0xb91   :  { %v9643_v17 = vpop.f32.mrf.mxu3 }
 0xc0b   :  { %v9683_v28 = vpop.f32.mrf.mxu1 }
 0xc0c   :  { %v9684_v24 = vadd.f32 %v11475_v56, %v9683_v28 }
 0xc0e   :  { %v9686_v48 = vmax.f32 %v9684_v24, 0.0 }
 0xc10   :  { %9723 = vmatmul.f32.vlgmr.msrb.gmra.mxu2 %v9686_v48 }
 0xc93   :  { %v9724_v47 = vpop.f32.mrf.mxu2 }
 0xc94   :  { %v9725_v45 = vadd.f32 %v11476_v43, %v9724_v47 }
 0xc96   :  { %v9728_v12 = vsel %vm9727_vm9, %v9725_v45, -inf }
 0xc97   :  { %9729 = vmax.xlane.f32.xlu2 %v9728_v12 }
 0xd0a   :  { %v9730_v61 = vpop.xlane.xlu2 %9729 }
 0xd0b   :  { %v9731_v58 = vsub.f32 %v9725_v45, %v9730_v61 }
 0xd0d   :  { %v9732_v31 = vmul.f32 1.442695, %v9731_v58 }
 0xd0f   :  { %11477 = vpow2.f32 %v9732_v31 }
 0xd15   :  { %v11478_v63 = vpop.eup %11477 }
 0xd16   :  { %v9734_v46 = vsel %vm9727_vm9, %v11478_v63, 0.0 }
 0xd17   :  { %9735 = vadd.xlane.f32.xlu0 %v9734_v46 }
 0xd8a   :  { %v9736_v27 = vpop.xlane.xlu0 %9735 }
 0xd8b   :  { %11479 = vrcp.f32 %v9736_v27  ;;  %v9748_v7 = vand.u32 2147483648, %v9736_v27  ;;  %v9746_v59 = vand.u32 2147483647, %v9736_v27  ;;  %vm9742_vm11 = vweird.f32 %v9736_v27 }
 0xd8d   :  { %v9749_v3 = vor.u32 1.1754944e-38, %v9748_v7  ;;  %vm9747_vm13 = vcmp.eq.f32.partialorder %v9746_v59, 8.507059e+37 }
 0xd91   :  { %v11480_v32 = vpop.eup %11479 }
 0xd92   :  { %v9738_v8 = vmul.f32 %v11480_v32, %v9736_v27  ;;  %vm9743_vm10 = vweird.f32 %v11480_v32 }
 0xd93   :  { %vm9744_vm12 = vmor %vm9742_vm11, %vm9743_vm10 }
 0xd94   :  { %v9739_v14 = vsub.f32 1.0, %v9738_v8 }
 0xd96   :  { %v9740_v42 = vmul.f32 %v11480_v32, %v9739_v14 }
 0xd98   :  { %v9741_v9 = vadd.f32 %v11480_v32, %v9740_v42 }
 0xd9a   :  { %v9745_v41 = vsel %vm9744_vm12, %v11480_v32, %v9741_v9 }
 0xd9b   :  { %v9750_v16 = vsel %vm9747_vm13, %v9749_v3, %v9745_v41 }
 0xd9c   :  { %v9751_v18 = vmul.f32 %v11478_v63, %v9750_v16 }
 0xd9e   :  { %9752 = vst.msk [vmem:[%s16366_s12] sm:$0xff] %vm9727_vm9, %v9751_v18 }

</bundles_post_ra>
